<compile_context>
chip_gen: v5e
topology: v5e:2x2
jax: 0.10.0
libtpu: 0.0.40
codegen_flags: <defaults>
</compile_context>

<pallas_src>
import functools

import jax
import jax.numpy as jnp
from jax.experimental import pallas as pl
from jax.experimental.pallas import tpu as pltpu


# ----------------------------------------------------------------------------
# Fused Bottleneck kernel (one grid step == NB batch images, fully VMEM-resident)
# ----------------------------------------------------------------------------
def _make_bottleneck_kernel(*, NB, H, W, OH, OW, stride, planes, cout, has_down):
    Hp, Wp = H + 2, W + 2

    def kernel(x_ref, w1_ref, b1_ref, w2_ref, b2_ref, w3_ref, b3_ref, o_ref, t1_ref):
        cin = x_ref.shape[-1]
        x = x_ref[...]                                         # (NB, H, W, cin) bf16
        M1 = NB * H * W
        M2 = NB * OH * OW

        # ---- conv1 (1x1, bn1 scale folded into w1) + bias + relu -- interior only ----
        t1 = jnp.dot(x.reshape(M1, cin), w1_ref[...],
                     preferred_element_type=jnp.float32)
        t1 = jnp.maximum(t1 + b1_ref[...], 0.0).astype(jnp.bfloat16)

        # Padded copy in VMEM: zero the whole (tiny) buffer, overwrite the interior.
        # The untouched halo ring is exactly conv2's zero padding.
        t1_ref[...] = jnp.zeros_like(t1_ref)
        t1_ref[:, 1:H + 1, 1:W + 1, :] = t1.reshape(NB, H, W, planes)

        # ---- conv2 (3x3, stride) + bn2 + relu: ONE im2col matmul, K = 9*planes ----
        cols = []
        for kh in range(3):
            for kw in range(3):
                if stride == 1:
                    win = t1_ref[:, kh:kh + OH, kw:kw + OW, :]
                else:
                    win = t1_ref[:, pl.ds(kh, OH, stride), pl.ds(kw, OW, stride), :]
                cols.append(win.reshape(M2, planes))
        col = jnp.concatenate(cols, axis=-1)                   # (M2, 9*planes) bf16
        t2 = jnp.dot(col, w2_ref[...], preferred_element_type=jnp.float32)
        t2 = jnp.maximum(t2 + b2_ref[...], 0.0).astype(jnp.bfloat16)

        # ---- conv3 (1x1) + bn3, fused with the projection shortcut when present ----
        if has_down:
            if stride == 1:
                xs = x
            else:
                xs = x_ref[:, pl.ds(0, OH, stride), pl.ds(0, OW, stride), :]
            lhs = jnp.concatenate([t2, xs.reshape(M2, cin)], axis=-1)  # K = planes+cin
            out = jnp.dot(lhs, w3_ref[...], preferred_element_type=jnp.float32)
            out = out + b3_ref[...]
        else:
            # identity shortcut (stride == 1 and cin == cout, guarded in the wrapper)
            out = jnp.dot(t2, w3_ref[...], preferred_element_type=jnp.float32)
            out = out + b3_ref[...] + x.reshape(M2, cin).astype(jnp.float32)

        # ---- final relu + bf16 NHWC store (lane-dense cout) ----
        o_ref[...] = jnp.maximum(out, 0.0).reshape(NB, OH, OW, cout).astype(o_ref.dtype)

    return kernel


def bottleneck_forward(x_nhwc, params, stride, *, batch_block=2):
    """Fused Bottleneck forward.  x: (N, H, W, Cin) -> (N, OH, OW, 4*planes) bf16 NHWC."""
    x = x_nhwc.astype(jnp.bfloat16)
    N, H, W, cin = x.shape
    planes = params["b2"].shape[-1]
    cout = params["b3"].shape[-1]
    has_down = params["w3"].shape[0] != planes     # fused [w3; wd] has planes+cin rows
    if not has_down and (stride != 1 or cin != cout):
        raise ValueError("identity shortcut requires stride == 1 and cin == 4*planes")

    OH = (H - 1) // stride + 1
    OW = (W - 1) // stride + 1
    NB = batch_block if (N % batch_block == 0) else 1

    kernel = _make_bottleneck_kernel(NB=NB, H=H, W=W, OH=OH, OW=OW, stride=stride,
                                     planes=planes, cout=cout, has_down=has_down)

    def const_spec(shape):
        zeros = (0,) * len(shape)
        return pl.BlockSpec(shape, lambda n, _z=zeros: _z)     # DMA'd once (grid-constant)

    in_specs = [
        pl.BlockSpec((NB, H, W, cin), lambda n: (n, 0, 0, 0)),
        const_spec(params["w1"].shape), const_spec(params["b1"].shape),
        const_spec(params["w2"].shape), const_spec(params["b2"].shape),
        const_spec(params["w3"].shape), const_spec(params["b3"].shape),
    ]

    out = pl.pallas_call(
        kernel,
        out_shape=jax.ShapeDtypeStruct((N, OH, OW, cout), jnp.bfloat16),
        grid=(N // NB,),
        in_specs=in_specs,
        out_specs=pl.BlockSpec((NB, OH, OW, cout), lambda n: (n, 0, 0, 0)),
        # padded conv1 activation (halo = conv2's zero padding); needed for all strides
        scratch_shapes=[pltpu.VMEM((NB, H + 2, W + 2, planes), jnp.bfloat16)],
        compiler_params=pltpu.CompilerParams(
            dimension_semantics=("parallel",),      # batch-block steps shard across TCs
            vmem_limit_bytes=48 * 1024 * 1024,
        ),
    )(x, params["w1"], params["b1"], params["w2"], params["b2"],
      params["w3"], params["b3"])
    return out


# ----------------------------------------------------------------------------
# Pure-JAX (XLA) reference using the SAME folded bf16 weights (NHWC in / out)
# ----------------------------------------------------------------------------
def bottleneck_reference(x_nhwc, params, stride):
    x = x_nhwc.astype(jnp.bfloat16).astype(jnp.float32)
    N, H, W, cin = x.shape
    planes = params["b2"].shape[-1]
    w1 = params["w1"].astype(jnp.float32)
    w2 = params["w2"].astype(jnp.float32).reshape(9, planes, planes)
    w3 = params["w3"].astype(jnp.float32)
    b1, b2, b3 = params["b1"], params["b2"], params["b3"]

    t1 = jax.nn.relu(jnp.einsum("nhwc,cp->nhwp", x, w1) + b1)
    tp = jnp.pad(t1, ((0, 0), (1, 1), (1, 1), (0, 0)))
    OH = (H - 1) // stride + 1
    OW = (W - 1) // stride + 1
    acc = jnp.zeros((N, OH, OW, planes), jnp.float32)
    for kh in range(3):
        for kw in range(3):
            win = tp[:, kh:kh + stride * (OH - 1) + 1:stride,
                     kw:kw + stride * (OW - 1) + 1:stride, :]
            acc = acc + jnp.einsum("nhwp,pq->nhwq", win, w2[kh * 3 + kw])
    t2 = jax.nn.relu(acc + b2)

    if w3.shape[0] != planes:                      # fused projection shortcut
        xs = x[:, ::stride, ::stride, :]
        t3 = (jnp.einsum("nhwq,qr->nhwr", t2, w3[:planes])
              + jnp.einsum("nhwc,cr->nhwr", xs, w3[planes:]) + b3)
    else:                                          # identity shortcut
        t3 = jnp.einsum("nhwq,qr->nhwr", t2, w3) + b3 + x
    return jax.nn.relu(t3)


# ----------------------------------------------------------------------------
# Deterministic parameter init: eval-mode BN folded into per-channel scale/bias,
# scales multiplied into the conv weights (bf16), conv2 pre-packed to (9*planes, planes),
# conv3 + projection shortcut stacked into one (planes+cin, cout) weight.
# (To import real PyTorch weights: transpose conv kernels to (cin, cout) / per-tap layout.)
# ----------------------------------------------------------------------------
def init_bottleneck_params(key, in_planes, planes, stride, eps=1e-5):
    expansion = 4
    cout = expansion * planes
    ks = iter(jax.random.split(key, 16))

    def bn_scale_bias(k, c):
        k1, k2, k3, k4 = jax.random.split(k, 4)
        gamma = 1.0 + 0.1 * jax.random.normal(k1, (c,), jnp.float32)
        beta = 0.1 * jax.random.normal(k2, (c,), jnp.float32)
        mean = 0.1 * jax.random.normal(k3, (c,), jnp.float32)
        var = jax.random.uniform(k4, (c,), jnp.float32, 0.5, 1.5)
        scale = gamma / jnp.sqrt(var + eps)
        bias = beta - mean * scale
        return scale, bias

    w1 = jax.random.normal(next(ks), (in_planes, planes), jnp.float32) * (2.0 / in_planes) ** 0.5
    s1, b1 = bn_scale_bias(next(ks), planes)
    w2 = jax.random.normal(next(ks), (9, planes, planes), jnp.float32) * (2.0 / (9 * planes)) ** 0.5
    s2, b2 = bn_scale_bias(next(ks), planes)
    w3 = jax.random.normal(next(ks), (planes, cout), jnp.float32) * (2.0 / planes) ** 0.5
    s3, b3 = bn_scale_bias(next(ks), cout)

    params = {
        "w1": (w1 * s1[None, :]).astype(jnp.bfloat16),
        "b1": b1.reshape(1, planes),
        "w2": (w2 * s2[None, None, :]).reshape(9 * planes, planes).astype(jnp.bfloat16),
        "b2": b2.reshape(1, planes),
    }
    if stride != 1 or in_planes != cout:           # projection shortcut: fuse into conv3
        wd = jax.random.normal(next(ks), (in_planes, cout), jnp.float32) * (2.0 / in_planes) ** 0.5
        sd, bd = bn_scale_bias(next(ks), cout)
        params["w3"] = jnp.concatenate(
            [w3 * s3[None, :], wd * sd[None, :]], axis=0).astype(jnp.bfloat16)
        params["b3"] = (b3 + bd).reshape(1, cout)
    else:
        params["w3"] = (w3 * s3[None, :]).astype(jnp.bfloat16)
        params["b3"] = b3.reshape(1, cout)
    return params


if __name__ == "__main__":
    N, H, W = 8, 16, 16
    configs = [
        (64, 32, 1),    # projection shortcut (4*planes != in_planes)
        (128, 32, 1),   # identity shortcut   (4*planes == in_planes)
    ]
    key = jax.random.PRNGKey(0)
    for in_planes, planes, stride in configs:
        key, pkey, xkey = jax.random.split(key, 3)
        params = init_bottleneck_params(pkey, in_planes, planes, stride)

        # The PyTorch module is NCHW; convert to NHWC once (kernel stays NHWC end-to-end).
        x_nchw = jax.random.normal(xkey, (N, in_planes, H, W), jnp.float32)
        x = jnp.transpose(x_nchw, (0, 2, 3, 1))

        fwd = jax.jit(functools.partial(bottleneck_forward, stride=stride))
        out = jax.block_until_ready(fwd(x, params))

        OH = (H - 1) // stride + 1
        OW = (W - 1) // stride + 1
        assert out.shape == (N, OH, OW, 4 * planes), out.shape
        assert out.dtype == jnp.bfloat16
        out_f32 = out.astype(jnp.float32)
        assert bool(jnp.all(jnp.isfinite(out_f32)))

        ref = bottleneck_reference(x, params, stride)
        ref_b = ref.astype(jnp.bfloat16).astype(jnp.float32)   # same output rounding
        err = float(jnp.max(jnp.abs(out_f32 - ref_b)))
        assert err < 0.3, f"cfg={(in_planes, planes, stride)}: max abs err {err}"

    print("KERNEL_OK")
</pallas_src>

<mosaic_0001>
module attributes {stable_mosaic.version = 11 : i64} {
  func.func @kernel(%arg0: i32, %arg1: memref<2x16x16x64xbf16, #tpu.memory_space<vmem>>, %arg2: memref<64x32xbf16, #tpu.memory_space<vmem>>, %arg3: memref<1x32xf32, #tpu.memory_space<vmem>>, %arg4: memref<288x32xbf16, #tpu.memory_space<vmem>>, %arg5: memref<1x32xf32, #tpu.memory_space<vmem>>, %arg6: memref<96x128xbf16, #tpu.memory_space<vmem>>, %arg7: memref<1x128xf32, #tpu.memory_space<vmem>>, %arg8: memref<2x16x16x128xbf16, #tpu.memory_space<vmem>>, %arg9: memref<2x18x18x32xbf16, #tpu.memory_space<vmem>>) attributes {dimension_semantics = [#tpu.dimension_semantics<parallel>], iteration_bounds = array<i64: 4>, scalar_prefetch = 0 : i64, scratch_operands = 1 : i64, tpu.core_type = #tpu.core_type<tc>, window_params = [{transform_indices = @transform_0, window_bounds = array<i64: 2, 16, 16, 64>}, {pipeline_mode = #tpu.pipeline_mode<synchronous>, transform_indices = @transform_1, window_bounds = array<i64: 64, 32>}, {pipeline_mode = #tpu.pipeline_mode<synchronous>, transform_indices = @transform_2, window_bounds = array<i64: 1, 32>}, {pipeline_mode = #tpu.pipeline_mode<synchronous>, transform_indices = @transform_3, window_bounds = array<i64: 288, 32>}, {pipeline_mode = #tpu.pipeline_mode<synchronous>, transform_indices = @transform_4, window_bounds = array<i64: 1, 32>}, {pipeline_mode = #tpu.pipeline_mode<synchronous>, transform_indices = @transform_5, window_bounds = array<i64: 96, 128>}, {pipeline_mode = #tpu.pipeline_mode<synchronous>, transform_indices = @transform_6, window_bounds = array<i64: 1, 128>}, {transform_indices = @transform_7, window_bounds = array<i64: 2, 16, 16, 128>}]} {
    %c0 = arith.constant 0 : index
    %c0_0 = arith.constant 0 : index
    %c0_1 = arith.constant 0 : index
    %c0_2 = arith.constant 0 : index
    %0 = vector.load %arg1[%c0, %c0_0, %c0_1, %c0_2] : memref<2x16x16x64xbf16, #tpu.memory_space<vmem>>, vector<2x16x16x64xbf16>
    %1 = vector.shape_cast %0 : vector<2x16x16x64xbf16> to vector<512x64xbf16>
    %c0_3 = arith.constant 0 : index
    %c0_4 = arith.constant 0 : index
    %2 = vector.load %arg2[%c0_3, %c0_4] : memref<64x32xbf16, #tpu.memory_space<vmem>>, vector<64x32xbf16>
    %cst = arith.constant dense<0.000000e+00> : vector<512x32xf32>
    %3 = tpu.matmul %1, %2, %cst {dimension_numbers = #tpu.dot_dimension_numbers<[1], [0], [0], [1], [0, 0, 1, 1], [], []>} : vector<512x64xbf16>, vector<64x32xbf16>, vector<512x32xf32> -> vector<512x32xf32>
    %c0_5 = arith.constant 0 : index
    %c0_6 = arith.constant 0 : index
    %4 = vector.load %arg3[%c0_5, %c0_6] : memref<1x32xf32, #tpu.memory_space<vmem>>, vector<1x32xf32>
    %5 = vector.broadcast %4 : vector<1x32xf32> to vector<512x32xf32>
    %6 = arith.addf %3, %5 : vector<512x32xf32>
    %cst_7 = arith.constant 0.000000e+00 : f32
    %7 = vector.broadcast %cst_7 : f32 to vector<512x32xf32>
    %8 = arith.maximumf %6, %7 : vector<512x32xf32>
    %9 = arith.truncf %8 : vector<512x32xf32> to vector<512x32xbf16>
    %cst_8 = arith.constant 0.000000e+00 : bf16
    %10 = vector.broadcast %cst_8 : bf16 to vector<2x18x18x32xbf16>
    %c0_9 = arith.constant 0 : index
    %c0_10 = arith.constant 0 : index
    %c0_11 = arith.constant 0 : index
    %c0_12 = arith.constant 0 : index
    %11 = vector.load %arg9[%c0_9, %c0_10, %c0_11, %c0_12] : memref<2x18x18x32xbf16, #tpu.memory_space<vmem>>, vector<2x18x18x32xbf16>
    tpu.vector_store %arg9[%c0_9, %c0_10, %c0_11, %c0_12], %10 {strides = array<i32>} : memref<2x18x18x32xbf16, #tpu.memory_space<vmem>>, vector<2x18x18x32xbf16>,
    %12 = vector.shape_cast %9 : vector<512x32xbf16> to vector<2x16x16x32xbf16>
    %c0_13 = arith.constant 0 : index
    %c1 = arith.constant 1 : index
    %c1_14 = arith.constant 1 : index
    %c0_15 = arith.constant 0 : index
    %13 = vector.load %arg9[%c0_13, %c1, %c1_14, %c0_15] : memref<2x18x18x32xbf16, #tpu.memory_space<vmem>>, vector<2x16x16x32xbf16>
    tpu.vector_store %arg9[%c0_13, %c1, %c1_14, %c0_15], %12 {strides = array<i32>} : memref<2x18x18x32xbf16, #tpu.memory_space<vmem>>, vector<2x16x16x32xbf16>,
    %c0_16 = arith.constant 0 : index
    %c0_17 = arith.constant 0 : index
    %c0_18 = arith.constant 0 : index
    %c0_19 = arith.constant 0 : index
    %14 = vector.load %arg9[%c0_16, %c0_17, %c0_18, %c0_19] : memref<2x18x18x32xbf16, #tpu.memory_space<vmem>>, vector<2x16x16x32xbf16>
    %15 = vector.shape_cast %14 : vector<2x16x16x32xbf16> to vector<512x32xbf16>
    %c0_20 = arith.constant 0 : index
    %c0_21 = arith.constant 0 : index
    %c1_22 = arith.constant 1 : index
    %c0_23 = arith.constant 0 : index
    %16 = vector.load %arg9[%c0_20, %c0_21, %c1_22, %c0_23] : memref<2x18x18x32xbf16, #tpu.memory_space<vmem>>, vector<2x16x16x32xbf16>
    %17 = vector.shape_cast %16 : vector<2x16x16x32xbf16> to vector<512x32xbf16>
    %c0_24 = arith.constant 0 : index
    %c0_25 = arith.constant 0 : index
    %c2 = arith.constant 2 : index
    %c0_26 = arith.constant 0 : index
    %18 = vector.load %arg9[%c0_24, %c0_25, %c2, %c0_26] : memref<2x18x18x32xbf16, #tpu.memory_space<vmem>>, vector<2x16x16x32xbf16>
    %19 = vector.shape_cast %18 : vector<2x16x16x32xbf16> to vector<512x32xbf16>
    %c0_27 = arith.constant 0 : index
    %c1_28 = arith.constant 1 : index
    %c0_29 = arith.constant 0 : index
    %c0_30 = arith.constant 0 : index
    %20 = vector.load %arg9[%c0_27, %c1_28, %c0_29, %c0_30] : memref<2x18x18x32xbf16, #tpu.memory_space<vmem>>, vector<2x16x16x32xbf16>
    %21 = vector.shape_cast %20 : vector<2x16x16x32xbf16> to vector<512x32xbf16>
    %c0_31 = arith.constant 0 : index
    %c1_32 = arith.constant 1 : index
    %c1_33 = arith.constant 1 : index
    %c0_34 = arith.constant 0 : index
    %22 = vector.load %arg9[%c0_31, %c1_32, %c1_33, %c0_34] : memref<2x18x18x32xbf16, #tpu.memory_space<vmem>>, vector<2x16x16x32xbf16>
    %23 = vector.shape_cast %22 : vector<2x16x16x32xbf16> to vector<512x32xbf16>
    %c0_35 = arith.constant 0 : index
    %c1_36 = arith.constant 1 : index
    %c2_37 = arith.constant 2 : index
    %c0_38 = arith.constant 0 : index
    %24 = vector.load %arg9[%c0_35, %c1_36, %c2_37, %c0_38] : memref<2x18x18x32xbf16, #tpu.memory_space<vmem>>, vector<2x16x16x32xbf16>
    %25 = vector.shape_cast %24 : vector<2x16x16x32xbf16> to vector<512x32xbf16>
    %c0_39 = arith.constant 0 : index
    %c2_40 = arith.constant 2 : index
    %c0_41 = arith.constant 0 : index
    %c0_42 = arith.constant 0 : index
    %26 = vector.load %arg9[%c0_39, %c2_40, %c0_41, %c0_42] : memref<2x18x18x32xbf16, #tpu.memory_space<vmem>>, vector<2x16x16x32xbf16>
    %27 = vector.shape_cast %26 : vector<2x16x16x32xbf16> to vector<512x32xbf16>
    %c0_43 = arith.constant 0 : index
    %c2_44 = arith.constant 2 : index
    %c1_45 = arith.constant 1 : index
    %c0_46 = arith.constant 0 : index
    %28 = vector.load %arg9[%c0_43, %c2_44, %c1_45, %c0_46] : memref<2x18x18x32xbf16, #tpu.memory_space<vmem>>, vector<2x16x16x32xbf16>
    %29 = vector.shape_cast %28 : vector<2x16x16x32xbf16> to vector<512x32xbf16>
    %c0_47 = arith.constant 0 : index
    %c2_48 = arith.constant 2 : index
    %c2_49 = arith.constant 2 : index
    %c0_50 = arith.constant 0 : index
    %30 = vector.load %arg9[%c0_47, %c2_48, %c2_49, %c0_50] : memref<2x18x18x32xbf16, #tpu.memory_space<vmem>>, vector<2x16x16x32xbf16>
    %31 = vector.shape_cast %30 : vector<2x16x16x32xbf16> to vector<512x32xbf16>
    %32 = tpu.concatenate %15, %17, %19, %21, %23, %25, %27, %29, %31 in 1 : vector<512x32xbf16>, vector<512x32xbf16>, vector<512x32xbf16>, vector<512x32xbf16>, vector<512x32xbf16>, vector<512x32xbf16>, vector<512x32xbf16>, vector<512x32xbf16>, vector<512x32xbf16> -> vector<512x288xbf16>
    %c0_51 = arith.constant 0 : index
    %c0_52 = arith.constant 0 : index
    %33 = vector.load %arg4[%c0_51, %c0_52] : memref<288x32xbf16, #tpu.memory_space<vmem>>, vector<288x32xbf16>
    %cst_53 = arith.constant dense<0.000000e+00> : vector<512x32xf32>
    %34 = tpu.matmul %32, %33, %cst_53 {dimension_numbers = #tpu.dot_dimension_numbers<[1], [0], [0], [1], [0, 0, 1, 1], [], []>} : vector<512x288xbf16>, vector<288x32xbf16>, vector<512x32xf32> -> vector<512x32xf32>
    %c0_54 = arith.constant 0 : index
    %c0_55 = arith.constant 0 : index
    %35 = vector.load %arg5[%c0_54, %c0_55] : memref<1x32xf32, #tpu.memory_space<vmem>>, vector<1x32xf32>
    %36 = vector.broadcast %35 : vector<1x32xf32> to vector<512x32xf32>
    %37 = arith.addf %34, %36 : vector<512x32xf32>
    %cst_56 = arith.constant 0.000000e+00 : f32
    %38 = vector.broadcast %cst_56 : f32 to vector<512x32xf32>
    %39 = arith.maximumf %37, %38 : vector<512x32xf32>
    %40 = arith.truncf %39 : vector<512x32xf32> to vector<512x32xbf16>
    %41 = vector.shape_cast %0 : vector<2x16x16x64xbf16> to vector<512x64xbf16>
    %42 = tpu.concatenate %40, %41 in 1 : vector<512x32xbf16>, vector<512x64xbf16> -> vector<512x96xbf16>
    %c0_57 = arith.constant 0 : index
    %c0_58 = arith.constant 0 : index
    %43 = vector.load %arg6[%c0_57, %c0_58] : memref<96x128xbf16, #tpu.memory_space<vmem>>, vector<96x128xbf16>
    %cst_59 = arith.constant dense<0.000000e+00> : vector<512x128xf32>
    %44 = tpu.matmul %42, %43, %cst_59 {dimension_numbers = #tpu.dot_dimension_numbers<[1], [0], [0], [1], [0, 0, 1, 1], [], []>} : vector<512x96xbf16>, vector<96x128xbf16>, vector<512x128xf32> -> vector<512x128xf32>
    %c0_60 = arith.constant 0 : index
    %c0_61 = arith.constant 0 : index
    %45 = vector.load %arg7[%c0_60, %c0_61] : memref<1x128xf32, #tpu.memory_space<vmem>>, vector<1x128xf32>
    %46 = vector.broadcast %45 : vector<1x128xf32> to vector<512x128xf32>
    %47 = arith.addf %44, %46 : vector<512x128xf32>
    %cst_62 = arith.constant 0.000000e+00 : f32
    %48 = vector.broadcast %cst_62 : f32 to vector<512x128xf32>
    %49 = arith.maximumf %47, %48 : vector<512x128xf32>
    %50 = vector.shape_cast %49 : vector<512x128xf32> to vector<2x16x16x128xf32>
    %51 = arith.truncf %50 : vector<2x16x16x128xf32> to vector<2x16x16x128xbf16>
    %c0_63 = arith.constant 0 : index
    %c0_64 = arith.constant 0 : index
    %c0_65 = arith.constant 0 : index
    %c0_66 = arith.constant 0 : index
    %52 = vector.load %arg8[%c0_63, %c0_64, %c0_65, %c0_66] : memref<2x16x16x128xbf16, #tpu.memory_space<vmem>>, vector<2x16x16x128xbf16>
    tpu.vector_store %arg8[%c0_63, %c0_64, %c0_65, %c0_66], %51 {strides = array<i32>} : memref<2x16x16x128xbf16, #tpu.memory_space<vmem>>, vector<2x16x16x128xbf16>,
    return
  }
  func.func @transform_0(%arg0: i32) -> (i32, i32, i32, i32) {
    %c0_i32 = arith.constant 0 : i32
    %c0_i32_0 = arith.constant 0 : i32
    %c0_i32_1 = arith.constant 0 : i32
    %c0_i32_2 = arith.constant 0 : i32
    return %arg0, %c0_i32, %c0_i32_0, %c0_i32_1 : i32, i32, i32, i32
  }
  func.func @transform_1(%arg0: i32) -> (i32, i32) {
    %c0_i32 = arith.constant 0 : i32
    %c0_i32_0 = arith.constant 0 : i32
    %c0_i32_1 = arith.constant 0 : i32
    return %c0_i32, %c0_i32_0 : i32, i32
  }
  func.func @transform_2(%arg0: i32) -> (i32, i32) {
    %c0_i32 = arith.constant 0 : i32
    %c0_i32_0 = arith.constant 0 : i32
    %c0_i32_1 = arith.constant 0 : i32
    return %c0_i32, %c0_i32_0 : i32, i32
  }
  func.func @transform_3(%arg0: i32) -> (i32, i32) {
    %c0_i32 = arith.constant 0 : i32
    %c0_i32_0 = arith.constant 0 : i32
    %c0_i32_1 = arith.constant 0 : i32
    return %c0_i32, %c0_i32_0 : i32, i32
  }
  func.func @transform_4(%arg0: i32) -> (i32, i32) {
    %c0_i32 = arith.constant 0 : i32
    %c0_i32_0 = arith.constant 0 : i32
    %c0_i32_1 = arith.constant 0 : i32
    return %c0_i32, %c0_i32_0 : i32, i32
  }
  func.func @transform_5(%arg0: i32) -> (i32, i32) {
    %c0_i32 = arith.constant 0 : i32
    %c0_i32_0 = arith.constant 0 : i32
    %c0_i32_1 = arith.constant 0 : i32
    return %c0_i32, %c0_i32_0 : i32, i32
  }
  func.func @transform_6(%arg0: i32) -> (i32, i32) {
    %c0_i32 = arith.constant 0 : i32
    %c0_i32_0 = arith.constant 0 : i32
    %c0_i32_1 = arith.constant 0 : i32
    return %c0_i32, %c0_i32_0 : i32, i32
  }
  func.func @transform_7(%arg0: i32) -> (i32, i32, i32, i32) {
    %c0_i32 = arith.constant 0 : i32
    %c0_i32_0 = arith.constant 0 : i32
    %c0_i32_1 = arith.constant 0 : i32
    %c0_i32_2 = arith.constant 0 : i32
    return %arg0, %c0_i32, %c0_i32_0, %c0_i32_1 : i32, i32, i32, i32
  }
}

</mosaic_0001>

<bundles_post_ra>
// kernel: bottleneck_forward.1
= control target key start
LH: loop header
LB: loop body
LE: loop exit
PB: predicated region body
PF: predicated region fallthrough
CT: control target
= control target key end

     0   :  { %12 = vsyncpa [#allocation4], 0  ;;  %s15119_s0 = inlined_call_operand.vmem [shape: bf16[8,16,16,64], index: 0, kind: input, shape index: {}]   ;;  %s15120_s1 = inlined_call_operand.vmem [shape: bf16[64,32], index: 1, kind: input, shape index: {}]   ;;  %s15121_s2 = inlined_call_operand.vmem [shape: f32[1,32], index: 2, kind: input, shape index: {}]   ;;  %s15122_s3 = inlined_call_operand.vmem [shape: bf16[288,32], index: 3, kind: input, shape index: {}]   ;;  %s15123_s4 = inlined_call_operand.vmem [shape: f32[1,32], index: 4, kind: input, shape index: {}]   ;;  %s15124_s5 = inlined_call_operand.vmem [shape: bf16[96,128], index: 5, kind: input, shape index: {}]   ;;  %s15125_s6 = inlined_call_operand.vmem [shape: f32[1,128], index: 6, kind: input, shape index: {}]   ;;  %s15126_s7 = inlined_call_operand.hbm [shape: bf16[8,16,16,128], index: 7, kind: output, shape index: {}]  }
   0x1   :  { %14 = vsyncpa [#allocation4 + $0x1], 0  ;;  %s10674_s24 = smov 0   ;;  %s10676_s25 = smov 0  }
   0x2   :  { %s10678_s26 = smov 0   ;;  %s10680_s27 = smov 0  }
   0x3 LB: > { %s10695_s28 = sadd.s32 4294967295, %s10627_s27   ;;  %s9189_s29 = sadd.s32 4294967294, %s10627_s27   ;;  %s10627_s27 = sphi %s10680_s27, %s15410_s27   ;;  %s10623_s26 = sphi %s10678_s26, %s15409_s26   ;;  %s10619_s25 = sphi %s10676_s25, %s15408_s25   ;;  %s10615_s24 = sphi %s10674_s24, %s15407_s24  }
   0x4   : > { %s10699_s30 = sadd.s32 1, %s10627_s27   ;;  %s179_s8 = sadd.s32 1, %s10623_s26 }
   0x5   : > { %s176_s9 = ssub.s32 %s10627_s27, %s10699_s30  ;;  %p189_p0 = scmp.ne.s32.totalorder %s10623_s26, %s10619_s25 }
   0x6   : > { %p177_p1 = scmp.eq.s32.totalorder %s176_s9, 0  ;;  %p190_p2 = scmp.eq.s32.totalorder %s10695_s28, 3 }
   0x7   : > { %p195_p3 = scmp.ne.s32.totalorder %s10619_s25, %s10615_s24  ;;  %p196_p4 = scmp.eq.s32.totalorder %s9189_s29, 3 }
   0x8   : > { %s10710_s10 = scalar_select %p177_p1, %s10623_s26, %s179_s8  }
   0x9   : > { %p10712_p5 = por %p190_p2, %p189_p0  ;;  %p10716_p6 = por %p196_p4, %p195_p3 }
   0xa   : > { %p9192_p7 = scmp.ge.s32.totalorder %s10627_s27, 1  ;;  %p242_p8 = scmp.lt.s32.totalorder %s10627_s27, 5 }
   0xc   : > { %p243_p9 = pnand %p9192_p7, %p242_p8 }
   0xe   : > { %246 = sbr.rel (%p243_p9) target bundleno = 1590 (0x636), region = 48 }
  0x13   : > { %v10055_v0 = vld [vmem:[%s15120_s1 + $0x18] sm:$0xff]  ;;  %s9194_s15 = sshll.u32 %s10695_s28, 1  ;;  %v10054_v1 = vld [vmem:[%s15120_s1 + $0x10] sm:$0xff]  ;;  %v10053_v2 = vld [vmem:[%s15120_s1 + $0x8] sm:$0xff]  ;;  %vm544_vm0 = vcmask 523264   ;;  %vm938_vm1 = vcmask 257024  }
  0x14   : > { %p276_p10 = scmp.lt.s32.totalorder %s9194_s15, 7  ;;  %645 = vmatpush.bf16.msra.mxu0 %v10055_v0  ;;  %10369 = vmatpush.bf16.msra.mxu1 %v10055_v0  ;;  %v10052_v3 = vld [vmem:[%s15120_s1] sm:$0xff]  ;;  %v10629_v14 = vmov 0   ;;  %vm1693_vm2 = vsmask.f32 7938  ;;  %vm941_vm7 = vcmask 253952  }
  0x15   : > { %10370 = vmatpush.bf16.msra.mxu2 %v10055_v0  ;;  %943 = vst.msk [vmem:[#allocation2 + $0xc] sm:$0xf] %vm938_vm1, %v10629_v14  ;;  %v10813_v16 = vld [vmem:[%s15121_s2] ss:$0 sm:$0xff]  ;;  %vm10845_vm3 = vmand %vm938_vm1, %vm1693_vm2  ;;  %vm1048_vm4 = vsmask.f32 256 }
  0x16   : > { %s15412_s15 = smov (!%p276_p10, %s9194_s15), 7  ;;  %939 = vst.msk [vmem:[#allocation2] sm:$0xf] %vm938_vm1, %v10629_v14  ;;  %vm1049_vm5 = vsmask.f32 4368  ;;  %vm10945_vm8 = vmand %vm941_vm7, %vm1048_vm4  ;;  %vm2916_vm9 = vcmask 1042432  }
  0x17   : > { %s10019_s20 = sshll.u32 %s15412_s15, 7  ;;  %940 = vst.msk [vmem:[#allocation2 + $0x4] sm:$0xf] %vm938_vm1, %v10629_v14  ;;  %vm10918_vm6 = vmor %vm1048_vm4, %vm1049_vm5  ;;  %vm2917_vm10 = vcmask 1046532   ;;  %vm2017_vm12 = vsmask.f32 3328 }
  0x18   : > { %646 = vmatpush.bf16.msra.mxu0 %v10054_v1  ;;  %10371 = vmatpush.bf16.msra.mxu1 %v10054_v1  ;;  %s10738_s8 = scalar_lea.vmem %s15119_s0, %s10019_s20  ;;  %944 = vst.msk [vmem:[#allocation2 + $0x10] sm:$0xf] %vm938_vm1, %v10629_v14  ;;  %vm10972_vm11 = vmor %vm2916_vm9, %vm2917_vm10  ;;  %vm2018_vm13 = vsmask.f32 7440  ;;  %s10630_s14 = smov 32   ;;  %vm6920_vm15 = vcmask 261120  }
  0x19   : > { %10372 = vmatpush.bf16.msra.mxu2 %v10054_v1  ;;  %v10020_v4 = vld [vmem:[%s10738_s8] sm:$0xff]  ;;  %v10021_v5 = vld [vmem:[%s10738_s8 + $0x8] sm:$0xff]  ;;  %v10022_v6 = vld [vmem:[%s10738_s8 + $0x10] sm:$0xff]  ;;  %946 = vst.msk [vmem:[#allocation2 + $0x18] sm:$0xf] %vm938_vm1, %v10629_v14  ;;  %s10631_s17 = smov 64  }
  0x1a   : > { %v10023_v7 = vld [vmem:[%s10738_s8 + $0x18] sm:$0xff]  ;;  %v10038_v8 = vld [vmem:[%s10738_s8 + $0x90] sm:$0xff]  ;;  %v10024_v9 = vld [vmem:[%s10738_s8 + $0x20] sm:$0xff]  ;;  %947 = vst.msk [vmem:[#allocation2 + $0x1c] sm:$0xf] %vm938_vm1, %v10629_v14  ;;  %s10632_s18 = smov 96  }
  0x1b   : > { %v10039_v10 = vld [vmem:[%s10738_s8 + $0x98] sm:$0xff]  ;;  %v10025_v11 = vld [vmem:[%s10738_s8 + $0x28] sm:$0xff]  ;;  %v10040_v12 = vld [vmem:[%s10738_s8 + $0xa0] sm:$0xff]  ;;  %949 = vst.msk [vmem:[#allocation2 + $0x24] sm:$0xf] %vm938_vm1, %v10629_v14  ;;  %vm7081_vm2 = vcmask 785408  }
  0x1c   : > { %647 = vmatpush.bf16.msra.mxu0 %v10053_v2  ;;  %10373 = vmatpush.bf16.msra.mxu1 %v10053_v2  ;;  %v10026_v13 = vld [vmem:[%s10738_s8 + $0x30] sm:$0xff]  ;;  %950 = vst.msk [vmem:[#allocation2 + $0x28] sm:$0xf] %vm938_vm1, %v10629_v14  ;;  %v10027_v15 = vld [vmem:[%s10738_s8 + $0x38] sm:$0xff]  ;;  %v10028_v17 = vld [vmem:[%s10738_s8 + $0x40] sm:$0xff]  ;;  %s272_s23 = sand.u32 1, %s10619_s25  }
  0x1d   : > { %10374 = vmatpush.bf16.msra.mxu2 %v10053_v2  ;;  %952 = vst.msk [vmem:[#allocation2 + $0x30] sm:$0xf] %vm938_vm1, %v10629_v14  ;;  %v1695_v26 = vld [vmem:[#allocation2 + $0xc] sm:$0xf]  ;;  %v10042_v46 = vld [vmem:[%s10738_s8 + $0xb0] sm:$0xff]  ;;  %vm10985_vm14 = vmor %vm2017_vm12, %vm2018_vm13  ;;  %s14324_s29 = sshll.u32 %s272_s23, 8 }
  0x1e   : > { %953 = vst.msk [vmem:[#allocation2 + $0x34] sm:$0xf] %vm938_vm1, %v10629_v14  ;;  %v10041_v29 = vld [vmem:[%s10738_s8 + $0xa8] sm:$0xff]  ;;  %v10030_v55 = vld [vmem:[%s10738_s8 + $0x50] sm:$0xff]  ;;  %s14360_s15 = scalar_lea.vmem [#allocation3], %s14324_s29  ;;  %s10177_s21 = sshll.u32 %s10695_s28, 8 }
  0x1f   : > { %955 = vst.msk [vmem:[#allocation2 + $0x3c] sm:$0xf] %vm938_vm1, %v10629_v14  ;;  %v10029_v38 = vld [vmem:[%s10738_s8 + $0x48] sm:$0xff]  ;;  %v14742_v0 = vld [vmem:[%s15125_s6] ss:$0 sm:$0xff]  ;;  %s9123_s9 = scalar_lea.hbm %s15126_s7, %s10177_s21  ;;  %s9124_s13 = sshll.u32 %s14360_s15, 4  ;;  %s9125_s13 = int_to_ptr.vmem [resolvable:$true] %s9124_s13 }
  0x20   : > { %648 = vmatpush.bf16.msra.mxu0 %v10052_v3  ;;  %10375 = vmatpush.bf16.msra.mxu1 %v10052_v3  ;;  %956 = vst.msk [vmem:[#allocation2 + $0x40] sm:$0xf] %vm938_vm1, %v10629_v14  ;;  %s9126_s16 = sshll.u32 %s9123_s9, 4  ;;  %s9111_s28 = scalar_lea.sflag [#allocation4], %s272_s23  ;;  %s9127_s16 = int_to_ptr.hbm [resolvable:$true] %s9126_s16 }
  0x21   : > { %10376 = vmatpush.bf16.msra.mxu2 %v10052_v3  ;;  %958 = vst.msk [vmem:[#allocation2 + $0x48] sm:$0xf] %vm938_vm1, %v10629_v14  ;;  %s10579_s19 = sshra.s32 %s9127_s16, 4  ;;  %s10580_s19 = int_to_ptr.hbm [resolvable:$true] %s10579_s19 }
  0x22   : > { %959 = vst.msk [vmem:[#allocation2 + $0x4c] sm:$0xf] %vm938_vm1, %v10629_v14  ;;  %p10586_p0 = scmp.lt.s32.totalorder %s10580_s19, %s15126_s7 }
  0x23   : > { %9341 = vmatmul.msk.bf16.vlgmr.msra.gmra.mxu0 %vm544_vm0, %v10020_v4  ;;  %9359 = vmatmul.msk.bf16.vlgmr.msra.gmra.mxu1 %vm544_vm0, %v10038_v8  ;;  %961 = vst.msk [vmem:[#allocation2 + $0x54] sm:$0xf] %vm938_vm1, %v10629_v14 }
  0x24   : > { %962 = vst.msk [vmem:[#allocation2 + $0x58] sm:$0xf] %vm938_vm1, %v10629_v14 }
  0x25   : > { %964 = vst.msk [vmem:[#allocation2 + $0x60] sm:$0xf] %vm938_vm1, %v10629_v14 }
  0x26   : > { %965 = vst.msk [vmem:[#allocation2 + $0x64] sm:$0xf] %vm938_vm1, %v10629_v14 }
  0x27   : > { %967 = vst.msk [vmem:[#allocation2 + $0x6c] sm:$0xf] %vm938_vm1, %v10629_v14 }
  0x28   : > { %968 = vst.msk [vmem:[#allocation2 + $0x70] sm:$0xf] %vm938_vm1, %v10629_v14 }
  0x29   : > { %970 = vst.msk [vmem:[#allocation2 + $0x78] sm:$0xf] %vm938_vm1, %v10629_v14 }
  0x2a   : > { %971 = vst.msk [vmem:[#allocation2 + $0x7c] sm:$0xf] %vm938_vm1, %v10629_v14 }
  0x2b   : > { %973 = vst.msk [vmem:[#allocation2 + $0x84] sm:$0xf] %vm938_vm1, %v10629_v14 }
  0x2c   : > { %974 = vst.msk [vmem:[#allocation2 + $0x88] sm:$0xf] %vm938_vm1, %v10629_v14 }
  0x2d   : > { %976 = vst.msk [vmem:[#allocation2 + $0x90] sm:$0xf] %vm938_vm1, %v10629_v14 }
  0x2e   : > { %977 = vst.msk [vmem:[#allocation2 + $0x94] sm:$0xf] %vm938_vm1, %v10629_v14 }
  0x2f   : > { %979 = vst.msk [vmem:[#allocation2 + $0x9c] sm:$0xf] %vm938_vm1, %v10629_v14 }
  0x30   : > { %980 = vst.msk [vmem:[#allocation2 + $0xa0] sm:$0xf] %vm938_vm1, %v10629_v14 }
  0x31   : > { %982 = vst.msk [vmem:[#allocation2 + $0xa8] sm:$0xf] %vm938_vm1, %v10629_v14 }
  0x32   : > { %983 = vst.msk [vmem:[#allocation2 + $0xac] sm:$0xf] %vm938_vm1, %v10629_v14 }
  0x33   : > { %9342 = vmatmul.msk.bf16.gmra.mxu0 %vm544_vm0, %v10021_v5  ;;  %9360 = vmatmul.msk.bf16.gmra.mxu1 %vm544_vm0, %v10039_v10  ;;  %985 = vst.msk [vmem:[#allocation2 + $0xb4] sm:$0xf] %vm938_vm1, %v10629_v14 }
  0x34   : > { %986 = vst.msk [vmem:[#allocation2 + $0xb8] sm:$0xf] %vm938_vm1, %v10629_v14 }
  0x35   : > { %988 = vst.msk [vmem:[#allocation2 + $0xc0] sm:$0xf] %vm938_vm1, %v10629_v14 }
  0x36   : > { %989 = vst.msk [vmem:[#allocation2 + $0xc4] sm:$0xf] %vm938_vm1, %v10629_v14 }
  0x37   : > { %991 = vst.msk [vmem:[#allocation2 + $0xcc] sm:$0xf] %vm938_vm1, %v10629_v14 }
  0x38   : > { %992 = vst.msk [vmem:[#allocation2 + $0xd0] sm:$0xf] %vm938_vm1, %v10629_v14 }
  0x39   : > { %994 = vst.msk [vmem:[#allocation2 + $0xd8] sm:$0xf] %vm938_vm1, %v10629_v14 }
  0x3a   : > { %995 = vst.msk [vmem:[#allocation2 + $0xdc] sm:$0xf] %vm938_vm1, %v10629_v14 }
  0x3b   : > { %997 = vst.msk [vmem:[#allocation2 + $0xe4] sm:$0xf] %vm938_vm1, %v10629_v14 }
  0x3c   : > { %998 = vst.msk [vmem:[#allocation2 + $0xe8] sm:$0xf] %vm938_vm1, %v10629_v14 }
  0x3d   : > { %1000 = vst.msk [vmem:[#allocation2 + $0xf0] sm:$0xf] %vm938_vm1, %v10629_v14 }
  0x3e   : > { %1001 = vst.msk [vmem:[#allocation2 + $0xf4] sm:$0xf] %vm938_vm1, %v10629_v14 }
  0x3f   : > { %1003 = vst.msk [vmem:[#allocation2 + $0xfc] sm:$0xf] %vm938_vm1, %v10629_v14 }
  0x40   : > { %1004 = vst.msk [vmem:[#allocation2 + $0x100] sm:$0xf] %vm938_vm1, %v10629_v14 }
  0x41   : > { %1006 = vst.msk [vmem:[#allocation2 + $0x108] sm:$0xf] %vm938_vm1, %v10629_v14 }
  0x42   : > { %1007 = vst.msk [vmem:[#allocation2 + $0x10c] sm:$0xf] %vm938_vm1, %v10629_v14 }
  0x43   : > { %9343 = vmatmul.msk.bf16.gmra.mxu0 %vm544_vm0, %v10022_v6  ;;  %9361 = vmatmul.msk.bf16.gmra.mxu1 %vm544_vm0, %v10040_v12  ;;  %1009 = vst.msk [vmem:[#allocation2 + $0x114] sm:$0xf] %vm938_vm1, %v10629_v14 }
  0x44   : > { %1010 = vst.msk [vmem:[#allocation2 + $0x118] sm:$0xf] %vm938_vm1, %v10629_v14 }
  0x45   : > { %1012 = vst.msk [vmem:[#allocation2 + $0x120] sm:$0xf] %vm938_vm1, %v10629_v14 }
  0x46   : > { %1013 = vst.msk [vmem:[#allocation2 + $0x124] sm:$0xf] %vm938_vm1, %v10629_v14 }
  0x47   : > { %1015 = vst.msk [vmem:[#allocation2 + $0x12c] sm:$0xf] %vm938_vm1, %v10629_v14 }
  0x48   : > { %1016 = vst.msk [vmem:[#allocation2 + $0x130] sm:$0xf] %vm938_vm1, %v10629_v14 }
  0x49   : > { %1018 = vst.msk [vmem:[#allocation2 + $0x138] sm:$0xf] %vm938_vm1, %v10629_v14 }
  0x4a   : > { %1019 = vst.msk [vmem:[#allocation2 + $0x13c] sm:$0xf] %vm938_vm1, %v10629_v14 }
  0x4b   : > { %1021 = vst.msk [vmem:[#allocation2 + $0x144] sm:$0xf] %vm938_vm1, %v10629_v14 }
  0x4c   : > { %1022 = vst.msk [vmem:[#allocation2 + $0x148] sm:$0xf] %vm938_vm1, %v10629_v14 }
  0x4d   : > { %1024 = vst.msk [vmem:[#allocation2 + $0x150] sm:$0xf] %vm938_vm1, %v10629_v14 }
  0x4e   : > { %1025 = vst.msk [vmem:[#allocation2 + $0x154] sm:$0xf] %vm938_vm1, %v10629_v14 }
  0x4f   : > { %1027 = vst.msk [vmem:[#allocation2 + $0x15c] sm:$0xf] %vm938_vm1, %v10629_v14 }
  0x50   : > { %1028 = vst.msk [vmem:[#allocation2 + $0x160] sm:$0xf] %vm938_vm1, %v10629_v14 }
  0x51   : > { %1030 = vst.msk [vmem:[#allocation2 + $0x168] sm:$0xf] %vm938_vm1, %v10629_v14 }
  0x52   : > { %1031 = vst.msk [vmem:[#allocation2 + $0x16c] sm:$0xf] %vm938_vm1, %v10629_v14 }
  0x53   : > { %9344 = vmatmul.msk.bf16.gmra.mxu0 %vm544_vm0, %v10023_v7  ;;  %9362 = vmatmul.msk.bf16.gmra.mxu1 %vm544_vm0, %v10041_v29  ;;  %1033 = vst.msk [vmem:[#allocation2 + $0x174] sm:$0xf] %vm938_vm1, %v10629_v14 }
  0x54   : > { %1034 = vst.msk [vmem:[#allocation2 + $0x178] sm:$0xf] %vm938_vm1, %v10629_v14 }
  0x55   : > { %1036 = vst.msk [vmem:[#allocation2 + $0x180] sm:$0xf] %vm938_vm1, %v10629_v14 }
  0x56   : > { %1037 = vst.msk [vmem:[#allocation2 + $0x184] sm:$0xf] %vm938_vm1, %v10629_v14 }
  0x57   : > { %1039 = vst.msk [vmem:[#allocation2 + $0x18c] sm:$0xf] %vm938_vm1, %v10629_v14 }
  0x58   : > { %1040 = vst.msk [vmem:[#allocation2 + $0x190] sm:$0xf] %vm938_vm1, %v10629_v14 }
  0x59   : > { %1042 = vst.msk [vmem:[#allocation2 + $0x198] sm:$0xf] %vm938_vm1, %v10629_v14 }
  0x5a   : > { %1043 = vst.msk [vmem:[#allocation2 + $0x19c] sm:$0xf] %vm938_vm1, %v10629_v14 }
  0x5b   : > { %1045 = vst.msk [vmem:[#allocation2 + $0x1a4] sm:$0xf] %vm938_vm1, %v10629_v14 }
  0x5c   : > { %1046 = vst.msk [vmem:[#allocation2 + $0x1a8] sm:$0xf] %vm938_vm1, %v10629_v14 }
  0x5d   : > { %945 = vst.msk [vmem:[#allocation2 + $0x14] sm:$0x1] %vm941_vm7, %v10629_v14 }
  0x5e   : > { %942 = vst.msk [vmem:[#allocation2 + $0x8] sm:$0x1] %vm941_vm7, %v10629_v14 }
  0x5f   : > { %948 = vst.msk [vmem:[#allocation2 + $0x20] sm:$0x1] %vm941_vm7, %v10629_v14 }
  0x60   : > { %951 = vst.msk [vmem:[#allocation2 + $0x2c] sm:$0x1] %vm941_vm7, %v10629_v14 }
  0x61   : > { %954 = vst.msk [vmem:[#allocation2 + $0x38] sm:$0x1] %vm941_vm7, %v10629_v14 }
  0x62   : > { %957 = vst.msk [vmem:[#allocation2 + $0x44] sm:$0x1] %vm941_vm7, %v10629_v14 }
  0x63   : > { %9345 = vmatmul.msk.bf16.gmra.mxu0 %vm544_vm0, %v10024_v9  ;;  %9363 = vmatmul.msk.bf16.gmra.mxu1 %vm544_vm0, %v10042_v46  ;;  %960 = vst.msk [vmem:[#allocation2 + $0x50] sm:$0x1] %vm941_vm7, %v10629_v14 }
  0x64   : > { %v1701_v50 = vld [vmem:[#allocation2 + $0x14] sm:$0x1]  ;;  %963 = vst.msk [vmem:[#allocation2 + $0x5c] sm:$0x1] %vm941_vm7, %v10629_v14 }
  0x65   : > { %966 = vst.msk [vmem:[#allocation2 + $0x68] sm:$0x1] %vm941_vm7, %v10629_v14 }
  0x66   : > { %969 = vst.msk [vmem:[#allocation2 + $0x74] sm:$0x1] %vm941_vm7, %v10629_v14 }
  0x67   : > { %972 = vst.msk [vmem:[#allocation2 + $0x80] sm:$0x1] %vm941_vm7, %v10629_v14 }
  0x68   : > { %975 = vst.msk [vmem:[#allocation2 + $0x8c] sm:$0x1] %vm941_vm7, %v10629_v14 }
  0x69   : > { %978 = vst.msk [vmem:[#allocation2 + $0x98] sm:$0x1] %vm941_vm7, %v10629_v14 }
  0x6a   : > { %981 = vst.msk [vmem:[#allocation2 + $0xa4] sm:$0x1] %vm941_vm7, %v10629_v14 }
  0x6b   : > { %984 = vst.msk [vmem:[#allocation2 + $0xb0] sm:$0x1] %vm941_vm7, %v10629_v14 }
  0x6c   : > { %987 = vst.msk [vmem:[#allocation2 + $0xbc] sm:$0x1] %vm941_vm7, %v10629_v14 }
  0x6d   : > { %990 = vst.msk [vmem:[#allocation2 + $0xc8] sm:$0x1] %vm941_vm7, %v10629_v14 }
  0x6e   : > { %993 = vst.msk [vmem:[#allocation2 + $0xd4] sm:$0x1] %vm941_vm7, %v10629_v14 }
  0x6f   : > { %996 = vst.msk [vmem:[#allocation2 + $0xe0] sm:$0x1] %vm941_vm7, %v10629_v14 }
  0x70   : > { %999 = vst.msk [vmem:[#allocation2 + $0xec] sm:$0x1] %vm941_vm7, %v10629_v14 }
  0x71   : > { %1002 = vst.msk [vmem:[#allocation2 + $0xf8] sm:$0x1] %vm941_vm7, %v10629_v14 }
  0x72   : > { %1005 = vst.msk [vmem:[#allocation2 + $0x104] sm:$0x1] %vm941_vm7, %v10629_v14 }
  0x73   : > { %9346 = vmatmul.msk.bf16.gmra.mxu0 %vm544_vm0, %v10025_v11  ;;  %1008 = vst.msk [vmem:[#allocation2 + $0x110] sm:$0x1] %vm941_vm7, %v10629_v14 }
  0x74   : > { %1011 = vst.msk [vmem:[#allocation2 + $0x11c] sm:$0x1] %vm941_vm7, %v10629_v14 }
  0x75   : > { %1014 = vst.msk [vmem:[#allocation2 + $0x128] sm:$0x1] %vm941_vm7, %v10629_v14 }
  0x76   : > { %1017 = vst.msk [vmem:[#allocation2 + $0x134] sm:$0x1] %vm941_vm7, %v10629_v14 }
  0x77   : > { %1020 = vst.msk [vmem:[#allocation2 + $0x140] sm:$0x1] %vm941_vm7, %v10629_v14 }
  0x78   : > { %1023 = vst.msk [vmem:[#allocation2 + $0x14c] sm:$0x1] %vm941_vm7, %v10629_v14 }
  0x79   : > { %1026 = vst.msk [vmem:[#allocation2 + $0x158] sm:$0x1] %vm941_vm7, %v10629_v14 }
  0x7a   : > { %1029 = vst.msk [vmem:[#allocation2 + $0x164] sm:$0x1] %vm941_vm7, %v10629_v14 }
  0x7b   : > { %1032 = vst.msk [vmem:[#allocation2 + $0x170] sm:$0x1] %vm941_vm7, %v10629_v14 }
  0x7c   : > { %1035 = vst.msk [vmem:[#allocation2 + $0x17c] sm:$0x1] %vm941_vm7, %v10629_v14 }
  0x7d   : > { %1038 = vst.msk [vmem:[#allocation2 + $0x188] sm:$0x1] %vm941_vm7, %v10629_v14 }
  0x7e   : > { %1041 = vst.msk [vmem:[#allocation2 + $0x194] sm:$0x1] %vm941_vm7, %v10629_v14 }
  0x7f   : > { %1044 = vst.msk [vmem:[#allocation2 + $0x1a0] sm:$0x1] %vm941_vm7, %v10629_v14 }
  0x80   : > { %1047 = vst.msk [vmem:[#allocation2 + $0x1ac] sm:$0x1] %vm941_vm7, %v10629_v14 }
  0x83   : > { %9347 = vmatmul.msk.bf16.gmra.mxu0 %vm544_vm0, %v10026_v13 }
  0x93   : > { %9348 = vmatmul.msk.bf16.gmra.mxu0 %vm544_vm0, %v10027_v15 }
  0xa0   : > { %v650_v18 = vpop.f32.mrf.mxu0 }
  0xa1   : > { %v651_v19 = vadd.f32 %v10813_v16, %v650_v18 }
  0xa3   : > { %v810_v20 = vmax.f32 %v651_v19, 0.0  ;;  %9349 = vmatmul.msk.bf16.gmra.mxu0 %vm544_vm0, %v10028_v17 }
  0xa5   : > { %v874_v21 = vpack.c.bf16 %v810_v20, %v810_v20  ;;  %v10043_v20 = vld [vmem:[%s10738_s8 + $0xb8] sm:$0xff] }
  0xa6   : > { %9364 = vmatmul.msk.bf16.gmra.mxu1 %vm544_vm0, %v10043_v20 }
  0xa7   : > { %v1052_v22 = vshrl.u32 %v874_v21, 16  ;;  %v1055_v24 = vshll.u32 %v874_v21, 16 }
  0xa8   : > { %v652_v30 = vpop.f32.mrf.mxu0 }
  0xa9   : > { %v1054_v23 = vrot.slane %v1052_v22, 7  ;;  %v653_v31 = vadd.f32 %v10813_v16, %v652_v30 }
  0xab   : > { %v1057_v27 = vor.u32 %v1055_v24, %v1054_v23  ;;  %v811_v32 = vmax.f32 %v653_v31, 0.0  ;;  %v1058_v41 = vrot.slane %v1054_v23, 4 }
  0xad   : > { %v1696_v28 = vsel %vm10845_vm3, %v1057_v27, %v1695_v26  ;;  %v875_v33 = vpack.c.bf16 %v811_v32, %v811_v32 }
  0xae   : > { %1697 = vst [vmem:[#allocation2 + $0xc] sm:$0xf] %v1696_v28 }
  0xaf   : > { %v1060_v34 = vshrl.u32 %v875_v33, 16  ;;  %v1063_v37 = vshll.u32 %v875_v33, 16 }
  0xb0   : > { %v655_v36 = vpop.f32.mrf.mxu0 }
  0xb1   : > { %v1062_v35 = vrot.slane %v1060_v34, 7  ;;  %v656_v54 = vadd.f32 %v10813_v16, %v655_v36  ;;  %v10031_v36 = vld [vmem:[%s10738_s8 + $0x58] sm:$0xff] }
  0xb3   : > { %v1065_v39 = vor.u32 %v1063_v37, %v1062_v35  ;;  %9350 = vmatmul.msk.bf16.gmra.mxu0 %vm544_vm0, %v10029_v38  ;;  %v1067_v45 = vrot.slane %v1062_v35, 4  ;;  %v812_v63 = vmax.f32 %v656_v54, 0.0 }
  0xb5   : > { %v1066_v42 = vsel %vm10918_vm6, %v1058_v41, %v1065_v39  ;;  %v3143_v44 = vld [vmem:[#allocation2 + $0xc] sm:$0xf]  ;;  %v1702_v51 = vsel %vm10945_vm8, %v1067_v45, %v1701_v50  ;;  %v876_v18 = vpack.c.bf16 %v812_v63, %v812_v63 }
  0xb6   : > { %1698 = vst.msk [vmem:[#allocation2 + $0x10] sm:$0xf] %vm938_vm1, %v1066_v42  ;;  %v3240_v48 = vshrl.u32 %v3143_v44, 16  ;;  %v3243_v49 = vshll.u32 %v3143_v44, 16  ;;  %v4007_v59 = vld [vmem:[#allocation2 + $0xc] sm:$0xe] }
  0xb7   : > { %1703 = vst [vmem:[#allocation2 + $0x14] sm:$0x1] %v1702_v51  ;;  %v9405_v2 = vrot.slane %v4007_v59, 9  ;;  %v1069_v34 = vshrl.u32 %v876_v18, 16  ;;  %v1072_v50 = vshll.u32 %v876_v18, 16 }
  0xb8   : > { %v657_v43 = vpop.f32.mrf.mxu0  ;;  %v3242_v57 = vrot.slane %v3240_v48, 4  ;;  %v3245_v58 = vrot.slane %v3243_v49, 5  ;;  %v1715_v18 = vld [vmem:[#allocation2 + $0x2c] sm:$0x1] }
  0xb9   : > { %v658_v60 = vadd.f32 %v10813_v16, %v657_v43  ;;  %v1071_v45 = vrot.slane %v1069_v34, 7 }
  0xba   : > { %v3246_v3 = vor.u32 %v3245_v58, %v3242_v57  ;;  %v1704_v57 = vld [vmem:[#allocation2 + $0x18] sm:$0xf] }
  0xbb   : > { %v813_v5 = vmax.f32 %v658_v60, 0.0  ;;  %v1074_v54 = vor.u32 %v1072_v50, %v1071_v45 }
  0xbc   : > { %v3247_v17 = vrot.slane %v3246_v3, 4  ;;  %v1708_v3 = vld [vmem:[#allocation2 + $0x20] sm:$0x1] }
  0xbd   : > { %v3144_v53 = vld [vmem:[#allocation2 + $0x10] sm:$0xf]  ;;  %v877_v22 = vpack.c.bf16 %v813_v5, %v813_v5  ;;  %v10044_v5 = vld [vmem:[%s10738_s8 + $0xc0] sm:$0xff] }
  0xbe   : > { %v3253_v56 = vshrl.u32 %v3144_v53, 16  ;;  %v3249_v61 = vshll.u32 %v3144_v53, 16  ;;  %v4137_v62 = vrot.slane %v3144_v53, 5  ;;  %v3207_v8 = vld [vmem:[#allocation2 + $0x14] sm:$0x1]  ;;  %9365 = vmatmul.msk.bf16.gmra.mxu1 %vm544_vm0, %v10044_v5 }
  0xbf   : > { %v3259_v12 = vshll.u32 %v3207_v8, 16  ;;  %v4140_v13 = vrot.slane %v3207_v8, 5  ;;  %v1077_v39 = vshrl.u32 %v877_v22, 16 }
  0xc0   : > { %v660_v52 = vpop.f32.mrf.mxu0  ;;  %v3255_v1 = vrot.slane %v3253_v56, 4  ;;  %v4139_v6 = vrot.slane %v4137_v62, 4  ;;  %v3251_v7 = vrot.slane %v3249_v61, 5  ;;  %v4138_v9 = vsel %vm10972_vm11, %v9405_v2, %v4137_v62 }
  0xc1   : > { %v661_v4 = vadd.f32 %v10813_v16, %v660_v52  ;;  %v6312_v24 = vunpack.c.l.b16 %v4138_v9  ;;  %v3261_v27 = vrot.slane %v3259_v12, 5  ;;  %v1079_v49 = vrot.slane %v1077_v39, 7 }
  0xc2   : > { %v3256_v21 = vor.u32 %v3255_v1, %v3251_v7  ;;  %v4141_v23 = vsel %vm10972_vm11, %v4139_v6, %v4140_v13  ;;  %v3252_v26 = vsel %vm10985_vm14, %v3247_v17, %v3251_v7  ;;  %v1080_v52 = vshll.u32 %v877_v22, 16  ;;  %v1711_v7 = vld [vmem:[#allocation2 + $0x24] sm:$0xf]  ;;  %v1718_v22 = vld [vmem:[#allocation2 + $0x30] sm:$0xf] }
  0xc3   : > { %9351 = vmatmul.msk.bf16.gmra.mxu0 %vm544_vm0, %v10030_v55  ;;  %v814_v19 = vmax.f32 %v661_v4, 0.0  ;;  %v6313_v28 = vunpack.c.l.b16 %v4141_v23  ;;  %v11015_v38 = vunpack.c.l.b16 %v3252_v26  ;;  %v1084_v61 = vrot.slane %v1079_v49, 4 }
  0xc4   : > { %v3257_v30 = vrot.slane %v3256_v21, 4  ;;  %v1082_v58 = vor.u32 %v1080_v52, %v1079_v49  ;;  %v1075_v2 = vrot.slane %v1071_v45, 4  ;;  %v1705_v6 = vsel %vm10845_vm3, %v1074_v54, %v1704_v57 }
  0xc5   : > { %v878_v31 = vpack.c.bf16 %v814_v19, %v814_v19  ;;  %v6376_v32 = vpack.c.b16 %v6313_v28, %v6312_v24  ;;  %1706 = vst [vmem:[#allocation2 + $0x18] sm:$0xf] %v1705_v6  ;;  %v10032_v24 = vld [vmem:[%s10738_s8 + $0x60] sm:$0xff] }
  0xc6   : > { %v3262_v33 = vsel %vm10985_vm14, %v3257_v30, %v3261_v27  ;;  %v1083_v12 = vsel %vm10918_vm6, %v1075_v2, %v1082_v58  ;;  %v10045_v2 = vld [vmem:[%s10738_s8 + $0xc8] sm:$0xff] }
  0xc7   : > { %v11013_v37 = vunpack.c.l.b16 %v3262_v33  ;;  %6408 = vrot.lane.b32.xlu0 %v6376_v32, %s10630_s14  ;;  %v1086_v44 = vshrl.u32 %v878_v31, 16  ;;  %v1089_v59 = vshll.u32 %v878_v31, 16  ;;  %1707 = vst.msk [vmem:[#allocation2 + $0x1c] sm:$0xf] %vm938_vm1, %v1083_v12  ;;  %v1722_v32 = vld [vmem:[#allocation2 + $0x38] sm:$0x1] }
  0xc8   : > { %v662_v10 = vpop.f32.mrf.mxu0  ;;  %v10046_v33 = vld [vmem:[%s10738_s8 + $0xd0] sm:$0xff] }
  0xc9   : > { %v663_v15 = vadd.f32 %v10813_v16, %v662_v10  ;;  %v6280_v43 = vpack.c.b16 %v11013_v37, %v11015_v38  ;;  %v1088_v53 = vrot.slane %v1086_v44, 7  ;;  %9367 = vmatmul.msk.bf16.vlgmr.msra.gmra.mxu2 %vm544_vm0, %v10046_v33 }
  0xcb   : > { %v815_v29 = vmax.f32 %v663_v15, 0.0  ;;  %v1091_v4 = vor.u32 %v1089_v59, %v1088_v53  ;;  %v1709_v15 = vsel %vm10945_vm8, %v1084_v61, %v1708_v3  ;;  %v1092_v17 = vrot.slane %v1088_v53, 4 }
  0xcc   : > { %1710 = vst [vmem:[#allocation2 + $0x20] sm:$0x1] %v1709_v15  ;;  %v4360_v44 = vld [vmem:[#allocation2 + $0x18] sm:$0xf] }
  0xcd   : > { %v879_v35 = vpack.c.bf16 %v815_v29, %v815_v29  ;;  %v1712_v21 = vsel %vm10845_vm3, %v1091_v4, %v1711_v7  ;;  %v4457_v50 = vshrl.u32 %v4360_v44, 16  ;;  %v4460_v52 = vshll.u32 %v4360_v44, 16 }
  0xce   : > { %1713 = vst [vmem:[#allocation2 + $0x24] sm:$0xf] %v1712_v21  ;;  %v11082_v49 = vld [vmem:[#allocation2 + $0x1c] sm:$0xf]  ;;  %9366 = vmatmul.msk.bf16.gmra.mxu1 %vm544_vm0, %v10045_v2 }
  0xcf   : > { %v1094_v46 = vshrl.u32 %v879_v35, 16  ;;  %v1097_v62 = vshll.u32 %v879_v35, 16  ;;  %v4466_v53 = vshll.u32 %v11082_v49, 16  ;;  %v4459_v54 = vrot.slane %v4457_v50, 4  ;;  %v11089_v61 = vld [vmem:[#allocation2 + $0x1c] sm:$0xf] }
  0xd0   : > { %v665_v41 = vpop.f32.mrf.mxu0  ;;  %v4462_v57 = vrot.slane %v4460_v52, 5 }
  0xd1   : > { %v666_v42 = vadd.f32 %v10813_v16, %v665_v41  ;;  %v1096_v55 = vrot.slane %v1094_v46, 7  ;;  %v10169_v46 = vld [vmem:[%s15122_s3 + $0x88] sm:$0xff]  ;;  %v4468_v58 = vrot.slane %v4466_v53, 5  ;;  %v11127_v53 = vpop.f32.mrf.mxu1 }
  0xd2   : > { %8022 = vmatpush.bf16.msrb.mxu0 %v10169_v46  ;;  %10378 = vmatpush.bf16.msra.mxu3 %v10169_v46  ;;  %v4463_v3 = vor.u32 %v4462_v57, %v4459_v54 }
  0xd3   : > { %v816_v48 = vmax.f32 %v666_v42, 0.0  ;;  %9352 = vmatmul.msk.bf16.gmra.mxu0 %vm544_vm0, %v10031_v36  ;;  %v1099_v8 = vor.u32 %v1097_v62, %v1096_v55  ;;  %v1101_v13 = vrot.slane %v1096_v55, 4  ;;  %v4470_v55 = vshrl.u32 %v11082_v49, 16  ;;  %v11096_v6 = vld [vmem:[#allocation2 + $0x20] sm:$0x1] }
  0xd4   : > { %v4464_v12 = vrot.slane %v4463_v3, 4 }
  0xd5   : > { %v880_v51 = vpack.c.bf16 %v816_v48, %v816_v48  ;;  %v1100_v14 = vsel %vm10918_vm6, %v1092_v17, %v1099_v8  ;;  %v1716_v26 = vsel %vm10945_vm8, %v1101_v13, %v1715_v18  ;;  %v10120_v48 = vld [vmem:[#allocation2 + $0x18] sm:$0xff]  ;;  %v4472_v62 = vrot.slane %v4470_v55, 4  ;;  %v4009_v18 = vld [vmem:[#allocation2 + $0x24] sm:$0xe] }
  0xd6   : > { %1714 = vst.msk [vmem:[#allocation2 + $0x28] sm:$0xf] %vm938_vm1, %v1100_v14  ;;  %6600 = vrot.lane.b32.xlu0 %v10120_v48, %s10631_s17  ;;  %v5354_v8 = vrot.slane %v11082_v49, 5 }
  0xd7   : > { %v1103_v56 = vshrl.u32 %v880_v51, 16  ;;  %v1106_v9 = vshll.u32 %v880_v51, 16  ;;  %1717 = vst [vmem:[#allocation2 + $0x2c] sm:$0x1] %v1716_v26  ;;  %v11084_v51 = vld [vmem:[#allocation2 + $0x20] sm:$0x1]  ;;  %v4473_v7 = vor.u32 %v4472_v62, %v4468_v58 }
  0xd8   : > { %v667_v60 = vpop.f32.mrf.mxu0 }
  0xd9   : > { %v1105_v63 = vrot.slane %v1103_v56, 7  ;;  %v668_v1 = vadd.f32 %v10813_v16, %v667_v60 }
  0xdb   : > { %v817_v10 = vmax.f32 %v668_v1, 0.0  ;;  %v1108_v19 = vor.u32 %v1106_v9, %v1105_v63  ;;  %v1109_v34 = vrot.slane %v1105_v63, 4  ;;  %v4476_v63 = vshll.u32 %v11084_v51, 16  ;;  %v4008_v1 = vld [vmem:[#allocation2 + $0x18] sm:$0xe] }
  0xdc   : > { %v1725_v9 = vld [vmem:[#allocation2 + $0x3c] sm:$0xf]  ;;  %v9406_v15 = vrot.slane %v4008_v1, 9 }
  0xdd   : > { %v881_v20 = vpack.c.bf16 %v817_v10, %v817_v10  ;;  %v1719_v28 = vsel %vm10845_vm3, %v1108_v19, %v1718_v22  ;;  %v10121_v60 = vld [vmem:[#allocation2 + $0x24] sm:$0xff]  ;;  %v4144_v10 = vrot.slane %v11089_v61, 5  ;;  %v4474_v19 = vrot.slane %v4473_v7, 4 }
  0xde   : > { %1720 = vst [vmem:[#allocation2 + $0x30] sm:$0xf] %v1719_v28  ;;  %6602 = vrot.lane.b32.xlu2 %v10121_v60, %s10631_s17  ;;  %v11101_v17 = vld [vmem:[#allocation2 + $0x28] sm:$0xf]  ;;  %v4147_v22 = vrot.slane %v11096_v6, 5 }
  0xdf   : > { %v1111_v23 = vshrl.u32 %v881_v20, 16  ;;  %v1114_v30 = vshll.u32 %v881_v20, 16  ;;  %v4478_v20 = vrot.slane %v4476_v63, 5  ;;  %v4146_v21 = vrot.slane %v4144_v10, 4  ;;  %v11104_v14 = vld [vmem:[#allocation2 + $0x2c] sm:$0x1] }
  0xe0   : > { %v670_v27 = vpop.f32.mrf.mxu0  ;;  %v4362_v28 = vld [vmem:[#allocation2 + $0x24] sm:$0xf]  ;;  %v4151_v33 = vrot.slane %v11101_v17, 5  ;;  %v4363_v44 = vld [vmem:[#allocation2 + $0x28] sm:$0xf] }
  0xe1   : > { %v1113_v29 = vrot.slane %v1111_v23, 7  ;;  %v671_v31 = vadd.f32 %v10813_v16, %v670_v27  ;;  %v4469_v23 = vsel %vm10985_vm14, %v4464_v12, %v4468_v58  ;;  %v4145_v27 = vsel %vm10972_vm11, %v9406_v15, %v4144_v10  ;;  %v11125_v48 = vld [vmem:[#allocation2 + $0x2c] sm:$0x1] }
  0xe2   : > { %v4153_v46 = vrot.slane %v4151_v33, 4  ;;  %v4481_v50 = vshrl.u32 %v4362_v28, 16  ;;  %v4484_v52 = vshll.u32 %v4362_v28, 16  ;;  %v4490_v62 = vshll.u32 %v4363_v44, 16 }
  0xe3   : > { %v1116_v35 = vor.u32 %v1114_v30, %v1113_v29  ;;  %v1118_v36 = vrot.slane %v1113_v29, 4  ;;  %v818_v39 = vmax.f32 %v671_v31, 0.0  ;;  %9353 = vmatmul.msk.bf16.gmra.mxu0 %vm544_vm0, %v10032_v24  ;;  %v10033_v29 = vld [vmem:[%s10738_s8 + $0x68] sm:$0xff]  ;;  %v4479_v30 = vsel %vm10985_vm14, %v4474_v19, %v4478_v20 }
  0xe4   : > { %v4148_v31 = vsel %vm10972_vm11, %v4146_v21, %v4147_v22  ;;  %v4486_v60 = vrot.slane %v4484_v52, 5  ;;  %v4494_v2 = vshrl.u32 %v4363_v44, 16  ;;  %v4500_v3 = vshll.u32 %v11125_v48, 16 }
  0xe5   : > { %v1117_v41 = vsel %vm10918_vm6, %v1109_v34, %v1116_v35  ;;  %v1723_v42 = vsel %vm10945_vm8, %v1118_v36, %v1722_v32  ;;  %v882_v45 = vpack.c.bf16 %v818_v39, %v818_v39  ;;  %v9407_v32 = vrot.slane %v4009_v18, 9  ;;  %v10047_v35 = vld [vmem:[%s10738_s8 + $0xd8] sm:$0xff]  ;;  %v4010_v12 = vld [vmem:[#allocation2 + $0x30] sm:$0xe] }
  0xe6   : > { %1721 = vst.msk [vmem:[#allocation2 + $0x34] sm:$0xf] %vm938_vm1, %v1117_v41  ;;  %v6664_v36 = vunpack.c.l.b16 %v4469_v23  ;;  %v6665_v39 = vunpack.c.l.b16 %v4479_v30  ;;  %v4154_v41 = vrot.slane %v11104_v14, 5  ;;  %v6315_v55 = vunpack.c.l.b16 %v4148_v31  ;;  %9368 = vmatmul.msk.bf16.gmra.mxu2 %vm544_vm0, %v10047_v35 }
  0xe7   : > { %1724 = vst [vmem:[#allocation2 + $0x38] sm:$0x1] %v1723_v42  ;;  %v1120_v59 = vshrl.u32 %v882_v45, 16  ;;  %v1123_v5 = vshll.u32 %v882_v45, 16  ;;  %v4152_v45 = vsel %vm10972_vm11, %v9407_v32, %v4151_v33  ;;  %v4496_v18 = vrot.slane %v4494_v2, 4 }
  0xe8   : > { %v672_v56 = vpop.f32.mrf.mxu0  ;;  %v6728_v54 = vpack.c.b16 %v6665_v39, %v6664_v36  ;;  %v6316_v57 = vunpack.c.l.b16 %v4152_v45  ;;  %v4502_v30 = vrot.slane %v4500_v3, 5  ;;  %v9408_v31 = vrot.slane %v4010_v12, 9  ;;  %v1729_v32 = vld [vmem:[#allocation2 + $0x44] sm:$0x1] }
  0xe9   : > { %v11093_v4 = vrot.slane %v1120_v59, 7  ;;  %v673_v42 = vadd.f32 %v10813_v16, %v672_v56  ;;  %v4155_v56 = vsel %vm10972_vm11, %v4153_v46, %v4154_v41  ;;  %v4483_v59 = vrot.slane %v4481_v50, 4 }
  0xea   : > { %6760 = vrot.lane.b32.xlu1 %v6728_v54, %s10632_s18  ;;  %v6317_v63 = vunpack.c.l.b16 %v4155_v56  ;;  %v4364_v54 = vld [vmem:[#allocation2 + $0x30] sm:$0xf]  ;;  %v741_v3 = vadd.f32 %v10813_v16, %v11127_v53 }
  0xeb   : > { %v1125_v13 = vor.u32 %v1123_v5, %v11093_v4  ;;  %v1126_v24 = vrot.slane %v11093_v4, 4  ;;  %v819_v58 = vmax.f32 %v673_v42, 0.0  ;;  %v6314_v5 = vunpack.c.l.b16 %v4145_v27 }
  0xec   : > { %v4487_v7 = vor.u32 %v4486_v60, %v4483_v59  ;;  %v1732_v59 = vld [vmem:[#allocation2 + $0x48] sm:$0xf] }
  0xed   : > { %v1726_v26 = vsel %vm10845_vm3, %v1125_v13, %v1725_v9  ;;  %v883_v1 = vpack.c.bf16 %v819_v58, %v819_v58  ;;  %v4492_v9 = vrot.slane %v4490_v62, 5  ;;  %v6378_v13 = vpack.c.b16 %v6317_v63, %v6316_v57  ;;  %v11136_v19 = vld [vmem:[#allocation2 + $0x34] sm:$0xf] }
  0xee   : > { %1727 = vst [vmem:[#allocation2 + $0x3c] sm:$0xf] %v1726_v26  ;;  %v11138_v20 = vld [vmem:[#allocation2 + $0x38] sm:$0x1]  ;;  %v6377_v21 = vpack.c.b16 %v6315_v55, %v6314_v5  ;;  %v4488_v23 = vrot.slane %v4487_v7, 4  ;;  %v4158_v35 = vrot.slane %v11136_v19, 5  ;;  %v742_v55 = vpop.f32.mrf.mxu1 }
  0xef   : > { %v1128_v15 = vshrl.u32 %v883_v1, 16  ;;  %v1131_v22 = vshll.u32 %v883_v1, 16  ;;  %6412 = vrot.lane.b32.xlu0 %v6378_v13, %s10630_s14  ;;  %v4161_v36 = vrot.slane %v11138_v20, 5  ;;  %v4505_v5 = vshrl.u32 %v4364_v54, 16 }
  0xf0   : > { %v675_v34 = vpop.f32.mrf.mxu0  ;;  %v4493_v33 = vsel %vm10985_vm14, %v4488_v23, %v4492_v9  ;;  %v4159_v50 = vsel %vm10972_vm11, %v9408_v31, %v4158_v35  ;;  %v4160_v52 = vrot.slane %v4158_v35, 4  ;;  %v4508_v7 = vshll.u32 %v4364_v54, 16  ;;  %v11166_v23 = vld [vmem:[#allocation2 + $0x38] sm:$0x1] }
  0xf1   : > { %v676_v10 = vadd.f32 %v10813_v16, %v675_v34  ;;  %v1130_v27 = vrot.slane %v1128_v15, 7  ;;  %v6666_v44 = vunpack.c.l.b16 %v4493_v33  ;;  %v6318_v60 = vunpack.c.l.b16 %v4159_v50  ;;  %v10167_v31 = vld [vmem:[%s15122_s3 + $0x78] sm:$0xff] }
  0xf2   : > { %6410 = vrot.lane.b32.xlu1 %v6377_v21, %s10630_s14  ;;  %v4162_v4 = vsel %vm10972_vm11, %v4160_v52, %v4161_v36  ;;  %v11177_v33 = vrot.slane %v5354_v8, 4  ;;  %7847 = vmatpush.bf16.msrb.mxu2 %v10167_v31 }
  0xf3   : > { %9354 = vmatmul.msk.bf16.gmra.mxu0 %vm544_vm0, %v10033_v29  ;;  %v820_v26 = vmax.f32 %v676_v10, 0.0  ;;  %v4497_v29 = vor.u32 %v4496_v18, %v4492_v9  ;;  %v1133_v39 = vor.u32 %v1131_v22, %v1130_v27  ;;  %v1135_v41 = vrot.slane %v1130_v27, 4  ;;  %v10034_v9 = vld [vmem:[%s10738_s8 + $0x70] sm:$0xff] }
  0xf4   : > { %v6319_v2 = vunpack.c.l.b16 %v4162_v4  ;;  %v10122_v18 = vld [vmem:[#allocation2 + $0x30] sm:$0xff]  ;;  %v846_v22 = vmax.f32 %v741_v3, 0.0 }
  0xf5   : > { %v884_v34 = vpack.c.bf16 %v820_v26, %v820_v26  ;;  %v4498_v42 = vrot.slane %v4497_v29, 4  ;;  %v1134_v57 = vsel %vm10918_vm6, %v1126_v24, %v1133_v39  ;;  %v1730_v58 = vsel %vm10945_vm8, %v1135_v41, %v1729_v32  ;;  %v4365_v24 = vld [vmem:[#allocation2 + $0x34] sm:$0xf]  ;;  %v10048_v32 = vld [vmem:[%s10738_s8 + $0xe0] sm:$0xff] }
  0xf6   : > { %1728 = vst.msk [vmem:[#allocation2 + $0x40] sm:$0xf] %vm938_vm1, %v1134_v57  ;;  %v6379_v21 = vpack.c.b16 %v6319_v2, %v6318_v60  ;;  %v4507_v26 = vrot.slane %v4505_v5, 4  ;;  %v4514_v29 = vshll.u32 %v4365_v24, 16  ;;  %v910_v35 = vpack.c.bf16 %v846_v22, %v846_v22  ;;  %9369 = vmatmul.msk.bf16.gmra.mxu2 %vm544_vm0, %v10048_v32 }
  0xf7   : > { %v1137_v45 = vshrl.u32 %v884_v34, 16  ;;  %v1140_v46 = vshll.u32 %v884_v34, 16  ;;  %v4503_v56 = vsel %vm10985_vm14, %v4498_v42, %v4502_v30  ;;  %1731 = vst [vmem:[#allocation2 + $0x44] sm:$0x1] %v1730_v58  ;;  %v4518_v30 = vshrl.u32 %v4365_v24, 16 }
  0xf8   : > { %v677_v28 = vpop.f32.mrf.mxu0  ;;  %v6667_v62 = vunpack.c.l.b16 %v4503_v56  ;;  %v5357_v34 = vrot.slane %v11084_v51, 5  ;;  %6414 = vrot.lane.b32.xlu0 %v6379_v21, %s10630_s14  ;;  %v4516_v41 = vrot.slane %v4514_v29, 5  ;;  %v1361_v50 = vshll.u32 %v910_v35, 16 }
  0xf9   : > { %v11157_v63 = vrot.slane %v1137_v45, 7  ;;  %v678_v1 = vadd.f32 %v10813_v16, %v677_v28  ;;  %v4510_v28 = vrot.slane %v4508_v7, 5  ;;  %v4520_v42 = vrot.slane %v4518_v30, 4 }
  0xfa   : > { %v6729_v10 = vpack.c.b16 %v6667_v62, %v6666_v44  ;;  %v4524_v44 = vshll.u32 %v11166_v23, 16  ;;  %6604 = vrot.lane.b32.xlu1 %v10122_v18, %s10631_s17  ;;  %v743_v56 = vadd.f32 %v10813_v16, %v742_v55  ;;  %v1736_v62 = vld [vmem:[#allocation2 + $0x50] sm:$0x1] }
  0xfb   : > { %v1142_v12 = vor.u32 %v1140_v46, %v11157_v63  ;;  %v821_v13 = vmax.f32 %v678_v1, 0.0  ;;  %v4511_v36 = vor.u32 %v4510_v28, %v4507_v26  ;;  %v1358_v46 = vshrl.u32 %v910_v35, 16  ;;  %v1823_v1 = vld [vmem:[#allocation2 + $0xfc] sm:$0xf] }
  0xfc   : > { %6762 = vrot.lane.b32.xlu2 %v6729_v10, %s10632_s18  ;;  %v4521_v57 = vor.u32 %v4520_v42, %v4516_v41  ;;  %v1143_v60 = vrot.slane %v11157_v63, 4  ;;  %v4526_v7 = vrot.slane %v4524_v44, 5  ;;  %v847_v18 = vmax.f32 %v743_v56, 0.0  ;;  %v4366_v42 = vld [vmem:[#allocation2 + $0x3c] sm:$0xf] }
  0xfd   : > { %v1733_v53 = vsel %vm10845_vm3, %v1142_v12, %v1732_v59  ;;  %v885_v27 = vpack.c.bf16 %v821_v13, %v821_v13  ;;  %v4512_v52 = vrot.slane %v4511_v36, 4  ;;  %v745_v59 = vpop.f32.mrf.mxu1  ;;  %v11188_v4 = vrot.slane %v1358_v46, 7  ;;  %v11193_v63 = vld [vmem:[#allocation2 + $0x40] sm:$0xf] }
  0xfe   : > { %1734 = vst [vmem:[#allocation2 + $0x48] sm:$0xf] %v1733_v53  ;;  %v4522_v5 = vrot.slane %v4521_v57, 4  ;;  %v11202_v53 = vld [vmem:[#allocation2 + $0x44] sm:$0x1]  ;;  %v911_v32 = vpack.c.bf16 %v847_v18, %v847_v18  ;;  %v4165_v36 = vrot.slane %v11193_v63, 5 }
  0xff   : > { %v1145_v39 = vshrl.u32 %v885_v27, 16  ;;  %v1148_v45 = vshll.u32 %v885_v27, 16  ;;  %v4517_v24 = vsel %vm10985_vm14, %v4512_v52, %v4516_v41  ;;  %v1363_v12 = vor.u32 %v1361_v50, %v11188_v4  ;;  %v10166_v27 = vld [vmem:[%s15122_s3 + $0x70] sm:$0xff] }
 0x100   : > { %v680_v15 = vpop.f32.mrf.mxu0  ;;  %v6668_v13 = vunpack.c.l.b16 %v4517_v24  ;;  %v1364_v26 = vrot.slane %v11188_v4, 4  ;;  %v4527_v28 = vsel %vm10985_vm14, %v4522_v5, %v4526_v7  ;;  %v746_v41 = vadd.f32 %v10813_v16, %v745_v59  ;;  %7848 = vmatpush.bf16.msrb.mxu2 %v10166_v27  ;;  %v1739_v4 = vld [vmem:[#allocation2 + $0x54] sm:$0xf] }
 0x101   : > { %v1147_v54 = vrot.slane %v1145_v39, 7  ;;  %v681_v58 = vadd.f32 %v10813_v16, %v680_v15  ;;  %v10123_v15 = vld [vmem:[#allocation2 + $0x3c] sm:$0xff]  ;;  %v1824_v29 = vsel %vm10845_vm3, %v1363_v12, %v1823_v1  ;;  %v6669_v30 = vunpack.c.l.b16 %v4527_v28  ;;  %v1827_v1 = vld [vmem:[#allocation2 + $0x104] sm:$0x1] }
 0x102   : > { %1825 = vst [vmem:[#allocation2 + $0xfc] sm:$0xf] %v1824_v29  ;;  %6606 = vrot.lane.b32.xlu1 %v10123_v15, %s10631_s17  ;;  %v1366_v46 = vshrl.u32 %v911_v32, 16  ;;  %v4168_v50 = vrot.slane %v11202_v53, 5  ;;  %v1369_v52 = vshll.u32 %v911_v32, 16  ;;  %v4167_v57 = vrot.slane %v4165_v36, 4 }
 0x103   : > { %9355 = vmatmul.msk.bf16.gmra.mxu0 %vm544_vm0, %v10034_v9  ;;  %v1150_v2 = vor.u32 %v1148_v45, %v1147_v54  ;;  %v1152_v3 = vrot.slane %v1147_v54, 4  ;;  %v4011_v9 = vld [vmem:[#allocation2 + $0x3c] sm:$0xe]  ;;  %v822_v55 = vmax.f32 %v681_v58, 0.0  ;;  %v6730_v44 = vpack.c.b16 %v6669_v30, %v6668_v13  ;;  %v4367_v28 = vld [vmem:[#allocation2 + $0x40] sm:$0xf] }
 0x104   : > { %v9409_v35 = vrot.slane %v4011_v9, 9  ;;  %v1368_v59 = vrot.slane %v1366_v46, 7  ;;  %v4169_v24 = vsel %vm10972_vm11, %v4167_v57, %v4168_v50  ;;  %v4529_v5 = vshrl.u32 %v4366_v42, 16  ;;  %v1743_v32 = vld [vmem:[#allocation2 + $0x5c] sm:$0x1] }
 0x105   : > { %v1151_v21 = vsel %vm10918_vm6, %v1143_v60, %v1150_v2  ;;  %v1737_v22 = vsel %vm10945_vm8, %v1152_v3, %v1736_v62  ;;  %v886_v31 = vpack.c.bf16 %v822_v55, %v822_v55  ;;  %6764 = vrot.lane.b32.xlu2 %v6730_v44, %s10632_s18  ;;  %v848_v60 = vmax.f32 %v746_v41, 0.0  ;;  %v10035_v62 = vld [vmem:[%s10738_s8 + $0x78] sm:$0xff]  ;;  %v747_v9 = vpop.f32.mrf.mxu1 }
 0x106   : > { %1735 = vst.msk [vmem:[#allocation2 + $0x4c] sm:$0xf] %vm938_vm1, %v1151_v21  ;;  %v4166_v54 = vsel %vm10972_vm11, %v9409_v35, %v4165_v36  ;;  %v1371_v12 = vor.u32 %v1369_v52, %v1368_v59  ;;  %v1373_v13 = vrot.slane %v1368_v59, 4  ;;  %v4532_v55 = vshll.u32 %v4366_v42, 16  ;;  %v4427_v35 = vld [vmem:[#allocation2 + $0x44] sm:$0x1] }
 0x107   : > { %1738 = vst [vmem:[#allocation2 + $0x50] sm:$0x1] %v1737_v22  ;;  %v1154_v45 = vshrl.u32 %v886_v31, 16  ;;  %v1157_v56 = vshll.u32 %v886_v31, 16  ;;  %v6320_v2 = vunpack.c.l.b16 %v4166_v54  ;;  %v6321_v15 = vunpack.c.l.b16 %v4169_v24  ;;  %v1830_v59 = vld [vmem:[#allocation2 + $0x108] sm:$0xf] }
 0x108   : > { %v682_v10 = vpop.f32.mrf.mxu0  ;;  %v912_v22 = vpack.c.bf16 %v848_v60, %v848_v60  ;;  %v1372_v30 = vsel %vm10918_vm6, %v1364_v26, %v1371_v12  ;;  %v1828_v31 = vsel %vm10945_vm8, %v1373_v13, %v1827_v1  ;;  %v4531_v36 = vrot.slane %v4529_v5, 4 }
 0x109   : > { %v683_v39 = vadd.f32 %v10813_v16, %v682_v10  ;;  %v1156_v16 = vrot.slane %v1154_v45, 7  ;;  %v10049_v45 = vld [vmem:[%s10738_s8 + $0xe8] sm:$0xff]  ;;  %1826 = vst.msk [vmem:[#allocation2 + $0x100] sm:$0xf] %vm938_vm1, %v1372_v30  ;;  %v4534_v50 = vrot.slane %v4532_v55, 5  ;;  %v4538_v52 = vshll.u32 %v4367_v28, 16 }
 0x10a   : > { %v1375_v42 = vshrl.u32 %v912_v22, 16  ;;  %v1378_v44 = vshll.u32 %v912_v22, 16  ;;  %v4542_v26 = vshrl.u32 %v4367_v28, 16  ;;  %1829 = vst [vmem:[#allocation2 + $0x104] sm:$0x1] %v1828_v31  ;;  %9370 = vmatmul.msk.bf16.gmra.mxu2 %vm544_vm0, %v10049_v45  ;;  %v3277_v1 = vshrl.u32 %v11089_v61, 16 }
 0x10b   : > { %v823_v58 = vmax.f32 %v683_v39, 0.0  ;;  %v1159_v10 = vor.u32 %v1157_v56, %v1156_v16  ;;  %v6380_v39 = vpack.c.b16 %v6321_v15, %v6320_v2  ;;  %v1160_v46 = vrot.slane %v1156_v16, 4  ;;  %v11245_v55 = vld [vmem:[%s15121_s2] ss:$0 sm:$0xff]  ;;  %v10165_v22 = vld [vmem:[%s15122_s3 + $0x68] sm:$0xff] }
 0x10c   : > { %v4548_v56 = vshll.u32 %v4427_v35, 16  ;;  %v4535_v60 = vor.u32 %v4534_v50, %v4531_v36  ;;  %v4540_v16 = vrot.slane %v4538_v52, 5  ;;  %7849 = vmatpush.bf16.msrb.mxu2 %v10165_v22  ;;  %v1834_v22 = vld [vmem:[#allocation2 + $0x110] sm:$0x1]  ;;  %v3355_v51 = vshll.u32 %v11202_v53, 16 }
 0x10d   : > { %v887_v3 = vpack.c.bf16 %v823_v58, %v823_v58  ;;  %v10124_v27 = vld [vmem:[#allocation2 + $0x48] sm:$0xff]  ;;  %v1740_v29 = vsel %vm10845_vm3, %v1159_v10, %v1739_v4  ;;  %6416 = vrot.lane.b32.xlu0 %v6380_v39, %s10630_s14  ;;  %v11232_v58 = vrot.slane %v1375_v42, 7  ;;  %v750_v31 = vpop.f32.mrf.mxu1  ;;  %v1774_v61 = vld [vmem:[#allocation2 + $0x90] sm:$0xf] }
 0x10e   : > { %1741 = vst [vmem:[#allocation2 + $0x54] sm:$0xf] %v1740_v29  ;;  %6608 = vrot.lane.b32.xlu1 %v10124_v27, %s10631_s17  ;;  %v4012_v4 = vld [vmem:[#allocation2 + $0x48] sm:$0xe]  ;;  %v3154_v5 = vld [vmem:[#allocation2 + $0x4c] sm:$0xf]  ;;  %v751_v50 = vadd.f32 %v11245_v55, %v750_v31 }
 0x10f   : > { %v1162_v18 = vshrl.u32 %v887_v3, 16  ;;  %v1165_v21 = vshll.u32 %v887_v3, 16  ;;  %v1380_v3 = vor.u32 %v1378_v44, %v11232_v58  ;;  %v4536_v12 = vrot.slane %v4535_v60, 4  ;;  %v2792_v53 = vld [vmem:[#allocation2 + $0x30] sm:$0xe] }
 0x110   : > { %v685_v7 = vpop.f32.mrf.mxu0  ;;  %v1381_v28 = vrot.slane %v11232_v58, 4  ;;  %v4550_v29 = vrot.slane %v4548_v56, 5  ;;  %v9410_v30 = vrot.slane %v4012_v4, 9  ;;  %v4172_v39 = vrot.slane %v3154_v5, 5  ;;  %v4368_v58 = vld [vmem:[#allocation2 + $0x48] sm:$0xf] }
 0x111   : > { %v1164_v41 = vrot.slane %v1162_v18, 7  ;;  %v686_v15 = vadd.f32 %v11245_v55, %v685_v7  ;;  %v748_v18 = vadd.f32 %v11245_v55, %v747_v9  ;;  %v1831_v27 = vsel %vm10845_vm3, %v1380_v3, %v1830_v59 }
 0x112   : > { %1832 = vst [vmem:[#allocation2 + $0x108] sm:$0xf] %v1831_v27  ;;  %v4541_v7 = vsel %vm10985_vm14, %v4536_v12, %v4540_v16  ;;  %v4556_v31 = vshll.u32 %v4368_v58, 16 }
 0x113   : > { %9356 = vmatmul.msk.bf16.gmra.mxu0 %vm544_vm0, %v10035_v62  ;;  %v1167_v54 = vor.u32 %v1165_v21, %v1164_v41  ;;  %v1169_v57 = vrot.slane %v1164_v41, 4  ;;  %v4544_v62 = vrot.slane %v4542_v26, 4  ;;  %v3212_v21 = vld [vmem:[#allocation2 + $0x50] sm:$0x1]  ;;  %v824_v9 = vmax.f32 %v686_v15, 0.0 }
 0x114   : > { %v849_v35 = vmax.f32 %v748_v18, 0.0  ;;  %v6670_v36 = vunpack.c.l.b16 %v4541_v7  ;;  %v4175_v41 = vrot.slane %v3212_v21, 5  ;;  %v4173_v26 = vsel %vm10972_vm11, %v9410_v30, %v4172_v39 }
 0x115   : > { %v1168_v24 = vsel %vm10918_vm6, %v1160_v46, %v1167_v54  ;;  %v1744_v2 = vsel %vm10945_vm8, %v1169_v57, %v1743_v32  ;;  %v4545_v13 = vor.u32 %v4544_v62, %v4540_v16  ;;  %v888_v45 = vpack.c.bf16 %v824_v9, %v824_v9  ;;  %v10036_v62 = vld [vmem:[%s10738_s8 + $0x80] sm:$0xff] }
 0x116   : > { %1742 = vst.msk [vmem:[#allocation2 + $0x58] sm:$0xf] %vm938_vm1, %v1168_v24  ;;  %v913_v46 = vpack.c.bf16 %v849_v35, %v849_v35  ;;  %v4174_v54 = vrot.slane %v4172_v39, 4  ;;  %v850_v21 = vmax.f32 %v751_v50, 0.0  ;;  %v4553_v30 = vshrl.u32 %v4368_v58, 16  ;;  %v10050_v58 = vld [vmem:[%s10738_s8 + $0xf0] sm:$0xff] }
 0x117   : > { %1745 = vst [vmem:[#allocation2 + $0x5c] sm:$0x1] %v1744_v2  ;;  %v4546_v32 = vrot.slane %v4545_v13, 4  ;;  %v1171_v56 = vshrl.u32 %v888_v45, 16  ;;  %v1174_v59 = vshll.u32 %v888_v45, 16  ;;  %v6322_v2 = vunpack.c.l.b16 %v4173_v26 }
 0x118   : > { %v687_v10 = vpop.f32.mrf.mxu0  ;;  %v1383_v60 = vshrl.u32 %v913_v46, 16  ;;  %v1386_v16 = vshll.u32 %v913_v46, 16  ;;  %v4176_v24 = vsel %vm10972_vm11, %v4174_v54, %v4175_v41  ;;  %v1746_v13 = vld [vmem:[#allocation2 + $0x60] sm:$0xf]  ;;  %v914_v41 = vpack.c.bf16 %v850_v21, %v850_v21  ;;  %v752_v46 = vpop.f32.mrf.mxu1  ;;  %v1750_v54 = vld [vmem:[#allocation2 + $0x68] sm:$0x1] }
 0x119   : > { %v688_v42 = vadd.f32 %v11245_v55, %v687_v10  ;;  %v4551_v44 = vsel %vm10985_vm14, %v4546_v32, %v4550_v29  ;;  %v1173_v12 = vrot.slane %v1171_v56, 7  ;;  %v6323_v18 = vunpack.c.l.b16 %v4176_v24 }
 0x11a   : > { %v6671_v52 = vunpack.c.l.b16 %v4551_v44  ;;  %v1385_v15 = vrot.slane %v1383_v60, 7  ;;  %v4428_v44 = vld [vmem:[#allocation2 + $0x50] sm:$0x1]  ;;  %v4555_v45 = vrot.slane %v4553_v30, 4  ;;  %v1392_v60 = vshrl.u32 %v914_v41, 16  ;;  %9371 = vmatmul.msk.bf16.gmra.mxu2 %vm544_vm0, %v10050_v58 }
 0x11b   : > { %v825_v57 = vmax.f32 %v688_v42, 0.0  ;;  %v1176_v7 = vor.u32 %v1174_v59, %v1173_v12  ;;  %v1177_v32 = vrot.slane %v1173_v12, 4  ;;  %v4369_v42 = vld [vmem:[#allocation2 + $0x4c] sm:$0xf]  ;;  %v3301_v21 = vshrl.u32 %v11101_v17, 16 }
 0x11c   : > { %v6731_v4 = vpack.c.b16 %v6671_v52, %v6670_v36  ;;  %v1388_v9 = vor.u32 %v1386_v16, %v1385_v15  ;;  %v1390_v35 = vrot.slane %v1385_v15, 4  ;;  %v6381_v36 = vpack.c.b16 %v6323_v18, %v6322_v2  ;;  %v1837_v15 = vld [vmem:[#allocation2 + $0x114] sm:$0xf] }
 0x11d   : > { %v889_v3 = vpack.c.bf16 %v825_v57, %v825_v57  ;;  %v10125_v10 = vld [vmem:[#allocation2 + $0x54] sm:$0xff]  ;;  %v1747_v50 = vsel %vm10845_vm3, %v1176_v7, %v1746_v13  ;;  %v4558_v57 = vrot.slane %v4556_v31, 5  ;;  %v1395_v16 = vshll.u32 %v914_v41, 16 }
 0x11e   : > { %6766 = vrot.lane.b32.xlu2 %v6731_v4, %s10632_s18  ;;  %6610 = vrot.lane.b32.xlu1 %v10125_v10, %s10631_s17  ;;  %v1389_v52 = vsel %vm10918_vm6, %v1381_v28, %v1388_v9  ;;  %v1835_v26 = vsel %vm10945_vm8, %v1390_v35, %v1834_v22  ;;  %1748 = vst [vmem:[#allocation2 + $0x60] sm:$0xf] %v1747_v50  ;;  %v4562_v4 = vshll.u32 %v4369_v42, 16  ;;  %v4566_v24 = vshrl.u32 %v4369_v42, 16  ;;  %v10164_v28 = vld [vmem:[%s15122_s3 + $0x60] sm:$0xff] }
 0x11f   : > { %v1179_v27 = vshrl.u32 %v889_v3, 16  ;;  %v1182_v29 = vshll.u32 %v889_v3, 16  ;;  %6418 = vrot.lane.b32.xlu0 %v6381_v36, %s10630_s14  ;;  %1833 = vst.msk [vmem:[#allocation2 + $0x10c] sm:$0xf] %vm938_vm1, %v1389_v52  ;;  %v4572_v2 = vshll.u32 %v4428_v44, 16  ;;  %v3283_v3 = vshll.u32 %v11096_v6, 16  ;;  %7850 = vmatpush.bf16.msrb.mxu2 %v10164_v28 }
 0x120   : > { %v690_v5 = vpop.f32.mrf.mxu0  ;;  %1836 = vst [vmem:[#allocation2 + $0x110] sm:$0x1] %v1835_v26  ;;  %v11287_v13 = vrot.slane %v1392_v60, 7  ;;  %v753_v7 = vadd.f32 %v11245_v55, %v752_v46  ;;  %v4013_v9 = vld [vmem:[#allocation2 + $0x54] sm:$0xe]  ;;  %v3307_v35 = vshll.u32 %v11104_v14, 16 }
 0x121   : > { %v1181_v39 = vrot.slane %v1179_v27, 7  ;;  %v4564_v27 = vrot.slane %v4562_v4, 5  ;;  %v691_v31 = vadd.f32 %v11245_v55, %v690_v5  ;;  %v4574_v41 = vrot.slane %v4572_v2, 5  ;;  %v3213_v42 = vld [vmem:[#allocation2 + $0x5c] sm:$0x1]  ;;  %v10037_v28 = vld [vmem:[%s10738_s8 + $0x88] sm:$0xff] }
 0x122   : > { %v1397_v30 = vor.u32 %v1395_v16, %v11287_v13  ;;  %v1398_v44 = vrot.slane %v11287_v13, 4  ;;  %v851_v52 = vmax.f32 %v753_v7, 0.0  ;;  %v4370_v5 = vld [vmem:[#allocation2 + $0x54] sm:$0xf]  ;;  %v755_v16 = vpop.f32.mrf.mxu1  ;;  %v3147_v6 = vld [vmem:[#allocation2 + $0x24] sm:$0xf] }
 0x123   : > { %9357 = vmatmul.msk.bf16.gmra.mxu0 %vm544_vm0, %v10036_v62  ;;  %v1184_v56 = vor.u32 %v1182_v29, %v1181_v39  ;;  %v1186_v59 = vrot.slane %v1181_v39, 4  ;;  %v4559_v62 = vor.u32 %v4558_v57, %v4555_v45  ;;  %v4568_v29 = vrot.slane %v4566_v24, 4 }
 0x124   : > { %v1838_v45 = vsel %vm10845_vm3, %v1397_v30, %v1837_v15  ;;  %v826_v50 = vmax.f32 %v691_v31, 0.0  ;;  %v756_v2 = vadd.f32 %v11245_v55, %v755_v16  ;;  %v4577_v15 = vshrl.u32 %v4370_v5, 16 }
 0x125   : > { %v1185_v10 = vsel %vm10918_vm6, %v1177_v32, %v1184_v56  ;;  %v1751_v12 = vsel %vm10945_vm8, %v1186_v59, %v1750_v54  ;;  %v4560_v22 = vrot.slane %v4559_v62, 4  ;;  %v3156_v32 = vld [vmem:[#allocation2 + $0x58] sm:$0xf]  ;;  %v4569_v39 = vor.u32 %v4568_v29, %v4564_v27  ;;  %1839 = vst [vmem:[#allocation2 + $0x114] sm:$0xf] %v1838_v45 }
 0x126   : > { %1749 = vst.msk [vmem:[#allocation2 + $0x64] sm:$0xf] %vm938_vm1, %v1185_v10  ;;  %v9411_v54 = vrot.slane %v4013_v9, 9  ;;  %v4179_v57 = vrot.slane %v3156_v32, 5  ;;  %v890_v58 = vpack.c.bf16 %v826_v50, %v826_v50  ;;  %v915_v56 = vpack.c.bf16 %v851_v52, %v851_v52 }
 0x127   : > { %1752 = vst [vmem:[#allocation2 + $0x68] sm:$0x1] %v1751_v12  ;;  %v4565_v36 = vsel %vm10985_vm14, %v4560_v22, %v4564_v27  ;;  %v4570_v46 = vrot.slane %v4569_v39, 4  ;;  %v4182_v59 = vrot.slane %v3213_v42, 5  ;;  %v1753_v39 = vld [vmem:[#allocation2 + $0x6c] sm:$0xf] }
 0x128   : > { %v692_v18 = vpop.f32.mrf.mxu0  ;;  %v6672_v26 = vunpack.c.l.b16 %v4565_v36  ;;  %v4180_v4 = vsel %vm10972_vm11, %v9411_v54, %v4179_v57  ;;  %v4181_v24 = vrot.slane %v4179_v57, 4  ;;  %v1188_v12 = vshrl.u32 %v890_v58, 16 }
 0x129   : > { %v693_v60 = vadd.f32 %v11245_v55, %v692_v18  ;;  %v4575_v62 = vsel %vm10985_vm14, %v4570_v46, %v4574_v41  ;;  %v1400_v13 = vshrl.u32 %v915_v56, 16  ;;  %v1191_v27 = vshll.u32 %v890_v58, 16  ;;  %v1841_v41 = vld [vmem:[#allocation2 + $0x11c] sm:$0x1] }
 0x12a   : > { %v6673_v10 = vunpack.c.l.b16 %v4575_v62  ;;  %v1403_v29 = vshll.u32 %v915_v56, 16  ;;  %v4183_v18 = vsel %vm10972_vm11, %v4181_v24, %v4182_v59  ;;  %v1190_v7 = vrot.slane %v1188_v12, 7  ;;  %v4429_v62 = vld [vmem:[#allocation2 + $0x5c] sm:$0x1] }
 0x12b   : > { %v827_v30 = vmax.f32 %v693_v60, 0.0  ;;  %v1402_v32 = vrot.slane %v1400_v13, 7  ;;  %v6325_v9 = vunpack.c.l.b16 %v4183_v18  ;;  %v6324_v42 = vunpack.c.l.b16 %v4180_v4 }
 0x12c   : > { %v6732_v31 = vpack.c.b16 %v6673_v10, %v6672_v26  ;;  %v852_v50 = vmax.f32 %v756_v2, 0.0  ;;  %v4580_v52 = vshll.u32 %v4370_v5, 16  ;;  %v1193_v46 = vor.u32 %v1191_v27, %v1190_v7  ;;  %v4371_v26 = vld [vmem:[#allocation2 + $0x58] sm:$0xf]  ;;  %v1757_v2 = vld [vmem:[#allocation2 + $0x74] sm:$0x1] }
 0x12d   : > { %v10126_v22 = vld [vmem:[#allocation2 + $0x60] sm:$0xff]  ;;  %v891_v45 = vpack.c.bf16 %v827_v30, %v827_v30  ;;  %v1405_v54 = vor.u32 %v1403_v29, %v1402_v32  ;;  %v1407_v57 = vrot.slane %v1402_v32, 4  ;;  %v4579_v58 = vrot.slane %v4577_v15, 4 }
 0x12e   : > { %6612 = vrot.lane.b32.xlu1 %v10126_v22, %s10631_s17  ;;  %6768 = vrot.lane.b32.xlu2 %v6732_v31, %s10632_s18  ;;  %v6382_v56 = vpack.c.b16 %v6325_v9, %v6324_v42  ;;  %v916_v16 = vpack.c.bf16 %v852_v50, %v852_v50  ;;  %v1754_v4 = vsel %vm10845_vm3, %v1193_v46, %v1753_v39  ;;  %v4586_v15 = vshll.u32 %v4371_v26, 16  ;;  %v757_v39 = vpop.f32.mrf.mxu1  ;;  %v11331_v46 = vld [vmem:[%s15122_s3 + $0x80] sm:$0xff] }
 0x12f   : > { %v1196_v59 = vshrl.u32 %v891_v45, 16  ;;  %v1199_v60 = vshll.u32 %v891_v45, 16  ;;  %v1406_v5 = vsel %vm10918_vm6, %v1398_v44, %v1405_v54  ;;  %v1842_v24 = vsel %vm10945_vm8, %v1407_v57, %v1841_v41  ;;  %1755 = vst [vmem:[#allocation2 + $0x6c] sm:$0xf] %v1754_v4  ;;  %v10163_v44 = vld [vmem:[%s15122_s3 + $0x58] sm:$0xff]  ;;  %8023 = vmatpush.bf16.msrb.mxu0 %v11331_v46  ;;  %10380 = vmatpush.bf16.msra.mxu3 %v11331_v46 }
 0x130   : > { %v695_v36 = vpop.f32.mrf.mxu0  ;;  %6420 = vrot.lane.b32.xlu0 %v6382_v56, %s10630_s14  ;;  %v1409_v12 = vshrl.u32 %v916_v16, 16  ;;  %v1412_v13 = vshll.u32 %v916_v16, 16  ;;  %v1194_v22 = vrot.slane %v1190_v7, 4  ;;  %1840 = vst.msk [vmem:[#allocation2 + $0x118] sm:$0xf] %vm938_vm1, %v1406_v5  ;;  %v4590_v29 = vshrl.u32 %v4371_v26, 16  ;;  %7851 = vmatpush.bf16.msrb.mxu2 %v10163_v44 }
 0x131   : > { %v1198_v10 = vrot.slane %v1196_v59, 7  ;;  %v4596_v18 = vshll.u32 %v4429_v62, 16  ;;  %1843 = vst [vmem:[#allocation2 + $0x11c] sm:$0x1] %v1842_v24  ;;  %v4588_v9 = vrot.slane %v4586_v15, 5  ;;  %v10051_v41 = vld [vmem:[%s10738_s8 + $0xf8] sm:$0xff]  ;;  %v758_v62 = vadd.f32 %v11245_v55, %v757_v39 }
 0x132   : > { %v11323_v32 = vrot.slane %v1409_v12, 7  ;;  %v5364_v42 = vrot.slane %v11125_v48, 5  ;;  %v1844_v7 = vld [vmem:[#allocation2 + $0x120] sm:$0xf]  ;;  %v4592_v50 = vrot.slane %v4590_v29, 4  ;;  %v3325_v54 = vshrl.u32 %v11136_v19, 16  ;;  %9372 = vmatmul.msk.bf16.gmra.mxu2 %vm544_vm0, %v10051_v41 }
 0x133   : > { %9358 = vmatmul.msk.bf16.gmra.mxu0 %vm544_vm0, %v10037_v28  ;;  %v4582_v28 = vrot.slane %v4580_v52, 5  ;;  %v1201_v30 = vor.u32 %v1199_v60, %v1198_v10  ;;  %v1203_v31 = vrot.slane %v1198_v10, 4  ;;  %v696_v52 = vadd.f32 %v11245_v55, %v695_v36  ;;  %v3158_v56 = vld [vmem:[#allocation2 + $0x64] sm:$0xf]  ;;  %v4014_v59 = vld [vmem:[#allocation2 + $0x60] sm:$0xe] }
 0x134   : > { %v4593_v60 = vor.u32 %v4592_v50, %v4588_v9  ;;  %v3214_v4 = vld [vmem:[#allocation2 + $0x68] sm:$0x1]  ;;  %v1415_v24 = vrot.slane %v11323_v32, 4  ;;  %v2788_v10 = vld [vmem:[#allocation2] sm:$0xe]  ;;  %v4186_v29 = vrot.slane %v3158_v56, 5 }
 0x135   : > { %v4583_v27 = vor.u32 %v4582_v28, %v4579_v58  ;;  %v1202_v57 = vsel %vm10918_vm6, %v1194_v22, %v1201_v30  ;;  %v1758_v26 = vsel %vm10945_vm8, %v1203_v31, %v1757_v2  ;;  %v1414_v58 = vor.u32 %v1412_v13, %v11323_v32  ;;  %v11352_v39 = vld [vmem:[#allocation2 + $0x4] sm:$0xf]  ;;  %v10162_v56 = vld [vmem:[%s15122_s3 + $0x50] sm:$0xff] }
 0x136   : > { %1756 = vst.msk [vmem:[#allocation2 + $0x70] sm:$0xf] %vm938_vm1, %v1202_v57  ;;  %v828_v16 = vmax.f32 %v696_v52, 0.0  ;;  %v4598_v28 = vrot.slane %v4596_v18, 5  ;;  %v4594_v12 = vrot.slane %v4593_v60, 4  ;;  %v853_v22 = vmax.f32 %v758_v62, 0.0  ;;  %7852 = vmatpush.bf16.msrb.mxu2 %v10162_v56 }
 0x137   : > { %v4584_v45 = vrot.slane %v4583_v27, 4  ;;  %1759 = vst [vmem:[#allocation2 + $0x74] sm:$0x1] %v1758_v26  ;;  %v1845_v2 = vsel %vm10845_vm3, %v1414_v58, %v1844_v7  ;;  %v9412_v27 = vrot.slane %v4014_v59, 9  ;;  %v4189_v44 = vrot.slane %v3214_v4, 5  ;;  %v760_v4 = vpop.f32.mrf.mxu1 }
 0x138   : > { %v697_v5 = vpop.f32.mrf.mxu0  ;;  %1846 = vst [vmem:[#allocation2 + $0x120] sm:$0xf] %v1845_v2  ;;  %v892_v15 = vpack.c.bf16 %v828_v16, %v828_v16  ;;  %v4599_v31 = vsel %vm10985_vm14, %v4594_v12, %v4598_v28  ;;  %v9373_v18 = vrot.slane %v2788_v10, 9  ;;  %v2921_v62 = vrot.slane %v11352_v39, 5  ;;  %v11362_v12 = vld [vmem:[#allocation2 + $0x8] sm:$0x1] }
 0x139   : > { %v4589_v36 = vsel %vm10985_vm14, %v4584_v45, %v4588_v9  ;;  %v698_v30 = vadd.f32 %v11245_v55, %v697_v5  ;;  %v917_v9 = vpack.c.bf16 %v853_v22, %v853_v22  ;;  %v6675_v41 = vunpack.c.l.b16 %v4599_v31  ;;  %v1764_v56 = vld [vmem:[#allocation2 + $0x80] sm:$0x1] }
 0x13a   : > { %v6674_v13 = vunpack.c.l.b16 %v4589_v36  ;;  %v1205_v32 = vshrl.u32 %v892_v15, 16  ;;  %v4187_v7 = vsel %vm10972_vm11, %v9412_v27, %v4186_v29  ;;  %v4188_v45 = vrot.slane %v4186_v29, 4  ;;  %v1760_v36 = vld [vmem:[#allocation2 + $0x78] sm:$0xf] }
 0x13b   : > { %v829_v50 = vmax.f32 %v698_v30, 0.0  ;;  %v1208_v57 = vshll.u32 %v892_v15, 16  ;;  %v1417_v26 = vshrl.u32 %v917_v9, 16  ;;  %v1420_v58 = vshll.u32 %v917_v9, 16  ;;  %v4372_v9 = vld [vmem:[#allocation2 + $0x60] sm:$0xf] }
 0x13c   : > { %v1207_v52 = vrot.slane %v1205_v32, 7  ;;  %v6733_v59 = vpack.c.b16 %v6675_v41, %v6674_v13  ;;  %v4190_v60 = vsel %vm10972_vm11, %v4188_v45, %v4189_v44  ;;  %v6326_v28 = vunpack.c.l.b16 %v4187_v7  ;;  %v1848_v13 = vld [vmem:[#allocation2 + $0x128] sm:$0x1]  ;;  %v4373_v41 = vld [vmem:[#allocation2 + $0x64] sm:$0xf] }
 0x13d   : > { %v893_v16 = vpack.c.bf16 %v829_v50, %v829_v50  ;;  %v1419_v2 = vrot.slane %v1417_v26, 7  ;;  %v6327_v10 = vunpack.c.l.b16 %v4190_v60  ;;  %v3331_v15 = vshll.u32 %v11138_v20, 16 }
 0x13e   : > { %v1210_v5 = vor.u32 %v1208_v57, %v1207_v52  ;;  %6770 = vrot.lane.b32.xlu2 %v6733_v59, %s10632_s18  ;;  %v2922_v27 = vsel %vm10972_vm11, %v9373_v18, %v2921_v62  ;;  %v2923_v29 = vrot.slane %v2921_v62, 4  ;;  %v1211_v7 = vrot.slane %v1207_v52, 4 }
 0x13f   : > { %v1213_v22 = vshrl.u32 %v893_v16, 16  ;;  %v1422_v30 = vor.u32 %v1420_v58, %v1419_v2  ;;  %v1424_v31 = vrot.slane %v1419_v2, 4  ;;  %v6383_v32 = vpack.c.b16 %v6327_v10, %v6326_v28 }
 0x140   : > { %v1761_v44 = vsel %vm10845_vm3, %v1210_v5, %v1760_v36  ;;  %v1216_v50 = vshll.u32 %v893_v16, 16  ;;  %v2924_v57 = vrot.slane %v11362_v12, 5  ;;  %v5864_v58 = vunpack.c.l.b16 %v2922_v27  ;;  %v4430_v16 = vld [vmem:[#allocation2 + $0x68] sm:$0x1]  ;;  %v700_v10 = vpop.f32.mrf.mxu0 }
 0x141   : > { %1762 = vst [vmem:[#allocation2 + $0x78] sm:$0xf] %v1761_v44  ;;  %v1215_v45 = vrot.slane %v1213_v22, 7  ;;  %v1423_v26 = vsel %vm10918_vm6, %v1415_v24, %v1422_v30  ;;  %v1849_v18 = vsel %vm10945_vm8, %v1424_v31, %v1848_v13  ;;  %6422 = vrot.lane.b32.xlu0 %v6383_v32, %s10630_s14  ;;  %v761_v59 = vadd.f32 %v11245_v55, %v760_v4 }
 0x142   : > { %1847 = vst.msk [vmem:[#allocation2 + $0x124] sm:$0xf] %vm938_vm1, %v1423_v26  ;;  %v2925_v60 = vsel %vm10972_vm11, %v2923_v29, %v2924_v57  ;;  %v4601_v62 = vshrl.u32 %v4372_v9, 16  ;;  %v4604_v2 = vshll.u32 %v4372_v9, 16  ;;  %v4610_v28 = vshll.u32 %v4373_v41, 16  ;;  %v10161_v29 = vld [vmem:[%s15122_s3 + $0x48] sm:$0xff]  ;;  %v762_v26 = vpop.f32.mrf.mxu1 }
 0x143   : > { %v1218_v52 = vor.u32 %v1216_v50, %v1215_v45  ;;  %v1220_v36 = vrot.slane %v1215_v45, 4  ;;  %1850 = vst [vmem:[#allocation2 + $0x128] sm:$0x1] %v1849_v18  ;;  %v5865_v24 = vunpack.c.l.b16 %v2925_v60  ;;  %v854_v5 = vmax.f32 %v761_v59, 0.0  ;;  %v1921_v9 = vld [vmem:[#allocation2] sm:$0xf]  ;;  %7853 = vmatpush.bf16.msrb.mxu2 %v10161_v29 }
 0x144   : > { %v4603_v22 = vrot.slane %v4601_v62, 4  ;;  %v4614_v27 = vshrl.u32 %v4373_v41, 16  ;;  %v4606_v31 = vrot.slane %v4604_v2, 5  ;;  %v4612_v32 = vrot.slane %v4610_v28, 5  ;;  %v10160_v62 = vld [vmem:[%s15122_s3 + $0x40] sm:$0xff] }
 0x145   : > { %v1219_v13 = vsel %vm10918_vm6, %v1211_v7, %v1218_v52  ;;  %v1765_v4 = vsel %vm10945_vm8, %v1220_v36, %v1764_v56  ;;  %v5928_v44 = vpack.c.b16 %v5865_v24, %v5864_v58  ;;  %v918_v30 = vpack.c.bf16 %v854_v5, %v854_v5  ;;  %v1851_v28 = vld [vmem:[#allocation2 + $0x12c] sm:$0xf] }
 0x146   : > { %1763 = vst.msk [vmem:[#allocation2 + $0x7c] sm:$0xf] %vm938_vm1, %v1219_v13  ;;  %v5371_v45 = vrot.slane %v11166_v23, 5  ;;  %v4616_v7 = vrot.slane %v4614_v27, 4  ;;  %v4620_v50 = vshll.u32 %v4430_v16, 16  ;;  %v701_v57 = vadd.f32 %v11245_v55, %v700_v10 }
 0x147   : > { %1766 = vst [vmem:[#allocation2 + $0x80] sm:$0x1] %v1765_v4  ;;  %5960 = vrot.lane.b32.xlu1 %v5928_v44, %s10631_s17  ;;  %v1426_v41 = vshrl.u32 %v918_v30, 16  ;;  %v1429_v18 = vshll.u32 %v918_v30, 16  ;;  %v4607_v56 = vor.u32 %v4606_v31, %v4603_v22  ;;  %v763_v58 = vadd.f32 %v11245_v55, %v762_v26  ;;  %7854 = vmatpush.bf16.msrb.mxu2 %v10160_v62  ;;  %v10127_v30 = vld [vmem:[#allocation2 + $0x6c] sm:$0xff] }
 0x148   : > { %v4617_v59 = vor.u32 %v4616_v7, %v4612_v32  ;;  %v4622_v52 = vrot.slane %v4620_v50, 5  ;;  %v830_v36 = vmax.f32 %v701_v57, 0.0  ;;  %v2021_v60 = vshrl.u32 %v1921_v9, 16  ;;  %v10429_v7 = vld [vmem:[%s15122_s3 + $0x88] sm:$0xff]  ;;  %v4016_v48 = vld [vmem:[#allocation2 + $0x78] sm:$0xe] }
 0x149   : > { %v1428_v16 = vrot.slane %v1426_v41, 7  ;;  %v4608_v24 = vrot.slane %v4607_v56, 4  ;;  %v855_v5 = vmax.f32 %v763_v58, 0.0  ;;  %v2024_v2 = vshll.u32 %v1921_v9, 16  ;;  %v5224_v41 = vld [vmem:[#allocation2 + $0x18] sm:$0xe] }
 0x14a   : > { %v4618_v10 = vrot.slane %v4617_v59, 4  ;;  %v894_v13 = vpack.c.bf16 %v830_v36, %v830_v36  ;;  %v2023_v4 = vrot.slane %v2021_v60, 4  ;;  %v2030_v22 = vshll.u32 %v11352_v39, 16 }
 0x14b   : > { %v1431_v27 = vor.u32 %v1429_v18, %v1428_v16  ;;  %v1432_v29 = vrot.slane %v1428_v16, 4  ;;  %v4613_v44 = vsel %vm10985_vm14, %v4608_v24, %v4612_v32  ;;  %v919_v31 = vpack.c.bf16 %v855_v5, %v855_v5  ;;  %10377 = vmatpush.bf16.msra.mxu2 %v10429_v7  ;;  %v1767_v24 = vld [vmem:[#allocation2 + $0x84] sm:$0xf] }
 0x14c   : > { %v4623_v9 = vsel %vm10985_vm14, %v4618_v10, %v4622_v52  ;;  %v6676_v50 = vunpack.c.l.b16 %v4613_v44  ;;  %v1222_v57 = vshrl.u32 %v894_v13, 16  ;;  %v1225_v26 = vshll.u32 %v894_v13, 16 }
 0x14d   : > { %v1852_v18 = vsel %vm10845_vm3, %v1431_v27, %v1851_v28  ;;  %v6677_v56 = vunpack.c.l.b16 %v4623_v9  ;;  %v1434_v58 = vshrl.u32 %v919_v31, 16  ;;  %v1437_v32 = vshll.u32 %v919_v31, 16  ;;  %v1855_v27 = vld [vmem:[#allocation2 + $0x134] sm:$0x1]  ;;  %v3160_v9 = vld [vmem:[#allocation2 + $0x70] sm:$0xf] }
 0x14e   : > { %1853 = vst [vmem:[#allocation2 + $0x12c] sm:$0xf] %v1852_v18  ;;  %v11405_v59 = vrot.slane %v1222_v57, 7  ;;  %v2026_v36 = vrot.slane %v2024_v2, 5  ;;  %v2032_v60 = vrot.slane %v2030_v22, 5  ;;  %v2034_v62 = vshrl.u32 %v11352_v39, 16  ;;  %v702_v57 = vpop.f32.mrf.mxu0 }
 0x14f   : > { %v6734_v16 = vpack.c.b16 %v6677_v56, %v6676_v50  ;;  %6614 = vrot.lane.b32.xlu1 %v10127_v30, %s10631_s17  ;;  %v1436_v52 = vrot.slane %v1434_v58, 7  ;;  %v2040_v5 = vshll.u32 %v11362_v12, 16  ;;  %v9437_v10 = vrot.slane %v5224_v41, 9  ;;  %10379 = vmatpush.bf16.msra.mxu2 %v11331_v46  ;;  %v4015_v50 = vld [vmem:[#allocation2 + $0x6c] sm:$0xe]  ;;  %v10128_v58 = vld [vmem:[#allocation2 + $0x78] sm:$0xff] }
 0x150   : > { %v3349_v28 = vshrl.u32 %v11193_v63, 16  ;;  %v1227_v13 = vor.u32 %v1225_v26, %v11405_v59  ;;  %v2027_v44 = vor.u32 %v2026_v36, %v2023_v4  ;;  %v2036_v2 = vrot.slane %v2034_v62, 4  ;;  %v6409_v26 = vpop.permute.xlu0 %6408  ;;  %v3215_v56 = vld [vmem:[#allocation2 + $0x74] sm:$0x1]  ;;  %v4374_v36 = vld [vmem:[#allocation2 + $0x6c] sm:$0xf] }
 0x151   : > { %6772 = vrot.lane.b32.xlu2 %v6734_v16, %s10632_s18  ;;  %v1439_v39 = vor.u32 %v1437_v32, %v1436_v52  ;;  %v1441_v22 = vrot.slane %v1436_v52, 4  ;;  %v2042_v31 = vrot.slane %v2040_v5, 5  ;;  %v5355_v12 = vsel %vm10972_vm11, %v9437_v10, %v5354_v8  ;;  %v765_v32 = vpop.f32.mrf.mxu1 }
 0x152   : > { %v1768_v46 = vsel %vm10845_vm3, %v1227_v13, %v1767_v24  ;;  %v2028_v30 = vrot.slane %v2027_v44, 4  ;;  %v2037_v7 = vor.u32 %v2036_v2, %v2032_v60  ;;  %v5358_v4 = vsel %vm10972_vm11, %v11177_v33, %v5357_v34  ;;  %v4375_v24 = vld [vmem:[#allocation2 + $0x70] sm:$0xf] }
 0x153   : > { %1769 = vst [vmem:[#allocation2 + $0x84] sm:$0xf] %v1768_v46  ;;  %v1440_v49 = vsel %vm10918_vm6, %v1432_v29, %v1439_v39  ;;  %v1856_v8 = vsel %vm10945_vm8, %v1441_v22, %v1855_v27  ;;  %v6824_v41 = vunpack.c.l.b16 %v5355_v12  ;;  %v6825_v18 = vunpack.c.l.b16 %v5358_v4  ;;  %v4431_v4 = vld [vmem:[#allocation2 + $0x74] sm:$0x1] }
 0x154   : > { %1854 = vst.msk [vmem:[#allocation2 + $0x130] sm:$0xf] %vm938_vm1, %v1440_v49  ;;  %v2033_v33 = vsel %vm10985_vm14, %v2028_v30, %v2032_v60  ;;  %v2038_v34 = vrot.slane %v2037_v7, 4  ;;  %v9413_v16 = vrot.slane %v4015_v50, 9  ;;  %v4193_v5 = vrot.slane %v3160_v9, 5 }
 0x155   : > { %1857 = vst [vmem:[#allocation2 + $0x134] sm:$0x1] %v1856_v8  ;;  %v5704_v29 = vunpack.c.l.b16 %v2033_v33  ;;  %v6888_v62 = vpack.c.b16 %v6825_v18, %v6824_v41  ;;  %v4196_v10 = vrot.slane %v3215_v56, 5  ;;  %v703_v13 = vadd.f32 %v11245_v55, %v702_v57 }
 0x156   : > { %v2043_v52 = vsel %vm10985_vm14, %v2038_v34, %v2042_v31  ;;  %v766_v60 = vadd.f32 %v11245_v55, %v765_v32  ;;  %v4625_v44 = vshrl.u32 %v4374_v36, 16  ;;  %v4628_v2 = vshll.u32 %v4374_v36, 16  ;;  %v705_v33 = vpop.f32.mrf.mxu0 }
 0x157   : > { %v5705_v27 = vunpack.c.l.b16 %v2043_v52  ;;  %9925 = vmatmul.msk.bf16.vlgmr.msrb.gmra.mxu0 %vm6920_vm15, %v6888_v62  ;;  %6616 = vrot.lane.b32.xlu1 %v10128_v58, %s10631_s17  ;;  %v4194_v39 = vsel %vm10972_vm11, %v9413_v16, %v4193_v5  ;;  %v4195_v22 = vrot.slane %v4193_v5, 4  ;;  %v831_v12 = vmax.f32 %v703_v13, 0.0  ;;  %v5225_v13 = vld [vmem:[#allocation2 + $0x24] sm:$0xe] }
 0x158   : > { %v4634_v46 = vshll.u32 %v4375_v24, 16  ;;  %v7180_v31 = vsel %vm6920_vm15, %v6280_v43, %v6409_v26  ;;  %v856_v7 = vmax.f32 %v766_v60, 0.0  ;;  %v4627_v9 = vrot.slane %v4625_v44, 4  ;;  %v6601_v34 = vpop.permute.xlu0 %6600 }
 0x159   : > { %v5768_v30 = vpack.c.b16 %v5705_v27, %v5704_v29  ;;  %v4197_v50 = vsel %vm10972_vm11, %v4195_v22, %v4196_v10  ;;  %v6328_v57 = vunpack.c.l.b16 %v4194_v39  ;;  %v895_v49 = vpack.c.bf16 %v831_v12, %v831_v12  ;;  %v767_v10 = vpop.f32.mrf.mxu1  ;;  %v1858_v12 = vld [vmem:[#allocation2 + $0x138] sm:$0xf] }
 0x15a   : > { %v4630_v8 = vrot.slane %v4628_v2, 5  ;;  %v6329_v41 = vunpack.c.l.b16 %v4197_v50  ;;  %v920_v18 = vpack.c.bf16 %v856_v7, %v856_v7  ;;  %v4636_v56 = vrot.slane %v4634_v46, 5 }
 0x15b   : > { %5800 = vrot.lane.b32.xlu2 %v5768_v30, %s10630_s14  ;;  %v4638_v58 = vshrl.u32 %v4375_v24, 16  ;;  %v1228_v37 = vrot.slane %v11405_v59, 4  ;;  %v1230_v38 = vshrl.u32 %v895_v49, 16  ;;  %v4644_v26 = vshll.u32 %v4431_v4, 16  ;;  %v1771_v24 = vld [vmem:[#allocation2 + $0x8c] sm:$0x1] }
 0x15c   : > { %v4631_v43 = vor.u32 %v4630_v8, %v4627_v9  ;;  %v6384_v32 = vpack.c.b16 %v6329_v41, %v6328_v57  ;;  %v1443_v36 = vshrl.u32 %v920_v18, 16  ;;  %v1446_v29 = vshll.u32 %v920_v18, 16  ;;  %v6761_v30 = vpop.permute.xlu1 %6760 }
 0x15d   : > { %v4640_v62 = vrot.slane %v4638_v58, 4  ;;  %v1232_v16 = vrot.slane %v1230_v38, 7  ;;  %v1233_v52 = vshll.u32 %v895_v49, 16  ;;  %v706_v60 = vadd.f32 %v11245_v55, %v705_v33 }
 0x15e   : > { %v4632_v5 = vrot.slane %v4631_v43, 4  ;;  %6424 = vrot.lane.b32.xlu0 %v6384_v32, %s10630_s14  ;;  %v11450_v27 = vrot.slane %v1443_v36, 7  ;;  %v768_v44 = vadd.f32 %v11245_v55, %v767_v10  ;;  %v7275_v2 = vsel %vm544_vm0, %v7180_v31, %v6601_v34 }
 0x15f   : > { %v4641_v59 = vor.u32 %v4640_v62, %v4636_v56  ;;  %v1235_v39 = vor.u32 %v1233_v52, %v1232_v16  ;;  %v1237_v22 = vrot.slane %v1232_v16, 4  ;;  %v4646_v46 = vrot.slane %v4644_v26, 5  ;;  %v10431_v26 = vld [vmem:[#allocation2 + $0x1c] sm:$0xf]  ;;  %v3145_v62 = vld [vmem:[#allocation2 + $0x18] sm:$0xf] }
 0x160   : > { %v1448_v7 = vor.u32 %v1446_v29, %v11450_v27  ;;  %v4637_v4 = vsel %vm10985_vm14, %v4632_v5, %v4636_v56  ;;  %v9438_v50 = vrot.slane %v5225_v13, 9  ;;  %v7339_v31 = vsel %vm7081_vm2, %v7275_v2, %v6761_v30  ;;  %v10430_v56 = vld [vmem:[#allocation2 + $0x28] sm:$0xf]  ;;  %v3162_v30 = vld [vmem:[#allocation2 + $0x7c] sm:$0xf] }
 0x161   : > { %v4642_v9 = vrot.slane %v4641_v59, 4  ;;  %v1236_v57 = vsel %vm10918_vm6, %v1228_v37, %v1235_v39  ;;  %v1772_v55 = vsel %vm10945_vm8, %v1237_v22, %v1771_v24  ;;  %v832_v49 = vmax.f32 %v706_v60, 0.0  ;;  %7855 = vmatmul.bf16.vlgmr.msrb.gmra.mxu2 %v7339_v31 }
 0x162   : > { %1770 = vst.msk [vmem:[#allocation2 + $0x88] sm:$0xf] %vm938_vm1, %v1236_v57  ;;  %v1859_v8 = vsel %vm10845_vm3, %v1448_v7, %v1858_v12  ;;  %v857_v18 = vmax.f32 %v768_v44, 0.0  ;;  %v5361_v58 = vrot.slane %v10430_v56, 5  ;;  %v6678_v37 = vunpack.c.l.b16 %v4637_v4  ;;  %v11483_v7 = vld [vmem:[#allocation2 + $0x44] sm:$0x1] }
 0x163   : > { %v4647_v41 = vsel %vm10985_vm14, %v4642_v9, %v4646_v46  ;;  %1773 = vst [vmem:[#allocation2 + $0x8c] sm:$0x1] %v1772_v55  ;;  %v896_v43 = vpack.c.bf16 %v832_v49, %v832_v49  ;;  %v3273_v33 = vshll.u32 %v10431_v26, 16  ;;  %v3279_v29 = vrot.slane %v3277_v1, 4  ;;  %v1862_v9 = vld [vmem:[#allocation2 + $0x140] sm:$0x1] }
 0x164   : > { %v6679_v38 = vunpack.c.l.b16 %v4647_v41  ;;  %1860 = vst [vmem:[#allocation2 + $0x138] sm:$0xf] %v1859_v8  ;;  %v921_v34 = vpack.c.bf16 %v857_v18, %v857_v18  ;;  %v5362_v32 = vsel %vm10972_vm11, %v9438_v50, %v5361_v58  ;;  %v5363_v36 = vrot.slane %v5361_v58, 4  ;;  %v3216_v55 = vld [vmem:[#allocation2 + $0x80] sm:$0x1] }
 0x165   : > { %v1239_v52 = vshrl.u32 %v896_v43, 16  ;;  %v1242_v5 = vshll.u32 %v896_v43, 16  ;;  %v6826_v10 = vunpack.c.l.b16 %v5362_v32  ;;  %v11476_v60 = vrot.slane %v3273_v33, 5  ;;  %v11498_v32 = vld [vmem:[#allocation2 + $0x14] sm:$0x1] }
 0x166   : > { %v6735_v16 = vpack.c.b16 %v6679_v38, %v6678_v37  ;;  %v1451_v13 = vshrl.u32 %v921_v34, 16  ;;  %v1454_v24 = vshll.u32 %v921_v34, 16  ;;  %v5365_v59 = vsel %vm10972_vm11, %v5363_v36, %v5364_v42  ;;  %v11490_v37 = vld [vmem:[#allocation2 + $0x10] sm:$0xf]  ;;  %v2789_v38 = vld [vmem:[#allocation2 + $0xc] sm:$0xe] }
 0x167   : > { %v11479_v44 = vrot.slane %v1239_v52, 7  ;;  %v6827_v1 = vunpack.c.l.b16 %v5365_v59  ;;  %v3264_v2 = vshrl.u32 %v3145_v62, 16  ;;  %v3267_v39 = vshll.u32 %v3145_v62, 16  ;;  %v10088_v36 = vld [vmem:[#allocation2 + $0xc] sm:$0xff]  ;;  %v11506_v52 = vld [vmem:[%s15121_s2] ss:$0 sm:$0xff] }
 0x168   : > { %6774 = vrot.lane.b32.xlu2 %v6735_v16, %s10632_s18  ;;  %v1449_v22 = vrot.slane %v11450_v27, 4  ;;  %v1453_v12 = vrot.slane %v1451_v13, 7  ;;  %v3280_v46 = vor.u32 %v3279_v29, %v11476_v60  ;;  %v5378_v42 = vrot.slane %v11483_v7, 5  ;;  %v707_v27 = vpop.f32.mrf.mxu0 }
 0x169   : > { %v1244_v4 = vor.u32 %v1242_v5, %v11479_v44  ;;  %v6889_v50 = vpack.c.b16 %v6827_v1, %v6826_v10  ;;  %v3266_v57 = vrot.slane %v3264_v2, 4  ;;  %v3269_v41 = vrot.slane %v3267_v39, 5 }
 0x16a   : > { %v1456_v31 = vor.u32 %v1454_v24, %v1453_v12  ;;  %v1458_v49 = vrot.slane %v1453_v12, 4  ;;  %v3281_v8 = vrot.slane %v3280_v46, 4  ;;  %v9414_v56 = vrot.slane %v4016_v48, 9 }
 0x16b   : > { %v1775_v18 = vsel %vm10845_vm3, %v1244_v4, %v1774_v61  ;;  %9926 = vmatmul.msk.bf16.gmra.mxu0 %vm6920_vm15, %v6889_v50  ;;  %v4200_v58 = vrot.slane %v3162_v30, 5  ;;  %v3285_v33 = vrot.slane %v3283_v3, 5  ;;  %v4203_v34 = vrot.slane %v3216_v55, 5  ;;  %v11509_v3 = vld [vmem:[#allocation2 + $0x4c] sm:$0xf] }
 0x16c   : > { %1776 = vst [vmem:[#allocation2 + $0x90] sm:$0xf] %v1775_v18  ;;  %v1457_v43 = vsel %vm10918_vm6, %v1449_v22, %v1456_v31  ;;  %v1863_v26 = vsel %vm10945_vm8, %v1458_v49, %v1862_v9  ;;  %v3270_v29 = vor.u32 %v3269_v41, %v3266_v57  ;;  %v708_v5 = vadd.f32 %v11506_v52, %v707_v27  ;;  %v10435_v49 = vld [vmem:[#allocation2 + $0x28] sm:$0xf] }
 0x16d   : > { %1861 = vst.msk [vmem:[#allocation2 + $0x13c] sm:$0xf] %vm938_vm1, %v1457_v43  ;;  %v4201_v62 = vsel %vm10972_vm11, %v9414_v56, %v4200_v58  ;;  %v4202_v16 = vrot.slane %v4200_v58, 4  ;;  %v3373_v10 = vshrl.u32 %v11509_v3, 16  ;;  %v3286_v13 = vsel %vm10985_vm14, %v3281_v8, %v3285_v33  ;;  %v770_v58 = vpop.f32.mrf.mxu1 }
 0x16e   : > { %1864 = vst [vmem:[#allocation2 + $0x140] sm:$0x1] %v1863_v26  ;;  %v9374_v24 = vrot.slane %v2789_v38, 9  ;;  %v2928_v59 = vrot.slane %v11490_v37, 5  ;;  %v6330_v1 = vunpack.c.l.b16 %v4201_v62  ;;  %v833_v2 = vmax.f32 %v708_v5, 0.0 }
 0x16f   : > { %v4204_v61 = vsel %vm10972_vm11, %v4202_v16, %v4203_v34  ;;  %v2931_v39 = vrot.slane %v11498_v32, 5  ;;  %v3288_v30 = vshrl.u32 %v3147_v6, 16  ;;  %v1245_v48 = vrot.slane %v11479_v44, 4  ;;  %v4376_v38 = vld [vmem:[#allocation2 + $0x78] sm:$0xf] }
 0x170   : > { %6152 = vrot.lane.b32.xlu2 %v10088_v36, %s10632_s18  ;;  %v6331_v22 = vunpack.c.l.b16 %v4204_v61  ;;  %v2929_v12 = vsel %vm10972_vm11, %v9374_v24, %v2928_v59  ;;  %v2930_v46 = vrot.slane %v2928_v59, 4  ;;  %v6219_v4 = vunpack.c.l.b16 %v3286_v13  ;;  %v4377_v34 = vld [vmem:[#allocation2 + $0x7c] sm:$0xf]  ;;  %v6603_v36 = vpop.permute.xlu2 %6602  ;;  %v6411_v61 = vpop.permute.xlu1 %6410 }
 0x171   : > { %v3271_v9 = vrot.slane %v3270_v29, 4  ;;  %v897_v50 = vpack.c.bf16 %v833_v2, %v833_v2  ;;  %v3291_v31 = vshll.u32 %v3147_v6, 16  ;;  %v3297_v8 = vshll.u32 %v10435_v49, 16  ;;  %v1778_v6 = vld [vmem:[#allocation2 + $0x98] sm:$0x1] }
 0x172   : > { %v6385_v57 = vpack.c.b16 %v6331_v22, %v6330_v1  ;;  %v2932_v55 = vsel %vm10972_vm11, %v2930_v46, %v2931_v39  ;;  %v5866_v18 = vunpack.c.l.b16 %v2929_v12  ;;  %v3290_v43 = vrot.slane %v3288_v30, 4  ;;  %v11535_v39 = vld [vmem:[#allocation2 + $0x50] sm:$0x1] }
 0x173   : > { %v3276_v41 = vsel %vm10985_vm14, %v3271_v9, %v11476_v60  ;;  %v1247_v27 = vshrl.u32 %v897_v50, 16  ;;  %v5867_v56 = vunpack.c.l.b16 %v2932_v55  ;;  %v1250_v44 = vshll.u32 %v897_v50, 16 }
 0x174   : > { %6426 = vrot.lane.b32.xlu0 %v6385_v57, %s10630_s14  ;;  %v11528_v26 = vrot.slane %v3297_v8, 5  ;;  %v3303_v33 = vrot.slane %v3301_v21, 4  ;;  %v3293_v16 = vrot.slane %v3291_v31, 5  ;;  %v771_v60 = vadd.f32 %v11506_v52, %v770_v58  ;;  %v4432_v31 = vld [vmem:[#allocation2 + $0x80] sm:$0x1]  ;;  %v10129_v58 = vld [vmem:[#allocation2 + $0x84] sm:$0xff] }
 0x175   : > { %v1249_v29 = vrot.slane %v1247_v27, 7  ;;  %v5929_v62 = vpack.c.b16 %v5867_v56, %v5866_v18  ;;  %v6218_v5 = vunpack.c.l.b16 %v3276_v41  ;;  %v4649_v24 = vshrl.u32 %v4376_v38, 16 }
 0x176   : > { %v3304_v13 = vor.u32 %v3303_v33, %v11528_v26  ;;  %v4652_v59 = vshll.u32 %v4376_v38, 16  ;;  %v858_v17 = vmax.f32 %v771_v60, 0.0  ;;  %v4658_v21 = vshll.u32 %v4377_v34, 16  ;;  %v710_v33 = vpop.f32.mrf.mxu0 }
 0x177   : > { %v1252_v1 = vor.u32 %v1250_v44, %v1249_v29  ;;  %v1254_v2 = vrot.slane %v1249_v29, 4  ;;  %5962 = vrot.lane.b32.xlu1 %v5929_v62, %s10631_s17  ;;  %v3379_v22 = vshll.u32 %v11535_v39, 16  ;;  %v6281_v12 = vpack.c.b16 %v6219_v4, %v6218_v5  ;;  %v772_v5 = vpop.f32.mrf.mxu1 }
 0x178   : > { %v4651_v46 = vrot.slane %v4649_v24, 4  ;;  %v4654_v30 = vrot.slane %v4652_v59, 5  ;;  %v3294_v57 = vor.u32 %v3293_v16, %v3290_v43  ;;  %v922_v55 = vpack.c.bf16 %v858_v17, %v858_v17  ;;  %v6763_v29 = vpop.permute.xlu2 %6762  ;;  %v5226_v24 = vld [vmem:[#allocation2 + $0x30] sm:$0xe]  ;;  %v1923_v59 = vld [vmem:[#allocation2 + $0xc] sm:$0xf] }
 0x179   : > { %v1253_v9 = vsel %vm10918_vm6, %v1245_v48, %v1252_v1  ;;  %v1779_v50 = vsel %vm10945_vm8, %v1254_v2, %v1778_v6  ;;  %v7183_v49 = vsel %vm6920_vm15, %v6281_v12, %v6411_v61  ;;  %v4660_v41 = vrot.slane %v4658_v21, 5  ;;  %v1865_v6 = vld [vmem:[#allocation2 + $0x144] sm:$0xf] }
 0x17a   : > { %1777 = vst.msk [vmem:[#allocation2 + $0x94] sm:$0xf] %vm938_vm1, %v1253_v9  ;;  %v4655_v8 = vor.u32 %v4654_v30, %v4651_v46  ;;  %v4662_v27 = vshrl.u32 %v4377_v34, 16  ;;  %v11544_v4 = vrot.slane %v3304_v13, 4  ;;  %v1460_v18 = vshrl.u32 %v922_v55, 16 }
 0x17b   : > { %1780 = vst [vmem:[#allocation2 + $0x98] sm:$0x1] %v1779_v50  ;;  %v1463_v56 = vshll.u32 %v922_v55, 16  ;;  %v11548_v48 = vrot.slane %v3307_v35, 5  ;;  %v4668_v43 = vshll.u32 %v4432_v31, 16  ;;  %v3295_v62 = vrot.slane %v3294_v57, 4 }
 0x17c   : > { %v4656_v38 = vrot.slane %v4655_v8, 4  ;;  %v4664_v44 = vrot.slane %v4662_v27, 4  ;;  %v11550_v16 = vrot.slane %v1460_v18, 7  ;;  %v7277_v34 = vsel %vm544_vm0, %v7183_v49, %v6603_v36  ;;  %v10437_v9 = vld [vmem:[#allocation2 + $0x34] sm:$0xf] }
 0x17d   : > { %v711_v60 = vadd.f32 %v11506_v52, %v710_v33  ;;  %v7342_v35 = vsel %vm7081_vm2, %v7277_v34, %v6763_v29  ;;  %v3300_v61 = vsel %vm10985_vm14, %v3295_v62, %v11528_v26  ;;  %v3310_v36 = vsel %vm10985_vm14, %v11544_v4, %v11548_v48 }
 0x17e   : > { %v4661_v13 = vsel %vm10985_vm14, %v4656_v38, %v4660_v41  ;;  %v4665_v14 = vor.u32 %v4664_v44, %v4660_v41  ;;  %v1465_v1 = vor.u32 %v1463_v56, %v11550_v16  ;;  %v4670_v2 = vrot.slane %v4668_v43, 5  ;;  %7860 = vmatmul.bf16.gmra.mxu2 %v7342_v35 }
 0x17f   : > { %6618 = vrot.lane.b32.xlu1 %v10129_v58, %s10631_s17  ;;  %v6680_v21 = vunpack.c.l.b16 %v4661_v13  ;;  %v834_v12 = vmax.f32 %v711_v60, 0.0  ;;  %v773_v46 = vadd.f32 %v11506_v52, %v772_v5  ;;  %v9439_v26 = vrot.slane %v5226_v24, 9 }
 0x180   : > { %v4666_v17 = vrot.slane %v4665_v14, 4  ;;  %v1866_v30 = vsel %vm10845_vm3, %v1465_v1, %v1865_v6  ;;  %v5368_v50 = vrot.slane %v10437_v9, 5  ;;  %v2045_v57 = vshrl.u32 %v1923_v59, 16  ;;  %v1781_v6 = vld [vmem:[#allocation2 + $0x9c] sm:$0xf] }
 0x181   : > { %1867 = vst [vmem:[#allocation2 + $0x144] sm:$0xf] %v1866_v30  ;;  %v898_v31 = vpack.c.bf16 %v834_v12, %v834_v12  ;;  %v859_v49 = vmax.f32 %v773_v46, 0.0  ;;  %v2048_v8 = vshll.u32 %v1923_v59, 16  ;;  %v2054_v29 = vshll.u32 %v11490_v37, 16 }
 0x182   : > { %v4671_v55 = vsel %vm10985_vm14, %v4666_v17, %v4670_v2  ;;  %v5369_v27 = vsel %vm10972_vm11, %v9439_v26, %v5368_v50  ;;  %v5370_v4 = vrot.slane %v5368_v50, 4  ;;  %v2047_v18 = vrot.slane %v2045_v57, 4  ;;  %v3164_v2 = vld [vmem:[#allocation2 + $0x88] sm:$0xf]  ;;  %v4017_v17 = vld [vmem:[#allocation2 + $0x84] sm:$0xe] }
 0x183   : > { %v6681_v41 = vunpack.c.l.b16 %v4671_v55  ;;  %v1256_v56 = vshrl.u32 %v898_v31, 16  ;;  %v1259_v58 = vshll.u32 %v898_v31, 16  ;;  %v923_v48 = vpack.c.bf16 %v859_v49, %v859_v49  ;;  %v1869_v46 = vld [vmem:[#allocation2 + $0x14c] sm:$0x1]  ;;  %v11588_v55 = vld [vmem:[#allocation2 + $0x1c] sm:$0xf] }
 0x184   : > { %v6828_v38 = vunpack.c.l.b16 %v5369_v27  ;;  %v5372_v43 = vsel %vm10972_vm11, %v5370_v4, %v5371_v45  ;;  %v2050_v33 = vrot.slane %v2048_v8, 5  ;;  %v2056_v14 = vrot.slane %v2054_v29, 5  ;;  %v3217_v9 = vld [vmem:[#allocation2 + $0x8c] sm:$0x1]  ;;  %v2790_v31 = vld [vmem:[#allocation2 + $0x18] sm:$0xe] }
 0x185   : > { %v6736_v44 = vpack.c.b16 %v6681_v41, %v6680_v21  ;;  %v11578_v62 = vrot.slane %v1256_v56, 7  ;;  %v1468_v34 = vshrl.u32 %v923_v48, 16  ;;  %v1471_v60 = vshll.u32 %v923_v48, 16  ;;  %v11592_v41 = vld [vmem:[#allocation2 + $0x20] sm:$0x1] }
 0x186   : > { %v6829_v5 = vunpack.c.l.b16 %v5372_v43  ;;  %v2051_v13 = vor.u32 %v2050_v33, %v2047_v18  ;;  %v2058_v35 = vshrl.u32 %v11490_v37, 16  ;;  %v2064_v23 = vshll.u32 %v11498_v32, 16 }
 0x187   : > { %6776 = vrot.lane.b32.xlu2 %v6736_v44, %s10632_s18  ;;  %v1466_v24 = vrot.slane %v11550_v16, 4  ;;  %v1261_v45 = vor.u32 %v1259_v58, %v11578_v62  ;;  %v1470_v59 = vrot.slane %v1468_v34, 7  ;;  %v6220_v21 = vunpack.c.l.b16 %v3300_v61  ;;  %v712_v16 = vpop.f32.mrf.mxu0  ;;  %v3149_v58 = vld [vmem:[#allocation2 + $0x30] sm:$0xf] }
 0x188   : > { %v6890_v1 = vpack.c.b16 %v6829_v5, %v6828_v38  ;;  %v6221_v12 = vunpack.c.l.b16 %v3310_v36  ;;  %v2052_v30 = vrot.slane %v2051_v13, 4  ;;  %v2060_v26 = vrot.slane %v2058_v35, 4  ;;  %v6413_v35 = vpop.permute.xlu0 %6412 }
 0x189   : > { %v1782_v50 = vsel %vm10845_vm3, %v1261_v45, %v1781_v6  ;;  %v1473_v37 = vor.u32 %v1471_v60, %v1470_v59  ;;  %v1475_v57 = vrot.slane %v1470_v59, 4  ;;  %v2066_v32 = vrot.slane %v2064_v23, 5 }
 0x18a   : > { %9927 = vmatmul.msk.bf16.gmra.mxu0 %vm6920_vm15, %v6890_v1  ;;  %1783 = vst [vmem:[#allocation2 + $0x9c] sm:$0xf] %v1782_v50  ;;  %v2057_v61 = vsel %vm10985_vm14, %v2052_v30, %v2056_v14  ;;  %v2061_v36 = vor.u32 %v2060_v26, %v2056_v14  ;;  %v9415_v49 = vrot.slane %v4017_v17, 9  ;;  %v4207_v8 = vrot.slane %v3164_v2, 5  ;;  %v11610_v1 = vld [vmem:[#allocation2 + $0x50] sm:$0x1] }
 0x18b   : > { %v1474_v27 = vsel %vm10918_vm6, %v1466_v24, %v1473_v37  ;;  %v1870_v4 = vsel %vm10945_vm8, %v1475_v57, %v1869_v46  ;;  %v5706_v18 = vunpack.c.l.b16 %v2057_v61  ;;  %v4210_v56 = vrot.slane %v3217_v9, 5  ;;  %v11613_v17 = vld [vmem:[#allocation2 + $0x58] sm:$0xf] }
 0x18c   : > { %1868 = vst.msk [vmem:[#allocation2 + $0x148] sm:$0xf] %vm938_vm1, %v1474_v27  ;;  %v2062_v48 = vrot.slane %v2061_v36, 4  ;;  %v4208_v38 = vsel %vm10972_vm11, %v9415_v49, %v4207_v8  ;;  %v4209_v44 = vrot.slane %v4207_v8, 4  ;;  %v713_v43 = vadd.f32 %v11506_v52, %v712_v16  ;;  %v775_v49 = vpop.f32.mrf.mxu1  ;;  %v4379_v8 = vld [vmem:[#allocation2 + $0x88] sm:$0xf] }
 0x18d   : > { %1871 = vst [vmem:[#allocation2 + $0x14c] sm:$0x1] %v1870_v4  ;;  %v6332_v33 = vunpack.c.l.b16 %v4208_v38  ;;  %v9375_v29 = vrot.slane %v2790_v31, 9  ;;  %v2935_v34 = vrot.slane %v11588_v55, 5  ;;  %v2938_v60 = vrot.slane %v11592_v41, 5  ;;  %v6605_v4 = vpop.permute.xlu1 %6604 }
 0x18e   : > { %v2067_v5 = vsel %vm10985_vm14, %v2062_v48, %v2066_v32  ;;  %v4211_v6 = vsel %vm10972_vm11, %v4209_v44, %v4210_v56  ;;  %v835_v13 = vmax.f32 %v713_v43, 0.0  ;;  %v3312_v14 = vshrl.u32 %v3149_v58, 16  ;;  %v4378_v32 = vld [vmem:[#allocation2 + $0x84] sm:$0xf] }
 0x18f   : > { %v5707_v23 = vunpack.c.l.b16 %v2067_v5  ;;  %v6333_v24 = vunpack.c.l.b16 %v4211_v6  ;;  %v2936_v45 = vsel %vm10972_vm11, %v9375_v29, %v2935_v34  ;;  %v2937_v59 = vrot.slane %v2935_v34, 4  ;;  %v1785_v43 = vld [vmem:[#allocation2 + $0xa4] sm:$0x1] }
 0x190   : > { %v5385_v2 = vrot.slane %v11610_v1, 5  ;;  %v3397_v46 = vshrl.u32 %v11613_v17, 16  ;;  %v6282_v30 = vpack.c.b16 %v6221_v12, %v6220_v21  ;;  %v899_v26 = vpack.c.bf16 %v835_v13, %v835_v13  ;;  %v10440_v12 = vld [vmem:[#allocation2 + $0x34] sm:$0xf]  ;;  %v6415_v7 = vpop.permute.xlu0 %6414 }
 0x191   : > { %v5769_v9 = vpack.c.b16 %v5707_v23, %v5706_v18  ;;  %v6386_v50 = vpack.c.b16 %v6333_v24, %v6332_v33  ;;  %v2939_v37 = vsel %vm10972_vm11, %v2937_v59, %v2938_v60  ;;  %v3315_v57 = vshll.u32 %v3149_v58, 16  ;;  %v4433_v24 = vld [vmem:[#allocation2 + $0x8c] sm:$0x1] }
 0x192   : > { %v7186_v16 = vsel %vm6920_vm15, %v6282_v30, %v6413_v35  ;;  %v1264_v31 = vshrl.u32 %v899_v26, 16  ;;  %v5868_v61 = vunpack.c.l.b16 %v2936_v45  ;;  %v5869_v36 = vunpack.c.l.b16 %v2939_v37 }
 0x193   : > { %v1262_v27 = vrot.slane %v11578_v62, 4  ;;  %5802 = vrot.lane.b32.xlu2 %v5769_v9, %s10630_s14  ;;  %6428 = vrot.lane.b32.xlu0 %v6386_v50, %s10630_s14  ;;  %v3314_v21 = vrot.slane %v3312_v14, 4  ;;  %v3321_v18 = vshll.u32 %v10440_v12, 16  ;;  %v776_v56 = vadd.f32 %v11506_v52, %v775_v49  ;;  %v11633_v50 = vld [vmem:[#allocation2 + $0x5c] sm:$0x1] }
 0x194   : > { %v1266_v58 = vrot.slane %v1264_v31, 7  ;;  %v1267_v48 = vshll.u32 %v899_v26, 16  ;;  %v5930_v38 = vpack.c.b16 %v5869_v36, %v5868_v61  ;;  %v4673_v44 = vshrl.u32 %v4378_v32, 16  ;;  %v6765_v31 = vpop.permute.xlu2 %6764 }
 0x195   : > { %v3317_v33 = vrot.slane %v3315_v57, 5  ;;  %v860_v29 = vmax.f32 %v776_v56, 0.0  ;;  %v4676_v34 = vshll.u32 %v4378_v32, 16  ;;  %v4682_v60 = vshll.u32 %v4379_v8, 16  ;;  %v11637_v32 = vld [vmem:[#allocation2 + $0x5c] sm:$0x1] }
 0x196   : > { %v7279_v62 = vsel %vm544_vm0, %v7186_v16, %v6605_v4  ;;  %v1269_v5 = vor.u32 %v1267_v48, %v1266_v58  ;;  %v1271_v6 = vrot.slane %v1266_v58, 4  ;;  %5964 = vrot.lane.b32.xlu1 %v5930_v38, %s10631_s17  ;;  %v4675_v13 = vrot.slane %v4673_v44, 4  ;;  %v2791_v56 = vld [vmem:[#allocation2 + $0x24] sm:$0xe]  ;;  %v1872_v48 = vld [vmem:[#allocation2 + $0x150] sm:$0xf] }
 0x197   : > { %v11625_v14 = vrot.slane %v3321_v18, 5  ;;  %v3327_v35 = vrot.slane %v3325_v54, 4  ;;  %v924_v23 = vpack.c.bf16 %v860_v29, %v860_v29  ;;  %v4678_v45 = vrot.slane %v4676_v34, 5  ;;  %v11645_v18 = vld [vmem:[#allocation2 + $0x28] sm:$0xf] }
 0x198   : > { %v1270_v59 = vsel %vm10918_vm6, %v1262_v27, %v1269_v5  ;;  %v1786_v30 = vsel %vm10945_vm8, %v1271_v6, %v1785_v43  ;;  %v4684_v26 = vrot.slane %v4682_v60, 5  ;;  %v4686_v9 = vshrl.u32 %v4379_v8, 16  ;;  %v715_v27 = vpop.f32.mrf.mxu0  ;;  %v11649_v43 = vld [vmem:[#allocation2 + $0x2c] sm:$0x1] }
 0x199   : > { %v3403_v37 = vshll.u32 %v11633_v50, 16  ;;  %1784 = vst.msk [vmem:[#allocation2 + $0xa0] sm:$0xf] %vm938_vm1, %v1270_v59  ;;  %v3318_v57 = vor.u32 %v3317_v33, %v3314_v21  ;;  %v1477_v19 = vshrl.u32 %v924_v23, 16  ;;  %v1480_v54 = vshll.u32 %v924_v23, 16 }
 0x19a   : > { %v5392_v16 = vrot.slane %v11637_v32, 5  ;;  %1787 = vst [vmem:[#allocation2 + $0xa4] sm:$0x1] %v1786_v30  ;;  %v4679_v61 = vor.u32 %v4678_v45, %v4675_v13  ;;  %v4688_v36 = vrot.slane %v4686_v9, 4  ;;  %v4692_v49 = vshll.u32 %v4433_v24, 16  ;;  %v780_v24 = vpop.f32.mrf.mxu2  ;;  %v777_v45 = vpop.f32.mrf.mxu1 }
 0x19b   : > { %v3328_v8 = vor.u32 %v3327_v35, %v11625_v14  ;;  %v11641_v4 = vrot.slane %v1477_v19, 7  ;;  %v7345_v12 = vsel %vm7081_vm2, %v7279_v62, %v6765_v31  ;;  %v716_v21 = vadd.f32 %v11506_v52, %v715_v27 }
 0x19c   : > { %v3333_v58 = vrot.slane %v3331_v15, 5  ;;  %v4680_v38 = vrot.slane %v4679_v61, 4  ;;  %v4689_v44 = vor.u32 %v4688_v36, %v4684_v26  ;;  %7865 = vmatmul.bf16.gmra.mxu2 %v7345_v12  ;;  %v3319_v33 = vrot.slane %v3318_v57, 4 }
 0x19d   : > { %v1482_v29 = vor.u32 %v1480_v54, %v11641_v4  ;;  %v4694_v34 = vrot.slane %v4692_v49, 5  ;;  %v836_v60 = vmax.f32 %v716_v21, 0.0  ;;  %v9376_v6 = vrot.slane %v2791_v56, 9 }
 0x19e   : > { %v4685_v62 = vsel %vm10985_vm14, %v4680_v38, %v4684_v26  ;;  %v4690_v5 = vrot.slane %v4689_v44, 4  ;;  %v2942_v13 = vrot.slane %v11645_v18, 5  ;;  %v3329_v20 = vrot.slane %v3328_v8, 4  ;;  %v5227_v8 = vld [vmem:[#allocation2 + $0x3c] sm:$0xe] }
 0x19f   : > { %v1873_v15 = vsel %vm10845_vm3, %v1482_v29, %v1872_v48  ;;  %v900_v35 = vpack.c.bf16 %v836_v60, %v836_v60  ;;  %v2945_v23 = vrot.slane %v11649_v43, 5  ;;  %v781_v9 = vadd.f32 %v11506_v52, %v780_v24  ;;  %v1788_v44 = vld [vmem:[#allocation2 + $0xa8] sm:$0xf]  ;;  %v10443_v60 = vld [vmem:[#allocation2 + $0x40] sm:$0xf] }
 0x1a0   : > { %1874 = vst [vmem:[#allocation2 + $0x150] sm:$0xf] %v1873_v15  ;;  %v4695_v59 = vsel %vm10985_vm14, %v4690_v5, %v4694_v34  ;;  %v2943_v30 = vsel %vm10972_vm11, %v9376_v6, %v2942_v13  ;;  %v2944_v26 = vrot.slane %v2942_v13, 4  ;;  %v6682_v57 = vunpack.c.l.b16 %v4685_v62  ;;  %v3166_v15 = vld [vmem:[#allocation2 + $0x94] sm:$0xf] }
 0x1a1   : > { %v6683_v19 = vunpack.c.l.b16 %v4695_v59  ;;  %v1273_v54 = vshrl.u32 %v900_v35, 16  ;;  %v1276_v31 = vshll.u32 %v900_v35, 16  ;;  %v3324_v61 = vsel %vm10985_vm14, %v3319_v33, %v11625_v14  ;;  %v11673_v33 = vld [vmem:[#allocation2 + $0x64] sm:$0xf] }
 0x1a2   : > { %v2946_v36 = vsel %vm10972_vm11, %v2944_v26, %v2945_v23  ;;  %v862_v49 = vmax.f32 %v781_v9, 0.0  ;;  %v778_v27 = vadd.f32 %v11506_v52, %v777_v45  ;;  %v5870_v56 = vunpack.c.l.b16 %v2943_v30  ;;  %v717_v45 = vpop.f32.mrf.mxu0  ;;  %v4435_v39 = vld [vmem:[#allocation2 + $0xa4] sm:$0x1] }
 0x1a3   : > { %v6737_v12 = vpack.c.b16 %v6683_v19, %v6682_v57  ;;  %v11669_v21 = vrot.slane %v1273_v54, 7  ;;  %v5871_v48 = vunpack.c.l.b16 %v2946_v36  ;;  %v3334_v38 = vsel %vm10985_vm14, %v3329_v20, %v3333_v58  ;;  %v4018_v20 = vld [vmem:[#allocation2 + $0x90] sm:$0xe]  ;;  %v3218_v57 = vld [vmem:[#allocation2 + $0x98] sm:$0x1] }
 0x1a4   : > { %v926_v29 = vpack.c.bf16 %v862_v49, %v862_v49  ;;  %v861_v34 = vmax.f32 %v778_v27, 0.0  ;;  %v5375_v14 = vrot.slane %v10443_v60, 5  ;;  %v3421_v62 = vshrl.u32 %v11673_v33, 16  ;;  %v1879_v49 = vld [vmem:[#allocation2 + $0x15c] sm:$0xf] }
 0x1a5   : > { %6778 = vrot.lane.b32.xlu2 %v6737_v12, %s10632_s18  ;;  %v1278_v5 = vor.u32 %v1276_v31, %v11669_v21  ;;  %v5931_v6 = vpack.c.b16 %v5871_v48, %v5870_v56  ;;  %v9440_v13 = vrot.slane %v5227_v8, 9  ;;  %v6222_v35 = vunpack.c.l.b16 %v3324_v61 }
 0x1a6   : > { %v1494_v23 = vshrl.u32 %v926_v29, 16  ;;  %v1497_v24 = vshll.u32 %v926_v29, 16  ;;  %v925_v58 = vpack.c.bf16 %v861_v34, %v861_v34  ;;  %v6223_v59 = vunpack.c.l.b16 %v3334_v38  ;;  %v1876_v29 = vld [vmem:[#allocation2 + $0x158] sm:$0x1] }
 0x1a7   : > { %v1789_v30 = vsel %vm10845_vm3, %v1278_v5, %v1788_v44  ;;  %5966 = vrot.lane.b32.xlu1 %v5931_v6, %s10631_s17  ;;  %v5376_v26 = vsel %vm10972_vm11, %v9440_v13, %v5375_v14  ;;  %v5377_v9 = vrot.slane %v5375_v14, 4  ;;  %v4214_v61 = vrot.slane %v3166_v15, 5  ;;  %v10089_v34 = vld [vmem:[#allocation2 + $0x18] sm:$0xff] }
 0x1a8   : > { %1790 = vst [vmem:[#allocation2 + $0xa8] sm:$0xf] %v1789_v30  ;;  %v11683_v19 = vrot.slane %v1494_v23, 7  ;;  %v1485_v54 = vshrl.u32 %v925_v58, 16  ;;  %v1488_v31 = vshll.u32 %v925_v58, 16  ;;  %v1483_v36 = vrot.slane %v11641_v4, 4 }
 0x1a9   : > { %v5379_v27 = vsel %vm10972_vm11, %v5377_v9, %v5378_v42  ;;  %v9416_v8 = vrot.slane %v4018_v20, 9  ;;  %v718_v12 = vadd.f32 %v11506_v52, %v717_v45  ;;  %v6830_v38 = vunpack.c.l.b16 %v5376_v26  ;;  %v11696_v23 = vld [vmem:[#allocation2 + $0x68] sm:$0x1]  ;;  %v10130_v30 = vld [vmem:[#allocation2 + $0x90] sm:$0xff]  ;;  %v3151_v26 = vld [vmem:[#allocation2 + $0x3c] sm:$0xf] }
 0x1aa   : > { %v1499_v56 = vor.u32 %v1497_v24, %v11683_v19  ;;  %v1487_v48 = vrot.slane %v1485_v54, 7  ;;  %v6831_v44 = vunpack.c.l.b16 %v5379_v27  ;;  %v4216_v4 = vrot.slane %v4214_v61, 4 }
 0x1ab   : > { %v4215_v60 = vsel %vm10972_vm11, %v9416_v8, %v4214_v61  ;;  %v4217_v14 = vrot.slane %v3218_v57, 5  ;;  %v837_v5 = vmax.f32 %v718_v12, 0.0  ;;  %v3427_v24 = vshll.u32 %v11696_v23, 16 }
 0x1ac   : > { %v1880_v42 = vsel %vm10845_vm3, %v1499_v56, %v1879_v49  ;;  %v1490_v6 = vor.u32 %v1488_v31, %v1487_v48  ;;  %v1492_v13 = vrot.slane %v1487_v48, 4  ;;  %v6891_v15 = vpack.c.b16 %v6831_v44, %v6830_v38  ;;  %v10447_v48 = vld [vmem:[#allocation2 + $0x40] sm:$0xf] }
 0x1ad   : > { %v6283_v58 = vpack.c.b16 %v6223_v59, %v6222_v35  ;;  %1881 = vst [vmem:[#allocation2 + $0x15c] sm:$0xf] %v1880_v42  ;;  %6154 = vrot.lane.b32.xlu2 %v10089_v34, %s10632_s18  ;;  %v4218_v20 = vsel %vm10972_vm11, %v4216_v4, %v4217_v14  ;;  %v901_v45 = vpack.c.bf16 %v837_v5, %v837_v5  ;;  %v6334_v54 = vunpack.c.l.b16 %v4215_v60  ;;  %v1925_v35 = vld [vmem:[#allocation2 + $0x18] sm:$0xf]  ;;  %v11707_v59 = vld [vmem:[#allocation2 + $0x68] sm:$0x1]  ;;  %v6607_v14 = vpop.permute.xlu1 %6606 }
 0x1ae   : > { %v1491_v9 = vsel %vm10918_vm6, %v1483_v36, %v1490_v6  ;;  %v1877_v57 = vsel %vm10945_vm8, %v1492_v13, %v1876_v29  ;;  %9928 = vmatmul.msk.bf16.gmra.mxu0 %vm6920_vm15, %v6891_v15  ;;  %v6335_v31 = vunpack.c.l.b16 %v4218_v20  ;;  %v5399_v61 = vrot.slane %v11707_v59, 5  ;;  %v782_v36 = vpop.f32.mrf.mxu2 }
 0x1af   : > { %v7189_v49 = vsel %vm6920_vm15, %v6283_v58, %v6415_v7  ;;  %v1279_v27 = vrot.slane %v11669_v21, 4  ;;  %1875 = vst.msk [vmem:[#allocation2 + $0x154] sm:$0xf] %vm938_vm1, %v1491_v9  ;;  %v1281_v8 = vshrl.u32 %v901_v45, 16  ;;  %6620 = vrot.lane.b32.xlu1 %v10130_v30, %s10631_s17  ;;  %v3336_v56 = vshrl.u32 %v3151_v26, 16 }
 0x1b0   : > { %1878 = vst [vmem:[#allocation2 + $0x158] sm:$0x1] %v1877_v57  ;;  %v6387_v12 = vpack.c.b16 %v6335_v31, %v6334_v54  ;;  %v3345_v38 = vshll.u32 %v10447_v48, 16  ;;  %v783_v44 = vadd.f32 %v11506_v52, %v782_v36  ;;  %v1284_v34 = vshll.u32 %v901_v45, 16  ;;  %v1792_v21 = vld [vmem:[#allocation2 + $0xb0] sm:$0x1] }
 0x1b1   : > { %v1283_v29 = vrot.slane %v1281_v8, 7  ;;  %v2069_v60 = vshrl.u32 %v1925_v35, 16  ;;  %v2072_v4 = vshll.u32 %v1925_v35, 16  ;;  %v3339_v5 = vshll.u32 %v3151_v26, 16  ;;  %v4380_v35 = vld [vmem:[#allocation2 + $0x90] sm:$0xf] }
 0x1b2   : > { %6430 = vrot.lane.b32.xlu0 %v6387_v12, %s10630_s14  ;;  %v863_v7 = vmax.f32 %v783_v44, 0.0  ;;  %v2078_v42 = vshll.u32 %v11588_v55, 16  ;;  %v2082_v6 = vshrl.u32 %v11588_v55, 16  ;;  %v3351_v58 = vrot.slane %v3349_v28, 4  ;;  %v4381_v8 = vld [vmem:[#allocation2 + $0x94] sm:$0xf] }
 0x1b3   : > { %v1286_v13 = vor.u32 %v1284_v34, %v1283_v29  ;;  %v1288_v15 = vrot.slane %v1283_v29, 4  ;;  %v2071_v20 = vrot.slane %v2069_v60, 4  ;;  %v11720_v30 = vrot.slane %v3345_v38, 5 }
 0x1b4   : > { %v927_v45 = vpack.c.bf16 %v863_v7, %v863_v7  ;;  %v2074_v9 = vrot.slane %v2072_v4, 5  ;;  %v2080_v57 = vrot.slane %v2078_v42, 5  ;;  %v7281_v54 = vsel %vm544_vm0, %v7189_v49, %v6607_v14  ;;  %v1883_v4 = vld [vmem:[#allocation2 + $0x164] sm:$0x1] }
 0x1b5   : > { %v1287_v26 = vsel %vm10918_vm6, %v1279_v27, %v1286_v13  ;;  %v1793_v31 = vsel %vm10945_vm8, %v1288_v15, %v1792_v21  ;;  %v2084_v55 = vrot.slane %v2082_v6, 4  ;;  %v1500_v63 = vrot.slane %v11683_v19, 4  ;;  %v4434_v6 = vld [vmem:[#allocation2 + $0x98] sm:$0x1] }
 0x1b6   : > { %1791 = vst.msk [vmem:[#allocation2 + $0xac] sm:$0xf] %vm938_vm1, %v1287_v26  ;;  %v11729_v28 = vrot.slane %v3336_v56, 4  ;;  %v1502_v36 = vshrl.u32 %v927_v45, 16  ;;  %v1505_v12 = vshll.u32 %v927_v45, 16  ;;  %v11731_v48 = vrot.slane %v3339_v5, 5 }
 0x1b7   : > { %1794 = vst [vmem:[#allocation2 + $0xb0] sm:$0x1] %v1793_v31  ;;  %v2075_v49 = vor.u32 %v2074_v9, %v2071_v20  ;;  %v2085_v38 = vor.u32 %v2084_v55, %v2080_v57  ;;  %v2088_v27 = vshll.u32 %v11592_v41, 16  ;;  %v3352_v44 = vor.u32 %v3351_v58, %v11720_v30  ;;  %v11749_v55 = vld [vmem:[#allocation2 + $0x34] sm:$0xf] }
 0x1b8   : > { %v1504_v29 = vrot.slane %v1502_v36, 7  ;;  %v4697_v34 = vshrl.u32 %v4380_v35, 16  ;;  %v4700_v60 = vshll.u32 %v4380_v35, 16  ;;  %v4706_v56 = vshll.u32 %v4381_v8, 16  ;;  %v11751_v35 = vld [vmem:[#allocation2 + $0x38] sm:$0x1] }
 0x1b9   : > { %v2076_v19 = vrot.slane %v2075_v49, 4  ;;  %v2086_v14 = vrot.slane %v2085_v38, 4  ;;  %v2090_v21 = vrot.slane %v2088_v27, 5  ;;  %v3342_v15 = vor.u32 %v11731_v48, %v11729_v28  ;;  %v720_v38 = vpop.f32.mrf.mxu0 }
 0x1ba   : > { %v1507_v7 = vor.u32 %v1505_v12, %v1504_v29  ;;  %v1509_v42 = vrot.slane %v1504_v29, 4  ;;  %v4699_v13 = vrot.slane %v4697_v34, 4  ;;  %v4702_v5 = vrot.slane %v4700_v60, 5  ;;  %v5247_v60 = vld [vmem:[#allocation2 + $0x144] sm:$0xe] }
 0x1bb   : > { %v11739_v41 = vrot.slane %v3355_v51, 5  ;;  %v2081_v58 = vsel %vm10985_vm14, %v2076_v19, %v2080_v57  ;;  %v2091_v20 = vsel %vm10985_vm14, %v2086_v14, %v2090_v21  ;;  %v6767_v51 = vpop.permute.xlu2 %6766  ;;  %v4708_v36 = vrot.slane %v4706_v56, 5  ;;  %v4407_v56 = vld [vmem:[#allocation2 + $0x148] sm:$0xf] }
 0x1bc   : > { %v1508_v45 = vsel %vm10918_vm6, %v1500_v63, %v1507_v7  ;;  %v1884_v9 = vsel %vm10945_vm8, %v1509_v42, %v1883_v4  ;;  %v5708_v26 = vunpack.c.l.b16 %v2081_v58  ;;  %v5709_v31 = vunpack.c.l.b16 %v2091_v20  ;;  %v785_v7 = vpop.f32.mrf.mxu2 }
 0x1bd   : > { %1882 = vst.msk [vmem:[#allocation2 + $0x160] sm:$0xf] %vm938_vm1, %v1508_v45  ;;  %v4703_v57 = vor.u32 %v4702_v5, %v4699_v13  ;;  %v4710_v12 = vshrl.u32 %v4381_v8, 16  ;;  %v4716_v49 = vshll.u32 %v4434_v6, 16  ;;  %v11754_v27 = vrot.slane %v3352_v44, 4 }
 0x1be   : > { %1885 = vst [vmem:[#allocation2 + $0x164] sm:$0x1] %v1884_v9  ;;  %v5770_v63 = vpack.c.b16 %v5709_v31, %v5708_v26  ;;  %v7348_v29 = vsel %vm7081_vm2, %v7281_v54, %v6767_v51  ;;  %v721_v34 = vadd.f32 %v11506_v52, %v720_v38  ;;  %v9377_v14 = vrot.slane %v2792_v53, 9  ;;  %v4447_v54 = vld [vmem:[#allocation2 + $0x14c] sm:$0x1] }
 0x1bf   : > { %v4704_v4 = vrot.slane %v4703_v57, 4  ;;  %v4712_v19 = vrot.slane %v4710_v12, 4  ;;  %7870 = vmatmul.bf16.gmra.mxu2 %v7348_v29  ;;  %v2949_v21 = vrot.slane %v11749_v55, 5  ;;  %v4718_v8 = vrot.slane %v4716_v49, 5 }
 0x1c0   : > { %5804 = vrot.lane.b32.xlu2 %v5770_v63, %s10630_s14  ;;  %v838_v44 = vmax.f32 %v721_v34, 0.0  ;;  %v2952_v42 = vrot.slane %v11751_v35, 5  ;;  %v786_v6 = vadd.f32 %v11506_v52, %v785_v7  ;;  %v9460_v20 = vrot.slane %v5247_v60, 9 }
 0x1c1   : > { %v4713_v13 = vor.u32 %v4712_v19, %v4708_v36  ;;  %v2950_v5 = vsel %vm10972_vm11, %v9377_v14, %v2949_v21  ;;  %v2951_v58 = vrot.slane %v2949_v21, 4  ;;  %v4709_v45 = vsel %vm10985_vm14, %v4704_v4, %v4708_v36  ;;  %v5228_v4 = vld [vmem:[#allocation2 + $0x48] sm:$0xe] }
 0x1c2   : > { %v902_v9 = vpack.c.bf16 %v838_v44, %v838_v44  ;;  %v5872_v26 = vunpack.c.l.b16 %v2950_v5  ;;  %v864_v31 = vmax.f32 %v786_v6, 0.0  ;;  %v5515_v57 = vrot.slane %v4407_v56, 5  ;;  %v10090_v56 = vld [vmem:[#allocation2 + $0x24] sm:$0xff]  ;;  %v4390_v44 = vld [vmem:[#allocation2 + $0xcc] sm:$0xf] }
 0x1c3   : > { %v4714_v53 = vrot.slane %v4713_v13, 4  ;;  %v2953_v51 = vsel %vm10972_vm11, %v2951_v58, %v2952_v42  ;;  %v5518_v12 = vrot.slane %v4447_v54, 5  ;;  %v6684_v34 = vunpack.c.l.b16 %v4709_v45  ;;  %v1795_v6 = vld [vmem:[#allocation2 + $0xb4] sm:$0xf]  ;;  %v4391_v5 = vld [vmem:[#allocation2 + $0xd0] sm:$0xf] }
 0x1c4   : > { %v1290_v52 = vshrl.u32 %v902_v9, 16  ;;  %v1293_v49 = vshll.u32 %v902_v9, 16  ;;  %v5873_v38 = vunpack.c.l.b16 %v2953_v51  ;;  %v928_v63 = vpack.c.bf16 %v864_v31, %v864_v31  ;;  %v10159_v58 = vld [vmem:[%s15122_s3 + $0x38] sm:$0xff]  ;;  %v10448_v31 = vld [vmem:[#allocation2 + $0x4c] sm:$0xf] }
 0x1c5   : > { %v4719_v29 = vsel %vm10985_vm14, %v4714_v53, %v4718_v8  ;;  %v5516_v36 = vsel %vm10972_vm11, %v9460_v20, %v5515_v57  ;;  %v5517_v60 = vrot.slane %v5515_v57, 4  ;;  %v3358_v42 = vsel %vm10985_vm14, %v11754_v27, %v11739_v41  ;;  %v1886_v41 = vld [vmem:[#allocation2 + $0x168] sm:$0xf]  ;;  %7678 = vmatpush.bf16.msrb.mxu1 %v10159_v58  ;;  %v10131_v58 = vld [vmem:[#allocation2 + $0x9c] sm:$0xff] }
 0x1c6   : > { %v6685_v19 = vunpack.c.l.b16 %v4719_v29  ;;  %v11772_v14 = vrot.slane %v1290_v52, 7  ;;  %v5932_v21 = vpack.c.b16 %v5873_v38, %v5872_v26  ;;  %v1511_v7 = vshrl.u32 %v928_v63, 16  ;;  %v4439_v38 = vld [vmem:[#allocation2 + $0xd4] sm:$0x1] }
 0x1c7   : > { %v1514_v8 = vshll.u32 %v928_v63, 16  ;;  %v5519_v54 = vsel %vm10972_vm11, %v5517_v60, %v5518_v12  ;;  %v6870_v13 = vunpack.c.l.b16 %v5516_v36  ;;  %v9441_v26 = vrot.slane %v5228_v4, 9  ;;  %v722_v4 = vpop.f32.mrf.mxu0 }
 0x1c8   : > { %v6738_v20 = vpack.c.b16 %v6685_v19, %v6684_v34  ;;  %v1295_v45 = vor.u32 %v1293_v49, %v11772_v14  ;;  %5968 = vrot.lane.b32.xlu1 %v5932_v21, %s10631_s17  ;;  %v11785_v9 = vrot.slane %v1511_v7, 7  ;;  %6156 = vrot.lane.b32.xlu2 %v10090_v56, %s10632_s18  ;;  %v6871_v27 = vunpack.c.l.b16 %v5519_v54  ;;  %v3153_v21 = vld [vmem:[#allocation2 + $0x48] sm:$0xf]  ;;  %v11812_v54 = vld [vmem:[%s15121_s2] ss:$0 sm:$0xff] }
 0x1c9   : > { %v5382_v53 = vrot.slane %v10448_v31, 5  ;;  %v4817_v51 = vshrl.u32 %v4390_v44, 16  ;;  %v4820_v57 = vshll.u32 %v4390_v44, 16  ;;  %v3343_v12 = vrot.slane %v3342_v15, 4 }
 0x1ca   : > { %6780 = vrot.lane.b32.xlu0 %v6738_v20, %s10632_s18  ;;  %v1796_v52 = vsel %vm10845_vm3, %v1295_v45, %v1795_v6  ;;  %v1516_v49 = vor.u32 %v1514_v8, %v11785_v9  ;;  %v4826_v63 = vshll.u32 %v4391_v5, 16  ;;  %v6911_v29 = vpack.c.b16 %v6871_v27, %v6870_v13 }
 0x1cb   : > { %1797 = vst [vmem:[#allocation2 + $0xb4] sm:$0xf] %v1796_v52  ;;  %v5383_v34 = vsel %vm10972_vm11, %v9441_v26, %v5382_v53  ;;  %v5384_v36 = vrot.slane %v5382_v53, 4  ;;  %v4819_v60 = vrot.slane %v4817_v51, 4  ;;  %v3348_v28 = vsel %vm10985_vm14, %v3343_v12, %v11720_v30  ;;  %v10158_v53 = vld [vmem:[%s15122_s3 + $0x30] sm:$0xff] }
 0x1cc   : > { %v11800_v48 = vunpack.c.l.b16 %v3358_v42  ;;  %v1887_v15 = vsel %vm10845_vm3, %v1516_v49, %v1886_v41  ;;  %v4822_v19 = vrot.slane %v4820_v57, 5  ;;  %9948 = vmatmul.msk.bf16.vlgmr.msra.gmra.mxu3 %vm6920_vm15, %v6911_v29  ;;  %v4828_v56 = vrot.slane %v4826_v63, 5  ;;  %v11815_v41 = vld [vmem:[#allocation2 + $0x70] sm:$0xf]  ;;  %v11822_v51 = vld [vmem:[#allocation2 + $0x74] sm:$0x1]  ;;  %7679 = vmatpush.bf16.msrb.mxu1 %v10158_v53 }
 0x1cd   : > { %1888 = vst [vmem:[#allocation2 + $0x168] sm:$0xf] %v1887_v15  ;;  %v5386_v7 = vsel %vm10972_vm11, %v5384_v36, %v5385_v2  ;;  %v4830_v44 = vshrl.u32 %v4391_v5, 16  ;;  %v4836_v6 = vshll.u32 %v4439_v38, 16  ;;  %v6832_v8 = vunpack.c.l.b16 %v5383_v34  ;;  %v787_v38 = vpop.f32.mrf.mxu2  ;;  %v1927_v63 = vld [vmem:[#allocation2 + $0x24] sm:$0xf] }
 0x1ce   : > { %v6833_v30 = vunpack.c.l.b16 %v5386_v7  ;;  %v4823_v42 = vor.u32 %v4822_v19, %v4819_v60  ;;  %v723_v13 = vadd.f32 %v11812_v54, %v722_v4  ;;  %v6224_v20 = vunpack.c.l.b16 %v3348_v28  ;;  %v11826_v29 = vld [vmem:[#allocation2 + $0x74] sm:$0x1]  ;;  %v10453_v19 = vld [vmem:[#allocation2 + $0x4c] sm:$0xf] }
 0x1cf   : > { %v4832_v45 = vrot.slane %v4830_v44, 4  ;;  %v3360_v1 = vshrl.u32 %v3153_v21, 16  ;;  %v3363_v26 = vshll.u32 %v3153_v21, 16  ;;  %v3445_v2 = vshrl.u32 %v11815_v41, 16 }
 0x1d0   : > { %v6892_v5 = vpack.c.b16 %v6833_v30, %v6832_v8  ;;  %v4824_v27 = vrot.slane %v4823_v42, 4  ;;  %v839_v31 = vmax.f32 %v723_v13, 0.0  ;;  %6622 = vrot.lane.b32.xlu1 %v10131_v58, %s10631_s17  ;;  %v3451_v57 = vshll.u32 %v11822_v51, 16  ;;  %v10135_v30 = vld [vmem:[#allocation2 + $0xcc] sm:$0xff] }
 0x1d1   : > { %v6284_v12 = vpack.c.b16 %v11800_v48, %v6224_v20  ;;  %v4833_v52 = vor.u32 %v4832_v45, %v4828_v56  ;;  %v4838_v49 = vrot.slane %v4836_v6, 5  ;;  %v5406_v34 = vrot.slane %v11826_v29, 5  ;;  %v6417_v20 = vpop.permute.xlu0 %6416 }
 0x1d2   : > { %9929 = vmatmul.msk.bf16.gmra.mxu0 %vm6920_vm15, %v6892_v5  ;;  %v4829_v36 = vsel %vm10985_vm14, %v4824_v27, %v4828_v56  ;;  %v903_v60 = vpack.c.bf16 %v839_v31, %v839_v31  ;;  %v788_v4 = vadd.f32 %v11812_v54, %v787_v38  ;;  %v3362_v15 = vrot.slane %v3360_v1, 4 }
 0x1d3   : > { %v4834_v28 = vrot.slane %v4833_v52, 4  ;;  %v3365_v48 = vrot.slane %v3363_v26, 5  ;;  %v3369_v21 = vshll.u32 %v10453_v19, 16  ;;  %v6694_v7 = vunpack.c.l.b16 %v4829_v36  ;;  %v1799_v26 = vld [vmem:[#allocation2 + $0xbc] sm:$0x1] }
 0x1d4   : > { %v1298_v44 = vshrl.u32 %v903_v60, 16  ;;  %v865_v6 = vmax.f32 %v788_v4, 0.0  ;;  %v2093_v8 = vshrl.u32 %v1927_v63, 16  ;;  %v1296_v42 = vrot.slane %v11772_v14, 4  ;;  %v6609_v4 = vpop.permute.xlu1 %6608 }
 0x1d5   : > { %v4839_v13 = vsel %vm10985_vm14, %v4834_v28, %v4838_v49  ;;  %v1301_v56 = vshll.u32 %v903_v60, 16  ;;  %v2096_v58 = vshll.u32 %v1927_v63, 16  ;;  %v11836_v31 = vrot.slane %v3369_v21, 5 }
 0x1d6   : > { %v6695_v45 = vunpack.c.l.b16 %v4839_v13  ;;  %v1300_v5 = vrot.slane %v1298_v44, 7  ;;  %v929_v27 = vpack.c.bf16 %v865_v6, %v865_v6  ;;  %v2095_v1 = vrot.slane %v2093_v8, 4  ;;  %v4019_v6 = vld [vmem:[#allocation2 + $0x9c] sm:$0xe] }
 0x1d7   : > { %v11840_v53 = vrot.slane %v3373_v10, 4  ;;  %v2098_v52 = vrot.slane %v2096_v58, 5  ;;  %v2102_v14 = vshll.u32 %v11645_v18, 16  ;;  %v3366_v60 = vor.u32 %v3365_v48, %v3362_v15  ;;  %v3168_v48 = vld [vmem:[#allocation2 + $0xa0] sm:$0xf] }
 0x1d8   : > { %v6743_v38 = vpack.c.b16 %v6695_v45, %v6694_v7  ;;  %v1303_v36 = vor.u32 %v1301_v56, %v1300_v5  ;;  %v1305_v49 = vrot.slane %v1300_v5, 4  ;;  %6630 = vrot.lane.b32.xlu1 %v10135_v30, %s10631_s17  ;;  %v7192_v63 = vsel %vm6920_vm15, %v6284_v12, %v6417_v20  ;;  %v1890_v7 = vld [vmem:[#allocation2 + $0x170] sm:$0x1] }
 0x1d9   : > { %v1519_v28 = vshrl.u32 %v929_v27, 16  ;;  %v1522_v19 = vshll.u32 %v929_v27, 16  ;;  %v2099_v21 = vor.u32 %v2098_v52, %v2095_v1  ;;  %v2104_v44 = vrot.slane %v2102_v14, 5  ;;  %v4409_v1 = vld [vmem:[#allocation2 + $0x154] sm:$0xf] }
 0x1da   : > { %6790 = vrot.lane.b32.xlu0 %v6743_v38, %s10632_s18  ;;  %v1304_v3 = vsel %vm10918_vm6, %v1296_v42, %v1303_v36  ;;  %v1800_v10 = vsel %vm10945_vm8, %v1305_v49, %v1799_v26  ;;  %v2106_v15 = vshrl.u32 %v11645_v18, 16  ;;  %v1517_v12 = vrot.slane %v11785_v9, 4  ;;  %v3219_v18 = vld [vmem:[#allocation2 + $0xa4] sm:$0x1]  ;;  %v6769_v26 = vpop.permute.xlu2 %6768  ;;  %v5248_v49 = vld [vmem:[#allocation2 + $0x150] sm:$0xe] }
 0x1db   : > { %1798 = vst.msk [vmem:[#allocation2 + $0xb8] sm:$0xf] %vm938_vm1, %v1304_v3  ;;  %v1521_v8 = vrot.slane %v1519_v28, 7  ;;  %v2100_v30 = vrot.slane %v2099_v21, 4  ;;  %v2112_v13 = vshll.u32 %v11649_v43, 16  ;;  %v7283_v56 = vsel %vm544_vm0, %v7192_v63, %v6609_v4  ;;  %v10157_v43 = vld [vmem:[%s15122_s3 + $0x28] sm:$0xff] }
 0x1dc   : > { %1801 = vst [vmem:[#allocation2 + $0xbc] sm:$0x1] %v1800_v10  ;;  %v11855_v42 = vrot.slane %v3366_v60, 4  ;;  %v3376_v58 = vor.u32 %v11840_v53, %v11836_v31  ;;  %v2108_v20 = vrot.slane %v2106_v15, 4  ;;  %v9417_v27 = vrot.slane %v4019_v6, 9  ;;  %v10132_v53 = vld [vmem:[#allocation2 + $0xa8] sm:$0xff]  ;;  %7680 = vmatpush.bf16.msrb.mxu1 %v10157_v43 }
 0x1dd   : > { %v1524_v45 = vor.u32 %v1522_v19, %v1521_v8  ;;  %v1526_v5 = vrot.slane %v1521_v8, 4  ;;  %v2105_v9 = vsel %vm10985_vm14, %v2100_v30, %v2104_v44  ;;  %v2114_v14 = vrot.slane %v2112_v13, 5  ;;  %v725_v19 = vpop.f32.mrf.mxu0  ;;  %v4448_v21 = vld [vmem:[#allocation2 + $0x158] sm:$0x1] }
 0x1de   : > { %v2109_v52 = vor.u32 %v2108_v20, %v2104_v44  ;;  %v5710_v38 = vunpack.c.l.b16 %v2105_v9  ;;  %v4221_v36 = vrot.slane %v3168_v48, 5  ;;  %v4224_v4 = vrot.slane %v3219_v18, 5  ;;  %v790_v48 = vpop.f32.mrf.mxu2  ;;  %v5229_v18 = vld [vmem:[#allocation2 + $0x54] sm:$0xe] }
 0x1df   : > { %v1525_v60 = vsel %vm10918_vm6, %v1517_v12, %v1524_v45  ;;  %v1891_v63 = vsel %vm10945_vm8, %v1526_v5, %v1890_v7  ;;  %v7351_v28 = vsel %vm7081_vm2, %v7283_v56, %v6769_v26  ;;  %v726_v15 = vadd.f32 %v11812_v54, %v725_v19 }
 0x1e0   : > { %1889 = vst.msk [vmem:[#allocation2 + $0x16c] sm:$0xf] %vm938_vm1, %v1525_v60  ;;  %v2110_v3 = vrot.slane %v2109_v52, 4  ;;  %v4222_v10 = vsel %vm10972_vm11, %v9417_v27, %v4221_v36  ;;  %v4223_v44 = vrot.slane %v4221_v36, 4  ;;  %7875 = vmatmul.bf16.gmra.mxu2 %v7351_v28  ;;  %6624 = vrot.lane.b32.xlu1 %v10132_v53, %s10631_s17  ;;  %v791_v6 = vadd.f32 %v11812_v54, %v790_v48  ;;  %v4382_v36 = vld [vmem:[#allocation2 + $0x9c] sm:$0xf] }
 0x1e1   : > { %1892 = vst [vmem:[#allocation2 + $0x170] sm:$0x1] %v1891_v63  ;;  %v6336_v7 = vunpack.c.l.b16 %v4222_v10  ;;  %v9461_v12 = vrot.slane %v5248_v49, 9  ;;  %v5522_v8 = vrot.slane %v4409_v1, 5  ;;  %v840_v56 = vmax.f32 %v726_v15, 0.0 }
 0x1e2   : > { %v2115_v30 = vsel %vm10985_vm14, %v2110_v3, %v2114_v14  ;;  %v4225_v13 = vsel %vm10972_vm11, %v4223_v44, %v4224_v4  ;;  %v5525_v20 = vrot.slane %v4448_v21, 5  ;;  %v866_v9 = vmax.f32 %v791_v6, 0.0  ;;  %v10156_v14 = vld [vmem:[%s15122_s3 + $0x20] sm:$0xff]  ;;  %v10454_v21 = vld [vmem:[#allocation2 + $0x58] sm:$0xf] }
 0x1e3   : > { %v5711_v45 = vunpack.c.l.b16 %v2115_v30  ;;  %v6337_v5 = vunpack.c.l.b16 %v4225_v13  ;;  %v5523_v27 = vsel %vm10972_vm11, %v9461_v12, %v5522_v8  ;;  %v11881_v43 = vrot.slane %v3376_v58, 4  ;;  %7681 = vmatpush.bf16.msrb.mxu1 %v10156_v14  ;;  %v4383_v6 = vld [vmem:[#allocation2 + $0xa0] sm:$0xf]  ;;  %v3155_v14 = vld [vmem:[#allocation2 + $0x54] sm:$0xf] }
 0x1e4   : > { %v904_v26 = vpack.c.bf16 %v840_v56, %v840_v56  ;;  %v5524_v52 = vrot.slane %v5522_v8, 4  ;;  %v6872_v1 = vunpack.c.l.b16 %v5523_v27  ;;  %v930_v60 = vpack.c.bf16 %v866_v9, %v866_v9  ;;  %v1802_v30 = vld [vmem:[#allocation2 + $0xc0] sm:$0xf] }
 0x1e5   : > { %v5771_v49 = vpack.c.b16 %v5711_v45, %v5710_v38  ;;  %v6388_v53 = vpack.c.b16 %v6337_v5, %v6336_v7  ;;  %v9442_v63 = vrot.slane %v5229_v18, 9  ;;  %v5389_v58 = vrot.slane %v10454_v21, 5  ;;  %v1893_v5 = vld [vmem:[#allocation2 + $0x174] sm:$0xf] }
 0x1e6   : > { %v1307_v4 = vshrl.u32 %v904_v26, 16  ;;  %v1310_v28 = vshll.u32 %v904_v26, 16  ;;  %v5526_v19 = vsel %vm10972_vm11, %v5524_v52, %v5525_v20  ;;  %v1528_v3 = vshrl.u32 %v930_v60, 16 }
 0x1e7   : > { %5806 = vrot.lane.b32.xlu2 %v5771_v49, %s10630_s14  ;;  %6432 = vrot.lane.b32.xlu0 %v6388_v53, %s10630_s14  ;;  %v1531_v10 = vshll.u32 %v930_v60, 16  ;;  %v6873_v44 = vunpack.c.l.b16 %v5526_v19  ;;  %v4721_v15 = vshrl.u32 %v4382_v36, 16  ;;  %v5390_v48 = vsel %vm10972_vm11, %v9442_v63, %v5389_v58  ;;  %v10091_v53 = vld [vmem:[#allocation2 + $0x30] sm:$0xff] }
 0x1e8   : > { %v11890_v38 = vrot.slane %v1307_v4, 7  ;;  %v5391_v7 = vrot.slane %v5389_v58, 4  ;;  %v4724_v12 = vshll.u32 %v4382_v36, 16  ;;  %v3381_v8 = vrot.slane %v3379_v22, 5  ;;  %v727_v4 = vpop.f32.mrf.mxu0 }
 0x1e9   : > { %v11896_v13 = vrot.slane %v1528_v3, 7  ;;  %v6912_v56 = vpack.c.b16 %v6873_v44, %v6872_v1  ;;  %v4723_v20 = vrot.slane %v4721_v15, 4  ;;  %v3372_v18 = vsel %vm10985_vm14, %v11855_v42, %v11836_v31 }
 0x1ea   : > { %v1312_v45 = vor.u32 %v1310_v28, %v11890_v38  ;;  %v5393_v9 = vsel %vm10972_vm11, %v5391_v7, %v5392_v16  ;;  %v4726_v22 = vrot.slane %v4724_v12, 5  ;;  %v6834_v26 = vunpack.c.l.b16 %v5390_v48  ;;  %v10155_v28 = vld [vmem:[%s15122_s3 + $0x18] sm:$0xff]  ;;  %v1929_v12 = vld [vmem:[#allocation2 + $0x30] sm:$0xf] }
 0x1eb   : > { %v1533_v27 = vor.u32 %v1531_v10, %v11896_v13  ;;  %9949 = vmatmul.msk.bf16.gmra.mxu3 %vm6920_vm15, %v6912_v56  ;;  %v6835_v52 = vunpack.c.l.b16 %v5393_v9  ;;  %v4730_v1 = vshll.u32 %v4383_v6, 16  ;;  %v3382_v31 = vsel %vm10985_vm14, %v11881_v43, %v3381_v8  ;;  %v11919_v43 = vld [vmem:[#allocation2 + $0x7c] sm:$0xf]  ;;  %v11923_v10 = vld [vmem:[#allocation2 + $0x80] sm:$0x1]  ;;  %7682 = vmatpush.bf16.msrb.mxu1 %v10155_v28 }
 0x1ec   : > { %v1803_v42 = vsel %vm10845_vm3, %v1312_v45, %v1802_v30  ;;  %v4727_v32 = vor.u32 %v4726_v22, %v4723_v20  ;;  %v4734_v36 = vshrl.u32 %v4383_v6, 16  ;;  %v4740_v63 = vshll.u32 %v4435_v39, 16  ;;  %v10457_v7 = vld [vmem:[#allocation2 + $0x58] sm:$0xf]  ;;  %v792_v22 = vpop.f32.mrf.mxu2 }
 0x1ed   : > { %1804 = vst [vmem:[#allocation2 + $0xc0] sm:$0xf] %v1803_v42  ;;  %v1894_v16 = vsel %vm10845_vm3, %v1533_v27, %v1893_v5  ;;  %v6893_v49 = vpack.c.b16 %v6835_v52, %v6834_v26  ;;  %v4732_v60 = vrot.slane %v4730_v1, 5  ;;  %v3469_v19 = vshrl.u32 %v11919_v43, 16  ;;  %v10154_v27 = vld [vmem:[%s15122_s3 + $0x10] sm:$0xff] }
 0x1ee   : > { %1895 = vst [vmem:[#allocation2 + $0x174] sm:$0xf] %v1894_v16  ;;  %v4728_v21 = vrot.slane %v4727_v32, 4  ;;  %v4736_v58 = vrot.slane %v4734_v36, 4  ;;  %v728_v3 = vadd.f32 %v11812_v54, %v727_v4  ;;  %v3475_v44 = vshll.u32 %v11923_v10, 16 }
 0x1ef   : > { %9930 = vmatmul.msk.bf16.gmra.mxu0 %vm6920_vm15, %v6893_v49  ;;  %6158 = vrot.lane.b32.xlu2 %v10091_v53, %s10632_s18  ;;  %v3384_v15 = vshrl.u32 %v3155_v14, 16  ;;  %v3387_v48 = vshll.u32 %v3155_v14, 16  ;;  %v3393_v6 = vshll.u32 %v10457_v7, 16  ;;  %v6226_v8 = vunpack.c.l.b16 %v3372_v18  ;;  %v6419_v14 = vpop.permute.xlu0 %6418  ;;  %v12400_v10 = vld [vmem:[#allocation2 + $0x110] sm:$0x1] }
 0x1f0   : > { %v6227_v30 = vunpack.c.l.b16 %v3382_v31  ;;  %v4737_v56 = vor.u32 %v4736_v58, %v4732_v60  ;;  %v841_v20 = vmax.f32 %v728_v3, 0.0  ;;  %v4733_v45 = vsel %vm10985_vm14, %v4728_v21, %v4732_v60  ;;  %7683 = vmatpush.bf16.msrb.mxu1 %v10154_v27  ;;  %15161 = vst [vmem:[#allocation8_spill] sm:$0xff] %v12400_v10 }
 0x1f1   : > { %v4742_v5 = vrot.slane %v4740_v63, 5  ;;  %v3386_v9 = vrot.slane %v3384_v15, 4  ;;  %v3399_v39 = vrot.slane %v3397_v46, 4  ;;  %v793_v18 = vadd.f32 %v11812_v54, %v792_v22 }
 0x1f2   : > { %v4738_v26 = vrot.slane %v4737_v56, 4  ;;  %v905_v52 = vpack.c.bf16 %v841_v20, %v841_v20  ;;  %v2117_v1 = vshrl.u32 %v1929_v12, 16  ;;  %v3389_v31 = vrot.slane %v3387_v48, 5  ;;  %v6611_v48 = vpop.permute.xlu1 %6610  ;;  %v6771_v20 = vpop.permute.xlu2 %6770 }
 0x1f3   : > { %v11936_v42 = vrot.slane %v3393_v6, 5  ;;  %v2120_v32 = vshll.u32 %v1929_v12, 16  ;;  %v2126_v36 = vshll.u32 %v11749_v55, 16  ;;  %v867_v49 = vmax.f32 %v793_v18, 0.0  ;;  %v1806_v6 = vld [vmem:[#allocation2 + $0xc8] sm:$0x1] }
 0x1f4   : > { %v4743_v17 = vsel %vm10985_vm14, %v4738_v26, %v4742_v5  ;;  %v1315_v46 = vshrl.u32 %v905_v52, 16  ;;  %v1318_v16 = vshll.u32 %v905_v52, 16  ;;  %v6285_v53 = vpack.c.b16 %v6227_v30, %v6226_v8  ;;  %v3170_v52 = vld [vmem:[#allocation2 + $0xac] sm:$0xf] }
 0x1f5   : > { %v6686_v60 = vunpack.c.l.b16 %v4733_v45  ;;  %v6687_v63 = vunpack.c.l.b16 %v4743_v17  ;;  %v2119_v4 = vrot.slane %v2117_v1, 4  ;;  %v1313_v28 = vrot.slane %v11890_v38, 4 }
 0x1f6   : > { %v1317_v21 = vrot.slane %v1315_v46, 7  ;;  %v931_v58 = vpack.c.bf16 %v867_v49, %v867_v49  ;;  %v2122_v3 = vrot.slane %v2120_v32, 5  ;;  %v7195_v15 = vsel %vm6920_vm15, %v6285_v53, %v6419_v14  ;;  %v1897_v32 = vld [vmem:[#allocation2 + $0x17c] sm:$0x1] }
 0x1f7   : > { %v6739_v7 = vpack.c.b16 %v6687_v63, %v6686_v60  ;;  %v2128_v12 = vrot.slane %v2126_v36, 5  ;;  %v2130_v56 = vshrl.u32 %v11749_v55, 16  ;;  %v3390_v8 = vor.u32 %v3389_v31, %v3386_v9  ;;  %v3220_v31 = vld [vmem:[#allocation2 + $0xb0] sm:$0x1] }
 0x1f8   : > { %v1320_v5 = vor.u32 %v1318_v16, %v1317_v21  ;;  %v1322_v22 = vrot.slane %v1317_v21, 4  ;;  %v3400_v30 = vor.u32 %v3399_v39, %v11936_v42  ;;  %v1536_v38 = vshrl.u32 %v931_v58, 16  ;;  %v4020_v39 = vld [vmem:[#allocation2 + $0xa8] sm:$0xe]  ;;  %v11964_v21 = vld [vmem:[#allocation2 + $0x40] sm:$0xf] }
 0x1f9   : > { %6782 = vrot.lane.b32.xlu0 %v6739_v7, %s10632_s18  ;;  %v1539_v45 = vshll.u32 %v931_v58, 16  ;;  %v2123_v27 = vor.u32 %v2122_v3, %v2119_v4  ;;  %v2132_v26 = vrot.slane %v2130_v56, 4  ;;  %v7285_v18 = vsel %vm544_vm0, %v7195_v15, %v6611_v48  ;;  %v10153_v58 = vld [vmem:[%s15122_s3 + $0x8] sm:$0xff] }
 0x1fa   : > { %v1321_v1 = vsel %vm10918_vm6, %v1313_v28, %v1320_v5  ;;  %v1807_v55 = vsel %vm10945_vm8, %v1322_v22, %v1806_v6  ;;  %v2136_v9 = vshll.u32 %v11751_v35, 16  ;;  %v1534_v36 = vrot.slane %v11896_v13, 4  ;;  %v2793_v35 = vld [vmem:[#allocation2 + $0x3c] sm:$0xe]  ;;  %v730_v5 = vpop.f32.mrf.mxu0  ;;  %v4411_v22 = vld [vmem:[#allocation2 + $0x160] sm:$0xf]  ;;  %7684 = vmatpush.bf16.msrb.mxu1 %v10153_v58 }
 0x1fb   : > { %1805 = vst.msk [vmem:[#allocation2 + $0xc4] sm:$0xf] %vm938_vm1, %v1321_v1  ;;  %v1538_v14 = vrot.slane %v1536_v38, 7  ;;  %v2124_v17 = vrot.slane %v2123_v27, 4  ;;  %v2133_v46 = vor.u32 %v2132_v26, %v2128_v12  ;;  %v11954_v16 = vrot.slane %v3390_v8, 4  ;;  %v11978_v8 = vpop.permute.xlu2 %6772 }
 0x1fc   : > { %1808 = vst [vmem:[#allocation2 + $0xc8] sm:$0x1] %v1807_v55  ;;  %v11956_v49 = vrot.slane %v3400_v30, 4  ;;  %v11960_v53 = vrot.slane %v3403_v37, 5  ;;  %v2138_v60 = vrot.slane %v2136_v9, 5  ;;  %v9418_v15 = vrot.slane %v4020_v39, 9  ;;  %v795_v55 = vpop.f32.mrf.mxu2 }
 0x1fd   : > { %v1541_v63 = vor.u32 %v1539_v45, %v1538_v14  ;;  %v1543_v4 = vrot.slane %v1538_v14, 4  ;;  %v2129_v13 = vsel %vm10985_vm14, %v2124_v17, %v2128_v12  ;;  %v2134_v28 = vrot.slane %v2133_v46, 4  ;;  %v11969_v37 = vld [vmem:[#allocation2 + $0x44] sm:$0x1]  ;;  %v5249_v26 = vld [vmem:[#allocation2 + $0x15c] sm:$0xe] }
 0x1fe   : > { %v5712_v3 = vunpack.c.l.b16 %v2129_v13  ;;  %v4228_v48 = vrot.slane %v3170_v52, 5  ;;  %v4231_v50 = vrot.slane %v3220_v31, 5  ;;  %v7354_v56 = vsel %vm7081_vm2, %v7285_v18, %v6771_v20 }
 0x1ff   : > { %v1542_v7 = vsel %vm10918_vm6, %v1534_v36, %v1541_v63  ;;  %v1898_v6 = vsel %vm10945_vm8, %v1543_v4, %v1897_v32  ;;  %v2139_v12 = vsel %vm10985_vm14, %v2134_v28, %v2138_v60  ;;  %7880 = vmatmul.bf16.gmra.mxu2 %v7354_v56  ;;  %v731_v27 = vadd.f32 %v11812_v54, %v730_v5  ;;  %v4449_v36 = vld [vmem:[#allocation2 + $0x164] sm:$0x1]  ;;  %v5230_v28 = vld [vmem:[#allocation2 + $0x60] sm:$0xe] }
 0x200   : > { %1896 = vst.msk [vmem:[#allocation2 + $0x178] sm:$0xf] %vm938_vm1, %v1542_v7  ;;  %v5713_v30 = vunpack.c.l.b16 %v2139_v12  ;;  %v4229_v38 = vsel %vm10972_vm11, %v9418_v15, %v4228_v48  ;;  %v4230_v45 = vrot.slane %v4228_v48, 4  ;;  %v9378_v1 = vrot.slane %v2793_v35, 9  ;;  %v10458_v5 = vld [vmem:[#allocation2 + $0x64] sm:$0xf] }
 0x201   : > { %1899 = vst [vmem:[#allocation2 + $0x17c] sm:$0x1] %v1898_v6  ;;  %v6338_v52 = vunpack.c.l.b16 %v4229_v38  ;;  %v2956_v20 = vrot.slane %v11964_v21, 5  ;;  %v2959_v18 = vrot.slane %v11969_v37, 5  ;;  %v842_v31 = vmax.f32 %v731_v27, 0.0 }
 0x202   : > { %v5772_v32 = vpack.c.b16 %v5713_v30, %v5712_v3  ;;  %v4232_v9 = vsel %vm10972_vm11, %v4230_v45, %v4231_v50  ;;  %v796_v39 = vadd.f32 %v11812_v54, %v795_v55  ;;  %v9462_v60 = vrot.slane %v5249_v26, 9  ;;  %v4384_v26 = vld [vmem:[#allocation2 + $0xa8] sm:$0xf] }
 0x203   : > { %v6339_v14 = vunpack.c.l.b16 %v4232_v9  ;;  %v2957_v17 = vsel %vm10972_vm11, %v9378_v1, %v2956_v20  ;;  %v2958_v46 = vrot.slane %v2956_v20, 4  ;;  %v3406_v35 = vsel %vm10985_vm14, %v11956_v49, %v11960_v53 }
 0x204   : > { %5808 = vrot.lane.b32.xlu2 %v5772_v32, %s10630_s14  ;;  %v906_v63 = vpack.c.bf16 %v842_v31, %v842_v31  ;;  %v868_v4 = vmax.f32 %v796_v39, 0.0  ;;  %v5529_v13 = vrot.slane %v4411_v22, 5  ;;  %v5874_v15 = vunpack.c.l.b16 %v2957_v17  ;;  %v10152_v32 = vld [vmem:[%s15122_s3] sm:$0xff]  ;;  %v5801_v31 = vpop.permute.xlu2 %5800 }
 0x205   : > { %v6389_v58 = vpack.c.b16 %v6339_v14, %v6338_v52  ;;  %v2960_v3 = vsel %vm10972_vm11, %v2958_v46, %v2959_v18  ;;  %v5532_v48 = vrot.slane %v4449_v36, 5  ;;  %v9443_v56 = vrot.slane %v5230_v28, 9  ;;  %v1809_v52 = vld [vmem:[#allocation2 + $0xe4] sm:$0xf]  ;;  %v10092_v17 = vld [vmem:[#allocation2 + $0x3c] sm:$0xff]  ;;  %7685 = vmatpush.bf16.msrb.mxu1 %v10152_v32 }
 0x206   : > { %v1324_v50 = vshrl.u32 %v906_v63, 16  ;;  %v1327_v7 = vshll.u32 %v906_v63, 16  ;;  %v5875_v6 = vunpack.c.l.b16 %v2960_v3  ;;  %v932_v12 = vpack.c.bf16 %v868_v4, %v868_v4  ;;  %v4385_v46 = vld [vmem:[#allocation2 + $0xac] sm:$0xf]  ;;  %v1900_v63 = vld [vmem:[#allocation2 + $0x180] sm:$0xf] }
 0x207   : > { %6434 = vrot.lane.b32.xlu0 %v6389_v58, %s10630_s14  ;;  %v5530_v49 = vsel %vm10972_vm11, %v9462_v60, %v5529_v13  ;;  %v5531_v53 = vrot.slane %v5529_v13, 4  ;;  %v5396_v22 = vrot.slane %v10458_v5, 5  ;;  %v3396_v9 = vsel %vm10985_vm14, %v11954_v16, %v11936_v42  ;;  %v12022_v13 = vld [vmem:[#allocation2 + $0xb0] sm:$0x1]  ;;  %v6421_v5 = vpop.permute.xlu0 %6420 }
 0x208   : > { %v12001_v30 = vrot.slane %v1324_v50, 7  ;;  %v5933_v38 = vpack.c.b16 %v5875_v6, %v5874_v15  ;;  %v1545_v45 = vshrl.u32 %v932_v12, 16  ;;  %v1548_v27 = vshll.u32 %v932_v12, 16  ;;  %v10056_v6 = vld [vmem:[#allocation2] sm:$0xff] }
 0x209   : > { %v5533_v1 = vsel %vm10972_vm11, %v5531_v53, %v5532_v48  ;;  %v6874_v20 = vunpack.c.l.b16 %v5530_v49  ;;  %v5397_v18 = vsel %vm10972_vm11, %v9443_v56, %v5396_v22  ;;  %v5398_v55 = vrot.slane %v5396_v22, 4  ;;  %v732_v56 = vpop.f32.mrf.mxu0 }
 0x20a   : > { %v1329_v39 = vor.u32 %v1327_v7, %v12001_v30  ;;  %5970 = vrot.lane.b32.xlu1 %v5933_v38, %s10631_s17  ;;  %v12016_v36 = vrot.slane %v1545_v45, 7  ;;  %v6875_v14 = vunpack.c.l.b16 %v5533_v1  ;;  %v6229_v60 = vunpack.c.l.b16 %v3406_v35  ;;  %v3157_v35 = vld [vmem:[#allocation2 + $0x60] sm:$0xf]  ;;  %v10133_v1 = vld [vmem:[#allocation2 + $0xb4] sm:$0xff] }
 0x20b   : > { %v5400_v4 = vsel %vm10972_vm11, %v5398_v55, %v5399_v61  ;;  %v4745_v42 = vshrl.u32 %v4384_v26, 16  ;;  %v4748_v16 = vshll.u32 %v4384_v26, 16  ;;  %v6836_v15 = vunpack.c.l.b16 %v5397_v18  ;;  %v12033_v55 = vld [vmem:[#allocation2 + $0x80] sm:$0x1] }
 0x20c   : > { %v1810_v28 = vsel %vm10845_vm3, %v1329_v39, %v1809_v52  ;;  %v1550_v58 = vor.u32 %v1548_v27, %v12016_v36  ;;  %v6913_v3 = vpack.c.b16 %v6875_v14, %v6874_v20  ;;  %6160 = vrot.lane.b32.xlu2 %v10092_v17, %s10632_s18  ;;  %v6837_v59 = vunpack.c.l.b16 %v5400_v4  ;;  %v10460_v14 = vld [vmem:[#allocation2 + $0x64] sm:$0xf] }
 0x20d   : > { %1811 = vst [vmem:[#allocation2 + $0xe4] sm:$0xf] %v1810_v28  ;;  %v4747_v48 = vrot.slane %v4745_v42, 4  ;;  %v4750_v50 = vrot.slane %v4748_v16, 5  ;;  %v4754_v61 = vshll.u32 %v4385_v46, 16  ;;  %v6228_v7 = vunpack.c.l.b16 %v3396_v9  ;;  %v6613_v42 = vpop.permute.xlu1 %6612  ;;  %v797_v28 = vpop.f32.mrf.mxu2 }
 0x20e   : > { %v1901_v12 = vsel %vm10845_vm3, %v1550_v58, %v1900_v63  ;;  %9950 = vmatmul.msk.bf16.gmra.mxu3 %vm6920_vm15, %v6913_v3  ;;  %v4758_v49 = vshrl.u32 %v4385_v46, 16  ;;  %v4764_v53 = vshll.u32 %v12022_v13, 16  ;;  %v6894_v22 = vpack.c.b16 %v6837_v59, %v6836_v15  ;;  %v12037_v46 = vld [vmem:[#allocation2 + $0x88] sm:$0xf]  ;;  %v1931_v59 = vld [vmem:[#allocation2 + $0x3c] sm:$0xf] }
 0x20f   : > { %1902 = vst [vmem:[#allocation2 + $0x180] sm:$0xf] %v1901_v12  ;;  %v4751_v38 = vor.u32 %v4750_v50, %v4747_v48  ;;  %v4756_v45 = vrot.slane %v4754_v61, 5  ;;  %v733_v27 = vadd.f32 %v11812_v54, %v732_v56  ;;  %v6286_v26 = vpack.c.b16 %v6229_v60, %v6228_v7  ;;  %v12046_v48 = vpop.permute.xlu2 %6774 }
 0x210   : > { %v4760_v52 = vrot.slane %v4758_v49, 4  ;;  %v3408_v20 = vshrl.u32 %v3157_v35, 16  ;;  %v3411_v18 = vshll.u32 %v3157_v35, 16  ;;  %v5413_v32 = vrot.slane %v12033_v55, 5  ;;  %9931 = vmatmul.msk.bf16.gmra.mxu0 %vm6920_vm15, %v6894_v22 }
 0x211   : > { %v4752_v9 = vrot.slane %v4751_v38, 4  ;;  %v843_v39 = vmax.f32 %v733_v27, 0.0  ;;  %v3417_v17 = vshll.u32 %v10460_v14, 16  ;;  %v3493_v63 = vshrl.u32 %v12037_v46, 16 }
 0x212   : > { %v7198_v60 = vsel %vm6920_vm15, %v6286_v26, %v6421_v5  ;;  %v6923_v4 = vsel %vm6920_vm15, %v10056_v6, %v5801_v31  ;;  %v4761_v16 = vor.u32 %v4760_v52, %v4756_v45  ;;  %6626 = vrot.lane.b32.xlu1 %v10133_v1, %s10631_s17  ;;  %v4766_v58 = vrot.slane %v4764_v53, 5 }
 0x213   : > { %v907_v3 = vpack.c.bf16 %v843_v39, %v843_v39  ;;  %v3423_v15 = vrot.slane %v3421_v62, 4  ;;  %v798_v35 = vadd.f32 %v11812_v54, %v797_v28  ;;  %v4757_v50 = vsel %vm10985_vm14, %v4752_v9, %v4756_v45  ;;  %v1813_v45 = vld [vmem:[#allocation2 + $0xec] sm:$0x1] }
 0x214   : > { %v4762_v61 = vrot.slane %v4761_v16, 4  ;;  %v3410_v31 = vrot.slane %v3408_v20, 4  ;;  %v3413_v7 = vrot.slane %v3411_v18, 5  ;;  %v12050_v49 = vrot.slane %v3417_v17, 5 }
 0x215   : > { %v1332_v6 = vshrl.u32 %v907_v3, 16  ;;  %v1335_v12 = vshll.u32 %v907_v3, 16  ;;  %v869_v53 = vmax.f32 %v798_v35, 0.0  ;;  %v1330_v56 = vrot.slane %v12001_v30, 4  ;;  %v12059_v3 = vld [vmem:[#allocation2 + $0xb8] sm:$0xf] }
 0x216   : > { %v4767_v33 = vsel %vm10985_vm14, %v4762_v61, %v4766_v58  ;;  %v2141_v62 = vshrl.u32 %v1931_v59, 16  ;;  %v2144_v5 = vshll.u32 %v1931_v59, 16  ;;  %v6688_v22 = vunpack.c.l.b16 %v4757_v50  ;;  %v1904_v50 = vld [vmem:[#allocation2 + $0x188] sm:$0x1] }
 0x217   : > { %v6689_v38 = vunpack.c.l.b16 %v4767_v33  ;;  %v1334_v27 = vrot.slane %v1332_v6, 7  ;;  %v933_v26 = vpack.c.bf16 %v869_v53, %v869_v53  ;;  %v3414_v52 = vor.u32 %v3413_v7, %v3410_v31  ;;  %v5961_v7 = vpop.permute.xlu1 %5960  ;;  %v6153_v23 = vpop.permute.xlu2 %6152 }
 0x218   : > { %v2143_v1 = vrot.slane %v2141_v62, 4  ;;  %v2146_v20 = vrot.slane %v2144_v5, 5  ;;  %v2150_v18 = vshll.u32 %v11964_v21, 16  ;;  %v3424_v30 = vor.u32 %v3423_v15, %v12050_v49  ;;  %v12066_v15 = vld [vmem:[#allocation2 + $0xbc] sm:$0x1] }
 0x219   : > { %v6740_v9 = vpack.c.b16 %v6689_v38, %v6688_v22  ;;  %v1337_v39 = vor.u32 %v1335_v12, %v1334_v27  ;;  %v1339_v14 = vrot.slane %v1334_v27, 4  ;;  %v1551_v17 = vrot.slane %v12016_v36, 4  ;;  %v4021_v36 = vld [vmem:[#allocation2 + $0xb4] sm:$0xe] }
 0x21a   : > { %v7287_v16 = vsel %vm544_vm0, %v7198_v60, %v6613_v42  ;;  %v1553_v28 = vshrl.u32 %v933_v26, 16  ;;  %v1556_v58 = vshll.u32 %v933_v26, 16  ;;  %v2147_v61 = vor.u32 %v2146_v20, %v2143_v1 }
 0x21b   : > { %6784 = vrot.lane.b32.xlu0 %v6740_v9, %s10632_s18  ;;  %v1338_v35 = vsel %vm10918_vm6, %v1330_v56, %v1337_v39  ;;  %v1814_v59 = vsel %vm10945_vm8, %v1339_v14, %v1813_v45  ;;  %v2152_v31 = vrot.slane %v2150_v18, 5  ;;  %v12071_v60 = vrot.slane %v3427_v24, 5  ;;  %v2794_v45 = vld [vmem:[#allocation2 + $0x48] sm:$0xe]  ;;  %v12088_v18 = vld [vmem:[#allocation2 + $0x4c] sm:$0xf] }
 0x21c   : > { %1812 = vst.msk [vmem:[#allocation2 + $0xe8] sm:$0xf] %vm938_vm1, %v1338_v35  ;;  %v1555_v42 = vrot.slane %v1553_v28, 7  ;;  %v2154_v6 = vshrl.u32 %v11964_v21, 16  ;;  %v2160_v12 = vshll.u32 %v11969_v37, 16  ;;  %v12075_v53 = vrot.slane %v3414_v52, 4  ;;  %v735_v28 = vpop.f32.mrf.mxu0 }
 0x21d   : > { %1815 = vst [vmem:[#allocation2 + $0xec] sm:$0x1] %v1814_v59  ;;  %v12077_v56 = vrot.slane %v3424_v30, 4  ;;  %v7018_v33 = vsel %vm544_vm0, %v6923_v4, %v5961_v7  ;;  %v2148_v62 = vrot.slane %v2147_v61, 4  ;;  %v9419_v24 = vrot.slane %v4021_v36, 9 }
 0x21e   : > { %v1558_v5 = vor.u32 %v1556_v58, %v1555_v42  ;;  %v1560_v22 = vrot.slane %v1555_v42, 4  ;;  %v2156_v38 = vrot.slane %v2154_v6, 4  ;;  %v2162_v26 = vrot.slane %v2160_v12, 5  ;;  %v12090_v9 = vld [vmem:[#allocation2 + $0x50] sm:$0x1] }
 0x21f   : > { %v2153_v27 = vsel %vm10985_vm14, %v2148_v62, %v2152_v31  ;;  %v4235_v21 = vrot.slane %v12059_v3, 5  ;;  %v4238_v37 = vrot.slane %v12066_v15, 5  ;;  %v7083_v30 = vsel %vm7081_vm2, %v7018_v33, %v6153_v23  ;;  %v5250_v58 = vld [vmem:[#allocation2 + $0x168] sm:$0xe]  ;;  %v4450_v62 = vld [vmem:[#allocation2 + $0x170] sm:$0x1] }
 0x220   : > { %v1559_v52 = vsel %vm10918_vm6, %v1551_v17, %v1558_v5  ;;  %v1905_v4 = vsel %vm10945_vm8, %v1560_v22, %v1904_v50  ;;  %v2157_v1 = vor.u32 %v2156_v38, %v2152_v31  ;;  %v5714_v20 = vunpack.c.l.b16 %v2153_v27  ;;  %7686 = vmatmul.bf16.vlgmr.msrb.gmra.mxu1 %v7083_v30  ;;  %v800_v31 = vpop.f32.mrf.mxu2 }
 0x221   : > { %1903 = vst.msk [vmem:[#allocation2 + $0x184] sm:$0xf] %vm938_vm1, %v1559_v52  ;;  %v4236_v39 = vsel %vm10972_vm11, %v9419_v24, %v4235_v21  ;;  %v4237_v14 = vrot.slane %v4235_v21, 4  ;;  %v7357_v17 = vsel %vm7081_vm2, %v7287_v16, %v11978_v8  ;;  %v736_v50 = vadd.f32 %v11812_v54, %v735_v28  ;;  %v4413_v16 = vld [vmem:[#allocation2 + $0x16c] sm:$0xf] }
 0x222   : > { %1906 = vst [vmem:[#allocation2 + $0x188] sm:$0x1] %v1905_v4  ;;  %v2158_v35 = vrot.slane %v2157_v1, 4  ;;  %v6340_v59 = vunpack.c.l.b16 %v4236_v39  ;;  %7885 = vmatmul.bf16.gmra.mxu2 %v7357_v17  ;;  %v9379_v61 = vrot.slane %v2794_v45, 9  ;;  %v2963_v42 = vrot.slane %v12088_v18, 5 }
 0x223   : > { %v4239_v36 = vsel %vm10972_vm11, %v4237_v14, %v4238_v37  ;;  %v2966_v7 = vrot.slane %v12090_v9, 5  ;;  %v801_v8 = vadd.f32 %v11812_v54, %v800_v31  ;;  %v844_v33 = vmax.f32 %v736_v50, 0.0  ;;  %v5231_v1 = vld [vmem:[#allocation2 + $0x6c] sm:$0xe]  ;;  %v4386_v28 = vld [vmem:[#allocation2 + $0xb4] sm:$0xf] }
 0x224   : > { %v2163_v6 = vsel %vm10985_vm14, %v2158_v35, %v2162_v26  ;;  %v6341_v12 = vunpack.c.l.b16 %v4239_v36  ;;  %v9463_v5 = vrot.slane %v5250_v58, 9  ;;  %v2964_v38 = vsel %vm10972_vm11, %v9379_v61, %v2963_v42 }
 0x225   : > { %v5715_v22 = vunpack.c.l.b16 %v2163_v6  ;;  %v2965_v23 = vrot.slane %v2963_v42, 4  ;;  %v870_v24 = vmax.f32 %v801_v8, 0.0  ;;  %v908_v21 = vpack.c.bf16 %v844_v33, %v844_v33  ;;  %v1816_v42 = vld [vmem:[#allocation2 + $0xf0] sm:$0xf] }
 0x226   : > { %v6390_v27 = vpack.c.b16 %v6341_v12, %v6340_v59  ;;  %v5876_v37 = vunpack.c.l.b16 %v2964_v38  ;;  %v5536_v45 = vrot.slane %v4413_v16, 5  ;;  %v5539_v26 = vrot.slane %v4450_v62, 5  ;;  %v10462_v16 = vld [vmem:[#allocation2 + $0x70] sm:$0xf]  ;;  %v1907_v62 = vld [vmem:[#allocation2 + $0x18c] sm:$0xf] }
 0x227   : > { %v5773_v52 = vpack.c.b16 %v5715_v22, %v5714_v20  ;;  %v2967_v54 = vsel %vm10972_vm11, %v2965_v23, %v2966_v7  ;;  %v934_v4 = vpack.c.bf16 %v870_v24, %v870_v24  ;;  %v1341_v39 = vshrl.u32 %v908_v21, 16  ;;  %v4387_v22 = vld [vmem:[#allocation2 + $0xb8] sm:$0xf] }
 0x228   : > { %6436 = vrot.lane.b32.xlu0 %v6390_v27, %s10630_s14  ;;  %v1344_v14 = vshll.u32 %v908_v21, 16  ;;  %v5877_v30 = vunpack.c.l.b16 %v2967_v54  ;;  %v5537_v17 = vsel %vm10972_vm11, %v9463_v5, %v5536_v45  ;;  %v3420_v20 = vsel %vm10985_vm14, %v12075_v53, %v12050_v49  ;;  %v12124_v49 = vld [vmem:[#allocation2 + $0x8c] sm:$0x1] }
 0x229   : > { %5810 = vrot.lane.b32.xlu2 %v5773_v52, %s10630_s14  ;;  %v1562_v58 = vshrl.u32 %v934_v4, 16  ;;  %v1565_v35 = vshll.u32 %v934_v4, 16  ;;  %v5538_v59 = vrot.slane %v5536_v45, 4  ;;  %v12118_v50 = vrot.slane %v1341_v39, 7  ;;  %v10093_v54 = vld [vmem:[#allocation2 + $0x48] sm:$0xff] }
 0x22a   : > { %v5934_v61 = vpack.c.b16 %v5877_v30, %v5876_v37  ;;  %v6876_v31 = vunpack.c.l.b16 %v5537_v17  ;;  %v9444_v36 = vrot.slane %v5231_v1, 9  ;;  %v5403_v6 = vrot.slane %v10462_v16, 5  ;;  %v12140_v4 = vld [vmem:[#allocation2 + $0xbc] sm:$0x1] }
 0x22b   : > { %v12120_v7 = vrot.slane %v1562_v58, 7  ;;  %v5540_v8 = vsel %vm10972_vm11, %v5538_v59, %v5539_v26  ;;  %v4769_v12 = vshrl.u32 %v4386_v28, 16  ;;  %v3499_v53 = vshll.u32 %v12124_v49, 16  ;;  %v737_v58 = vpop.f32.mrf.mxu0 }
 0x22c   : > { %v1346_v33 = vor.u32 %v1344_v14, %v12118_v50  ;;  %5972 = vrot.lane.b32.xlu1 %v5934_v61, %s10631_s17  ;;  %v6877_v5 = vunpack.c.l.b16 %v5540_v8  ;;  %v4772_v38 = vshll.u32 %v4386_v28, 16  ;;  %v3430_v23 = vsel %vm10985_vm14, %v12077_v56, %v12071_v60  ;;  %v3159_v14 = vld [vmem:[#allocation2 + $0x6c] sm:$0xf] }
 0x22d   : > { %v1567_v24 = vor.u32 %v1565_v35, %v12120_v7  ;;  %v5404_v27 = vsel %vm10972_vm11, %v9444_v36, %v5403_v6  ;;  %v5405_v21 = vrot.slane %v5403_v6, 4  ;;  %v12136_v37 = vunpack.c.l.b16 %v3420_v20  ;;  %v10134_v35 = vld [vmem:[#allocation2 + $0xc0] sm:$0xff]  ;;  %v12157_v6 = vld [vmem:[#allocation2 + $0x8c] sm:$0x1] }
 0x22e   : > { %v1817_v45 = vsel %vm10845_vm3, %v1346_v33, %v1816_v42  ;;  %v6914_v52 = vpack.c.b16 %v6877_v5, %v6876_v31  ;;  %v4771_v26 = vrot.slane %v4769_v12, 4  ;;  %v4774_v1 = vrot.slane %v4772_v38, 5  ;;  %v12160_v33 = vld [vmem:[#allocation2 + $0x94] sm:$0xf]  ;;  %v1933_v38 = vld [vmem:[#allocation2 + $0x48] sm:$0xf] }
 0x22f   : > { %1818 = vst [vmem:[#allocation2 + $0xf0] sm:$0xf] %v1817_v45  ;;  %v1908_v60 = vsel %vm10845_vm3, %v1567_v24, %v1907_v62  ;;  %v5407_v56 = vsel %vm10972_vm11, %v5405_v21, %v5406_v34  ;;  %v4778_v39 = vshll.u32 %v4387_v22, 16  ;;  %v6231_v30 = vunpack.c.l.b16 %v3430_v23  ;;  %v12154_v34 = vld [vmem:[%s15121_s2] ss:$0 sm:$0xff] }
 0x230   : > { %1909 = vst [vmem:[#allocation2 + $0x18c] sm:$0xf] %v1908_v60  ;;  %9951 = vmatmul.msk.bf16.gmra.mxu3 %vm6920_vm15, %v6914_v52  ;;  %v6838_v17 = vunpack.c.l.b16 %v5404_v27  ;;  %v6839_v28 = vunpack.c.l.b16 %v5407_v56  ;;  %v4782_v20 = vshrl.u32 %v4387_v22, 16  ;;  %v4775_v59 = vor.u32 %v4774_v1, %v4771_v26  ;;  %v10467_v21 = vld [vmem:[#allocation2 + $0x70] sm:$0xf]  ;;  %v802_v52 = vpop.f32.mrf.mxu2 }
 0x231   : > { %6162 = vrot.lane.b32.xlu2 %v10093_v54, %s10632_s18  ;;  %v4780_v61 = vrot.slane %v4778_v39, 5  ;;  %v4788_v29 = vshll.u32 %v12140_v4, 16  ;;  %v738_v31 = vadd.f32 %v12154_v34, %v737_v58  ;;  %v3432_v8 = vshrl.u32 %v3159_v14, 16  ;;  %v6615_v58 = vpop.permute.xlu1 %6614 }
 0x232   : > { %v6895_v36 = vpack.c.b16 %v6839_v28, %v6838_v17  ;;  %v4784_v42 = vrot.slane %v4782_v20, 4  ;;  %v3435_v16 = vshll.u32 %v3159_v14, 16  ;;  %v5420_v12 = vrot.slane %v12157_v6, 5 }
 0x233   : > { %v3517_v62 = vshrl.u32 %v12160_v33, 16  ;;  %v4776_v5 = vrot.slane %v4775_v59, 4  ;;  %v845_v22 = vmax.f32 %v738_v31, 0.0  ;;  %v6287_v23 = vpack.c.b16 %v6231_v30, %v12136_v37 }
 0x234   : > { %v1347_v24 = vrot.slane %v12118_v50, 4  ;;  %9932 = vmatmul.msk.bf16.gmra.mxu0 %vm6920_vm15, %v6895_v36  ;;  %v4785_v27 = vor.u32 %v4784_v42, %v4780_v61  ;;  %6628 = vrot.lane.b32.xlu1 %v10134_v35, %s10631_s17  ;;  %v3441_v45 = vshll.u32 %v10467_v21, 16  ;;  %v4790_v26 = vrot.slane %v4788_v29, 5  ;;  %v6423_v50 = vpop.permute.xlu0 %6422 }
 0x235   : > { %v4781_v54 = vsel %vm10985_vm14, %v4776_v5, %v4780_v61  ;;  %v909_v60 = vpack.c.bf16 %v845_v22, %v845_v22  ;;  %v803_v56 = vadd.f32 %v12154_v34, %v802_v52  ;;  %v3434_v39 = vrot.slane %v3432_v8, 4  ;;  %v1820_v5 = vld [vmem:[#allocation2 + $0xf8] sm:$0x1] }
 0x236   : > { %v4786_v1 = vrot.slane %v4785_v27, 4  ;;  %v3437_v37 = vrot.slane %v3435_v16, 5  ;;  %v2165_v14 = vshrl.u32 %v1933_v38, 16  ;;  %v3447_v28 = vrot.slane %v3445_v2, 4  ;;  %v10137_v27 = vld [vmem:[#allocation2 + $0xfc] sm:$0xff] }
 0x237   : > { %v1349_v30 = vshrl.u32 %v909_v60, 16  ;;  %v1352_v17 = vshll.u32 %v909_v60, 16  ;;  %v871_v20 = vmax.f32 %v803_v56, 0.0  ;;  %v6690_v59 = vunpack.c.l.b16 %v4781_v54 }
 0x238   : > { %v4791_v35 = vsel %vm10985_vm14, %v4786_v1, %v4790_v26  ;;  %v12174_v61 = vrot.slane %v3441_v45, 5  ;;  %v2168_v29 = vshll.u32 %v1933_v38, 16  ;;  %v2167_v8 = vrot.slane %v2165_v14, 4  ;;  %v4394_v1 = vld [vmem:[#allocation2 + $0xfc] sm:$0xf] }
 0x239   : > { %v6691_v31 = vunpack.c.l.b16 %v4791_v35  ;;  %v1351_v36 = vrot.slane %v1349_v30, 7  ;;  %v935_v42 = vpack.c.bf16 %v871_v20, %v871_v20  ;;  %v7201_v16 = vsel %vm6920_vm15, %v6287_v23, %v6423_v50  ;;  %v12182_v23 = vpop.permute.xlu2 %6776  ;;  %v1911_v50 = vld [vmem:[#allocation2 + $0x194] sm:$0x1] }
 0x23a   : > { %v2170_v22 = vrot.slane %v2168_v29, 5  ;;  %v2174_v41 = vshll.u32 %v12088_v18, 16  ;;  %v2178_v2 = vshrl.u32 %v12088_v18, 16  ;;  %v7289_v21 = vsel %vm544_vm0, %v7201_v16, %v6615_v58 }
 0x23b   : > { %v6741_v52 = vpack.c.b16 %v6691_v31, %v6690_v59  ;;  %v1354_v54 = vor.u32 %v1352_v17, %v1351_v36  ;;  %v1356_v45 = vrot.slane %v1351_v36, 4  ;;  %v3438_v26 = vor.u32 %v3437_v37, %v3434_v39 }
 0x23c   : > { %v3448_v38 = vor.u32 %v3447_v28, %v12174_v61  ;;  %v1570_v60 = vshrl.u32 %v935_v42, 16  ;;  %v1573_v56 = vshll.u32 %v935_v42, 16  ;;  %6634 = vrot.lane.b32.xlu1 %v10137_v27, %s10631_s17  ;;  %v2171_v30 = vor.u32 %v2170_v22, %v2167_v8  ;;  %v12198_v8 = vld [vmem:[#allocation2 + $0x104] sm:$0x1]  ;;  %v4415_v27 = vld [vmem:[#allocation2 + $0x178] sm:$0xf] }
 0x23d   : > { %6786 = vrot.lane.b32.xlu0 %v6741_v52, %s10632_s18  ;;  %v1355_v18 = vsel %vm10918_vm6, %v1347_v24, %v1354_v54  ;;  %v1821_v14 = vsel %vm10945_vm8, %v1356_v45, %v1820_v5  ;;  %v2176_v39 = vrot.slane %v2174_v41, 5  ;;  %v1568_v37 = vrot.slane %v12120_v7, 4  ;;  %v4395_v7 = vld [vmem:[#allocation2 + $0x100] sm:$0xf]  ;;  %15159 = vst [vmem:[#allocation6_spill] sm:$0xff] %v12198_v8 }
 0x23e   : > { %1819 = vst.msk [vmem:[#allocation2 + $0xf4] sm:$0xf] %vm938_vm1, %v1355_v18  ;;  %v1572_v17 = vrot.slane %v1570_v60, 7  ;;  %v2180_v28 = vrot.slane %v2178_v2, 4  ;;  %v2184_v20 = vshll.u32 %v12090_v9, 16  ;;  %v12194_v58 = vrot.slane %v3451_v57, 5  ;;  %v805_v60 = vpop.f32.mrf.mxu2 }
 0x23f   : > { %1822 = vst [vmem:[#allocation2 + $0xf8] sm:$0x1] %v1821_v14  ;;  %v2172_v24 = vrot.slane %v2171_v30, 4  ;;  %v4865_v35 = vshrl.u32 %v4394_v1, 16  ;;  %v4868_v59 = vshll.u32 %v4394_v1, 16  ;;  %v12196_v29 = vrot.slane %v3438_v26, 4 }
 0x240   : > { %v1575_v31 = vor.u32 %v1573_v56, %v1572_v17  ;;  %v1577_v36 = vrot.slane %v1572_v17, 4  ;;  %v2181_v42 = vor.u32 %v2180_v28, %v2176_v39  ;;  %v12200_v16 = vrot.slane %v3448_v38, 4  ;;  %v5251_v52 = vld [vmem:[#allocation2 + $0x174] sm:$0xe] }
 0x241   : > { %v2177_v9 = vsel %vm10985_vm14, %v2172_v24, %v2176_v39  ;;  %v4867_v5 = vrot.slane %v4865_v35, 4  ;;  %v4870_v51 = vrot.slane %v4868_v59, 5  ;;  %v2186_v2 = vrot.slane %v2184_v20, 5  ;;  %v5232_v59 = vld [vmem:[#allocation2 + $0x78] sm:$0xe] }
 0x242   : > { %v1576_v57 = vsel %vm10918_vm6, %v1568_v37, %v1575_v31  ;;  %v1912_v22 = vsel %vm10945_vm8, %v1577_v36, %v1911_v50  ;;  %v2182_v41 = vrot.slane %v2181_v42, 4  ;;  %v4874_v45 = vshll.u32 %v4395_v7, 16  ;;  %v4451_v50 = vld [vmem:[#allocation2 + $0x17c] sm:$0x1]  ;;  %v12215_v36 = vpop.permute.xlu2 %5802 }
 0x243   : > { %1910 = vst.msk [vmem:[#allocation2 + $0x190] sm:$0xf] %vm938_vm1, %v1576_v57  ;;  %v4871_v54 = vor.u32 %v4870_v51, %v4867_v5  ;;  %v4878_v26 = vshrl.u32 %v4395_v7, 16  ;;  %v4884_v38 = vshll.u32 %v12198_v8, 16  ;;  %v5716_v1 = vunpack.c.l.b16 %v2177_v9 }
 0x244   : > { %1913 = vst [vmem:[#allocation2 + $0x194] sm:$0x1] %v1912_v22  ;;  %v2187_v56 = vsel %vm10985_vm14, %v2182_v41, %v2186_v2  ;;  %v7360_v18 = vsel %vm7081_vm2, %v7289_v21, %v12046_v48  ;;  %v806_v14 = vadd.f32 %v12154_v34, %v805_v60  ;;  %v4876_v37 = vrot.slane %v4874_v45, 5  ;;  %v10468_v45 = vld [vmem:[#allocation2 + $0x7c] sm:$0xf] }
 0x245   : > { %v5717_v30 = vunpack.c.l.b16 %v2187_v56  ;;  %v4872_v39 = vrot.slane %v4871_v54, 4  ;;  %v4880_v17 = vrot.slane %v4878_v26, 4  ;;  %7890 = vmatmul.bf16.gmra.mxu2 %v7360_v18  ;;  %v4886_v28 = vrot.slane %v4884_v38, 5  ;;  %v4025_v38 = vld [vmem:[#allocation2 + $0xfc] sm:$0xe] }
 0x246   : > { %v872_v20 = vmax.f32 %v806_v14, 0.0  ;;  %v9464_v24 = vrot.slane %v5251_v52, 9  ;;  %v5543_v35 = vrot.slane %v4415_v27, 5  ;;  %v5546_v21 = vrot.slane %v4451_v50, 5  ;;  %v2795_v18 = vld [vmem:[#allocation2 + $0x54] sm:$0xe] }
 0x247   : > { %v5774_v31 = vpack.c.b16 %v5717_v30, %v5716_v1  ;;  %v4877_v42 = vsel %vm10985_vm14, %v4872_v39, %v4876_v37  ;;  %v4881_v48 = vor.u32 %v4880_v17, %v4876_v37  ;;  %v3444_v7 = vsel %vm10985_vm14, %v12196_v29, %v12174_v61  ;;  %v12228_v61 = vld [vmem:[#allocation2 + $0x98] sm:$0x1]  ;;  %v12241_v37 = vld [vmem:[#allocation2 + $0x100] sm:$0xf]  ;;  %v12243_v17 = vld [vmem:[#allocation2 + $0x104] sm:$0x1] }
 0x248   : > { %v936_v9 = vpack.c.bf16 %v872_v20, %v872_v20  ;;  %v5544_v5 = vsel %vm10972_vm11, %v9464_v24, %v5543_v35  ;;  %v5545_v51 = vrot.slane %v5543_v35, 4  ;;  %v6698_v22 = vunpack.c.l.b16 %v4877_v42  ;;  %v1914_v24 = vld [vmem:[#allocation2 + $0x198] sm:$0xf] }
 0x249   : > { %5812 = vrot.lane.b32.xlu2 %v5774_v31, %s10630_s14  ;;  %v4882_v57 = vrot.slane %v4881_v48, 4  ;;  %v6878_v41 = vunpack.c.l.b16 %v5544_v5  ;;  %v9445_v2 = vrot.slane %v5232_v59, 9  ;;  %v5410_v26 = vrot.slane %v10468_v45, 5  ;;  %v12248_v35 = vld [vmem:[#allocation2 + $0x58] sm:$0xf] }
 0x24a   : > { %v1579_v27 = vshrl.u32 %v936_v9, 16  ;;  %v1582_v52 = vshll.u32 %v936_v9, 16  ;;  %v5547_v54 = vsel %vm10972_vm11, %v5545_v51, %v5546_v21  ;;  %v3523_v29 = vshll.u32 %v12228_v61, 16  ;;  %v3161_v21 = vld [vmem:[#allocation2 + $0x78] sm:$0xf] }
 0x24b   : > { %v3454_v60 = vsel %vm10985_vm14, %v12200_v16, %v12194_v58  ;;  %v4887_v56 = vsel %vm10985_vm14, %v4882_v57, %v4886_v28  ;;  %v6879_v1 = vunpack.c.l.b16 %v5547_v54  ;;  %v5411_v30 = vsel %vm10972_vm11, %v9445_v2, %v5410_v26  ;;  %v10094_v5 = vld [vmem:[#allocation2 + $0x54] sm:$0xff]  ;;  %v12268_v54 = vpop.permute.xlu2 %6778 }
 0x24c   : > { %v6699_v14 = vunpack.c.l.b16 %v4887_v56  ;;  %v12237_v50 = vrot.slane %v1579_v27, 7  ;;  %v5412_v39 = vrot.slane %v5410_v26, 4  ;;  %v12245_v20 = vunpack.c.l.b16 %v3444_v7  ;;  %v12256_v7 = vpop.permute.xlu1 %6616 }
 0x24d   : > { %v6915_v58 = vpack.c.b16 %v6879_v1, %v6878_v41  ;;  %v9423_v16 = vrot.slane %v4025_v38, 9  ;;  %v4263_v28 = vrot.slane %v12241_v37, 5  ;;  %v6840_v48 = vunpack.c.l.b16 %v5411_v30  ;;  %v12261_v41 = vld [vmem:[#allocation2 + $0x5c] sm:$0x1]  ;;  %v12278_v30 = vld [vmem:[#allocation2 + $0xd4] sm:$0x1] }
 0x24e   : > { %v6745_v59 = vpack.c.b16 %v6699_v14, %v6698_v22  ;;  %v1584_v31 = vor.u32 %v1582_v52, %v12237_v50  ;;  %v5414_v42 = vsel %vm10972_vm11, %v5412_v39, %v5413_v32  ;;  %v4266_v22 = vrot.slane %v12243_v17, 5  ;;  %v4396_v39 = vld [vmem:[#allocation2 + $0x108] sm:$0xf] }
 0x24f   : > { %9952 = vmatmul.msk.bf16.gmra.mxu3 %vm6920_vm15, %v6915_v58  ;;  %v6841_v9 = vunpack.c.l.b16 %v5414_v42  ;;  %v4264_v51 = vsel %vm10972_vm11, %v9423_v16, %v4263_v28  ;;  %v4265_v57 = vrot.slane %v4263_v28, 4  ;;  %v6233_v55 = vunpack.c.l.b16 %v3454_v60  ;;  %v10473_v16 = vld [vmem:[#allocation2 + $0x7c] sm:$0xf] }
 0x250   : > { %6794 = vrot.lane.b32.xlu0 %v6745_v59, %s10632_s18  ;;  %v1915_v32 = vsel %vm10845_vm3, %v1584_v31, %v1914_v24  ;;  %v9380_v2 = vrot.slane %v2795_v18, 9  ;;  %v2970_v27 = vrot.slane %v12248_v35, 5  ;;  %v6348_v26 = vunpack.c.l.b16 %v4264_v51  ;;  %v12275_v18 = vld [vmem:[#allocation2 + $0x98] sm:$0x1]  ;;  %v12281_v24 = vld [vmem:[#allocation2 + $0xa0] sm:$0xf] }
 0x251   : > { %1916 = vst [vmem:[#allocation2 + $0x198] sm:$0xf] %v1915_v32  ;;  %v6896_v52 = vpack.c.b16 %v6841_v9, %v6840_v48  ;;  %6164 = vrot.lane.b32.xlu2 %v10094_v5, %s10632_s18  ;;  %v4267_v45 = vsel %vm10972_vm11, %v4265_v57, %v4266_v22  ;;  %v3456_v38 = vshrl.u32 %v3161_v21, 16  ;;  %v2973_v1 = vrot.slane %v12261_v41, 5  ;;  %v1935_v59 = vld [vmem:[#allocation2 + $0x54] sm:$0xf]  ;;  %v807_v5 = vpop.f32.mrf.mxu2 }
 0x252   : > { %v6349_v60 = vunpack.c.l.b16 %v4267_v45  ;;  %v2971_v56 = vsel %vm10972_vm11, %v9380_v2, %v2970_v27  ;;  %v2972_v25 = vrot.slane %v2970_v27, 4  ;;  %v5427_v14 = vrot.slane %v12275_v18, 5  ;;  %v6425_v2 = vpop.permute.xlu0 %6424 }
 0x253   : > { %9933 = vmatmul.msk.bf16.gmra.mxu0 %vm6920_vm15, %v6896_v52  ;;  %v3465_v28 = vshll.u32 %v10473_v16, 16  ;;  %v6288_v31 = vpack.c.b16 %v6233_v55, %v12245_v20  ;;  %v5878_v48 = vunpack.c.l.b16 %v2971_v56  ;;  %v3459_v9 = vshll.u32 %v3161_v21, 16 }
 0x254   : > { %v2974_v42 = vsel %vm10972_vm11, %v2972_v25, %v2973_v1  ;;  %v12288_v57 = vrot.slane %v3456_v38, 4  ;;  %v3471_v22 = vrot.slane %v3469_v19, 4  ;;  %v808_v32 = vadd.f32 %v12154_v34, %v807_v5  ;;  %v10057_v25 = vld [vmem:[#allocation2 + $0xc] sm:$0xff]  ;;  %v5963_v1 = vpop.permute.xlu1 %5962 }
 0x255   : > { %v5879_v51 = vunpack.c.l.b16 %v2974_v42  ;;  %v6394_v27 = vpack.c.b16 %v6349_v60, %v6348_v26  ;;  %v2189_v52 = vshrl.u32 %v1935_v59, 16  ;;  %v2192_v45 = vshll.u32 %v1935_v59, 16  ;;  %v12303_v42 = vld [vmem:[#allocation2 + $0xa4] sm:$0x1] }
 0x256   : > { %v2198_v20 = vshll.u32 %v12248_v35, 16  ;;  %v12294_v16 = vrot.slane %v3465_v28, 5  ;;  %v873_v56 = vmax.f32 %v808_v32, 0.0  ;;  %v2202_v21 = vshrl.u32 %v12248_v35, 16 }
 0x257   : > { %v5935_v55 = vpack.c.b16 %v5879_v51, %v5878_v48  ;;  %v12298_v38 = vrot.slane %v3459_v9, 5  ;;  %v2191_v43 = vrot.slane %v2189_v52, 4  ;;  %v2194_v19 = vrot.slane %v2192_v45, 5  ;;  %v4022_v51 = vld [vmem:[#allocation2 + $0xc0] sm:$0xe]  ;;  %v6155_v52 = vpop.permute.xlu2 %6154 }
 0x258   : > { %6444 = vrot.lane.b32.xlu0 %v6394_v27, %s10630_s14  ;;  %v2200_v34 = vrot.slane %v2198_v20, 5  ;;  %v7204_v26 = vsel %vm6920_vm15, %v6288_v31, %v6425_v2  ;;  %v937_v60 = vpack.c.bf16 %v873_v56, %v873_v56  ;;  %v2204_v59 = vrot.slane %v2202_v21, 4  ;;  %v12317_v56 = vld [vmem:[#allocation2 + $0xc4] sm:$0xf] }
 0x259   : > { %5974 = vrot.lane.b32.xlu1 %v5935_v55, %s10631_s17  ;;  %v2208_v28 = vshll.u32 %v12261_v41, 16  ;;  %v6926_v48 = vsel %vm6920_vm15, %v10057_v25, %v12215_v36  ;;  %v7291_v9 = vsel %vm544_vm0, %v7204_v26, %v12256_v7  ;;  %v2195_v5 = vor.u32 %v2194_v19, %v2191_v43  ;;  %v12312_v41 = vld [vmem:[#allocation2 + $0xc8] sm:$0x1] }
 0x25a   : > { %v1585_v31 = vrot.slane %v12237_v50, 4  ;;  %v3472_v32 = vor.u32 %v3471_v22, %v12294_v16  ;;  %v1587_v2 = vshrl.u32 %v937_v60, 16  ;;  %v1590_v27 = vshll.u32 %v937_v60, 16  ;;  %15160 = vst [vmem:[#allocation7_spill] sm:$0xff] %v12312_v41  ;;  %v1918_v22 = vld [vmem:[#allocation2 + $0x1a0] sm:$0x1] }
 0x25b   : > { %v3462_v45 = vor.u32 %v12298_v38, %v12288_v57  ;;  %v7020_v20 = vsel %vm544_vm0, %v6926_v48, %v5963_v1  ;;  %v2196_v36 = vrot.slane %v2195_v5, 4  ;;  %v2205_v55 = vor.u32 %v2204_v59, %v2200_v34  ;;  %v5252_v48 = vld [vmem:[#allocation2 + $0x180] sm:$0xe] }
 0x25c   : > { %v1589_v7 = vrot.slane %v1587_v2, 7  ;;  %v2210_v21 = vrot.slane %v2208_v28, 5  ;;  %v9420_v25 = vrot.slane %v4022_v51, 9  ;;  %v4242_v50 = vrot.slane %v12317_v56, 5  ;;  %v10138_v28 = vld [vmem:[#allocation2 + $0x108] sm:$0xff] }
 0x25d   : > { %v2201_v43 = vsel %vm10985_vm14, %v2196_v36, %v2200_v34  ;;  %v2206_v19 = vrot.slane %v2205_v55, 4  ;;  %v4245_v26 = vrot.slane %v12312_v41, 5  ;;  %v7086_v57 = vsel %vm7081_vm2, %v7020_v20, %v6155_v52  ;;  %v12328_v36 = vld [vmem:[#allocation2 + $0x184] sm:$0xf]  ;;  %v12330_v55 = vld [vmem:[#allocation2 + $0x188] sm:$0x1] }
 0x25e   : > { %v3473_v38 = vrot.slane %v3472_v32, 4  ;;  %v1592_v60 = vor.u32 %v1590_v27, %v1589_v7  ;;  %v1594_v1 = vrot.slane %v1589_v7, 4  ;;  %v4243_v59 = vsel %vm10972_vm11, %v9420_v25, %v4242_v50  ;;  %7691 = vmatmul.bf16.gmra.mxu1 %v7086_v57  ;;  %v5233_v7 = vld [vmem:[#allocation2 + $0x84] sm:$0xe] }
 0x25f   : > { %v2211_v5 = vsel %vm10985_vm14, %v2206_v19, %v2210_v21  ;;  %v5718_v51 = vunpack.c.l.b16 %v2201_v43  ;;  %v4244_v2 = vrot.slane %v4242_v50, 4  ;;  %v6342_v34 = vunpack.c.l.b16 %v4243_v59  ;;  %v12339_v21 = vld [vmem:[#allocation2 + $0xa4] sm:$0x1]  ;;  %v4388_v43 = vld [vmem:[#allocation2 + $0xc0] sm:$0xf] }
 0x260   : > { %v1593_v32 = vsel %vm10918_vm6, %v1585_v31, %v1592_v60  ;;  %v1919_v27 = vsel %vm10945_vm8, %v1594_v1, %v1918_v22  ;;  %v5719_v52 = vunpack.c.l.b16 %v2211_v5  ;;  %v7363_v20 = vsel %vm7081_vm2, %v7291_v9, %v12182_v23  ;;  %v12349_v19 = vld [vmem:[#allocation2 + $0xac] sm:$0xf] }
 0x261   : > { %6636 = vrot.lane.b32.xlu1 %v10138_v28, %s10631_s17  ;;  %v5434_v25 = vrot.slane %v12339_v21, 5  ;;  %v3477_v50 = vrot.slane %v3475_v44, 5  ;;  %1917 = vst.msk [vmem:[#allocation2 + $0x19c] sm:$0xf] %vm938_vm1, %v1593_v32  ;;  %v4246_v40 = vsel %vm10972_vm11, %v4244_v2, %v4245_v26  ;;  %7895 = vmatmul.bf16.gmra.mxu2 %v7363_v20  ;;  %v9465_v47 = vrot.slane %v5252_v48, 9 }
 0x262   : > { %1920 = vst [vmem:[#allocation2 + $0x1a0] sm:$0x1] %v1919_v27  ;;  %v5775_v31 = vpack.c.b16 %v5719_v52, %v5718_v51  ;;  %v6343_v23 = vunpack.c.l.b16 %v4246_v40  ;;  %v5550_v9 = vrot.slane %v12328_v36, 5  ;;  %v5553_v22 = vrot.slane %v12330_v55, 5  ;;  %v4389_v26 = vld [vmem:[#allocation2 + $0xc4] sm:$0xf] }
 0x263   : > { %v3463_v44 = vrot.slane %v3462_v45, 4  ;;  %v3478_v57 = vsel %vm10985_vm14, %v3473_v38, %v3477_v50  ;;  %v9446_v60 = vrot.slane %v5233_v7, 9  ;;  %v10477_v48 = vld [vmem:[#allocation2 + $0x88] sm:$0xf]  ;;  %v10136_v51 = vld [vmem:[#allocation2 + $0xf0] sm:$0xff]  ;;  %v4793_v38 = vshrl.u32 %v4388_v43, 16 }
 0x264   : > { %5814 = vrot.lane.b32.xlu2 %v5775_v31, %s10630_s14  ;;  %v6391_v1 = vpack.c.b16 %v6343_v23, %v6342_v34  ;;  %v5551_v59 = vsel %vm10972_vm11, %v9465_v47, %v5550_v9  ;;  %v5552_v28 = vrot.slane %v5550_v9, 4  ;;  %v5417_v5 = vrot.slane %v10477_v48, 5  ;;  %v12360_v32 = vld [vmem:[#allocation2 + $0xc8] sm:$0x1]  ;;  %v6619_v48 = vpop.permute.xlu1 %6618 }
 0x265   : > { %v3468_v2 = vsel %vm10985_vm14, %v3463_v44, %v12294_v16  ;;  %v6880_v45 = vunpack.c.l.b16 %v5551_v59  ;;  %v4796_v27 = vshll.u32 %v4388_v43, 16  ;;  %v4802_v7 = vshll.u32 %v4389_v26, 16  ;;  %v12373_v59 = vld [vmem:[#allocation2 + $0xb0] sm:$0x1] }
 0x266   : > { %6438 = vrot.lane.b32.xlu0 %v6391_v1, %s10630_s14  ;;  %v5554_v34 = vsel %vm10972_vm11, %v5552_v28, %v5553_v22  ;;  %v5418_v52 = vsel %vm10972_vm11, %v9446_v60, %v5417_v5  ;;  %v5419_v20 = vrot.slane %v5417_v5, 4  ;;  %v6235_v50 = vunpack.c.l.b16 %v3478_v57  ;;  %v10095_v5 = vld [vmem:[#allocation2 + $0x60] sm:$0xff] }
 0x267   : > { %v6881_v40 = vunpack.c.l.b16 %v5554_v34  ;;  %v4795_v47 = vrot.slane %v4793_v38, 4  ;;  %v4798_v31 = vrot.slane %v4796_v27, 5  ;;  %v4804_v23 = vrot.slane %v4802_v7, 5  ;;  %v1937_v38 = vld [vmem:[#allocation2 + $0x60] sm:$0xf]  ;;  %v5805_v7 = vpop.permute.xlu2 %5804 }
 0x268   : > { %v5421_v16 = vsel %vm10972_vm11, %v5419_v20, %v5420_v12  ;;  %v4806_v9 = vshrl.u32 %v4389_v26, 16  ;;  %v4812_v43 = vshll.u32 %v12360_v32, 16  ;;  %v6842_v44 = vunpack.c.l.b16 %v5418_v52 }
 0x269   : > { %6632 = vrot.lane.b32.xlu1 %v10136_v51, %s10631_s17  ;;  %v6916_v22 = vpack.c.b16 %v6881_v40, %v6880_v45  ;;  %v6843_v60 = vunpack.c.l.b16 %v5421_v16  ;;  %v4799_v1 = vor.u32 %v4798_v31, %v4795_v47  ;;  %v6234_v6 = vunpack.c.l.b16 %v3468_v2  ;;  %v6427_v51 = vpop.permute.xlu0 %6426  ;;  %v12382_v47 = vld [vmem:[#allocation2 + $0x64] sm:$0xf] }
 0x26a   : > { %v4808_v12 = vrot.slane %v4806_v9, 4  ;;  %v4814_v40 = vrot.slane %v4812_v43, 5  ;;  %v3489_v43 = vshll.u32 %v12037_v46, 16  ;;  %v2222_v16 = vshll.u32 %v12382_v47, 16 }
 0x26b   : > { %9953 = vmatmul.msk.bf16.gmra.mxu3 %vm6920_vm15, %v6916_v22  ;;  %v6897_v45 = vpack.c.b16 %v6843_v60, %v6842_v44  ;;  %v4800_v34 = vrot.slane %v4799_v1, 4  ;;  %v6289_v20 = vpack.c.b16 %v6235_v50, %v6234_v6  ;;  %v12389_v22 = vld [vmem:[#allocation2 + $0x68] sm:$0x1]  ;;  %v2213_v44 = vshrl.u32 %v1937_v38, 16  ;;  %v3163_v1 = vld [vmem:[#allocation2 + $0x84] sm:$0xf] }
 0x26c   : > { %6166 = vrot.lane.b32.xlu2 %v10095_v5, %s10632_s18  ;;  %v4809_v2 = vor.u32 %v4808_v12, %v4804_v23  ;;  %v2216_v6 = vshll.u32 %v1937_v38, 16  ;;  %v10058_v5 = vld [vmem:[#allocation2 + $0x18] sm:$0xff]  ;;  %v2224_v38 = vrot.slane %v2222_v16, 5  ;;  %v3483_v57 = vshll.u32 %v3163_v1, 16 }
 0x26d   : > { %9934 = vmatmul.msk.bf16.gmra.mxu0 %vm6920_vm15, %v6897_v45  ;;  %v4805_v9 = vsel %vm10985_vm14, %v4800_v34, %v4804_v23  ;;  %v7207_v50 = vsel %vm6920_vm15, %v6289_v20, %v6427_v51  ;;  %v2215_v31 = vrot.slane %v2213_v44, 4  ;;  %v2226_v45 = vshrl.u32 %v12382_v47, 16 }
 0x26e   : > { %v4810_v60 = vrot.slane %v4809_v2, 4  ;;  %v6692_v12 = vunpack.c.l.b16 %v4805_v9  ;;  %v7293_v23 = vsel %vm544_vm0, %v7207_v50, %v6619_v48  ;;  %v2218_v27 = vrot.slane %v2216_v6, 5  ;;  %v4397_v9 = vld [vmem:[#allocation2 + $0x10c] sm:$0xf] }
 0x26f   : > { %v2232_v51 = vshll.u32 %v12389_v22, 16  ;;  %v6929_v20 = vsel %vm6920_vm15, %v10058_v5, %v5805_v7  ;;  %v2228_v26 = vrot.slane %v2226_v45, 4  ;;  %v3480_v44 = vshrl.u32 %v3163_v1, 16  ;;  %v6157_v46 = vpop.permute.xlu2 %6156 }
 0x270   : > { %v4815_v34 = vsel %vm10985_vm14, %v4810_v60, %v4814_v40  ;;  %v2219_v52 = vor.u32 %v2218_v27, %v2215_v31  ;;  %v4889_v28 = vshrl.u32 %v4396_v39, 16  ;;  %v12402_v48 = vrot.slane %v3489_v43, 5  ;;  %v5965_v60 = vpop.permute.xlu1 %5964 }
 0x271   : > { %v6693_v2 = vunpack.c.l.b16 %v4815_v34  ;;  %v3495_v40 = vrot.slane %v3493_v63, 4  ;;  %v2229_v50 = vor.u32 %v2228_v26, %v2224_v38  ;;  %v2234_v7 = vrot.slane %v2232_v51, 5 }
 0x272   : > { %v2220_v6 = vrot.slane %v2219_v52, 4  ;;  %v4891_v5 = vrot.slane %v4889_v28, 4  ;;  %v4892_v16 = vshll.u32 %v4396_v39, 16  ;;  %v4898_v1 = vshll.u32 %v4397_v9, 16 }
 0x273   : > { %v6742_v35 = vpack.c.b16 %v6693_v2, %v6692_v12  ;;  %v2230_v45 = vrot.slane %v2229_v50, 4  ;;  %v4902_v27 = vshrl.u32 %v4397_v9, 16  ;;  %v4908_v31 = vshll.u32 %v12400_v10, 16 }
 0x274   : > { %v3482_v34 = vrot.slane %v3480_v44, 4  ;;  %v3485_v12 = vrot.slane %v3483_v57, 5  ;;  %v2225_v43 = vsel %vm10985_vm14, %v2220_v6, %v2224_v38  ;;  %v4894_v63 = vrot.slane %v4892_v16, 5  ;;  %v5253_v44 = vld [vmem:[#allocation2 + $0x18c] sm:$0xe] }
 0x275   : > { %6788 = vrot.lane.b32.xlu0 %v6742_v35, %s10632_s18  ;;  %v7022_v26 = vsel %vm544_vm0, %v6929_v20, %v5965_v60  ;;  %v2235_v28 = vsel %vm10985_vm14, %v2230_v45, %v2234_v7  ;;  %v4900_v39 = vrot.slane %v4898_v1, 5  ;;  %v4904_v52 = vrot.slane %v4902_v27, 4  ;;  %v2796_v35 = vld [vmem:[#allocation2 + $0x60] sm:$0xe]  ;;  %v12417_v20 = vld [vmem:[#allocation2 + $0x190] sm:$0xf] }
 0x276   : > { %v3496_v51 = vor.u32 %v3495_v40, %v12402_v48  ;;  %v5720_v2 = vunpack.c.l.b16 %v2225_v43  ;;  %v5721_v9 = vunpack.c.l.b16 %v2235_v28  ;;  %v4895_v50 = vor.u32 %v4894_v63, %v4891_v5  ;;  %v12427_v43 = vld [vmem:[#allocation2 + $0x194] sm:$0x1]  ;;  %v5234_v28 = vld [vmem:[#allocation2 + $0x90] sm:$0xe]  ;;  %v12584_v45 = vld [vmem:[#allocation2 + $0x10c] sm:$0xf] }
 0x277   : > { %v4905_v57 = vor.u32 %v4904_v52, %v4900_v39  ;;  %v4910_v58 = vrot.slane %v4908_v31, 5  ;;  %v7089_v38 = vsel %vm7081_vm2, %v7022_v26, %v6157_v46  ;;  %v7366_v6 = vsel %vm7081_vm2, %v7293_v23, %v12268_v54  ;;  %15169 = vst [vmem:[#allocation16_spill] sm:$0xff] %v12584_v45 }
 0x278   : > { %v5776_v60 = vpack.c.b16 %v5721_v9, %v5720_v2  ;;  %v4896_v7 = vrot.slane %v4895_v50, 4  ;;  %7696 = vmatmul.bf16.gmra.mxu1 %v7089_v38  ;;  %7900 = vmatmul.bf16.gmra.mxu2 %v7366_v6  ;;  %v9381_v16 = vrot.slane %v2796_v35, 9  ;;  %v2977_v40 = vrot.slane %v12382_v47, 5 }
 0x279   : > { %v4906_v5 = vrot.slane %v4905_v57, 4  ;;  %v2980_v1 = vrot.slane %v12389_v22, 5  ;;  %v9466_v27 = vrot.slane %v5253_v44, 9  ;;  %v5557_v46 = vrot.slane %v12417_v20, 5 }
 0x27a   : > { %5816 = vrot.lane.b32.xlu2 %v5776_v60, %s10630_s14  ;;  %v4901_v54 = vsel %vm10985_vm14, %v4896_v7, %v4900_v39  ;;  %v2978_v23 = vsel %vm10972_vm11, %v9381_v16, %v2977_v40  ;;  %v2979_v31 = vrot.slane %v2977_v40, 4  ;;  %v5142_v47 = vshrl.u32 %v12328_v36, 16  ;;  %v4023_v36 = vld [vmem:[#allocation2 + $0xe4] sm:$0xe]  ;;  %v12438_v60 = vld [vmem:[#allocation2 + $0xec] sm:$0x1] }
 0x27b   : > { %v3486_v63 = vor.u32 %v3485_v12, %v3482_v34  ;;  %v4911_v22 = vsel %vm10985_vm14, %v4906_v5, %v4910_v58  ;;  %v6700_v26 = vunpack.c.l.b16 %v4901_v54  ;;  %v3497_v52 = vrot.slane %v3496_v51, 4  ;;  %v10479_v58 = vld [vmem:[#allocation2 + $0x94] sm:$0xf]  ;;  %15162 = vst [vmem:[#allocation9_spill] sm:$0xff] %v12438_v60  ;;  %v6429_v5 = vpop.permute.xlu0 %6428 }
 0x27c   : > { %v6701_v35 = vunpack.c.l.b16 %v4911_v22  ;;  %v2981_v39 = vsel %vm10972_vm11, %v2979_v31, %v2980_v1  ;;  %v5558_v2 = vsel %vm10972_vm11, %v9466_v27, %v5557_v46  ;;  %v5880_v9 = vunpack.c.l.b16 %v2978_v23  ;;  %v10096_v23 = vld [vmem:[#allocation2 + $0x6c] sm:$0xff]  ;;  %v5807_v31 = vpop.permute.xlu2 %5806  ;;  %v12453_v22 = vpop.permute.xlu1 %5966 }
 0x27d   : > { %v5881_v50 = vunpack.c.l.b16 %v2981_v39  ;;  %v5559_v44 = vrot.slane %v5557_v46, 4  ;;  %v5560_v57 = vrot.slane %v12427_v43, 5  ;;  %v6882_v12 = vunpack.c.l.b16 %v5558_v2  ;;  %v12447_v46 = vld [vmem:[#allocation2 + $0xe8] sm:$0xf] }
 0x27e   : > { %v6746_v34 = vpack.c.b16 %v6701_v35, %v6700_v26  ;;  %v9447_v38 = vrot.slane %v5234_v28, 9  ;;  %v5424_v6 = vrot.slane %v10479_v58, 5  ;;  %v3487_v51 = vrot.slane %v3486_v63, 4  ;;  %15163 = vst [vmem:[#allocation10_spill] sm:$0xff] %v12447_v46  ;;  %v10140_v58 = vld [vmem:[#allocation2 + $0x120] sm:$0xff] }
 0x27f   : > { %v3501_v7 = vrot.slane %v3499_v53, 5  ;;  %v5936_v16 = vpack.c.b16 %v5881_v50, %v5880_v9  ;;  %v5561_v40 = vsel %vm10972_vm11, %v5559_v44, %v5560_v57  ;;  %v9421_v63 = vrot.slane %v4023_v36, 9  ;;  %v3165_v57 = vld [vmem:[#allocation2 + $0x90] sm:$0xf]  ;;  %v1939_v36 = vld [vmem:[#allocation2 + $0x6c] sm:$0xf] }
 0x280   : > { %6796 = vrot.lane.b32.xlu0 %v6746_v34, %s10632_s18  ;;  %v6883_v1 = vunpack.c.l.b16 %v5561_v40  ;;  %v5425_v27 = vsel %vm10972_vm11, %v9447_v38, %v5424_v6  ;;  %v5426_v54 = vrot.slane %v5424_v6, 4  ;;  %v5148_v49 = vshll.u32 %v12330_v55, 16 }
 0x281   : > { %v3502_v53 = vsel %vm10985_vm14, %v3497_v52, %v3501_v7  ;;  %5976 = vrot.lane.b32.xlu1 %v5936_v16, %s10631_s17  ;;  %v4249_v26 = vrot.slane %v12447_v46, 5  ;;  %v4252_v28 = vrot.slane %v12438_v60, 5  ;;  %v3492_v39 = vsel %vm10985_vm14, %v3487_v51, %v12402_v48  ;;  %v10059_v16 = vld [vmem:[#allocation2 + $0x24] sm:$0xff] }
 0x282   : > { %v6917_v2 = vpack.c.b16 %v6883_v1, %v6882_v12  ;;  %v5428_v55 = vsel %vm10972_vm11, %v5426_v54, %v5427_v14  ;;  %6168 = vrot.lane.b32.xlu2 %v10096_v23, %s10632_s18  ;;  %v6844_v52 = vunpack.c.l.b16 %v5425_v27  ;;  %v12469_v38 = vrot.slane %v5142_v47, 4  ;;  %v12472_v12 = vld [vmem:[#allocation2 + $0x70] sm:$0xf]  ;;  %v12479_v47 = vld [vmem:[#allocation2 + $0x74] sm:$0x1] }
 0x283   : > { %v6845_v9 = vunpack.c.l.b16 %v5428_v55  ;;  %v4250_v50 = vsel %vm10972_vm11, %v9421_v63, %v4249_v26  ;;  %v4251_v44 = vrot.slane %v4249_v26, 4  ;;  %v6237_v48 = vunpack.c.l.b16 %v3502_v53  ;;  %v10139_v54 = vld [vmem:[#allocation2 + $0x114] sm:$0xff] }
 0x284   : > { %15164 = vst [vmem:[#allocation11_spill] sm:$0xff] %v12469_v38  ;;  %9954 = vmatmul.msk.bf16.gmra.mxu3 %vm6920_vm15, %v6917_v2  ;;  %v6344_v18 = vunpack.c.l.b16 %v4250_v50  ;;  %v12474_v14 = vrot.slane %v5148_v49, 5  ;;  %v6236_v7 = vunpack.c.l.b16 %v3492_v39  ;;  %v3504_v1 = vshrl.u32 %v3165_v57, 16  ;;  %v12485_v39 = vpop.permute.xlu0 %6430 }
 0x285   : > { %v6898_v6 = vpack.c.b16 %v6845_v9, %v6844_v52  ;;  %v4253_v51 = vsel %vm10972_vm11, %v4251_v44, %v4252_v28  ;;  %v2237_v27 = vshrl.u32 %v1939_v36, 16  ;;  %v3507_v23 = vshll.u32 %v3165_v57, 16  ;;  %v12487_v52 = vld [vmem:[#allocation2 + $0xf8] sm:$0x1] }
 0x286   : > { %15165 = vst [vmem:[#allocation12_spill] sm:$0xff] %v12474_v14  ;;  %v6345_v40 = vunpack.c.l.b16 %v4253_v51  ;;  %v2240_v63 = vshll.u32 %v1939_v36, 16  ;;  %v2246_v49 = vshll.u32 %v12472_v12, 16  ;;  %v2250_v53 = vshrl.u32 %v12472_v12, 16  ;;  %v4024_v36 = vld [vmem:[#allocation2 + $0xf0] sm:$0xe]  ;;  %v6159_v51 = vpop.permute.xlu2 %6158 }
 0x287   : > { %9935 = vmatmul.msk.bf16.gmra.mxu0 %vm6920_vm15, %v6898_v6  ;;  %v6290_v26 = vpack.c.b16 %v6237_v48, %v6236_v7  ;;  %v6932_v2 = vsel %vm6920_vm15, %v10059_v16, %v5807_v31  ;;  %v2239_v55 = vrot.slane %v2237_v27, 4  ;;  %v2256_v57 = vshll.u32 %v12479_v47, 16  ;;  %v2797_v48 = vld [vmem:[#allocation2 + $0x6c] sm:$0xe] }
 0x288   : > { %v6392_v28 = vpack.c.b16 %v6345_v40, %v6344_v18  ;;  %v2242_v9 = vrot.slane %v2240_v63, 5  ;;  %v2248_v50 = vrot.slane %v2246_v49, 5  ;;  %v2252_v44 = vrot.slane %v2250_v53, 4  ;;  %v6621_v40 = vpop.permute.xlu1 %6620  ;;  %v12496_v63 = vld [vmem:[#allocation2 + $0xf4] sm:$0xf] }
 0x289   : > { %6638 = vrot.lane.b32.xlu1 %v10139_v54, %s10631_s17  ;;  %v7210_v6 = vsel %vm6920_vm15, %v6290_v26, %v6429_v5  ;;  %v3513_v18 = vshll.u32 %v12160_v33, 16  ;;  %v3506_v7 = vrot.slane %v3504_v1, 4  ;;  %v3509_v16 = vrot.slane %v3507_v23, 5  ;;  %15166 = vst [vmem:[#allocation13_spill] sm:$0xff] %v12496_v63 }
 0x28a   : > { %6440 = vrot.lane.b32.xlu0 %v6392_v28, %s10630_s14  ;;  %v2243_v27 = vor.u32 %v2242_v9, %v2239_v55  ;;  %v2253_v54 = vor.u32 %v2252_v44, %v2248_v50  ;;  %v9422_v49 = vrot.slane %v4024_v36, 9  ;;  %v4256_v53 = vrot.slane %v12496_v63, 5 }
 0x28b   : > { %v4259_v5 = vrot.slane %v12487_v52, 5  ;;  %v7024_v26 = vsel %vm544_vm0, %v6932_v2, %v12453_v22  ;;  %v2258_v35 = vrot.slane %v2256_v57, 5  ;;  %v12503_v23 = vrot.slane %v3513_v18, 5  ;;  %v5254_v57 = vld [vmem:[#allocation2 + $0x198] sm:$0xe] }
 0x28c   : > { %v2244_v28 = vrot.slane %v2243_v27, 4  ;;  %v2254_v34 = vrot.slane %v2253_v54, 4  ;;  %v7092_v1 = vsel %vm7081_vm2, %v7024_v26, %v6159_v51  ;;  %v4257_v55 = vsel %vm10972_vm11, %v9422_v49, %v4256_v53 }
 0x28d   : > { %v4258_v9 = vrot.slane %v4256_v53, 4  ;;  %7701 = vmatmul.bf16.gmra.mxu1 %v7092_v1  ;;  %v2984_v44 = vrot.slane %v12472_v12, 5  ;;  %v6346_v2 = vunpack.c.l.b16 %v4257_v55  ;;  %v9382_v27 = vrot.slane %v2797_v48, 9  ;;  %v12516_v53 = vld [vmem:[#allocation2 + $0x19c] sm:$0xf]  ;;  %v6781_v1 = vpop.permute.xlu0 %6780 }
 0x28e   : > { %v2249_v36 = vsel %vm10985_vm14, %v2244_v28, %v2248_v50  ;;  %v2259_v22 = vsel %vm10985_vm14, %v2254_v34, %v2258_v35  ;;  %v3519_v18 = vrot.slane %v3517_v62, 4  ;;  %v12518_v12 = vld [vmem:[#allocation2 + $0x1a0] sm:$0x1]  ;;  %v2987_v34 = vrot.slane %v12479_v47, 5  ;;  %v5235_v48 = vld [vmem:[#allocation2 + $0x9c] sm:$0xe] }
 0x28f   : > { %v5722_v51 = vunpack.c.l.b16 %v2249_v36  ;;  %v5723_v54 = vunpack.c.l.b16 %v2259_v22  ;;  %v4260_v49 = vsel %vm10972_vm11, %v4258_v9, %v4259_v5  ;;  %v2985_v50 = vsel %vm10972_vm11, %v9382_v27, %v2984_v44  ;;  %v10480_v27 = vld [vmem:[#allocation2 + $0xa0] sm:$0xf] }
 0x290   : > { %v6347_v26 = vunpack.c.l.b16 %v4260_v49  ;;  %v2986_v35 = vrot.slane %v2984_v44, 4  ;;  %v3510_v28 = vor.u32 %v3509_v16, %v3506_v7  ;;  %v7295_v33 = vsel %vm544_vm0, %v7210_v6, %v6621_v40  ;;  %v4392_v49 = vld [vmem:[#allocation2 + $0xf0] sm:$0xf] }
 0x291   : > { %v5777_v62 = vpack.c.b16 %v5723_v54, %v5722_v51  ;;  %v9467_v55 = vrot.slane %v5254_v57, 9  ;;  %v5564_v9 = vrot.slane %v12516_v53, 5  ;;  %v5567_v22 = vrot.slane %v12518_v12, 5  ;;  %v5809_v54 = vpop.permute.xlu2 %5808 }
 0x292   : > { %v6393_v36 = vpack.c.b16 %v6347_v26, %v6346_v2  ;;  %v2988_v5 = vsel %vm10972_vm11, %v2986_v35, %v2987_v34  ;;  %v3520_v44 = vor.u32 %v3519_v18, %v12503_v23  ;;  %v5882_v47 = vunpack.c.l.b16 %v2985_v50  ;;  %v12533_v2 = vpop.permute.xlu1 %5968  ;;  %v4393_v26 = vld [vmem:[#allocation2 + $0xf4] sm:$0xf]  ;;  %v12538_v34 = vld [vmem:[#allocation2 + $0xf8] sm:$0x1] }
 0x293   : > { %5818 = vrot.lane.b32.xlu2 %v5777_v62, %s10630_s14  ;;  %v5883_v7 = vunpack.c.l.b16 %v2988_v5  ;;  %v9448_v16 = vrot.slane %v5235_v48, 9  ;;  %v5565_v6 = vsel %vm10972_vm11, %v9467_v55, %v5564_v9  ;;  %v5566_v40 = vrot.slane %v5564_v9, 4 }
 0x294   : > { %6442 = vrot.lane.b32.xlu0 %v6393_v36, %s10630_s14  ;;  %v5431_v57 = vrot.slane %v10480_v27, 5  ;;  %v7369_v51 = vsel %vm7081_vm2, %v7295_v33, %v6781_v1  ;;  %v12536_v18 = vrot.slane %v3510_v28, 4  ;;  %v6884_v50 = vunpack.c.l.b16 %v5565_v6 }
 0x295   : > { %v5937_v35 = vpack.c.b16 %v5883_v7, %v5882_v47  ;;  %7905 = vmatmul.bf16.gmra.mxu2 %v7369_v51  ;;  %v4841_v48 = vshrl.u32 %v4392_v49, 16  ;;  %v5568_v62 = vsel %vm10972_vm11, %v5566_v40, %v5567_v22  ;;  %v4844_v5 = vshll.u32 %v4392_v49, 16  ;;  %v4027_v40 = vld [vmem:[#allocation2 + $0x114] sm:$0xe]  ;;  %v12552_v51 = vld [vmem:[#allocation2 + $0x11c] sm:$0x1]  ;;  %v12568_v61 = vpop.permute.xlu0 %6790 }
 0x296   : > { %v5432_v55 = vsel %vm10972_vm11, %v9448_v16, %v5431_v57  ;;  %v5433_v36 = vrot.slane %v5431_v57, 4  ;;  %v12544_v9 = vrot.slane %v3520_v44, 4  ;;  %v6885_v28 = vunpack.c.l.b16 %v5568_v62  ;;  %v10097_v44 = vld [vmem:[#allocation2 + $0x78] sm:$0xff]  ;;  %15167 = vst [vmem:[#allocation14_spill] sm:$0xff] %v12568_v61 }
 0x297   : > { %5978 = vrot.lane.b32.xlu1 %v5937_v35, %s10631_s17  ;;  %v4843_v33 = vrot.slane %v4841_v48, 4  ;;  %v4850_v1 = vshll.u32 %v4393_v26, 16  ;;  %v4846_v7 = vrot.slane %v4844_v5, 5  ;;  %v4854_v6 = vshrl.u32 %v4393_v26, 16  ;;  %v12554_v35 = vpop.f32.mrf.mxu2  ;;  %v12559_v26 = vld [vmem:[#allocation2 + $0x118] sm:$0xf] }
 0x298   : > { %v5435_v47 = vsel %vm10972_vm11, %v5433_v36, %v5434_v25  ;;  %v4860_v22 = vshll.u32 %v12538_v34, 16  ;;  %v6918_v16 = vpack.c.b16 %v6885_v28, %v6884_v50  ;;  %v6846_v27 = vunpack.c.l.b16 %v5432_v55  ;;  %v10060_v36 = vld [vmem:[#allocation2 + $0x30] sm:$0xff] }
 0x299   : > { %v6847_v49 = vunpack.c.l.b16 %v5435_v47  ;;  %v4852_v57 = vrot.slane %v4850_v1, 5  ;;  %v3525_v21 = vrot.slane %v3523_v29, 5  ;;  %v4847_v25 = vor.u32 %v4846_v7, %v4843_v33  ;;  %v4026_v29 = vld [vmem:[#allocation2 + $0x108] sm:$0xe] }
 0x29a   : > { %v4856_v62 = vrot.slane %v4854_v6, 4  ;;  %v3516_v50 = vsel %vm10985_vm14, %v12536_v18, %v12503_v23  ;;  %9955 = vmatmul.msk.bf16.gmra.mxu3 %vm6920_vm15, %v6918_v16  ;;  %v9425_v5 = vrot.slane %v4027_v40, 9  ;;  %v4277_v28 = vrot.slane %v12559_v26, 5  ;;  %v12571_v6 = vld [vmem:[#allocation2 + $0x110] sm:$0x1] }
 0x29b   : > { %v6899_v55 = vpack.c.b16 %v6847_v49, %v6846_v27  ;;  %6170 = vrot.lane.b32.xlu2 %v10097_v44, %s10632_s18  ;;  %v4848_v33 = vrot.slane %v4847_v25, 4  ;;  %v4862_v47 = vrot.slane %v4860_v22, 5  ;;  %v4280_v7 = vrot.slane %v12552_v51, 5  ;;  %15168 = vst [vmem:[#allocation15_spill] sm:$0xff] %v12571_v6  ;;  %v4400_v27 = vld [vmem:[#allocation2 + $0x120] sm:$0xf]  ;;  %v12582_v25 = vpop.permute.xlu1 %6622 }
 0x29c   : > { %v4857_v1 = vor.u32 %v4856_v62, %v4852_v57  ;;  %v3526_v23 = vsel %vm10985_vm14, %v12544_v9, %v3525_v21  ;;  %v6935_v18 = vsel %vm6920_vm15, %v10060_v36, %v5809_v54  ;;  %v4278_v40 = vsel %vm10972_vm11, %v9425_v5, %v4277_v28  ;;  %v6161_v62 = vpop.permute.xlu2 %6160 }
 0x29d   : > { %9936 = vmatmul.msk.bf16.gmra.mxu0 %vm6920_vm15, %v6899_v55  ;;  %v4279_v16 = vrot.slane %v4277_v28, 4  ;;  %v4853_v22 = vsel %vm10985_vm14, %v4848_v33, %v4852_v57  ;;  %v6352_v44 = vunpack.c.l.b16 %v4278_v40  ;;  %v9424_v9 = vrot.slane %v4026_v29, 9  ;;  %v4401_v33 = vld [vmem:[#allocation2 + $0x124] sm:$0xf] }
 0x29e   : > { %v4858_v49 = vrot.slane %v4857_v1, 4  ;;  %v6696_v21 = vunpack.c.l.b16 %v4853_v22  ;;  %v4270_v55 = vrot.slane %v12584_v45, 5  ;;  %v4273_v36 = vrot.slane %v12571_v6, 5  ;;  %v1947_v6 = vld [vmem:[#allocation2 + $0x9c] sm:$0xf] }
 0x29f   : > { %v4281_v54 = vsel %vm10972_vm11, %v4279_v16, %v4280_v7  ;;  %v7026_v28 = vsel %vm544_vm0, %v6935_v18, %v12533_v2  ;;  %v4937_v1 = vshrl.u32 %v4400_v27, 16  ;;  %v12597_v16 = vld [vmem:[#allocation2 + $0x128] sm:$0x1]  ;;  %v6238_v48 = vunpack.c.l.b16 %v3516_v50 }
 0x2a0   : > { %v4863_v5 = vsel %vm10985_vm14, %v4858_v49, %v4862_v47  ;;  %v6353_v57 = vunpack.c.l.b16 %v4281_v54  ;;  %v4271_v29 = vsel %vm10972_vm11, %v9424_v9, %v4270_v55  ;;  %v4272_v22 = vrot.slane %v4270_v55, 4  ;;  %15170 = vst [vmem:[#allocation17_spill] sm:$0xff] %v12597_v16  ;;  %v3167_v54 = vld [vmem:[#allocation2 + $0x9c] sm:$0xf]  ;;  %v12602_v9 = vpop.f32.mrf.mxu2 }
 0x2a1   : > { %v6697_v40 = vunpack.c.l.b16 %v4863_v5  ;;  %v7095_v7 = vsel %vm7081_vm2, %v7026_v28, %v6161_v62  ;;  %v4939_v47 = vrot.slane %v4937_v1, 4  ;;  %v4940_v49 = vshll.u32 %v4400_v27, 16  ;;  %v12607_v28 = vpop.permute.xlu0 %6432 }
 0x2a2   : > { %v6396_v31 = vpack.c.b16 %v6353_v57, %v6352_v44  ;;  %7706 = vmatmul.bf16.gmra.mxu1 %v7095_v7  ;;  %v4274_v2 = vsel %vm10972_vm11, %v4272_v22, %v4273_v36  ;;  %v4946_v18 = vshll.u32 %v4401_v33, 16  ;;  %v4950_v5 = vshrl.u32 %v4401_v33, 16  ;;  %v12609_v36 = vpop.f32.mrf.mxu0 }
 0x2a3   : > { %v6744_v14 = vpack.c.b16 %v6697_v40, %v6696_v21  ;;  %6640 = vrot.lane.b32.xlu2 %v10140_v58, %s10631_s17  ;;  %v6239_v55 = vunpack.c.l.b16 %v3526_v23  ;;  %v6350_v62 = vunpack.c.l.b16 %v4271_v29  ;;  %v4942_v50 = vrot.slane %v4940_v49, 5 }
 0x2a4   : > { %6448 = vrot.lane.b32.xlu1 %v6396_v31, %s10630_s14  ;;  %v4956_v44 = vshll.u32 %v12597_v16, 16  ;;  %v4948_v27 = vrot.slane %v4946_v18, 5  ;;  %v4952_v21 = vrot.slane %v4950_v5, 4  ;;  %v3528_v57 = vshrl.u32 %v3167_v54, 16  ;;  %v5236_v31 = vld [vmem:[#allocation2 + $0xa8] sm:$0xe] }
 0x2a5   : > { %6792 = vrot.lane.b32.xlu0 %v6744_v14, %s10632_s18  ;;  %v3531_v58 = vshll.u32 %v3167_v54, 16  ;;  %v6351_v33 = vunpack.c.l.b16 %v4274_v2  ;;  %v4943_v1 = vor.u32 %v4942_v50, %v4939_v47  ;;  %v3537_v23 = vshll.u32 %v12281_v24, 16  ;;  %v12614_v18 = vld [vmem:[#allocation2 + $0x7c] sm:$0xf] }
 0x2a6   : > { %v4958_v40 = vrot.slane %v4956_v44, 5  ;;  %v4953_v29 = vor.u32 %v4952_v21, %v4948_v27  ;;  %v3530_v22 = vrot.slane %v3528_v57, 4  ;;  %v15171_v49 = vshrl.u32 %v12281_v24, 16  ;;  %v12626_v44 = vpop.permute.xlu1 %6630  ;;  %v2798_v21 = vld [vmem:[#allocation2 + $0x78] sm:$0xe] }
 0x2a7   : > { %v3533_v7 = vrot.slane %v3531_v58, 5  ;;  %v15172_v54 = vshrl.u32 %v12417_v20, 16  ;;  %v15174_v38 = vshll.u32 %v12427_v43, 16  ;;  %v4944_v47 = vrot.slane %v4943_v1, 4  ;;  %15176 = vst [vmem:[#allocation20_spill] sm:$0xff] %v12626_v44  ;;  %v10175_v20 = vld [vmem:[%s15124_s5 + $0x28] sm:$0xff] }
 0x2a8   : > { %v3543_v14 = vrot.slane %v15171_v49, 4  ;;  %v12624_v50 = vrot.slane %v3537_v23, 5  ;;  %v6291_v57 = vpack.c.b16 %v6239_v55, %v6238_v48  ;;  %v4954_v58 = vrot.slane %v4953_v29, 4  ;;  %v10481_v49 = vld [vmem:[#allocation2 + $0xac] sm:$0xf]  ;;  %8751 = vmatpush.bf16.msrb.mxu3 %v10175_v20 }
 0x2a9   : > { %v12618_v5 = vrot.slane %v15172_v54, 4  ;;  %v12622_v2 = vrot.slane %v15174_v38, 5  ;;  %v9449_v24 = vrot.slane %v5236_v31, 9  ;;  %v5438_v10 = vrot.slane %v10481_v49, 5  ;;  %v12634_v23 = vld [vmem:[#allocation2 + $0x80] sm:$0x1] }
 0x2aa   : > { %v4949_v43 = vsel %vm10985_vm14, %v4944_v47, %v4948_v27  ;;  %v3534_v38 = vor.u32 %v3533_v7, %v3530_v22  ;;  %v3544_v1 = vor.u32 %v3543_v14, %v12624_v50  ;;  %v2991_v54 = vrot.slane %v12614_v18, 5  ;;  %v4398_v7 = vld [vmem:[#allocation2 + $0x114] sm:$0xf]  ;;  %v4399_v47 = vld [vmem:[#allocation2 + $0x118] sm:$0xf] }
 0x2ab   : > { %15173 = vst [vmem:[#allocation18_spill] sm:$0xff] %v12618_v5  ;;  %v4959_v48 = vsel %vm10985_vm14, %v4954_v58, %v4958_v40  ;;  %v6704_v55 = vunpack.c.l.b16 %v4949_v43  ;;  %v9383_v31 = vrot.slane %v2798_v21, 9  ;;  %v7213_v29 = vsel %vm6920_vm15, %v6291_v57, %v12485_v39  ;;  %v12647_v21 = vpop.f32.mrf.mxu2  ;;  %v12657_v20 = vld [vmem:[#allocation2 + $0x11c] sm:$0x1] }
 0x2ac   : > { %15175 = vst [vmem:[#allocation19_spill] sm:$0xff] %v12622_v2  ;;  %v6395_v2 = vpack.c.b16 %v6351_v33, %v6350_v62  ;;  %v6705_v49 = vunpack.c.l.b16 %v4959_v48  ;;  %v5439_v27 = vsel %vm10972_vm11, %v9449_v24, %v5438_v10  ;;  %v5440_v22 = vrot.slane %v5438_v10, 4 }
 0x2ad   : > { %v3545_v14 = vrot.slane %v3544_v1, 4  ;;  %v2992_v62 = vsel %vm10972_vm11, %v9383_v31, %v2991_v54  ;;  %v2993_v33 = vrot.slane %v2991_v54, 4  ;;  %v2994_v40 = vrot.slane %v12634_v23, 5  ;;  %15177 = vst [vmem:[#allocation21_spill] sm:$0xff] %v12647_v21  ;;  %v6783_v31 = vpop.permute.xlu0 %6782 }
 0x2ae   : > { %6446 = vrot.lane.b32.xlu0 %v6395_v2, %s10630_s14  ;;  %v6748_v58 = vpack.c.b16 %v6705_v49, %v6704_v55  ;;  %v12649_v39 = vrot.slane %v3534_v38, 4  ;;  %v15178_v57 = vshll.u32 %v12303_v42, 16  ;;  %v15179_v10 = vrot.slane %v12022_v13, 5  ;;  %v12661_v55 = vpop.f32.mrf.mxu0  ;;  %v12669_v61 = vpop.permute.xlu1 %6624 }
 0x2af   : > { %v6848_v43 = vunpack.c.l.b16 %v5439_v27  ;;  %v2995_v54 = vsel %vm10972_vm11, %v2993_v33, %v2994_v40  ;;  %v5884_v48 = vunpack.c.l.b16 %v2992_v62  ;;  %v4913_v38 = vshrl.u32 %v4398_v7, 16 }
 0x2b0   : > { %v3549_v24 = vrot.slane %v15178_v57, 5  ;;  %v5442_v2 = vsel %vm10972_vm11, %v5440_v22, %v15179_v10  ;;  %6800 = vrot.lane.b32.xlu1 %v6748_v58, %s10632_s18  ;;  %v5885_v42 = vunpack.c.l.b16 %v2995_v54  ;;  %v4916_v49 = vshll.u32 %v4398_v7, 16  ;;  %v4028_v58 = vld [vmem:[#allocation2 + $0x120] sm:$0xe]  ;;  %v5811_v54 = vpop.permute.xlu2 %5810 }
 0x2b1   : > { %v6849_v1 = vunpack.c.l.b16 %v5442_v2  ;;  %v4922_v13 = vshll.u32 %v4399_v47, 16  ;;  %v4926_v10 = vshrl.u32 %v4399_v47, 16  ;;  %v4932_v27 = vshll.u32 %v12657_v20, 16  ;;  %v12667_v2 = vld [vmem:[#allocation2 + $0x128] sm:$0x1] }
 0x2b2   : > { %v3550_v22 = vsel %vm10985_vm14, %v3545_v14, %v3549_v24  ;;  %v5938_v33 = vpack.c.b16 %v5885_v42, %v5884_v48  ;;  %v4915_v62 = vrot.slane %v4913_v38, 4  ;;  %v4918_v40 = vrot.slane %v4916_v49, 5  ;;  %v1943_v24 = vld [vmem:[#allocation2 + $0x84] sm:$0xf]  ;;  %v12685_v49 = vld [vmem:[#allocation2 + $0x88] sm:$0xf] }
 0x2b3   : > { %v6900_v57 = vpack.c.b16 %v6849_v1, %v6848_v43  ;;  %v4924_v5 = vrot.slane %v4922_v13, 5  ;;  %v7297_v14 = vsel %vm544_vm0, %v7213_v29, %v12582_v25  ;;  %v4928_v47 = vrot.slane %v4926_v10, 4  ;;  %v12683_v38 = vld [vmem:[#allocation2 + $0x124] sm:$0xf] }
 0x2b4   : > { %v3540_v43 = vsel %vm10985_vm14, %v12649_v39, %v12624_v50  ;;  %v12680_v1 = vunpack.c.l.b16 %v3550_v22  ;;  %5980 = vrot.lane.b32.xlu2 %v5938_v33, %s10631_s17  ;;  %v4919_v48 = vor.u32 %v4918_v40, %v4915_v62  ;;  %v4934_v42 = vrot.slane %v4932_v27, 5  ;;  %v12693_v40 = vpop.f32.mrf.mxu2 }
 0x2b5   : > { %9937 = vmatmul.msk.bf16.gmra.mxu0 %vm6920_vm15, %v6900_v57  ;;  %v4929_v25 = vor.u32 %v4928_v47, %v4924_v5  ;;  %v9426_v29 = vrot.slane %v4028_v58, 9  ;;  %v4284_v13 = vrot.slane %v12683_v38, 5  ;;  %v4287_v57 = vrot.slane %v12667_v2, 5  ;;  %15180 = vst [vmem:[#allocation22_spill] sm:$0xff] %v12693_v40  ;;  %v10482_v47 = vld [vmem:[%s10738_s8 + $0x8] sm:$0xff]  ;;  %v12705_v40 = vpop.permute.xlu0 %6434 }
 0x2b6   : > { %v4920_v10 = vrot.slane %v4919_v48, 4  ;;  %v7372_v50 = vsel %vm7081_vm2, %v7297_v14, %v6783_v31  ;;  %v2285_v39 = vshrl.u32 %v1943_v24, 16  ;;  %v2288_v22 = vshll.u32 %v1943_v24, 16  ;;  %v12699_v31 = vld [vmem:[#allocation2 + $0x8c] sm:$0x1] }
 0x2b7   : > { %v4930_v7 = vrot.slane %v4929_v25, 4  ;;  %v4285_v27 = vsel %vm10972_vm11, %v9426_v29, %v4284_v13  ;;  %v4286_v33 = vrot.slane %v4284_v13, 4  ;;  %7910 = vmatmul.bf16.gmra.mxu2 %v7372_v50  ;;  %v2294_v62 = vshll.u32 %v12685_v49, 16  ;;  %v3169_v25 = vld [vmem:[#allocation2 + $0xa8] sm:$0xf] }
 0x2b8   : > { %v4925_v58 = vsel %vm10985_vm14, %v4920_v10, %v4924_v5  ;;  %8475 = vrot.lane.b32.xlu1 %v10482_v47, %s10630_s14  ;;  %v6354_v48 = vunpack.c.l.b16 %v4285_v27  ;;  %v2287_v14 = vrot.slane %v2285_v39, 4  ;;  %v2290_v24 = vrot.slane %v2288_v22, 5  ;;  %v12707_v5 = vpop.f32.mrf.mxu0 }
 0x2b9   : > { %v4935_v29 = vsel %vm10985_vm14, %v4930_v7, %v4934_v42  ;;  %v6702_v13 = vunpack.c.l.b16 %v4925_v58  ;;  %v4288_v50 = vsel %vm10972_vm11, %v4286_v33, %v4287_v57  ;;  %v2296_v60 = vrot.slane %v2294_v62, 5  ;;  %15181 = vst [vmem:[#allocation23_spill] sm:$0xff] %v12707_v5  ;;  %v5971_v33 = vpop.permute.xlu1 %5970  ;;  %v5237_v62 = vld [vmem:[#allocation2 + $0xb4] sm:$0xe] }
 0x2ba   : > { %v6703_v10 = vunpack.c.l.b16 %v4935_v29  ;;  %v6355_v27 = vunpack.c.l.b16 %v4288_v50  ;;  %v2291_v47 = vor.u32 %v2290_v24, %v2287_v14  ;;  %v2298_v39 = vshrl.u32 %v12685_v49, 16  ;;  %v4402_v14 = vld [vmem:[#allocation2 + $0x12c] sm:$0xf] }
 0x2bb   : > { %v2304_v22 = vshll.u32 %v12699_v31, 16  ;;  %v3552_v44 = vshrl.u32 %v3169_v25, 16  ;;  %v3555_v46 = vshll.u32 %v3169_v25, 16  ;;  %v3561_v7 = vshll.u32 %v12349_v19, 16 }
 0x2bc   : > { %v6240_v42 = vunpack.c.l.b16 %v3540_v43  ;;  %v6747_v58 = vpack.c.b16 %v6703_v10, %v6702_v13  ;;  %v6397_v8 = vpack.c.b16 %v6355_v27, %v6354_v48  ;;  %v2300_v57 = vrot.slane %v2298_v39, 4  ;;  %v4403_v13 = vld [vmem:[#allocation2 + $0x130] sm:$0xf]  ;;  %v10061_v10 = vld [vmem:[#allocation2 + $0x3c] sm:$0xff]  ;;  %v12726_v24 = vpop.f32.mrf.mxu2 }
 0x2bd   : > { %v2292_v21 = vrot.slane %v2291_v47, 4  ;;  %v3554_v41 = vrot.slane %v3552_v44, 4  ;;  %v3557_v5 = vrot.slane %v3555_v46, 5  ;;  %v12712_v29 = vrot.slane %v3561_v7, 5  ;;  %15183 = vst [vmem:[#allocation24_spill] sm:$0xff] %v12726_v24  ;;  %v10484_v24 = vld [vmem:[%s10738_s8] sm:$0xff] }
 0x2be   : > { %v6292_v50 = vpack.c.b16 %v12680_v1, %v6240_v42  ;;  %6798 = vrot.lane.b32.xlu0 %v6747_v58, %s10632_s18  ;;  %6450 = vrot.lane.b32.xlu2 %v6397_v8, %s10630_s14  ;;  %v2301_v43 = vor.u32 %v2300_v57, %v2296_v60  ;;  %v15182_v48 = vshrl.u32 %v12349_v19, 16  ;;  %v2306_v44 = vrot.slane %v2304_v22, 5  ;;  %v10483_v1 = vld [vmem:[#allocation2 + $0xb8] sm:$0xf]  ;;  %v6163_v22 = vpop.permute.xlu2 %6162 }
 0x2bf   : > { %v2297_v46 = vsel %vm10985_vm14, %v2292_v21, %v2296_v60  ;;  %v3558_v27 = vor.u32 %v3557_v5, %v3554_v41  ;;  %v9450_v47 = vrot.slane %v5237_v62, 9  ;;  %v5445_v42 = vrot.slane %v10483_v1, 5 }
 0x2c0   : > { %v3567_v25 = vrot.slane %v15182_v48, 4  ;;  %v2302_v39 = vrot.slane %v2301_v43, 4  ;;  %v4961_v58 = vshrl.u32 %v4402_v14, 16  ;;  %v7216_v8 = vsel %vm6920_vm15, %v6292_v50, %v12607_v28  ;;  %v12732_v28 = vld [vmem:[#allocation2 + $0x134] sm:$0x1]  ;;  %v12734_v50 = vpop.f32.mrf.mxu0 }
 0x2c1   : > { %v6938_v19 = vsel %vm6920_vm15, %v10061_v10, %v5811_v54  ;;  %v4964_v57 = vshll.u32 %v4402_v14, 16  ;;  %v4970_v48 = vshll.u32 %v4403_v13, 16  ;;  %v5446_v41 = vsel %vm10972_vm11, %v9450_v47, %v5445_v42  ;;  %15184 = vst [vmem:[#allocation25_spill] sm:$0xff] %v12732_v28  ;;  %v6785_v14 = vpop.permute.xlu0 %6784 }
 0x2c2   : > { %v3568_v7 = vor.u32 %v3567_v25, %v12712_v29  ;;  %v2307_v60 = vsel %vm10985_vm14, %v2302_v39, %v2306_v44  ;;  %v5447_v21 = vrot.slane %v5445_v42, 4  ;;  %v4974_v5 = vshrl.u32 %v4403_v13, 16 }
 0x2c3   : > { %v5726_v62 = vunpack.c.l.b16 %v2297_v46  ;;  %v5727_v43 = vunpack.c.l.b16 %v2307_v60  ;;  %v3559_v25 = vrot.slane %v3558_v27, 4  ;;  %v4963_v54 = vrot.slane %v4961_v58, 4  ;;  %v1941_v27 = vld [vmem:[#allocation2 + $0x78] sm:$0xf] }
 0x2c4   : > { %v3569_v10 = vrot.slane %v3568_v7, 4  ;;  %v7028_v1 = vsel %vm544_vm0, %v6938_v19, %v5971_v33  ;;  %v15185_v44 = vrot.slane %v12140_v4, 5  ;;  %v4966_v13 = vrot.slane %v4964_v57, 5  ;;  %v12746_v4 = vpop.permute.xlu1 %6626  ;;  %v10174_v19 = vld [vmem:[%s15124_s5 + $0x20] sm:$0xff] }
 0x2c5   : > { %v5779_v39 = vpack.c.b16 %v5727_v43, %v5726_v62  ;;  %v6850_v46 = vunpack.c.l.b16 %v5446_v41  ;;  %v4972_v60 = vrot.slane %v4970_v48, 5  ;;  %v7299_v58 = vsel %vm544_vm0, %v7216_v8, %v12669_v61  ;;  %8752 = vmatpush.bf16.msrb.mxu3 %v10174_v19 }
 0x2c6   : > { %v5449_v47 = vsel %vm10972_vm11, %v5447_v21, %v15185_v44  ;;  %8473 = vrot.lane.b32.xlu0 %v10484_v24, %s10630_s14  ;;  %v4967_v7 = vor.u32 %v4966_v13, %v4963_v54  ;;  %v4976_v63 = vrot.slane %v4974_v5, 4  ;;  %v4980_v33 = vshll.u32 %v12732_v28, 16 }
 0x2c7   : > { %v6851_v42 = vunpack.c.l.b16 %v5449_v47  ;;  %5822 = vrot.lane.b32.xlu1 %v5779_v39, %s10630_s14  ;;  %v3564_v57 = vsel %vm10985_vm14, %v3559_v25, %v12712_v29  ;;  %v15186_v61 = vshll.u32 %v12373_v59, 16  ;;  %v7098_v48 = vsel %vm7081_vm2, %v7028_v1, %v6163_v22 }
 0x2c8   : > { %v4968_v41 = vrot.slane %v4967_v7, 4  ;;  %v4977_v21 = vor.u32 %v4976_v63, %v4972_v60  ;;  %v4982_v5 = vrot.slane %v4980_v33, 5  ;;  %7711 = vmatmul.bf16.gmra.mxu1 %v7098_v48  ;;  %v2261_v62 = vshrl.u32 %v1941_v27, 16  ;;  %v5238_v48 = vld [vmem:[#allocation2 + $0xc0] sm:$0xe] }
 0x2c9   : > { %v3573_v8 = vrot.slane %v15186_v61, 5  ;;  %v6901_v24 = vpack.c.b16 %v6851_v42, %v6850_v46  ;;  %v2264_v54 = vshll.u32 %v1941_v27, 16  ;;  %v2270_v29 = vshll.u32 %v12614_v18, 16  ;;  %v3171_v46 = vld [vmem:[#allocation2 + $0xb4] sm:$0xf]  ;;  %v12768_v27 = vpop.f32.mrf.mxu2 }
 0x2ca   : > { %v2274_v59 = vshrl.u32 %v12614_v18, 16  ;;  %v4973_v25 = vsel %vm10985_vm14, %v4968_v41, %v4972_v60  ;;  %v4978_v22 = vrot.slane %v4977_v21, 4  ;;  %v2263_v1 = vrot.slane %v2261_v62, 4  ;;  %v12776_v41 = vpop.f32.mrf.mxu0  ;;  %v10062_v62 = vld [vmem:[#allocation2 + $0x48] sm:$0xff] }
 0x2cb   : > { %v3574_v43 = vsel %vm10985_vm14, %v3569_v10, %v3573_v8  ;;  %9938 = vmatmul.msk.bf16.gmra.mxu0 %vm6920_vm15, %v6901_v24  ;;  %v2280_v63 = vshll.u32 %v12634_v23, 16  ;;  %v6706_v44 = vunpack.c.l.b16 %v4973_v25  ;;  %v2266_v47 = vrot.slane %v2264_v54, 5  ;;  %v5813_v23 = vpop.permute.xlu2 %5812  ;;  %v10099_v8 = vld [vmem:[#allocation2 + $0x90] sm:$0xff]  ;;  %v12774_v24 = vpop.permute.xlu0 %6436  ;;  %v10489_v10 = vld [vmem:[#allocation2 + $0x148] sm:$0xf] }
 0x2cc   : > { %v2272_v13 = vrot.slane %v2270_v29, 5  ;;  %v2276_v39 = vrot.slane %v2274_v59, 4  ;;  %v5190_v42 = vshrl.u32 %v12516_v53, 16  ;;  %v4983_v18 = vsel %vm10985_vm14, %v4978_v22, %v4982_v5  ;;  %v1945_v29 = vld [vmem:[#allocation2 + $0x90] sm:$0xf] }
 0x2cd   : > { %v7375_v60 = vsel %vm7081_vm2, %v7299_v58, %v6785_v14  ;;  %v5196_v7 = vshll.u32 %v12518_v12, 16  ;;  %v6707_v33 = vunpack.c.l.b16 %v4983_v18  ;;  %v2267_v19 = vor.u32 %v2266_v47, %v2263_v1  ;;  %v10485_v22 = vld [vmem:[#allocation2 + $0xb8] sm:$0xf] }
 0x2ce   : > { %v2277_v61 = vor.u32 %v2276_v39, %v2272_v13  ;;  %7915 = vmatmul.bf16.gmra.mxu2 %v7375_v60  ;;  %v6242_v53 = vunpack.c.l.b16 %v3564_v57  ;;  %v6243_v21 = vunpack.c.l.b16 %v3574_v43  ;;  %v3576_v54 = vshrl.u32 %v3171_v46, 16  ;;  %v5973_v57 = vpop.permute.xlu1 %5972 }
 0x2cf   : > { %v3579_v5 = vshll.u32 %v3171_v46, 16  ;;  %v6749_v14 = vpack.c.b16 %v6707_v33, %v6706_v44  ;;  %v2268_v58 = vrot.slane %v2267_v19, 4  ;;  %v2282_v59 = vrot.slane %v2280_v63, 5  ;;  %6174 = vrot.lane.b32.xlu1 %v10099_v8, %s10632_s18  ;;  %v10486_v46 = vld [vmem:[#allocation2 + $0xc4] sm:$0xf] }
 0x2d0   : > { %v2278_v12 = vrot.slane %v2277_v61, 4  ;;  %v6941_v25 = vsel %vm6920_vm15, %v10062_v62, %v5813_v23  ;;  %v3585_v1 = vshll.u32 %v10485_v22, 16  ;;  %v15187_v47 = vshrl.u32 %v12059_v3, 16  ;;  %v1946_v3 = vld [vmem:[#allocation2 + $0x94] sm:$0xf] }
 0x2d1   : > { %v9451_v43 = vrot.slane %v5238_v48, 9  ;;  %6802 = vrot.lane.b32.xlu2 %v6749_v14, %s10632_s18  ;;  %v2273_v44 = vsel %vm10985_vm14, %v2268_v58, %v2272_v13  ;;  %v5452_v18 = vrot.slane %v10486_v46, 5  ;;  %v2309_v60 = vshrl.u32 %v1945_v29, 16 }
 0x2d2   : > { %v12782_v39 = vrot.slane %v15187_v47, 4  ;;  %v2283_v63 = vsel %vm10985_vm14, %v2278_v12, %v2282_v59  ;;  %v5724_v33 = vunpack.c.l.b16 %v2273_v44  ;;  %v3578_v19 = vrot.slane %v3576_v54, 4  ;;  %v1997_v12 = vld [vmem:[#allocation2 + $0x98] sm:$0x1] }
 0x2d3   : > { %v5725_v23 = vunpack.c.l.b16 %v2283_v63  ;;  %v3581_v61 = vrot.slane %v3579_v5, 5  ;;  %v5453_v8 = vsel %vm10972_vm11, %v9451_v43, %v5452_v18  ;;  %v5454_v48 = vrot.slane %v5452_v18, 4  ;;  %v10142_v59 = vld [vmem:[#allocation2 + $0x138] sm:$0xff] }
 0x2d4   : > { %v2311_v62 = vrot.slane %v2309_v60, 4  ;;  %v2312_v14 = vshll.u32 %v1945_v29, 16  ;;  %v12791_v47 = vrot.slane %v3585_v1, 5  ;;  %v7030_v13 = vsel %vm544_vm0, %v6941_v25, %v5973_v57  ;;  %v12802_v29 = vpop.f32.mrf.mxu2  ;;  %v6165_v57 = vpop.permute.xlu2 %6164 }
 0x2d5   : > { %v5778_v22 = vpack.c.b16 %v5725_v23, %v5724_v33  ;;  %v6852_v58 = vunpack.c.l.b16 %v5453_v8  ;;  %v15188_v44 = vrot.slane %v12360_v32, 5  ;;  %v2318_v63 = vshll.u32 %v1946_v3, 16  ;;  %v2800_v8 = vld [vmem:[#allocation2 + $0x90] sm:$0xe] }
 0x2d6   : > { %v2314_v5 = vrot.slane %v2312_v14, 5  ;;  %v2322_v46 = vshrl.u32 %v1946_v3, 16  ;;  %v12798_v43 = vrot.slane %v5190_v42, 4  ;;  %v12800_v18 = vrot.slane %v5196_v7, 5  ;;  %v12806_v42 = vpop.f32.mrf.mxu0 }
 0x2d7   : > { %v5456_v54 = vsel %vm10972_vm11, %v5454_v48, %v15188_v44  ;;  %v6293_v1 = vpack.c.b16 %v6243_v21, %v6242_v53  ;;  %5820 = vrot.lane.b32.xlu0 %v5778_v22, %s10630_s14  ;;  %6644 = vrot.lane.b32.xlu1 %v10142_v59, %s10631_s17  ;;  %v3582_v32 = vor.u32 %v3581_v61, %v3578_v19  ;;  %v2320_v33 = vrot.slane %v2318_v63, 5  ;;  %v6787_v48 = vpop.permute.xlu0 %6786  ;;  %v10487_v19 = vld [vmem:[%s10738_s8 + $0x10] sm:$0xff] }
 0x2d8   : > { %15189 = vst [vmem:[#allocation26_spill] sm:$0xff] %v12798_v43  ;;  %v6853_v25 = vunpack.c.l.b16 %v5456_v54  ;;  %v2315_v60 = vor.u32 %v2314_v5, %v2311_v62  ;;  %v2328_v23 = vshll.u32 %v1997_v12, 16  ;;  %v2324_v53 = vrot.slane %v2322_v46, 4  ;;  %v12819_v54 = vpop.permute.xlu1 %6628 }
 0x2d9   : > { %15190 = vst [vmem:[#allocation27_spill] sm:$0xff] %v12800_v18  ;;  %v7219_v7 = vsel %vm6920_vm15, %v6293_v1, %v12705_v40  ;;  %v7101_v21 = vsel %vm7081_vm2, %v7030_v13, %v6165_v57  ;;  %8477 = vrot.lane.b32.xlu2 %v10487_v19, %s10630_s14  ;;  %v3592_v61 = vor.u32 %v12782_v39, %v12791_v47  ;;  %v3005_v44 = vrot.slane %v1946_v3, 5  ;;  %v10098_v1 = vld [vmem:[#allocation2 + $0x84] sm:$0xff]  ;;  %v12832_v3 = vld [vmem:[%s15123_s4] ss:$0 sm:$0xff]  ;;  %v10063_v18 = vld [vmem:[#allocation2 + $0x54] sm:$0xff] }
 0x2da   : > { %v6902_v14 = vpack.c.b16 %v6853_v25, %v6852_v58  ;;  %v7301_v59 = vsel %vm544_vm0, %v7219_v7, %v12746_v4  ;;  %v2316_v62 = vrot.slane %v2315_v60, 4  ;;  %7716 = vmatmul.bf16.gmra.mxu1 %v7101_v21  ;;  %v2325_v40 = vor.u32 %v2324_v53, %v2320_v33  ;;  %v2799_v19 = vld [vmem:[#allocation2 + $0x84] sm:$0xe] }
 0x2db   : > { %v9385_v58 = vrot.slane %v2800_v8, 9  ;;  %v7378_v13 = vsel %vm7081_vm2, %v7301_v59, %v6787_v48  ;;  %v12823_v4 = vrot.slane %v3582_v32, 4  ;;  %v2330_v63 = vrot.slane %v2328_v23, 5  ;;  %v7687_v23 = vpop.f32.mrf.mxu1  ;;  %v4030_v48 = vld [vmem:[#allocation2 + $0x138] sm:$0xe] }
 0x2dc   : > { %9939 = vmatmul.msk.bf16.gmra.mxu0 %vm6920_vm15, %v6902_v14  ;;  %v3008_v46 = vrot.slane %v1997_v12, 5  ;;  %v2321_v39 = vsel %vm10985_vm14, %v2316_v62, %v2320_v33  ;;  %v2326_v25 = vrot.slane %v2325_v40, 4  ;;  %v3007_v60 = vrot.slane %v3005_v44, 4  ;;  %v12847_v12 = vpop.f32.mrf.mxu2  ;;  %v10488_v8 = vld [vmem:[#allocation2 + $0xd0] sm:$0xf] }
 0x2dd   : > { %v3006_v57 = vsel %vm10972_vm11, %v9385_v58, %v3005_v44  ;;  %v2998_v33 = vrot.slane %v12685_v49, 5  ;;  %v3593_v7 = vrot.slane %v3592_v61, 4  ;;  %v15191_v14 = vshll.u32 %v12066_v15, 16  ;;  %v5239_v49 = vld [vmem:[#allocation2 + $0xcc] sm:$0xe]  ;;  %15193 = vst [vmem:[#allocation29_spill] sm:$0xff] %v12847_v12 }
 0x2de   : > { %7920 = vmatmul.bf16.gmra.mxu2 %v7378_v13  ;;  %v2331_v21 = vsel %vm10985_vm14, %v2326_v25, %v2330_v63  ;;  %v3009_v59 = vsel %vm10972_vm11, %v3007_v60, %v3008_v46  ;;  %v5728_v62 = vunpack.c.l.b16 %v2321_v39  ;;  %v5888_v58 = vunpack.c.l.b16 %v3006_v57  ;;  %v12845_v13 = vld [vmem:[#allocation2 + $0x140] sm:$0x1] }
 0x2df   : > { %6172 = vrot.lane.b32.xlu0 %v10098_v1, %s10632_s18  ;;  %v3597_v53 = vrot.slane %v15191_v14, 5  ;;  %v5729_v40 = vunpack.c.l.b16 %v2331_v21  ;;  %v5889_v44 = vunpack.c.l.b16 %v3009_v59  ;;  %15192 = vst [vmem:[#allocation28_spill] sm:$0xff] %v12845_v13  ;;  %v3588_v15 = vsel %vm10985_vm14, %v12823_v4, %v12791_v47  ;;  %v12854_v1 = vld [vmem:[#allocation2 + $0x13c] sm:$0xf]  ;;  %v12857_v14 = vpop.f32.mrf.mxu0 }
 0x2e0   : > { %v7688_v61 = vadd.f32 %v12832_v3, %v7687_v23  ;;  %v3000_v63 = vrot.slane %v2998_v33, 4  ;;  %15194 = vst [vmem:[#allocation30_spill] sm:$0xff] %v12854_v1  ;;  %v9428_v46 = vrot.slane %v4030_v48, 9  ;;  %v9384_v57 = vrot.slane %v2799_v19, 9 }
 0x2e1   : > { %v5780_v39 = vpack.c.b16 %v5729_v40, %v5728_v62  ;;  %v5940_v25 = vpack.c.b16 %v5889_v44, %v5888_v58  ;;  %v4298_v60 = vrot.slane %v12854_v1, 5  ;;  %v3001_v21 = vrot.slane %v12699_v31, 5  ;;  %v10141_v31 = vld [vmem:[#allocation2 + $0x12c] sm:$0xff] }
 0x2e2   : > { %v4301_v59 = vrot.slane %v12845_v13, 5  ;;  %v9452_v32 = vrot.slane %v5239_v49, 9  ;;  %v5459_v47 = vrot.slane %v10488_v8, 5  ;;  %v3598_v4 = vsel %vm10985_vm14, %v3593_v7, %v3597_v53  ;;  %v12871_v8 = vpop.permute.xlu1 %6634 }
 0x2e3   : > { %5824 = vrot.lane.b32.xlu2 %v5780_v39, %s10630_s14  ;;  %5984 = vrot.lane.b32.xlu1 %v5940_v25, %s10631_s17  ;;  %v2999_v23 = vsel %vm10972_vm11, %v9384_v57, %v2998_v33  ;;  %v4299_v48 = vsel %vm10972_vm11, %v9428_v46, %v4298_v60  ;;  %v4300_v19 = vrot.slane %v4298_v60, 4  ;;  %v3002_v62 = vsel %vm10972_vm11, %v3000_v63, %v3001_v21  ;;  %v12879_v46 = vld [vmem:[#allocation2 + $0x134] sm:$0x1]  ;;  %v4029_v39 = vld [vmem:[#allocation2 + $0x12c] sm:$0xe] }
 0x2e4   : > { %v6358_v40 = vunpack.c.l.b16 %v4299_v48  ;;  %15195 = vst [vmem:[#allocation31_spill] sm:$0xff] %v12871_v8  ;;  %v5460_v7 = vsel %vm10972_vm11, %v9452_v32, %v5459_v47  ;;  %v5461_v53 = vrot.slane %v5459_v47, 4  ;;  %v6245_v25 = vunpack.c.l.b16 %v3598_v4  ;;  %v4406_v21 = vld [vmem:[#allocation2 + $0x144] sm:$0xf]  ;;  %v10496_v8 = vld [vmem:[#allocation2 + $0x158] sm:$0x1] }
 0x2e5   : > { %v4302_v33 = vsel %vm10972_vm11, %v4300_v19, %v4301_v59  ;;  %v6854_v49 = vunpack.c.l.b16 %v5460_v7  ;;  %15196 = vst [vmem:[#allocation32_spill] sm:$0xff] %v12879_v46  ;;  %v7857_v63 = vadd.f32 %v12554_v35, %v7688_v61  ;;  %v15197_v32 = vrot.slane %v12278_v30, 5  ;;  %v12887_v19 = vld [vmem:[#allocation2 + $0x130] sm:$0xf]  ;;  %v5815_v7 = vpop.permute.xlu2 %5814  ;;  %v10100_v61 = vld [vmem:[#allocation2 + $0x9c] sm:$0xff] }
 0x2e6   : > { %v6359_v57 = vunpack.c.l.b16 %v4302_v33  ;;  %v6244_v47 = vunpack.c.l.b16 %v3588_v15  ;;  %v5886_v48 = vunpack.c.l.b16 %v2999_v23  ;;  %v5887_v58 = vunpack.c.l.b16 %v3002_v62  ;;  %v10173_v15 = vld [vmem:[%s15124_s5 + $0x18] sm:$0xff]  ;;  %v12894_v23 = vpop.f32.mrf.mxu2 }
 0x2e7   : > { %6642 = vrot.lane.b32.xlu0 %v10141_v31, %s10631_s17  ;;  %v5463_v60 = vsel %vm10972_vm11, %v5461_v53, %v15197_v32  ;;  %v9427_v4 = vrot.slane %v4029_v39, 9  ;;  %v4291_v31 = vrot.slane %v12887_v19, 5  ;;  %v4294_v35 = vrot.slane %v12879_v46, 5  ;;  %15198 = vst [vmem:[#allocation33_spill] sm:$0xff] %v12894_v23  ;;  %v12903_v22 = vpop.f32.mrf.mxu0  ;;  %8753 = vmatpush.bf16.msrb.mxu3 %v10173_v15 }
 0x2e8   : > { %v6855_v59 = vunpack.c.l.b16 %v5463_v60  ;;  %v6399_v44 = vpack.c.b16 %v6359_v57, %v6358_v40  ;;  %v5009_v30 = vshrl.u32 %v4406_v21, 16  ;;  %v5012_v5 = vshll.u32 %v4406_v21, 16  ;;  %15200 = vst [vmem:[#allocation35_spill] sm:$0xff] %v12903_v22 }
 0x2e9   : > { %v5018_v53 = vshll.u32 %v10489_v10, 16  ;;  %v6294_v62 = vpack.c.b16 %v6245_v25, %v6244_v47  ;;  %v12897_v40 = vadd.f32 %v12609_v36, %v7857_v63  ;;  %v4293_v39 = vrot.slane %v4291_v31, 4  ;;  %v7689_v25 = vpop.f32.mrf.mxu1  ;;  %v10490_v63 = vld [vmem:[#allocation2 + $0x14c] sm:$0x1] }
 0x2ea   : > { %v6903_v33 = vpack.c.b16 %v6855_v59, %v6854_v49  ;;  %v5022_v57 = vshrl.u32 %v10489_v10, 16  ;;  %v5939_v32 = vpack.c.b16 %v5887_v58, %v5886_v48  ;;  %v12901_v49 = vpop.permute.xlu0 %6794  ;;  %v5011_v60 = vrot.slane %v5009_v30, 4  ;;  %v3179_v30 = vld [vmem:[#allocation2 + $0xfc] sm:$0xf] }
 0x2eb   : > { %6176 = vrot.lane.b32.xlu2 %v10100_v61, %s10632_s18  ;;  %6454 = vrot.lane.b32.xlu1 %v6399_v44, %s10630_s14  ;;  %15199 = vst [vmem:[#allocation34_spill] sm:$0xff] %v12901_v49  ;;  %v5014_v21 = vrot.slane %v5012_v5, 5  ;;  %v5020_v59 = vrot.slane %v5018_v53, 5  ;;  %v4292_v36 = vsel %vm10972_vm11, %v9427_v4, %v4291_v31  ;;  %v4295_v10 = vsel %vm10972_vm11, %v4293_v39, %v4294_v35  ;;  %v5975_v53 = vpop.permute.xlu1 %5974  ;;  %v12918_v5 = vld [vmem:[#allocation2 + $0xa0] sm:$0xf] }
 0x2ec   : > { %9940 = vmatmul.msk.bf16.gmra.mxu0 %vm6920_vm15, %v6903_v33  ;;  %v5024_v58 = vrot.slane %v5022_v57, 4  ;;  %v5028_v44 = vshll.u32 %v10490_v63, 16  ;;  %v7222_v33 = vsel %vm6920_vm15, %v6294_v62, %v12774_v24  ;;  %v6944_v4 = vsel %vm6920_vm15, %v10063_v18, %v5815_v7  ;;  %v2801_v48 = vld [vmem:[#allocation2 + $0x9c] sm:$0xe]  ;;  %v10143_v18 = vld [vmem:[#allocation2 + $0x144] sm:$0xff] }
 0x2ed   : > { %v5015_v61 = vor.u32 %v5014_v21, %v5011_v60  ;;  %v7690_v15 = vadd.f32 %v12832_v3, %v7689_v25  ;;  %v6356_v39 = vunpack.c.l.b16 %v4292_v36  ;;  %v6357_v57 = vunpack.c.l.b16 %v4295_v10  ;;  %v10491_v25 = vld [vmem:[#allocation2 + $0x100] sm:$0xf] }
 0x2ee   : > { %v5025_v31 = vor.u32 %v5024_v58, %v5020_v59  ;;  %v5030_v35 = vrot.slane %v5028_v44, 5  ;;  %v12922_v60 = vsel %vm544_vm0, %v7222_v33, %v12819_v54  ;;  %v3672_v62 = vshrl.u32 %v3179_v30, 16  ;;  %v12928_v58 = vld [vmem:[#allocation2 + $0xa4] sm:$0x1]  ;;  %v4404_v44 = vld [vmem:[#allocation2 + $0x138] sm:$0xf] }
 0x2ef   : > { %5982 = vrot.lane.b32.xlu0 %v5939_v32, %s10631_s17  ;;  %v5016_v63 = vrot.slane %v5015_v61, 4  ;;  %v3675_v21 = vshll.u32 %v3179_v30, 16  ;;  %v3681_v36 = vshll.u32 %v10491_v25, 16  ;;  %v7032_v10 = vsel %vm544_vm0, %v6944_v4, %v5975_v53  ;;  %v6167_v61 = vpop.permute.xlu2 %6166  ;;  %v12936_v4 = vpop.f32.mrf.mxu2 }
 0x2f0   : > { %v5026_v7 = vrot.slane %v5025_v31, 4  ;;  %v9386_v47 = vrot.slane %v2801_v48, 9  ;;  %v3012_v31 = vrot.slane %v12918_v5, 5  ;;  %v6398_v30 = vpack.c.b16 %v6357_v57, %v6356_v39  ;;  %15201 = vst [vmem:[#allocation36_spill] sm:$0xff] %v12936_v4  ;;  %v12941_v48 = vld [vmem:[#allocation2 + $0x13c] sm:$0xf] }
 0x2f1   : > { %v5021_v32 = vsel %vm10985_vm14, %v5016_v63, %v5020_v59  ;;  %v7859_v59 = vadd.f32 %v12602_v9, %v7690_v15  ;;  %v7104_v25 = vsel %vm7081_vm2, %v7032_v10, %v6167_v61  ;;  %15202 = vst [vmem:[#allocation37_spill] sm:$0xff] %v12941_v48  ;;  %v3677_v43 = vrot.slane %v3675_v21, 5  ;;  %v4446_v15 = vld [vmem:[#allocation2 + $0x140] sm:$0x1] }
 0x2f2   : > { %v5031_v54 = vsel %vm10985_vm14, %v5026_v7, %v5030_v35  ;;  %v6710_v33 = vunpack.c.l.b16 %v5021_v32  ;;  %v3013_v53 = vsel %vm10972_vm11, %v9386_v47, %v3012_v31  ;;  %v3014_v24 = vrot.slane %v3012_v31, 4  ;;  %7721 = vmatmul.bf16.gmra.mxu1 %v7104_v25  ;;  %v12943_v9 = vpop.permute.xlu0 %6444 }
 0x2f3   : > { %6646 = vrot.lane.b32.xlu2 %v10143_v18, %s10631_s17  ;;  %v6711_v63 = vunpack.c.l.b16 %v5031_v54  ;;  %v3015_v35 = vrot.slane %v12928_v58, 5  ;;  %v4985_v7 = vshrl.u32 %v4404_v44, 16  ;;  %v3674_v18 = vrot.slane %v3672_v62, 4 }
 0x2f4   : > { %v4988_v39 = vshll.u32 %v4404_v44, 16  ;;  %v12946_v57 = vrot.slane %v3681_v36, 5  ;;  %v15203_v47 = vshrl.u32 %v12241_v37, 16  ;;  %v4994_v31 = vshll.u32 %v12941_v48, 16 }
 0x2f5   : > { %v6751_v32 = vpack.c.b16 %v6711_v63, %v6710_v33  ;;  %v3016_v61 = vsel %vm10972_vm11, %v3014_v24, %v3015_v35  ;;  %v4987_v54 = vrot.slane %v4985_v7, 4  ;;  %v5890_v33 = vunpack.c.l.b16 %v3013_v53  ;;  %v3173_v63 = vld [vmem:[#allocation2 + $0xc0] sm:$0xf] }
 0x2f6   : > { %v3687_v10 = vrot.slane %v15203_v47, 4  ;;  %v5891_v62 = vunpack.c.l.b16 %v3016_v61  ;;  %v4990_v21 = vrot.slane %v4988_v39, 5  ;;  %v4998_v44 = vshrl.u32 %v12941_v48, 16 }
 0x2f7   : > { %6452 = vrot.lane.b32.xlu0 %v6398_v30, %s10630_s14  ;;  %6806 = vrot.lane.b32.xlu1 %v6751_v32, %s10632_s18  ;;  %v5004_v30 = vshll.u32 %v4446_v15, 16  ;;  %v15134_v36 = vrot.slane %v12941_v48, 5  ;;  %v5511_v25 = vrot.slane %v4446_v15, 5  ;;  %v3678_v37 = vor.u32 %v3677_v43, %v3674_v18  ;;  %v10494_v32 = vld [vmem:[#allocation2 + $0xf4] sm:$0xf] }
 0x2f8   : > { %v5941_v47 = vpack.c.b16 %v5891_v62, %v5890_v33  ;;  %v4991_v28 = vor.u32 %v4990_v21, %v4987_v54  ;;  %v4996_v22 = vrot.slane %v4994_v31, 5  ;;  %v3688_v24 = vor.u32 %v3687_v10, %v12946_v57  ;;  %v10492_v10 = vld [vmem:[#allocation2 + $0xc4] sm:$0xf]  ;;  %v5240_v33 = vld [vmem:[#allocation2 + $0xf0] sm:$0xe] }
 0x2f9   : > { %v5000_v35 = vrot.slane %v4998_v44, 4  ;;  %v5510_v53 = vrot.slane %v15134_v36, 4  ;;  %v3600_v7 = vshrl.u32 %v3173_v63, 16  ;;  %v3603_v4 = vshll.u32 %v3173_v63, 16  ;;  %v12976_v44 = vpop.permute.xlu1 %6636  ;;  %v10493_v36 = vld [vmem:[%s10738_s8 + $0x20] sm:$0xff] }
 0x2fa   : > { %v4992_v61 = vrot.slane %v4991_v28, 4  ;;  %v5006_v43 = vrot.slane %v5004_v30, 5  ;;  %v3609_v54 = vshll.u32 %v10492_v10, 16  ;;  %v15205_v62 = vmax.f32 %v12897_v40, 0.0  ;;  %v4031_v30 = vld [vmem:[#allocation2 + $0x144] sm:$0xe] }
 0x2fb   : > { %5986 = vrot.lane.b32.xlu2 %v5941_v47, %s10631_s17  ;;  %v5001_v15 = vor.u32 %v5000_v35, %v4996_v22  ;;  %v12964_v18 = vsel %vm10972_vm11, %v5510_v53, %v5511_v25  ;;  %v12972_v31 = vadd.f32 %v12661_v55, %v7859_v59  ;;  %v3679_v28 = vrot.slane %v3678_v37, 4  ;;  %v12978_v25 = vpop.f32.mrf.mxu2  ;;  %v5817_v47 = vpop.permute.xlu2 %5816  ;;  %v10064_v59 = vld [vmem:[#allocation2 + $0x60] sm:$0xff]  ;;  %v12998_v48 = vld [vmem:[#allocation2 + $0x14c] sm:$0x1] }
 0x2fc   : > { %15204 = vst [vmem:[#allocation38_spill] sm:$0xff] %v12964_v18  ;;  %v12969_v21 = vpack.c.bf16 %v15205_v62, %v15205_v62  ;;  %v4997_v63 = vsel %vm10985_vm14, %v4992_v61, %v4996_v22  ;;  %v12980_v35 = vrot.slane %v3688_v24, 4  ;;  %v15207_v40 = vshll.u32 %v12243_v17, 16  ;;  %v12986_v55 = vpop.f32.mrf.mxu0  ;;  %v12990_v61 = vpop.permute.xlu0 %6438 }
 0x2fd   : > { %15206 = vst [vmem:[#allocation39_spill] sm:$0xff] %v12978_v25  ;;  %v5002_v10 = vrot.slane %v5001_v15, 4  ;;  %v3602_v62 = vrot.slane %v3600_v7, 4  ;;  %v6708_v37 = vunpack.c.l.b16 %v4997_v63  ;;  %v3605_v22 = vrot.slane %v3603_v4, 5 }
 0x2fe   : > { %v12984_v53 = vrot.slane %v15207_v40, 5  ;;  %15208 = vst [vmem:[#allocation40_spill] sm:$0xff] %v12986_v55  ;;  %v9453_v39 = vrot.slane %v5240_v33, 9  ;;  %v5466_v24 = vrot.slane %v10494_v32, 5  ;;  %v12994_v40 = vrot.slane %v3609_v54, 5 }
 0x2ff   : > { %8481 = vrot.lane.b32.xlu1 %v10493_v36, %s10630_s14  ;;  %v5007_v17 = vsel %vm10985_vm14, %v5002_v10, %v5006_v43  ;;  %v15209_v7 = vshrl.u32 %v12317_v56, 16  ;;  %v9429_v63 = vrot.slane %v4031_v30, 9  ;;  %v13001_v18 = vsel %vm6920_vm15, %v10064_v59, %v5817_v47  ;;  %v13008_v43 = vld [vmem:[#allocation2 + $0x148] sm:$0xf] }
 0x300   : > { %v3684_v4 = vsel %vm10985_vm14, %v3679_v28, %v12946_v57  ;;  %v6709_v36 = vunpack.c.l.b16 %v5007_v17  ;;  %v5467_v32 = vsel %vm10972_vm11, %v9453_v39, %v5466_v24  ;;  %v5468_v33 = vrot.slane %v5466_v24, 4  ;;  %v1949_v47 = vld [vmem:[#allocation2 + $0xa8] sm:$0xf]  ;;  %v13017_v17 = vld [vmem:[#allocation2 + $0xac] sm:$0xf] }
 0x301   : > { %v3615_v15 = vrot.slane %v15209_v7, 4  ;;  %v4305_v30 = vrot.slane %v13008_v43, 5  ;;  %v3606_v59 = vor.u32 %v3605_v22, %v3602_v62  ;;  %v6856_v57 = vunpack.c.l.b16 %v5467_v32  ;;  %v15211_v62 = vld [vmem:[#allocation7_spill] sm:$0xff] }
 0x302   : > { %v6750_v10 = vpack.c.b16 %v6709_v36, %v6708_v37  ;;  %v4308_v28 = vrot.slane %v12998_v48, 5  ;;  %v13019_v39 = vunpack.c.l.b16 %v3684_v4  ;;  %v15210_v54 = vrot.slane %v12538_v34, 5  ;;  %v13033_v4 = vld [vmem:[#allocation2 + $0xb0] sm:$0x1] }
 0x303   : > { %v3616_v7 = vor.u32 %v3615_v15, %v12994_v40  ;;  %v4306_v24 = vsel %vm10972_vm11, %v9429_v63, %v4305_v30  ;;  %v15212_v37 = vshll.u32 %v15211_v62, 16  ;;  %v4307_v32 = vrot.slane %v4305_v30, 4  ;;  %v13046_v30 = vpop.f32.mrf.mxu2 }
 0x304   : > { %v5470_v56 = vsel %vm10972_vm11, %v5468_v33, %v15210_v54  ;;  %6804 = vrot.lane.b32.xlu0 %v6750_v10, %s10632_s18  ;;  %v2357_v13 = vshrl.u32 %v1949_v47, 16  ;;  %v6360_v15 = vunpack.c.l.b16 %v4306_v24  ;;  %v2360_v1 = vshll.u32 %v1949_v47, 16  ;;  %v4408_v33 = vld [vmem:[#allocation2 + $0x150] sm:$0xf]  ;;  %15213 = vst [vmem:[#allocation7_spill] sm:$0xff] %v13046_v30 }
 0x305   : > { %v13031_v22 = vrot.slane %v15212_v37, 5  ;;  %v6857_v36 = vunpack.c.l.b16 %v5470_v56  ;;  %v2366_v34 = vshll.u32 %v13017_v17, 16  ;;  %v2370_v54 = vshrl.u32 %v13017_v17, 16  ;;  %v13041_v37 = vpop.permute.xlu1 %6632  ;;  %v10172_v56 = vld [vmem:[%s15124_s5 + $0x10] sm:$0xff] }
 0x306   : > { %v13037_v25 = vrot.slane %v3606_v59, 4  ;;  %v4309_v10 = vsel %vm10972_vm11, %v4307_v32, %v4308_v28  ;;  %v2359_v62 = vrot.slane %v2357_v13, 4  ;;  %v13048_v47 = vrot.slane %v3616_v7, 4  ;;  %v13050_v59 = vpop.f32.mrf.mxu0  ;;  %v6789_v28 = vpop.permute.xlu0 %6788  ;;  %8754 = vmatpush.bf16.msrb.mxu3 %v10172_v56  ;;  %v10495_v30 = vld [vmem:[#allocation2 + $0x154] sm:$0xf] }
 0x307   : > { %v6904_v63 = vpack.c.b16 %v6857_v36, %v6856_v57  ;;  %v6361_v24 = vunpack.c.l.b16 %v4309_v10  ;;  %v2362_v55 = vrot.slane %v2360_v1, 5  ;;  %v2368_v23 = vrot.slane %v2366_v34, 5  ;;  %15214 = vst [vmem:[#allocation41_spill] sm:$0xff] %v13050_v59 }
 0x308   : > { %v2372_v57 = vrot.slane %v2370_v54, 4  ;;  %v2376_v13 = vshll.u32 %v13033_v4, 16  ;;  %v5033_v36 = vshrl.u32 %v4408_v33, 16  ;;  %v5036_v32 = vshll.u32 %v4408_v33, 16 }
 0x309   : > { %9941 = vmatmul.msk.bf16.gmra.mxu0 %vm6920_vm15, %v6904_v63  ;;  %v6400_v12 = vpack.c.b16 %v6361_v24, %v6360_v15  ;;  %v2363_v16 = vor.u32 %v2362_v55, %v2359_v62  ;;  %v5042_v7 = vshll.u32 %v10495_v30, 16  ;;  %v5046_v49 = vshrl.u32 %v10495_v30, 16  ;;  %v10497_v15 = vld [vmem:[%s10738_s8 + $0x18] sm:$0xff]  ;;  %v7692_v24 = vpop.f32.mrf.mxu1 }
 0x30a   : > { %v2373_v10 = vor.u32 %v2372_v57, %v2368_v23  ;;  %v5035_v1 = vrot.slane %v5033_v36, 4  ;;  %v5038_v34 = vrot.slane %v5036_v32, 5  ;;  %v5052_v59 = vshll.u32 %v10496_v8, 16 }
 0x30b   : > { %6456 = vrot.lane.b32.xlu2 %v6400_v12, %s10630_s14  ;;  %v2364_v54 = vrot.slane %v2363_v16, 4  ;;  %v5044_v63 = vrot.slane %v5042_v7, 5  ;;  %v5048_v45 = vrot.slane %v5046_v49, 4  ;;  %v7381_v33 = vsel %vm7081_vm2, %v12922_v60, %v6789_v28 }
 0x30c   : > { %8479 = vrot.lane.b32.xlu0 %v10497_v15, %s10630_s14  ;;  %v2374_v55 = vrot.slane %v2373_v10, 4  ;;  %v2378_v62 = vrot.slane %v2376_v13, 5  ;;  %v5039_v56 = vor.u32 %v5038_v34, %v5035_v1  ;;  %v5054_v30 = vrot.slane %v5052_v59, 5  ;;  %7925 = vmatmul.bf16.gmra.mxu2 %v7381_v33 }
 0x30d   : > { %v2369_v8 = vsel %vm10985_vm14, %v2364_v54, %v2368_v23  ;;  %v5049_v57 = vor.u32 %v5048_v45, %v5044_v63  ;;  %v2333_v12 = vshrl.u32 %v1947_v6, 16  ;;  %v2336_v16 = vshll.u32 %v1947_v6, 16  ;;  %v5977_v1 = vpop.permute.xlu1 %5976 }
 0x30e   : > { %v3612_v49 = vsel %vm10985_vm14, %v13037_v25, %v12994_v40  ;;  %v2379_v60 = vsel %vm10985_vm14, %v2374_v55, %v2378_v62  ;;  %v5732_v28 = vunpack.c.l.b16 %v2369_v8  ;;  %v5040_v13 = vrot.slane %v5039_v56, 4  ;;  %v5241_v25 = vld [vmem:[#allocation2 + $0xfc] sm:$0xe]  ;;  %v13072_v40 = vpop.f32.mrf.mxu2 }
 0x30f   : > { %v5733_v36 = vunpack.c.l.b16 %v2379_v60  ;;  %v5050_v59 = vrot.slane %v5049_v57, 4  ;;  %v2335_v32 = vrot.slane %v2333_v12, 4  ;;  %v2338_v7 = vrot.slane %v2336_v16, 5 }
 0x310   : > { %v5045_v23 = vsel %vm10985_vm14, %v5040_v13, %v5044_v63  ;;  %v7693_v45 = vadd.f32 %v12832_v3, %v7692_v24  ;;  %v2342_v6 = vshll.u32 %v12918_v5, 16  ;;  %v2346_v10 = vshrl.u32 %v12918_v5, 16 }
 0x311   : > { %v5782_v34 = vpack.c.b16 %v5733_v36, %v5732_v28  ;;  %v5055_v54 = vsel %vm10985_vm14, %v5050_v59, %v5054_v30  ;;  %v6712_v33 = vunpack.c.l.b16 %v5045_v23  ;;  %v2339_v15 = vor.u32 %v2338_v7, %v2335_v32  ;;  %v13084_v30 = vpop.f32.mrf.mxu0  ;;  %v10498_v28 = vld [vmem:[#allocation2 + $0x100] sm:$0xf]  ;;  %v3175_v7 = vld [vmem:[#allocation2 + $0xe4] sm:$0xf] }
 0x312   : > { %v3622_v63 = vsel %vm10985_vm14, %v13048_v47, %v13031_v22  ;;  %v6713_v55 = vunpack.c.l.b16 %v5055_v54  ;;  %v2344_v62 = vrot.slane %v2342_v6, 5  ;;  %v2348_v56 = vrot.slane %v2346_v10, 4  ;;  %v6169_v47 = vpop.permute.xlu2 %6168  ;;  %v7694_v10 = vpop.f32.mrf.mxu1 }
 0x313   : > { %5828 = vrot.lane.b32.xlu1 %v5782_v34, %s10630_s14  ;;  %v2340_v5 = vrot.slane %v2339_v15, 4  ;;  %v2352_v24 = vshll.u32 %v12928_v58, 16  ;;  %v7034_v8 = vsel %vm544_vm0, %v13001_v18, %v5977_v1  ;;  %v9454_v57 = vrot.slane %v5241_v25, 9  ;;  %v15216_v58 = vld [vmem:[#allocation21_spill] sm:$0xff]  ;;  %v13108_v15 = vpop.permute.xlu0 %6796 }
 0x314   : > { %v15215_v12 = vsel %vm10985_vm14, %v12980_v35, %v12984_v53  ;;  %v6752_v16 = vpack.c.b16 %v6713_v55, %v6712_v33  ;;  %v2349_v60 = vor.u32 %v2348_v56, %v2344_v62  ;;  %v5473_v13 = vrot.slane %v10498_v28, 5  ;;  %v10499_v28 = vld [vmem:[#allocation2 + $0xe8] sm:$0xf] }
 0x315   : > { %v6253_v22 = vunpack.c.l.b16 %v15215_v12  ;;  %v6246_v36 = vunpack.c.l.b16 %v3612_v49  ;;  %v6247_v59 = vunpack.c.l.b16 %v3622_v63  ;;  %v7862_v32 = vadd.f32 %v15216_v58, %v7693_v45  ;;  %v10101_v25 = vld [vmem:[#allocation2 + $0xa8] sm:$0xff] }
 0x316   : > { %v7107_v18 = vsel %vm7081_vm2, %v7034_v8, %v6169_v47  ;;  %6808 = vrot.lane.b32.xlu2 %v6752_v16, %s10632_s18  ;;  %v2345_v23 = vsel %vm10985_vm14, %v2340_v5, %v2344_v62  ;;  %v2350_v6 = vrot.slane %v2349_v60, 4  ;;  %v2354_v35 = vrot.slane %v2352_v24, 5  ;;  %v1951_v62 = vld [vmem:[#allocation2 + $0xb4] sm:$0xf]  ;;  %v13114_v47 = vld [vmem:[#allocation2 + $0xb8] sm:$0xf] }
 0x317   : > { %v5474_v53 = vsel %vm10972_vm11, %v9454_v57, %v5473_v13  ;;  %7726 = vmatmul.bf16.gmra.mxu1 %v7107_v18  ;;  %v15217_v1 = vmax.f32 %v12972_v31, 0.0  ;;  %v5475_v34 = vrot.slane %v5473_v13, 4  ;;  %v6298_v54 = vpack.c.b16 %v6253_v22, %v13019_v39  ;;  %v10102_v24 = vld [vmem:[#allocation2 + $0xb4] sm:$0xff]  ;;  %v13119_v18 = vpop.f32.mrf.mxu2 }
 0x318   : > { %v2355_v33 = vsel %vm10985_vm14, %v2350_v6, %v2354_v35  ;;  %v6858_v63 = vunpack.c.l.b16 %v5474_v53  ;;  %v3624_v55 = vshrl.u32 %v3175_v7, 16  ;;  %v5730_v56 = vunpack.c.l.b16 %v2345_v23  ;;  %v15218_v31 = vld [vmem:[#allocation6_spill] sm:$0xff]  ;;  %v15220_v22 = vld [vmem:[#allocation23_spill] sm:$0xff]  ;;  %15221 = vst [vmem:[#allocation21_spill] sm:$0xff] %v13119_v18  ;;  %v13122_v6 = vpop.permute.xlu1 %6638 }
 0x319   : > { %v13102_v45 = vpack.c.bf16 %v15217_v1, %v15217_v1  ;;  %v5731_v5 = vunpack.c.l.b16 %v2355_v33  ;;  %v15219_v8 = vrot.slane %v15218_v31, 5  ;;  %v3627_v12 = vshll.u32 %v3175_v7, 16  ;;  %v2000_v53 = vld [vmem:[#allocation2 + $0xbc] sm:$0x1] }
 0x31a   : > { %v6295_v39 = vpack.c.b16 %v6247_v59, %v6246_v36  ;;  %v8031_v16 = vadd.f32 %v15220_v22, %v7862_v32  ;;  %v3633_v13 = vshll.u32 %v10499_v28, 16  ;;  %v7234_v58 = vsel %vm6920_vm15, %v6298_v54, %v12943_v9  ;;  %v15224_v22 = vld [vmem:[#allocation20_spill] sm:$0xff]  ;;  %v2803_v28 = vld [vmem:[#allocation2 + $0xb4] sm:$0xe] }
 0x31b   : > { %v5477_v57 = vsel %vm10972_vm11, %v5475_v34, %v15219_v8  ;;  %v5781_v23 = vpack.c.b16 %v5731_v5, %v5730_v56  ;;  %6180 = vrot.lane.b32.xlu1 %v10102_v24, %s10632_s18  ;;  %v2381_v7 = vshrl.u32 %v1951_v62, 16  ;;  %v2384_v35 = vshll.u32 %v1951_v62, 16  ;;  %v13129_v56 = vpop.f32.mrf.mxu0  ;;  %v10500_v62 = vld [vmem:[%s10738_s8 + $0x28] sm:$0xff]  ;;  %v5819_v8 = vpop.permute.xlu2 %5818 }
 0x31c   : > { %v6859_v60 = vunpack.c.l.b16 %v5477_v57  ;;  %v7225_v36 = vsel %vm6920_vm15, %v6295_v39, %v12990_v61  ;;  %v3626_v32 = vrot.slane %v3624_v55, 4  ;;  %v2390_v1 = vshll.u32 %v13114_v47, 16 }
 0x31d   : > { %5826 = vrot.lane.b32.xlu0 %v5781_v23, %s10630_s14  ;;  %v3629_v9 = vrot.slane %v3627_v12, 5  ;;  %v2383_v34 = vrot.slane %v2381_v7, 4  ;;  %v2386_v54 = vrot.slane %v2384_v35, 5  ;;  %v2394_v33 = vshrl.u32 %v13114_v47, 16  ;;  %v10065_v7 = vld [vmem:[#allocation2 + $0x6c] sm:$0xff]  ;;  %v13152_v23 = vpop.permute.xlu0 %6440 }
 0x31e   : > { %v6905_v59 = vpack.c.b16 %v6859_v60, %v6858_v63  ;;  %v8187_v5 = vmax.f32 %v8031_v16, 0.0  ;;  %8483 = vrot.lane.b32.xlu2 %v10500_v62, %s10630_s14  ;;  %v13134_v61 = vrot.slane %v3633_v13, 5  ;;  %v15222_v63 = vld [vmem:[#allocation10_spill] sm:$0xff]  ;;  %v2392_v31 = vrot.slane %v2390_v1, 5  ;;  %v7697_v1 = vpop.f32.mrf.mxu1 }
 0x31f   : > { %v15223_v55 = vshrl.u32 %v15222_v63, 16  ;;  %v2387_v57 = vor.u32 %v2386_v54, %v2383_v34  ;;  %v2396_v12 = vrot.slane %v2394_v33, 4  ;;  %v2400_v39 = vshll.u32 %v2000_v53, 16  ;;  %v15225_v35 = vld [vmem:[#allocation14_spill] sm:$0xff]  ;;  %v10145_v54 = vld [vmem:[#allocation2 + $0x15c] sm:$0xff] }
 0x320   : > { %9942 = vmatmul.msk.bf16.gmra.mxu0 %vm6920_vm15, %v6905_v59  ;;  %v7305_v60 = vsel %vm544_vm0, %v7225_v36, %v15224_v22  ;;  %v13144_v13 = vsel %vm544_vm0, %v7234_v58, %v12976_v44  ;;  %v7695_v34 = vadd.f32 %v12832_v3, %v7694_v10  ;;  %v3630_v33 = vor.u32 %v3629_v9, %v3626_v32  ;;  %v3177_v63 = vld [vmem:[#allocation2 + $0xf0] sm:$0xf] }
 0x321   : > { %v3639_v24 = vrot.slane %v15223_v55, 4  ;;  %v7384_v59 = vsel %vm7081_vm2, %v7305_v60, %v15225_v35  ;;  %v2388_v62 = vrot.slane %v2387_v57, 4  ;;  %v2397_v36 = vor.u32 %v2396_v12, %v2392_v31 }
 0x322   : > { %7930 = vmatmul.bf16.gmra.mxu2 %v7384_v59  ;;  %v6950_v55 = vsel %vm6920_vm15, %v10065_v7, %v5819_v8  ;;  %v13150_v22 = vpack.c.bf16 %v8187_v5, %v8187_v5  ;;  %v9388_v44 = vrot.slane %v2803_v28, 9  ;;  %v3026_v58 = vrot.slane %v13114_v47, 5  ;;  %v13161_v7 = vpop.f32.mrf.mxu2  ;;  %v15227_v28 = vld [vmem:[#allocation22_spill] sm:$0xff]  ;;  %v15228_v59 = vld [vmem:[#allocation9_spill] sm:$0xff] }
 0x323   : > { %6650 = vrot.lane.b32.xlu1 %v10145_v54, %s10631_s17  ;;  %v3640_v10 = vor.u32 %v3639_v24, %v13134_v61  ;;  %v2393_v32 = vsel %vm10985_vm14, %v2388_v62, %v2392_v31  ;;  %v2398_v9 = vrot.slane %v2397_v36, 4  ;;  %v2402_v57 = vrot.slane %v2400_v39, 5  ;;  %15226 = vst [vmem:[#allocation6_spill] sm:$0xff] %v13161_v7  ;;  %v5979_v39 = vpop.permute.xlu1 %5978 }
 0x324   : > { %v3027_v8 = vsel %vm10972_vm11, %v9388_v44, %v3026_v58  ;;  %v3028_v5 = vrot.slane %v3026_v58, 4  ;;  %v3029_v12 = vrot.slane %v2000_v53, 5  ;;  %v3648_v60 = vshrl.u32 %v3177_v63, 16  ;;  %v5242_v58 = vld [vmem:[#allocation2 + $0x108] sm:$0xe] }
 0x325   : > { %v7864_v47 = vadd.f32 %v15227_v28, %v7695_v34  ;;  %6178 = vrot.lane.b32.xlu0 %v10101_v25, %s10632_s18  ;;  %v3631_v35 = vrot.slane %v3630_v33, 4  ;;  %v15229_v24 = vshll.u32 %v15228_v59, 16  ;;  %v2403_v31 = vsel %vm10985_vm14, %v2398_v9, %v2402_v57  ;;  %v10501_v28 = vld [vmem:[#allocation2 + $0xf4] sm:$0xf]  ;;  %v13171_v33 = vpop.f32.mrf.mxu0 }
 0x326   : > { %v5734_v62 = vunpack.c.l.b16 %v2393_v32  ;;  %v5735_v36 = vunpack.c.l.b16 %v2403_v31  ;;  %v3030_v53 = vsel %vm10972_vm11, %v3028_v5, %v3029_v12  ;;  %v3651_v44 = vshll.u32 %v3177_v63, 16  ;;  %v6171_v32 = vpop.permute.xlu2 %6170  ;;  %v10502_v5 = vld [vmem:[#allocation2 + $0x10c] sm:$0xf]  ;;  %v3185_v12 = vld [vmem:[#allocation2 + $0x120] sm:$0xf] }
 0x327   : > { %v3645_v54 = vrot.slane %v15229_v24, 5  ;;  %v3641_v16 = vrot.slane %v3640_v10, 4  ;;  %v5894_v49 = vunpack.c.l.b16 %v3027_v8  ;;  %v5895_v34 = vunpack.c.l.b16 %v3030_v53  ;;  %v15230_v53 = vld [vmem:[#allocation13_spill] sm:$0xff] }
 0x328   : > { %v3657_v25 = vshll.u32 %v10501_v28, 16  ;;  %v5783_v59 = vpack.c.b16 %v5735_v36, %v5734_v62  ;;  %v7698_v24 = vadd.f32 %v12832_v3, %v7697_v1  ;;  %v3650_v7 = vrot.slane %v3648_v60, 4  ;;  %v7699_v1 = vpop.f32.mrf.mxu1  ;;  %v13192_v28 = vpop.permute.xlu0 %6442 }
 0x329   : > { %v7036_v9 = vsel %vm544_vm0, %v6950_v55, %v5979_v39  ;;  %v5943_v57 = vpack.c.b16 %v5895_v34, %v5894_v49  ;;  %v3653_v31 = vrot.slane %v3651_v44, 5  ;;  %v9455_v46 = vrot.slane %v5242_v58, 9  ;;  %v10144_v39 = vld [vmem:[#allocation2 + $0x150] sm:$0xff]  ;;  %v15232_v58 = vld [vmem:[#allocation24_spill] sm:$0xff] }
 0x32a   : > { %v5480_v63 = vrot.slane %v10502_v5, 5  ;;  %v8033_v10 = vadd.f32 %v12734_v50, %v7864_v47  ;;  %5830 = vrot.lane.b32.xlu2 %v5783_v59, %s10630_s14  ;;  %v13177_v8 = vrot.slane %v3657_v25, 5  ;;  %v15231_v62 = vshrl.u32 %v15230_v53, 16  ;;  %v10507_v44 = vld [vmem:[#allocation2 + $0x170] sm:$0x1] }
 0x32b   : > { %v7110_v60 = vsel %vm7081_vm2, %v7036_v9, %v6171_v32  ;;  %v3636_v49 = vsel %vm10985_vm14, %v3631_v35, %v13134_v61  ;;  %v3646_v55 = vsel %vm10985_vm14, %v3641_v16, %v3645_v54  ;;  %5990 = vrot.lane.b32.xlu1 %v5943_v57, %s10631_s17  ;;  %v7867_v34 = vadd.f32 %v15232_v58, %v7698_v24  ;;  %v15233_v16 = vld [vmem:[#allocation8_spill] sm:$0xff] }
 0x32c   : > { %v3663_v36 = vrot.slane %v15231_v62, 4  ;;  %v5481_v50 = vsel %vm10972_vm11, %v9455_v46, %v5480_v63  ;;  %v5482_v47 = vrot.slane %v5480_v63, 4  ;;  %7731 = vmatmul.bf16.gmra.mxu1 %v7110_v60  ;;  %v3744_v59 = vshrl.u32 %v3185_v12, 16  ;;  %v2802_v63 = vld [vmem:[#allocation2 + $0xa8] sm:$0xe]  ;;  %v13202_v62 = vpop.f32.mrf.mxu2 }
 0x32d   : > { %v6860_v25 = vunpack.c.l.b16 %v5481_v50  ;;  %6648 = vrot.lane.b32.xlu0 %v10144_v39, %s10631_s17  ;;  %v3654_v61 = vor.u32 %v3653_v31, %v3650_v7  ;;  %v15234_v35 = vrot.slane %v15233_v16, 5  ;;  %v7700_v46 = vadd.f32 %v12832_v3, %v7699_v1  ;;  %15235 = vst [vmem:[#allocation23_spill] sm:$0xff] %v13202_v62  ;;  %v10503_v60 = vld [vmem:[#allocation2 + $0x124] sm:$0xf]  ;;  %v13208_v16 = vpop.f32.mrf.mxu0 }
 0x32e   : > { %v3747_v9 = vshll.u32 %v3185_v12, 16  ;;  %v6248_v32 = vunpack.c.l.b16 %v3636_v49  ;;  %v6249_v57 = vunpack.c.l.b16 %v3646_v55  ;;  %v3664_v5 = vor.u32 %v3663_v36, %v13177_v8  ;;  %v10103_v3 = vld [vmem:[#allocation2 + $0xc0] sm:$0xff]  ;;  %15236 = vst [vmem:[#allocation10_spill] sm:$0xff] %v13208_v16 }
 0x32f   : > { %v5484_v54 = vsel %vm10972_vm11, %v5482_v47, %v15234_v35  ;;  %v8188_v31 = vmax.f32 %v8033_v10, 0.0  ;;  %v3753_v39 = vshll.u32 %v10503_v60, 16  ;;  %v8036_v50 = vadd.f32 %v12776_v41, %v7867_v34 }
 0x330   : > { %v6861_v24 = vunpack.c.l.b16 %v5484_v54  ;;  %v3746_v12 = vrot.slane %v3744_v59, 4  ;;  %v3749_v1 = vrot.slane %v3747_v9, 5  ;;  %v3655_v49 = vrot.slane %v3654_v61, 4 }
 0x331   : > { %v7869_v36 = vadd.f32 %v12768_v27, %v7700_v46  ;;  %v9387_v55 = vrot.slane %v2802_v63, 9  ;;  %v3019_v58 = vrot.slane %v13017_v17, 5  ;;  %v6296_v35 = vpack.c.b16 %v6249_v57, %v6248_v32 }
 0x332   : > { %v6906_v47 = vpack.c.b16 %v6861_v24, %v6860_v25  ;;  %v3665_v54 = vrot.slane %v3664_v5, 4  ;;  %v15237_v10 = vshll.u32 %v12487_v52, 16  ;;  %6182 = vrot.lane.b32.xlu2 %v10103_v3, %s10632_s18  ;;  %v15238_v41 = vshrl.u32 %v12683_v38, 16  ;;  %v4033_v25 = vld [vmem:[#allocation2 + $0x15c] sm:$0xe]  ;;  %v13223_v52 = vpop.permute.xlu2 %6640  ;;  %v6793_v3 = vpop.permute.xlu0 %6792 }
 0x333   : > { %v13216_v59 = vrot.slane %v3753_v39, 5  ;;  %v3020_v27 = vsel %vm10972_vm11, %v9387_v55, %v3019_v58  ;;  %v3021_v17 = vrot.slane %v3019_v58, 4  ;;  %v3022_v61 = vrot.slane %v13033_v4, 5  ;;  %v13227_v38 = vld [vmem:[#allocation2 + $0x164] sm:$0x1] }
 0x334   : > { %v3669_v53 = vrot.slane %v15237_v10, 5  ;;  %9943 = vmatmul.msk.bf16.gmra.mxu0 %vm6920_vm15, %v6906_v47  ;;  %v3759_v34 = vrot.slane %v15238_v41, 4  ;;  %v13221_v46 = vpack.c.bf16 %v8188_v31, %v8188_v31  ;;  %v7228_v9 = vsel %vm6920_vm15, %v6296_v35, %v13152_v23  ;;  %15239 = vst [vmem:[#allocation20_spill] sm:$0xff] %v13227_v38  ;;  %v3183_v5 = vld [vmem:[#allocation2 + $0x114] sm:$0xf]  ;;  %v10146_v35 = vld [vmem:[#allocation2 + $0x168] sm:$0xff] }
 0x335   : > { %v8189_v32 = vmax.f32 %v8036_v50, 0.0  ;;  %v3750_v57 = vor.u32 %v3749_v1, %v3746_v12  ;;  %v3660_v24 = vsel %vm10985_vm14, %v3655_v49, %v13177_v8  ;;  %v8038_v63 = vadd.f32 %v12806_v42, %v7869_v36  ;;  %v13235_v31 = vld [vmem:[#allocation2 + $0x160] sm:$0xf]  ;;  %v10171_v49 = vld [vmem:[%s15124_s5 + $0x8] sm:$0xff] }
 0x336   : > { %v3023_v4 = vsel %vm10972_vm11, %v3021_v17, %v3022_v61  ;;  %15240 = vst [vmem:[#allocation14_spill] sm:$0xff] %v13235_v31  ;;  %v9431_v60 = vrot.slane %v4033_v25, 9  ;;  %v3670_v23 = vsel %vm10985_vm14, %v3665_v54, %v3669_v53  ;;  %v5892_v39 = vunpack.c.l.b16 %v3020_v27  ;;  %v13247_v54 = vpop.f32.mrf.mxu2  ;;  %v10504_v25 = vld [vmem:[#allocation2 + $0x118] sm:$0xf]  ;;  %8755 = vmatpush.bf16.msrb.mxu3 %v10171_v49  ;;  %v4412_v49 = vld [vmem:[#allocation2 + $0x168] sm:$0xf] }
 0x337   : > { %v5893_v50 = vunpack.c.l.b16 %v3023_v4  ;;  %v4319_v47 = vrot.slane %v13235_v31, 5  ;;  %v3760_v12 = vor.u32 %v3759_v34, %v13216_v59  ;;  %v4322_v8 = vrot.slane %v13227_v38, 5  ;;  %15241 = vst [vmem:[#allocation22_spill] sm:$0xff] %v13247_v54  ;;  %v4032_v4 = vld [vmem:[#allocation2 + $0x150] sm:$0xe]  ;;  %v13315_v31 = vpop.f32.mrf.mxu0 }
 0x338   : > { %v3720_v1 = vshrl.u32 %v3183_v5, 16  ;;  %v3723_v42 = vshll.u32 %v3183_v5, 16  ;;  %v3751_v36 = vrot.slane %v3750_v57, 4  ;;  %v13249_v10 = vpack.c.bf16 %v8189_v32, %v8189_v32  ;;  %15249 = vst [vmem:[#allocation42_spill] sm:$0xff] %v13315_v31  ;;  %v10510_v54 = vld [vmem:[#allocation2 + $0x160] sm:$0xf] }
 0x339   : > { %v5942_v55 = vpack.c.b16 %v5893_v50, %v5892_v39  ;;  %v4320_v53 = vsel %vm10972_vm11, %v9431_v60, %v4319_v47  ;;  %v4321_v58 = vrot.slane %v4319_v47, 4  ;;  %v13251_v41 = vunpack.c.l.b16 %v3660_v24 }
 0x33a   : > { %v6364_v34 = vunpack.c.l.b16 %v4320_v53  ;;  %v3729_v27 = vshll.u32 %v10504_v25, 16  ;;  %v13253_v17 = vunpack.c.l.b16 %v3670_v23  ;;  %v3722_v57 = vrot.slane %v3720_v1, 4  ;;  %6652 = vrot.lane.b32.xlu2 %v10146_v35, %s10631_s17 }
 0x33b   : > { %5988 = vrot.lane.b32.xlu0 %v5942_v55, %s10631_s17  ;;  %v4323_v61 = vsel %vm10972_vm11, %v4321_v58, %v4322_v8  ;;  %v3725_v5 = vrot.slane %v3723_v42, 5  ;;  %v8190_v24 = vmax.f32 %v8038_v63, 0.0  ;;  %v7307_v39 = vsel %vm544_vm0, %v7228_v9, %v13041_v37  ;;  %v13268_v42 = vld [vmem:[#allocation2 + $0x158] sm:$0x1]  ;;  %v13274_v37 = vld [vmem:[#allocation2 + $0x154] sm:$0xf] }
 0x33c   : > { %v6365_v60 = vunpack.c.l.b16 %v4323_v61  ;;  %v3756_v23 = vsel %vm10985_vm14, %v3751_v36, %v13216_v59  ;;  %v3761_v50 = vrot.slane %v3760_v12, 4  ;;  %v15242_v47 = vshll.u32 %v12667_v2, 16  ;;  %15243 = vst [vmem:[#allocation9_spill] sm:$0xff] %v13268_v42  ;;  %v13277_v12 = vpop.permute.xlu2 %5980  ;;  %v7702_v36 = vpop.f32.mrf.mxu1 }
 0x33d   : > { %v7387_v1 = vsel %vm7081_vm2, %v7307_v39, %v6793_v3  ;;  %v13270_v53 = vrot.slane %v3729_v27, 5  ;;  %v15244_v63 = vshrl.u32 %v12559_v26, 16  ;;  %15245 = vst [vmem:[#allocation13_spill] sm:$0xff] %v13274_v37  ;;  %v9430_v9 = vrot.slane %v4032_v4, 9  ;;  %v10505_v27 = vld [vmem:[#allocation2 + $0x16c] sm:$0xf] }
 0x33e   : > { %v3765_v8 = vrot.slane %v15242_v47, 5  ;;  %v6402_v55 = vpack.c.b16 %v6365_v60, %v6364_v34  ;;  %7935 = vmatmul.bf16.gmra.mxu2 %v7387_v1  ;;  %v6297_v2 = vpack.c.b16 %v13253_v17, %v13251_v41  ;;  %v3726_v3 = vor.u32 %v3725_v5, %v3722_v57  ;;  %v13290_v17 = vpop.permute.xlu0 %6446  ;;  %v13296_v5 = vld [vmem:[%s15123_s4] ss:$0 sm:$0xff] }
 0x33f   : > { %v3735_v58 = vrot.slane %v15244_v63, 4  ;;  %v4312_v35 = vrot.slane %v13274_v37, 5  ;;  %v4315_v26 = vrot.slane %v13268_v42, 5  ;;  %v5081_v34 = vshrl.u32 %v4412_v49, 16  ;;  %v13301_v63 = vpop.f32.mrf.mxu2 }
 0x340   : > { %6460 = vrot.lane.b32.xlu1 %v6402_v55, %s10630_s14  ;;  %v5084_v25 = vshll.u32 %v4412_v49, 16  ;;  %v5090_v61 = vshll.u32 %v10505_v27, 16  ;;  %v13284_v4 = vpack.c.bf16 %v8190_v24, %v8190_v24  ;;  %v3766_v60 = vsel %vm10985_vm14, %v3761_v50, %v3765_v8  ;;  %v13299_v49 = vpop.f32.mrf.mxu3  ;;  %15247 = vst [vmem:[#allocation8_spill] sm:$0xff] %v13301_v63  ;;  %v3181_v63 = vld [vmem:[#allocation2 + $0x108] sm:$0xf] }
 0x341   : > { %v6258_v39 = vunpack.c.l.b16 %v3756_v23  ;;  %v4313_v41 = vsel %vm10972_vm11, %v9430_v9, %v4312_v35  ;;  %v3736_v57 = vor.u32 %v3735_v58, %v13270_v53  ;;  %v7703_v47 = vadd.f32 %v13296_v5, %v7702_v36  ;;  %15246 = vst [vmem:[#allocation24_spill] sm:$0xff] %v13299_v49  ;;  %v13306_v36 = vpop.permute.xlu1 %6448 }
 0x342   : > { %v4314_v24 = vrot.slane %v4312_v35, 4  ;;  %v5083_v1 = vrot.slane %v5081_v34, 4  ;;  %v6362_v50 = vunpack.c.l.b16 %v4313_v41  ;;  %v5086_v23 = vrot.slane %v5084_v25, 5 }
 0x343   : > { %v5092_v8 = vrot.slane %v5090_v61, 5  ;;  %v5094_v55 = vshrl.u32 %v10505_v27, 16  ;;  %v6259_v9 = vunpack.c.l.b16 %v3766_v60  ;;  %v3727_v59 = vrot.slane %v3726_v3, 4 }
 0x344   : > { %v4316_v58 = vsel %vm10972_vm11, %v4314_v24, %v4315_v26  ;;  %v5100_v32 = vshll.u32 %v10507_v44, 16  ;;  %v5087_v34 = vor.u32 %v5086_v23, %v5083_v1  ;;  %v13310_v25 = vsel %vm6920_vm15, %v6297_v2, %v13192_v28  ;;  %v5243_v26 = vld [vmem:[#allocation2 + $0x114] sm:$0xe]  ;;  %v6451_v2 = vpop.permute.xlu2 %6450 }
 0x345   : > { %v6363_v35 = vunpack.c.l.b16 %v4316_v58  ;;  %v5096_v49 = vrot.slane %v5094_v55, 4  ;;  %v3737_v27 = vrot.slane %v3736_v57, 4  ;;  %v15248_v61 = vshll.u32 %v12552_v51, 16  ;;  %v5255_v58 = vld [vmem:[#allocation2 + $0x1a4] sm:$0xe] }
 0x346   : > { %v7872_v60 = vadd.f32 %v12802_v29, %v7703_v47  ;;  %v5088_v44 = vrot.slane %v5087_v34, 4  ;;  %v5102_v7 = vrot.slane %v5100_v32, 5  ;;  %v6301_v23 = vpack.c.b16 %v6259_v9, %v6258_v39  ;;  %v10508_v47 = vld [vmem:[#allocation2 + $0x118] sm:$0xf]  ;;  %v13332_v34 = vld [vmem:[#allocation2 + $0x1a8] sm:$0xf] }
 0x347   : > { %v3741_v3 = vrot.slane %v15248_v61, 5  ;;  %v6401_v41 = vpack.c.b16 %v6363_v35, %v6362_v50  ;;  %v5097_v24 = vor.u32 %v5096_v49, %v5092_v8  ;;  %v3732_v51 = vsel %vm10985_vm14, %v3727_v59, %v13270_v53  ;;  %v13334_v61 = vpop.permute.xlu0 %6798 }
 0x348   : > { %v5093_v29 = vsel %vm10985_vm14, %v5088_v44, %v5092_v8  ;;  %v9456_v32 = vrot.slane %v5243_v26, 9  ;;  %v5487_v49 = vrot.slane %v10508_v47, 5  ;;  %v8041_v39 = vadd.f32 %v12857_v14, %v7872_v60  ;;  %v2804_v26 = vld [vmem:[#allocation2 + $0xd8] sm:$0xe]  ;;  %v13351_v47 = vld [vmem:[#allocation2 + $0xdc] sm:$0xf] }
 0x349   : > { %6458 = vrot.lane.b32.xlu0 %v6401_v41, %s10630_s14  ;;  %v5098_v57 = vrot.slane %v5097_v24, 4  ;;  %v3742_v50 = vsel %vm10985_vm14, %v3737_v27, %v3741_v3  ;;  %v6716_v55 = vunpack.c.l.b16 %v5093_v29  ;;  %v3696_v9 = vshrl.u32 %v3181_v63, 16  ;;  %v10170_v27 = vld [vmem:[%s15124_s5] sm:$0xff]  ;;  %v13345_v41 = vpop.f32.mrf.mxu3 }
 0x34a   : > { %v3699_v59 = vshll.u32 %v3181_v63, 16  ;;  %v5488_v35 = vsel %vm10972_vm11, %v9456_v32, %v5487_v49  ;;  %v5489_v8 = vrot.slane %v5487_v49, 4  ;;  %v13340_v14 = vsel %vm6920_vm15, %v6301_v23, %v6451_v2  ;;  %v13343_v63 = vld [vmem:[#allocation2 + $0x1ac] sm:$0x1]  ;;  %15250 = vst [vmem:[#allocation43_spill] sm:$0xff] %v13345_v41  ;;  %8756 = vmatpush.bf16.msrb.mxu3 %v10170_v27  ;;  %v13355_v2 = vpop.f32.mrf.mxu2  ;;  %v13367_v41 = vpop.f32.mrf.mxu0 }
 0x34b   : > { %v5103_v53 = vsel %vm10985_vm14, %v5098_v57, %v5102_v7  ;;  %v6862_v7 = vunpack.c.l.b16 %v5488_v35  ;;  %v6256_v44 = vunpack.c.l.b16 %v3732_v51  ;;  %v6257_v24 = vunpack.c.l.b16 %v3742_v50  ;;  %v13353_v23 = vld [vmem:[#allocation2 + $0xe0] sm:$0x1]  ;;  %15252 = vst [vmem:[#allocation44_spill] sm:$0xff] %v13355_v2  ;;  %v13357_v51 = vpop.permute.xlu1 %6800 }
 0x34c   : > { %v6717_v60 = vunpack.c.l.b16 %v5103_v53  ;;  %v15251_v29 = vrot.slane %v12657_v20, 5  ;;  %v9468_v32 = vrot.slane %v5255_v58, 9  ;;  %v8191_v49 = vmax.f32 %v8041_v39, 0.0  ;;  %15253 = vst [vmem:[#allocation45_spill] sm:$0xff] %v13357_v51  ;;  %v4410_v58 = vld [vmem:[#allocation2 + $0x15c] sm:$0xf] }
 0x34d   : > { %v3698_v35 = vrot.slane %v3696_v9, 4  ;;  %v3701_v28 = vrot.slane %v3699_v59, 5  ;;  %v5571_v20 = vrot.slane %v13332_v34, 5  ;;  %v5574_v50 = vrot.slane %v13343_v63, 5  ;;  %v10509_v9 = vld [vmem:[#allocation2 + $0x10c] sm:$0xf] }
 0x34e   : > { %v5491_v57 = vsel %vm10972_vm11, %v5489_v8, %v15251_v29  ;;  %v6754_v53 = vpack.c.b16 %v6717_v60, %v6716_v55  ;;  %v9389_v8 = vrot.slane %v2804_v26, 9  ;;  %v3033_v1 = vrot.slane %v13351_v47, 5  ;;  %15254 = vst [vmem:[#allocation46_spill] sm:$0xff] %v13367_v41  ;;  %v13384_v41 = vld [vmem:[#allocation2 + $0x170] sm:$0x1] }
 0x34f   : > { %v6863_v3 = vunpack.c.l.b16 %v5491_v57  ;;  %v3036_v39 = vrot.slane %v13353_v23, 5  ;;  %v6300_v55 = vpack.c.b16 %v6257_v24, %v6256_v44  ;;  %v3705_v59 = vshll.u32 %v10509_v9, 16 }
 0x350   : > { %6812 = vrot.lane.b32.xlu1 %v6754_v53, %s10632_s18  ;;  %v5572_v60 = vsel %vm10972_vm11, %v9468_v32, %v5571_v20  ;;  %v5573_v57 = vrot.slane %v5571_v20, 4  ;;  %v3034_v53 = vsel %vm10972_vm11, %v9389_v8, %v3033_v1  ;;  %v5057_v29 = vshrl.u32 %v4410_v58, 16  ;;  %v15256_v8 = vld [vmem:[#allocation16_spill] sm:$0xff] }
 0x351   : > { %v6907_v27 = vpack.c.b16 %v6863_v3, %v6862_v7  ;;  %v6886_v26 = vunpack.c.l.b16 %v5572_v60  ;;  %v3035_v3 = vrot.slane %v3033_v1, 4  ;;  %v13372_v7 = vpop.f32.mrf.mxu1  ;;  %v13374_v2 = vpack.c.bf16 %v8191_v49, %v8191_v49 }
 0x352   : > { %v3702_v44 = vor.u32 %v3701_v28, %v3698_v35  ;;  %v5575_v24 = vsel %vm10972_vm11, %v5573_v57, %v5574_v50  ;;  %v5896_v32 = vunpack.c.l.b16 %v3034_v53  ;;  %v5060_v60 = vshll.u32 %v4410_v58, 16  ;;  %v13386_v28 = vpop.permute.xlu0 %8473  ;;  %v10511_v53 = vld [vmem:[#allocation2 + $0x164] sm:$0x1]  ;;  %v13388_v58 = vpop.f32.mrf.mxu3 }
 0x353   : > { %9944 = vmatmul.msk.bf16.gmra.mxu0 %vm6920_vm15, %v6907_v27  ;;  %15255 = vst [vmem:[#allocation47_spill] sm:$0xff] %v13374_v2  ;;  %v6887_v20 = vunpack.c.l.b16 %v5575_v24  ;;  %v3037_v9 = vsel %vm10972_vm11, %v3035_v3, %v3036_v39  ;;  %v5059_v27 = vrot.slane %v5057_v29, 4  ;;  %v13380_v42 = vrot.slane %v3705_v59, 5  ;;  %v4034_v29 = vld [vmem:[#allocation2 + $0x168] sm:$0xe]  ;;  %v15263_v3 = vld [vmem:[#allocation34_spill] sm:$0xff]  ;;  %v13433_v62 = vpop.f32.mrf.mxu0 }
 0x354   : > { %v15257_v1 = vshrl.u32 %v15256_v8, 16  ;;  %v5897_v38 = vunpack.c.l.b16 %v3037_v9  ;;  %v5066_v49 = vshll.u32 %v10510_v54, 16  ;;  %v5062_v50 = vrot.slane %v5060_v60, 5  ;;  %15258 = vst [vmem:[#allocation16_spill] sm:$0xff] %v13388_v58  ;;  %v13395_v8 = vpop.f32.mrf.mxu2  ;;  %v10512_v58 = vld [vmem:[%s10738_s8 + $0x38] sm:$0xff] }
 0x355   : > { %v6919_v35 = vpack.c.b16 %v6887_v20, %v6886_v26  ;;  %v5070_v57 = vshrl.u32 %v10510_v54, 16  ;;  %v5076_v39 = vshll.u32 %v10511_v53, 16  ;;  %v13392_v59 = vsel %vm6920_vm15, %v6300_v55, %v13306_v36  ;;  %15259 = vst [vmem:[#allocation48_spill] sm:$0xff] %v13395_v8  ;;  %v15260_v26 = vld [vmem:[#allocation15_spill] sm:$0xff]  ;;  %v13404_v36 = vld [vmem:[#allocation2 + $0x16c] sm:$0xf] }
 0x356   : > { %v3711_v37 = vrot.slane %v15257_v1, 4  ;;  %v5944_v24 = vpack.c.b16 %v5897_v38, %v5896_v32  ;;  %v5068_v9 = vrot.slane %v5066_v49, 5  ;;  %v3703_v1 = vrot.slane %v3702_v44, 4  ;;  %v13408_v38 = vpop.permute.xlu1 %8475  ;;  %15264 = vst [vmem:[#allocation15_spill] sm:$0xff] %v13433_v62  ;;  %v5244_v2 = vld [vmem:[#allocation2 + $0x120] sm:$0xe] }
 0x357   : > { %v15261_v20 = vshll.u32 %v15260_v26, 16  ;;  %9956 = vmatmul.msk.bf16.gmra.mxu3 %vm6920_vm15, %v6919_v35  ;;  %v5063_v54 = vor.u32 %v5062_v50, %v5059_v27  ;;  %v5072_v53 = vrot.slane %v5070_v57, 4  ;;  %v9432_v44 = vrot.slane %v4034_v29, 9  ;;  %v15262_v50 = vld [vmem:[#allocation31_spill] sm:$0xff] }
 0x358   : > { %8487 = vrot.lane.b32.xlu1 %v10512_v58, %s10630_s14  ;;  %v3712_v55 = vor.u32 %v3711_v37, %v13380_v42  ;;  %5992 = vrot.lane.b32.xlu2 %v5944_v24, %s10631_s17  ;;  %v4326_v32 = vrot.slane %v13404_v36, 5  ;;  %v4329_v49 = vrot.slane %v13384_v41, 5  ;;  %v5078_v27 = vrot.slane %v5076_v39, 5  ;;  %v1955_v58 = vld [vmem:[#allocation2 + $0xe4] sm:$0xf] }
 0x359   : > { %v13399_v60 = vrot.slane %v15261_v20, 5  ;;  %v5064_v26 = vrot.slane %v5063_v54, 4  ;;  %v5073_v35 = vor.u32 %v5072_v53, %v5068_v9  ;;  %v7309_v57 = vsel %vm544_vm0, %v13310_v25, %v15262_v50  ;;  %v7707_v25 = vpop.f32.mrf.mxu1  ;;  %v13425_v50 = vld [vmem:[#allocation2 + $0xe8] sm:$0xf] }
 0x35a   : > { %v4327_v37 = vsel %vm10972_vm11, %v9432_v44, %v4326_v32  ;;  %v4328_v24 = vrot.slane %v4326_v32, 4  ;;  %v7390_v29 = vsel %vm7081_vm2, %v7309_v57, %v15263_v3  ;;  %v3708_v54 = vsel %vm10985_vm14, %v3703_v1, %v13380_v42  ;;  %v13431_v3 = vld [vmem:[#allocation2 + $0xec] sm:$0x1] }
 0x35b   : > { %v5069_v39 = vsel %vm10985_vm14, %v5064_v26, %v5068_v9  ;;  %v5074_v53 = vrot.slane %v5073_v35, 4  ;;  %v6366_v8 = vunpack.c.l.b16 %v4327_v37  ;;  %7940 = vmatmul.bf16.gmra.mxu2 %v7390_v29  ;;  %v13427_v20 = vrot.slane %v3712_v55, 4  ;;  %v13478_v16 = vpop.f32.mrf.mxu0 }
 0x35c   : > { %v6714_v44 = vunpack.c.l.b16 %v5069_v39  ;;  %v4330_v32 = vsel %vm10972_vm11, %v4328_v24, %v4329_v49  ;;  %v2429_v57 = vshrl.u32 %v1955_v58, 16  ;;  %v2432_v26 = vshll.u32 %v1955_v58, 16  ;;  %v13440_v39 = vpop.permute.xlu0 %5820  ;;  %v13444_v24 = vpop.f32.mrf.mxu2 }
 0x35d   : > { %v5079_v9 = vsel %vm10985_vm14, %v5074_v53, %v5078_v27  ;;  %v6367_v1 = vunpack.c.l.b16 %v4330_v32  ;;  %v2438_v55 = vshll.u32 %v13425_v50, 16  ;;  %v2442_v29 = vshrl.u32 %v13425_v50, 16  ;;  %15265 = vst [vmem:[#allocation31_spill] sm:$0xff] %v13444_v24  ;;  %v13447_v27 = vpop.f32.mrf.mxu3  ;;  %v13449_v58 = vpop.permute.xlu2 %6802 }
 0x35e   : > { %v6715_v35 = vunpack.c.l.b16 %v5079_v9  ;;  %v2431_v37 = vrot.slane %v2429_v57, 4  ;;  %v13442_v49 = vunpack.c.l.b16 %v3708_v54  ;;  %v2434_v31 = vrot.slane %v2432_v26, 5  ;;  %15266 = vst [vmem:[#allocation34_spill] sm:$0xff] %v13447_v27  ;;  %v4414_v9 = vld [vmem:[#allocation2 + $0x174] sm:$0xf] }
 0x35f   : > { %v6403_v62 = vpack.c.b16 %v6367_v1, %v6366_v8  ;;  %v2448_v42 = vshll.u32 %v13431_v3, 16  ;;  %15267 = vst [vmem:[#allocation49_spill] sm:$0xff] %v13449_v58  ;;  %v3718_v53 = vsel %vm10985_vm14, %v13427_v20, %v13399_v60  ;;  %v2440_v57 = vrot.slane %v2438_v55, 5  ;;  %v10513_v55 = vld [vmem:[#allocation2 + $0x124] sm:$0xf] }
 0x360   : > { %v6753_v32 = vpack.c.b16 %v6715_v35, %v6714_v44  ;;  %v2444_v54 = vrot.slane %v2442_v29, 4  ;;  %v7705_v8 = vadd.f32 %v13296_v5, %v13372_v7  ;;  %v7708_v1 = vadd.f32 %v13296_v5, %v7707_v25  ;;  %v13464_v44 = vpop.permute.xlu1 %5822 }
 0x361   : > { %6462 = vrot.lane.b32.xlu2 %v6403_v62, %s10630_s14  ;;  %v2435_v26 = vor.u32 %v2434_v31, %v2431_v37  ;;  %v15268_v27 = vunpack.c.l.b16 %v12969_v21  ;;  %v15269_v24 = vunpack.c.l.b16 %v13102_v45  ;;  %v2450_v20 = vrot.slane %v2448_v42, 5 }
 0x362   : > { %6810 = vrot.lane.b32.xlu0 %v6753_v32, %s10632_s18  ;;  %v2445_v60 = vor.u32 %v2444_v54, %v2440_v57  ;;  %v9457_v35 = vrot.slane %v5244_v2, 9  ;;  %v5494_v29 = vrot.slane %v10513_v55, 5  ;;  %v5105_v25 = vshrl.u32 %v4414_v9, 16  ;;  %v7709_v55 = vpop.f32.mrf.mxu1 }
 0x363   : > { %v8441_v58 = vpack.c.b16 %v15269_v24, %v15268_v27  ;;  %v2436_v7 = vrot.slane %v2435_v26, 4  ;;  %v5108_v31 = vshll.u32 %v4414_v9, 16  ;;  %v10514_v24 = vld [vmem:[#allocation2 + $0x178] sm:$0xf]  ;;  %v15270_v9 = vld [vmem:[#allocation17_spill] sm:$0xff] }
 0x364   : > { %v2446_v37 = vrot.slane %v2445_v60, 4  ;;  %v5495_v21 = vsel %vm10972_vm11, %v9457_v35, %v5494_v29  ;;  %v5496_v45 = vrot.slane %v5494_v29, 4  ;;  %v5114_v27 = vshll.u32 %v10514_v24, 16  ;;  %v1953_v26 = vld [vmem:[#allocation2 + $0xd8] sm:$0xf]  ;;  %15272 = vst [vmem:[#allocation17_spill] sm:$0xff] %v13478_v16 }
 0x365   : > { %v8539_v62 = vsel %vm6920_vm15, %v8441_v58, %v13386_v28  ;;  %v2441_v42 = vsel %vm10985_vm14, %v2436_v7, %v2440_v57  ;;  %v6864_v32 = vunpack.c.l.b16 %v5495_v21  ;;  %v5107_v2 = vrot.slane %v5105_v25, 4  ;;  %v10515_v25 = vld [vmem:[#allocation2 + $0x17c] sm:$0x1] }
 0x366   : > { %v5110_v54 = vrot.slane %v5108_v31, 5  ;;  %v2451_v28 = vsel %vm10985_vm14, %v2446_v37, %v2450_v20  ;;  %v5738_v58 = vunpack.c.l.b16 %v2441_v42  ;;  %v15271_v60 = vrot.slane %v15270_v9, 5  ;;  %v13482_v42 = vpop.permute.xlu0 %6172  ;;  %v13484_v9 = vpop.f32.mrf.mxu2 }
 0x367   : > { %v5116_v29 = vrot.slane %v5114_v27, 5  ;;  %v5739_v51 = vunpack.c.l.b16 %v2451_v28  ;;  %9981 = vmatmul.msk.bf16.vlgmr.msrb.gmra.mxu3 %vm7081_vm2, %v8539_v62  ;;  %v5118_v7 = vshrl.u32 %v10514_v24, 16  ;;  %v5124_v31 = vshll.u32 %v10515_v25, 16  ;;  %15273 = vst [vmem:[#allocation50_spill] sm:$0xff] %v13484_v9  ;;  %v10516_v24 = vld [vmem:[%s10738_s8 + $0x30] sm:$0xff] }
 0x368   : > { %v5498_v35 = vsel %vm10972_vm11, %v5496_v45, %v15271_v60  ;;  %v5111_v57 = vor.u32 %v5110_v54, %v5107_v2  ;;  %v7710_v20 = vadd.f32 %v13296_v5, %v7709_v55  ;;  %v2405_v37 = vshrl.u32 %v1953_v26, 16  ;;  %v13490_v2 = vpop.permute.xlu2 %8477 }
 0x369   : > { %v6865_v18 = vunpack.c.l.b16 %v5498_v35  ;;  %v2408_v21 = vshll.u32 %v1953_v26, 16  ;;  %v5785_v45 = vpack.c.b16 %v5739_v51, %v5738_v58  ;;  %v5120_v28 = vrot.slane %v5118_v7, 4  ;;  %v13486_v35 = vpop.f32.mrf.mxu3  ;;  %v15275_v58 = vld [vmem:[#allocation29_spill] sm:$0xff] }
 0x36a   : > { %v5112_v60 = vrot.slane %v5111_v57, 4  ;;  %15274 = vst [vmem:[#allocation51_spill] sm:$0xff] %v13486_v35  ;;  %v13488_v62 = vunpack.c.l.b16 %v3718_v53  ;;  %8485 = vrot.lane.b32.xlu0 %v10516_v24, %s10630_s14  ;;  %v5126_v54 = vrot.slane %v5124_v31, 5  ;;  %v2407_v55 = vrot.slane %v2405_v37, 4  ;;  %v15276_v7 = vld [vmem:[#allocation33_spill] sm:$0xff]  ;;  %v10066_v37 = vld [vmem:[#allocation2 + $0x78] sm:$0xff] }
 0x36b   : > { %v6908_v27 = vpack.c.b16 %v6865_v18, %v6864_v32  ;;  %v2410_v26 = vrot.slane %v2408_v21, 5  ;;  %5834 = vrot.lane.b32.xlu1 %v5785_v45, %s10630_s14  ;;  %v5121_v51 = vor.u32 %v5120_v28, %v5116_v29  ;;  %v2414_v32 = vshll.u32 %v13351_v47, 16  ;;  %v13503_v21 = vpop.permute.xlu1 %6174  ;;  %v5245_v45 = vld [vmem:[#allocation2 + $0x12c] sm:$0xe]  ;;  %v15277_v35 = vld [vmem:[#allocation36_spill] sm:$0xff] }
 0x36c   : > { %v5117_v18 = vsel %vm10985_vm14, %v5112_v60, %v5116_v29  ;;  %v2418_v53 = vshrl.u32 %v13351_v47, 16  ;;  %v7874_v57 = vadd.f32 %v15275_v58, %v7705_v8  ;;  %v7877_v25 = vadd.f32 %v15276_v7, %v7708_v1 }
 0x36d   : > { %9945 = vmatmul.msk.bf16.gmra.mxu0 %vm6920_vm15, %v6908_v27  ;;  %v2411_v24 = vor.u32 %v2410_v26, %v2407_v55  ;;  %v2424_v31 = vshll.u32 %v13353_v23, 16  ;;  %v5122_v27 = vrot.slane %v5121_v51, 4  ;;  %v7879_v9 = vadd.f32 %v15277_v35, %v7710_v20 }
 0x36e   : > { %v2416_v60 = vrot.slane %v2414_v32, 5  ;;  %v2420_v29 = vrot.slane %v2418_v53, 4  ;;  %v6718_v28 = vunpack.c.l.b16 %v5117_v18  ;;  %v6953_v47 = vsel %vm6920_vm15, %v10066_v37, %v13440_v39  ;;  %v10517_v39 = vld [vmem:[#allocation2 + $0x130] sm:$0xf]  ;;  %v13519_v53 = vpop.f32.mrf.mxu0 }
 0x36f   : > { %v2412_v16 = vrot.slane %v2411_v24, 4  ;;  %v7393_v8 = vsel %vm7081_vm2, %v13144_v13, %v13108_v15  ;;  %v5127_v23 = vsel %vm10985_vm14, %v5122_v27, %v5126_v54  ;;  %v2426_v55 = vrot.slane %v2424_v31, 5  ;;  %v15279_v13 = vld [vmem:[#allocation35_spill] sm:$0xff]  ;;  %v10105_v24 = vld [vmem:[#allocation2 + $0xf0] sm:$0xff]  ;;  %v13524_v31 = vpop.f32.mrf.mxu2 }
 0x370   : > { %v2421_v1 = vor.u32 %v2420_v29, %v2416_v60  ;;  %7945 = vmatmul.bf16.gmra.mxu2 %v7393_v8  ;;  %v9458_v26 = vrot.slane %v5245_v45, 9  ;;  %v15278_v20 = vshrl.u32 %v13332_v34, 16  ;;  %v6719_v18 = vunpack.c.l.b16 %v5127_v23  ;;  %v13530_v27 = vld [vmem:[#allocation2 + $0xf8] sm:$0x1]  ;;  %v13532_v29 = vpop.permute.xlu0 %6642 }
 0x371   : > { %v2417_v51 = vsel %vm10985_vm14, %v2412_v16, %v2416_v60  ;;  %v5501_v32 = vrot.slane %v10517_v39, 5  ;;  %v6299_v15 = vpack.c.b16 %v13488_v62, %v13442_v49  ;;  %v8043_v54 = vadd.f32 %v15279_v13, %v7874_v57  ;;  %v2806_v60 = vld [vmem:[#allocation2 + $0xf0] sm:$0xe]  ;;  %v15280_v49 = vld [vmem:[#allocation40_spill] sm:$0xff]  ;;  %v15281_v57 = vld [vmem:[#allocation41_spill] sm:$0xff] }
 0x372   : > { %v13515_v35 = vrot.slane %v15278_v20, 4  ;;  %v2422_v58 = vrot.slane %v2421_v1, 4  ;;  %v5736_v7 = vunpack.c.l.b16 %v2417_v51  ;;  %v6755_v34 = vpack.c.b16 %v6719_v18, %v6718_v28  ;;  %v7712_v28 = vpop.f32.mrf.mxu1  ;;  %v15283_v20 = vld [vmem:[#allocation25_spill] sm:$0xff] }
 0x373   : > { %v5502_v37 = vsel %vm10972_vm11, %v9458_v26, %v5501_v32  ;;  %v5503_v45 = vrot.slane %v5501_v32, 4  ;;  %v7038_v16 = vsel %vm544_vm0, %v6953_v47, %v13277_v12  ;;  %v8046_v62 = vadd.f32 %v15280_v49, %v7877_v25  ;;  %6186 = vrot.lane.b32.xlu1 %v10105_v24, %s10632_s18  ;;  %v13541_v26 = vpop.f32.mrf.mxu3  ;;  %v13543_v12 = vpop.permute.xlu2 %5824 }
 0x374   : > { %v8048_v8 = vadd.f32 %v15281_v57, %v7879_v9  ;;  %v2427_v23 = vsel %vm10985_vm14, %v2422_v58, %v2426_v55  ;;  %v7113_v1 = vsel %vm7081_vm2, %v7038_v16, %v13482_v42  ;;  %15282 = vst [vmem:[#allocation29_spill] sm:$0xff] %v13541_v26  ;;  %6814 = vrot.lane.b32.xlu2 %v6755_v34, %s10632_s18  ;;  %v15284_v25 = vrot.slane %v15283_v20, 5  ;;  %v1958_v42 = vld [vmem:[#allocation2 + $0xf4] sm:$0xf]  ;;  %v1957_v34 = vld [vmem:[#allocation2 + $0xf0] sm:$0xf]  ;;  %v13555_v57 = vpop.permute.xlu1 %6644 }
 0x375   : > { %v5737_v47 = vunpack.c.l.b16 %v2427_v23  ;;  %v6866_v18 = vunpack.c.l.b16 %v5502_v37  ;;  %7736 = vmatmul.bf16.gmra.mxu1 %v7113_v1  ;;  %v15285_v55 = vunpack.c.l.b16 %v13150_v22  ;;  %v15286_v51 = vunpack.c.l.b16 %v13221_v46  ;;  %v10148_v20 = vld [vmem:[#allocation2 + $0x180] sm:$0xff] }
 0x376   : > { %v5505_v9 = vsel %vm10972_vm11, %v5503_v45, %v15284_v25  ;;  %v9391_v13 = vrot.slane %v2806_v60, 9  ;;  %v3047_v58 = vrot.slane %v1958_v42, 5  ;;  %v3050_v24 = vrot.slane %v13530_v27, 5  ;;  %v15288_v25 = vld [vmem:[#allocation39_spill] sm:$0xff] }
 0x377   : > { %v8442_v39 = vpack.c.b16 %v15286_v51, %v15285_v55  ;;  %v6867_v32 = vunpack.c.l.b16 %v5505_v9  ;;  %v8192_v16 = vmax.f32 %v8043_v54, 0.0  ;;  %v5784_v49 = vpack.c.b16 %v5737_v47, %v5736_v7  ;;  %v13575_v51 = vpop.f32.mrf.mxu0 }
 0x378   : > { %v7713_v45 = vadd.f32 %v13296_v5, %v7712_v28  ;;  %v7237_v22 = vsel %vm6920_vm15, %v6299_v15, %v13290_v17  ;;  %v15287_v46 = vshll.u32 %v13343_v63, 16  ;;  %v8193_v60 = vmax.f32 %v8046_v62, 0.0 }
 0x379   : > { %v8542_v37 = vsel %vm6920_vm15, %v8442_v39, %v13408_v38  ;;  %v3049_v1 = vrot.slane %v3047_v58, 4  ;;  %v8194_v54 = vmax.f32 %v8048_v8, 0.0  ;;  %5832 = vrot.lane.b32.xlu0 %v5784_v49, %s10630_s14  ;;  %v6909_v7 = vpack.c.b16 %v6867_v32, %v6866_v18  ;;  %v13581_v39 = vpop.f32.mrf.mxu2 }
 0x37a   : > { %v13564_v23 = vrot.slane %v15287_v46, 5  ;;  %9982 = vmatmul.msk.bf16.gmra.mxu3 %vm7081_vm2, %v8542_v37  ;;  %v2453_v47 = vshrl.u32 %v1957_v34, 16  ;;  %v2456_v28 = vshll.u32 %v1957_v34, 16  ;;  %v3048_v38 = vsel %vm10972_vm11, %v9391_v13, %v3047_v58 }
 0x37b   : > { %v3051_v17 = vsel %vm10972_vm11, %v3049_v1, %v3050_v24  ;;  %v2462_v63 = vshll.u32 %v1958_v42, 16  ;;  %v2466_v15 = vshrl.u32 %v1958_v42, 16  ;;  %v13572_v62 = vpack.c.bf16 %v8192_v16, %v8192_v16  ;;  %6656 = vrot.lane.b32.xlu1 %v10148_v20, %s10631_s17  ;;  %v10518_v24 = vld [vmem:[%s10738_s8 + $0x40] sm:$0xff]  ;;  %v13600_v20 = vpop.permute.xlu2 %6176 }
 0x37c   : > { %v7882_v9 = vadd.f32 %v15288_v25, %v7713_v45  ;;  %v2455_v8 = vrot.slane %v2453_v47, 4  ;;  %v2458_v55 = vrot.slane %v2456_v28, 5  ;;  %v13577_v18 = vpack.c.bf16 %v8193_v60, %v8193_v60  ;;  %8489 = vrot.lane.b32.xlu2 %v10518_v24, %s10630_s14  ;;  %v13590_v45 = vpop.permute.xlu0 %5982  ;;  %v10068_v60 = vld [vmem:[#allocation2 + $0x90] sm:$0xff]  ;;  %v10067_v1 = vld [vmem:[#allocation2 + $0x84] sm:$0xff] }
 0x37d   : > { %9946 = vmatmul.msk.bf16.gmra.mxu0 %vm6920_vm15, %v6909_v7  ;;  %v13583_v32 = vrot.slane %v2462_v63, 5  ;;  %v2468_v13 = vrot.slane %v2466_v15, 4  ;;  %v2472_v42 = vshll.u32 %v13530_v27, 16  ;;  %v13586_v58 = vpack.c.bf16 %v8194_v54, %v8194_v54  ;;  %v7714_v7 = vpop.f32.mrf.mxu1  ;;  %v13597_v54 = vpop.f32.mrf.mxu3  ;;  %v3191_v25 = vld [vmem:[#allocation2 + $0x144] sm:$0xf] }
 0x37e   : > { %v5900_v34 = vunpack.c.l.b16 %v3048_v38  ;;  %v5901_v16 = vunpack.c.l.b16 %v3051_v17  ;;  %v2459_v49 = vor.u32 %v2458_v55, %v2455_v8  ;;  %v7313_v27 = vsel %vm544_vm0, %v7237_v22, %v13122_v6  ;;  %15289 = vst [vmem:[#allocation33_spill] sm:$0xff] %v13597_v54  ;;  %v10104_v38 = vld [vmem:[#allocation2 + $0xe4] sm:$0xff]  ;;  %v4035_v28 = vld [vmem:[#allocation2 + $0x174] sm:$0xe] }
 0x37f   : > { %v2469_v47 = vor.u32 %v2468_v13, %v13583_v32  ;;  %v8051_v17 = vadd.f32 %v13084_v30, %v7882_v9  ;;  %v7396_v15 = vsel %vm7081_vm2, %v7313_v27, %v13334_v61  ;;  %v6959_v8 = vsel %vm6920_vm15, %v10068_v60, %v13543_v12  ;;  %v2805_v13 = vld [vmem:[#allocation2 + $0xe4] sm:$0xe]  ;;  %v5985_v9 = vpop.permute.xlu1 %5984  ;;  %v10519_v60 = vld [vmem:[#allocation2 + $0x148] sm:$0xf] }
 0x380   : > { %v2460_v63 = vrot.slane %v2459_v49, 4  ;;  %v6956_v6 = vsel %vm6920_vm15, %v10067_v1, %v13464_v44  ;;  %v2474_v55 = vrot.slane %v2472_v42, 5  ;;  %7950 = vmatmul.bf16.gmra.mxu2 %v7396_v15  ;;  %v5946_v30 = vpack.c.b16 %v5901_v16, %v5900_v34  ;;  %v4036_v49 = vld [vmem:[#allocation2 + $0x180] sm:$0xe] }
 0x381   : > { %v2470_v22 = vrot.slane %v2469_v47, 4  ;;  %6184 = vrot.lane.b32.xlu0 %v10104_v38, %s10632_s18  ;;  %v7715_v61 = vadd.f32 %v13296_v5, %v7714_v7  ;;  %v3816_v27 = vshrl.u32 %v3191_v25, 16  ;;  %v3819_v12 = vshll.u32 %v3191_v25, 16  ;;  %v10106_v1 = vld [vmem:[#allocation2 + $0xfc] sm:$0xff]  ;;  %v3236_v7 = vld [vmem:[#allocation2 + $0x188] sm:$0x1] }
 0x382   : > { %v3825_v37 = vshll.u32 %v10519_v60, 16  ;;  %v3040_v44 = vrot.slane %v13425_v50, 5  ;;  %v8195_v42 = vmax.f32 %v8051_v17, 0.0  ;;  %v13617_v47 = vsel %vm544_vm0, %v13340_v14, %v13532_v29  ;;  %v3202_v17 = vld [vmem:[#allocation2 + $0x184] sm:$0xf]  ;;  %v15290_v29 = vld [vmem:[#allocation7_spill] sm:$0xff] }
 0x383   : > { %v2465_v34 = vsel %vm10985_vm14, %v2460_v63, %v13583_v32  ;;  %v9390_v16 = vrot.slane %v2805_v13, 9  ;;  %5996 = vrot.lane.b32.xlu1 %v5946_v30, %s10631_s17  ;;  %v2475_v38 = vsel %vm10985_vm14, %v2470_v22, %v2474_v55  ;;  %v3043_v50 = vrot.slane %v13431_v3, 5  ;;  %v13641_v3 = vpop.f32.mrf.mxu2 }
 0x384   : > { %v3042_v15 = vrot.slane %v3040_v44, 4  ;;  %v9434_v25 = vrot.slane %v4036_v49, 9  ;;  %6188 = vrot.lane.b32.xlu2 %v10106_v1, %s10632_s18  ;;  %v13628_v14 = vsel %vm544_vm0, %v6959_v8, %v5985_v9  ;;  %v7884_v60 = vadd.f32 %v15290_v29, %v7715_v61  ;;  %15292 = vst [vmem:[#allocation36_spill] sm:$0xff] %v13641_v3  ;;  %v3189_v1 = vld [vmem:[#allocation2 + $0x138] sm:$0xf]  ;;  %v13647_v29 = vpop.permute.xlu0 %6452 }
 0x385   : > { %v15291_v32 = vshrl.u32 %v13008_v43, 16  ;;  %v4340_v13 = vrot.slane %v3202_v17, 5  ;;  %v13635_v30 = vrot.slane %v3816_v27, 4  ;;  %v13637_v22 = vrot.slane %v3819_v12, 5  ;;  %v10147_v8 = vld [vmem:[#allocation2 + $0x174] sm:$0xff]  ;;  %v13657_v17 = vpop.permute.xlu2 %6646 }
 0x386   : > { %v13639_v55 = vrot.slane %v3825_v37, 5  ;;  %v4343_v49 = vrot.slane %v3236_v7, 5  ;;  %v13643_v46 = vpack.c.bf16 %v8195_v42, %v8195_v42  ;;  %v5740_v9 = vunpack.c.l.b16 %v2465_v34  ;;  %v13655_v42 = vpop.f32.mrf.mxu3 }
 0x387   : > { %v13633_v63 = vrot.slane %v15291_v32, 4  ;;  %v5741_v61 = vunpack.c.l.b16 %v2475_v38  ;;  %v4341_v43 = vsel %vm10972_vm11, %v9434_v25, %v4340_v13  ;;  %v3041_v27 = vsel %vm10972_vm11, %v9390_v16, %v3040_v44  ;;  %15293 = vst [vmem:[#allocation35_spill] sm:$0xff] %v13655_v42  ;;  %v10520_v32 = vld [vmem:[#allocation2 + $0x13c] sm:$0xf]  ;;  %v15294_v42 = vld [vmem:[#allocation30_spill] sm:$0xff] }
 0x388   : > { %v3044_v37 = vsel %vm10972_vm11, %v3042_v15, %v3043_v50  ;;  %v4342_v12 = vrot.slane %v4340_v13, 4  ;;  %v7040_v7 = vsel %vm544_vm0, %v6956_v6, %v13590_v45  ;;  %v6370_v34 = vunpack.c.l.b16 %v4341_v43  ;;  %v13667_v43 = vpop.permute.xlu1 %6454 }
 0x389   : > { %6654 = vrot.lane.b32.xlu0 %v10147_v8, %s10631_s17  ;;  %v3792_v38 = vshrl.u32 %v3189_v1, 16  ;;  %v3795_v25 = vshll.u32 %v3189_v1, 16  ;;  %v3801_v24 = vshll.u32 %v10520_v32, 16  ;;  %v8053_v44 = vadd.f32 %v13129_v56, %v7884_v60  ;;  %v3235_v1 = vld [vmem:[#allocation2 + $0x17c] sm:$0x1]  ;;  %v7717_v60 = vpop.f32.mrf.mxu1 }
 0x38a   : > { %v3822_v16 = vor.u32 %v13637_v22, %v13635_v30  ;;  %v3832_v45 = vor.u32 %v13633_v63, %v13639_v55  ;;  %v4344_v6 = vsel %vm10972_vm11, %v4342_v12, %v4343_v49  ;;  %v5786_v15 = vpack.c.b16 %v5741_v61, %v5740_v9  ;;  %v4418_v32 = vld [vmem:[#allocation2 + $0x18c] sm:$0xf] }
 0x38b   : > { %v5898_v50 = vunpack.c.l.b16 %v3041_v27  ;;  %v5899_v13 = vunpack.c.l.b16 %v3044_v37  ;;  %v6371_v8 = vunpack.c.l.b16 %v4344_v6  ;;  %v15295_v54 = vshrl.u32 %v15294_v42, 16  ;;  %v3200_v6 = vld [vmem:[#allocation2 + $0x178] sm:$0xf] }
 0x38c   : > { %v15296_v30 = vunpack.c.l.b16 %v13249_v10  ;;  %v15297_v22 = vunpack.c.l.b16 %v13284_v4  ;;  %v7116_v49 = vsel %vm7081_vm2, %v7040_v7, %v13503_v21  ;;  %v9433_v9 = vrot.slane %v4035_v28, 9  ;;  %5836 = vrot.lane.b32.xlu2 %v5786_v15, %s10630_s14  ;;  %v13685_v7 = vpop.f32.mrf.mxu2  ;;  %v3187_v15 = vld [vmem:[#allocation2 + $0x12c] sm:$0xf] }
 0x38d   : > { %v3807_v56 = vrot.slane %v15295_v54, 4  ;;  %v6405_v61 = vpack.c.b16 %v6371_v8, %v6370_v34  ;;  %v3794_v27 = vrot.slane %v3792_v38, 4  ;;  %v3797_v37 = vrot.slane %v3795_v25, 5  ;;  %7741 = vmatmul.bf16.gmra.mxu1 %v7116_v49  ;;  %15298 = vst [vmem:[#allocation40_spill] sm:$0xff] %v13685_v7  ;;  %v10521_v38 = vld [vmem:[#allocation2 + $0x190] sm:$0xf] }
 0x38e   : > { %v8443_v63 = vpack.c.b16 %v15297_v22, %v15296_v30  ;;  %v13678_v12 = vrot.slane %v3801_v24, 5  ;;  %v4333_v10 = vrot.slane %v3200_v6, 5  ;;  %v4336_v42 = vrot.slane %v3235_v1, 5  ;;  %v13700_v6 = vpop.permute.xlu2 %5986 }
 0x38f   : > { %v5153_v4 = vshrl.u32 %v4418_v32, 16  ;;  %v8196_v30 = vmax.f32 %v8053_v44, 0.0  ;;  %v5945_v22 = vpack.c.b16 %v5899_v13, %v5898_v50  ;;  %6466 = vrot.lane.b32.xlu1 %v6405_v61, %s10630_s14  ;;  %v7718_v21 = vadd.f32 %v13296_v5, %v7717_v60  ;;  %v13698_v61 = vpop.f32.mrf.mxu3 }
 0x390   : > { %v8545_v54 = vsel %vm6920_vm15, %v8443_v63, %v13490_v2  ;;  %v5156_v28 = vshll.u32 %v4418_v32, 16  ;;  %v4334_v24 = vsel %vm10972_vm11, %v9433_v9, %v4333_v10  ;;  %v4335_v34 = vrot.slane %v4333_v10, 4  ;;  %v13693_v32 = vpop.permute.xlu0 %6804  ;;  %15300 = vst [vmem:[#allocation41_spill] sm:$0xff] %v13698_v61 }
 0x391   : > { %9983 = vmatmul.msk.bf16.gmra.mxu3 %vm7081_vm2, %v8545_v54  ;;  %v5155_v2 = vrot.slane %v5153_v4, 4  ;;  %v5162_v25 = vshll.u32 %v10521_v38, 16  ;;  %v3823_v50 = vrot.slane %v3822_v16, 4  ;;  %v3833_v13 = vrot.slane %v3832_v45, 4  ;;  %5994 = vrot.lane.b32.xlu0 %v5945_v22, %s10631_s17  ;;  %v10149_v16 = vld [vmem:[#allocation2 + $0x18c] sm:$0xff] }
 0x392   : > { %v15299_v8 = vshll.u32 %v12998_v48, 16  ;;  %v3798_v60 = vor.u32 %v3797_v37, %v3794_v27  ;;  %v3808_v63 = vor.u32 %v3807_v56, %v13678_v12  ;;  %v4337_v49 = vsel %vm10972_vm11, %v4335_v34, %v4336_v42  ;;  %v10522_v34 = vld [vmem:[#allocation2 + $0x130] sm:$0xf] }
 0x393   : > { %v5158_v9 = vrot.slane %v5156_v28, 5  ;;  %v6368_v45 = vunpack.c.l.b16 %v4334_v24  ;;  %v6369_v54 = vunpack.c.l.b16 %v4337_v49  ;;  %v5164_v48 = vrot.slane %v5162_v25, 5  ;;  %v15301_v28 = vld [vmem:[#allocation18_spill] sm:$0xff]  ;;  %v13712_v25 = vpop.permute.xlu1 %6806 }
 0x394   : > { %v3837_v1 = vrot.slane %v15299_v8, 5  ;;  %v3768_v10 = vshrl.u32 %v3187_v15, 16  ;;  %v13702_v4 = vpack.c.bf16 %v8196_v30, %v8196_v30  ;;  %v7887_v22 = vadd.f32 %v13072_v40, %v7718_v21  ;;  %6658 = vrot.lane.b32.xlu2 %v10149_v16, %s10631_s17  ;;  %v2807_v30 = vld [vmem:[#allocation2 + $0xfc] sm:$0xe]  ;;  %v15302_v21 = vld [vmem:[#allocation28_spill] sm:$0xff] }
 0x395   : > { %v5159_v27 = vor.u32 %v5158_v9, %v5155_v2  ;;  %v3771_v37 = vshll.u32 %v3187_v15, 16  ;;  %v3828_v56 = vsel %vm10985_vm14, %v3823_v50, %v13639_v55  ;;  %v5169_v24 = vor.u32 %v15301_v28, %v5164_v48 }
 0x396   : > { %v3838_v42 = vsel %vm10985_vm14, %v3833_v13, %v3837_v1  ;;  %v3777_v38 = vshll.u32 %v10522_v34, 16  ;;  %v3799_v8 = vrot.slane %v3798_v60, 4  ;;  %v3809_v40 = vrot.slane %v3808_v63, 4  ;;  %v7719_v13 = vpop.f32.mrf.mxu1  ;;  %v13716_v1 = vld [vmem:[#allocation2 + $0x100] sm:$0xf] }
 0x397   : > { %v15303_v2 = vshll.u32 %v15302_v21, 16  ;;  %v5160_v49 = vrot.slane %v5159_v27, 4  ;;  %v6404_v9 = vpack.c.b16 %v6369_v54, %v6368_v45  ;;  %v5170_v55 = vrot.slane %v5169_v24, 4  ;;  %v13723_v34 = vld [vmem:[#allocation2 + $0x104] sm:$0x1]  ;;  %v15304_v45 = vld [vmem:[#allocation19_spill] sm:$0xff]  ;;  %v13737_v21 = vpop.f32.mrf.mxu2 }
 0x398   : > { %v3770_v50 = vrot.slane %v3768_v10, 4  ;;  %v3773_v44 = vrot.slane %v3771_v37, 5  ;;  %v13719_v16 = vadd.f32 %v13171_v33, %v7887_v22  ;;  %v9392_v60 = vrot.slane %v2807_v30, 9  ;;  %15306 = vst [vmem:[#allocation25_spill] sm:$0xff] %v13737_v21 }
 0x399   : > { %v3813_v15 = vrot.slane %v15303_v2, 5  ;;  %v5165_v28 = vsel %vm10985_vm14, %v5160_v49, %v5164_v48  ;;  %v3054_v63 = vrot.slane %v13716_v1, 5  ;;  %6464 = vrot.lane.b32.xlu0 %v6404_v9, %s10630_s14  ;;  %v5175_v54 = vsel %vm10985_vm14, %v5170_v55, %v15304_v45  ;;  %v13743_v55 = vpop.permute.xlu0 %8479  ;;  %v13752_v45 = vpop.permute.xlu2 %6456 }
 0x39a   : > { %v6722_v10 = vunpack.c.l.b16 %v5165_v28  ;;  %v13730_v27 = vrot.slane %v3777_v38, 5  ;;  %v15305_v33 = vshrl.u32 %v12887_v19, 16  ;;  %v6723_v37 = vunpack.c.l.b16 %v5175_v54  ;;  %v15308_v54 = vld [vmem:[#allocation21_spill] sm:$0xff] }
 0x39b   : > { %v7720_v48 = vadd.f32 %v13296_v5, %v7719_v13  ;;  %v3055_v24 = vsel %vm10972_vm11, %v9392_v60, %v3054_v63  ;;  %v3056_v30 = vrot.slane %v3054_v63, 4  ;;  %v13740_v49 = vunpack.c.l.b16 %v3828_v56  ;;  %v4416_v60 = vld [vmem:[#allocation2 + $0x180] sm:$0xf]  ;;  %v13750_v63 = vpop.f32.mrf.mxu3  ;;  %v13769_v56 = vpop.permute.xlu1 %8481 }
 0x39c   : > { %v3783_v22 = vrot.slane %v15305_v33, 4  ;;  %v3774_v9 = vor.u32 %v3773_v44, %v3770_v50  ;;  %v3057_v38 = vrot.slane %v13723_v34, 5  ;;  %v13745_v19 = vunpack.c.l.b16 %v3838_v42  ;;  %15307 = vst [vmem:[#allocation39_spill] sm:$0xff] %v13750_v63 }
 0x39d   : > { %v3804_v5 = vsel %vm10985_vm14, %v3799_v8, %v13678_v12  ;;  %v6757_v13 = vpack.c.b16 %v6723_v37, %v6722_v10  ;;  %v5902_v28 = vunpack.c.l.b16 %v3055_v24  ;;  %v3814_v44 = vsel %vm10985_vm14, %v3809_v40, %v3813_v15  ;;  %v4037_v12 = vld [vmem:[#allocation2 + $0x18c] sm:$0xe] }
 0x39e   : > { %v3058_v42 = vsel %vm10972_vm11, %v3056_v30, %v3057_v38  ;;  %v7315_v50 = vsel %vm544_vm0, %v13392_v59, %v13223_v52  ;;  %v3784_v8 = vor.u32 %v3783_v22, %v13730_v27  ;;  %v7889_v10 = vadd.f32 %v15308_v54, %v7720_v48  ;;  %v15309_v37 = vld [vmem:[#allocation45_spill] sm:$0xff]  ;;  %v10523_v38 = vld [vmem:[#allocation2 + $0x184] sm:$0xf]  ;;  %v3237_v52 = vld [vmem:[#allocation2 + $0x194] sm:$0x1] }
 0x39f   : > { %6818 = vrot.lane.b32.xlu1 %v6757_v13, %s10632_s18  ;;  %v5903_v33 = vunpack.c.l.b16 %v3058_v42  ;;  %v7399_v40 = vsel %vm7081_vm2, %v7315_v50, %v15309_v37  ;;  %v13767_v15 = vrot.slane %v3774_v9, 4  ;;  %v5129_v24 = vshrl.u32 %v4416_v60, 16  ;;  %v1961_v42 = vld [vmem:[#allocation2 + $0x108] sm:$0xf]  ;;  %v15310_v54 = vld [vmem:[#allocation32_spill] sm:$0xff] }
 0x3a0   : > { %7955 = vmatmul.bf16.gmra.mxu2 %v7399_v40  ;;  %v5132_v30 = vshll.u32 %v4416_v60, 16  ;;  %v5138_v2 = vshll.u32 %v10523_v38, 16  ;;  %v13771_v59 = vunpack.c.l.b16 %v3804_v5  ;;  %v13773_v13 = vunpack.c.l.b16 %v3814_v44  ;;  %v3204_v60 = vld [vmem:[#allocation2 + $0x190] sm:$0xf] }
 0x3a1   : > { %v5947_v22 = vpack.c.b16 %v5903_v33, %v5902_v28  ;;  %v9435_v48 = vrot.slane %v4037_v12, 9  ;;  %v15311_v63 = vshll.u32 %v15310_v54, 16  ;;  %v5131_v9 = vrot.slane %v5129_v24, 4  ;;  %v15312_v38 = vld [vmem:[#allocation10_spill] sm:$0xff]  ;;  %v13785_v28 = vld [vmem:[#allocation2 + $0x10c] sm:$0xf] }
 0x3a2   : > { %v5134_v37 = vrot.slane %v5132_v30, 5  ;;  %v5140_v40 = vrot.slane %v5138_v2, 5  ;;  %v13779_v61 = vrot.slane %v3784_v8, 4  ;;  %v13782_v26 = vadd.f32 %v15312_v38, %v7889_v10  ;;  %v15313_v2 = vld [vmem:[#allocation11_spill] sm:$0xff]  ;;  %v13797_v30 = vpop.f32.mrf.mxu2 }
 0x3a3   : > { %v13777_v50 = vrot.slane %v15311_v63, 5  ;;  %5998 = vrot.lane.b32.xlu2 %v5947_v22, %s10631_s17  ;;  %v4347_v5 = vrot.slane %v3204_v60, 5  ;;  %v4350_v44 = vrot.slane %v3237_v52, 5  ;;  %v3780_v63 = vsel %vm10985_vm14, %v13767_v15, %v13730_v27  ;;  %15314 = vst [vmem:[#allocation7_spill] sm:$0xff] %v13797_v30  ;;  %v13800_v15 = vpop.permute.xlu0 %5826  ;;  %v4420_v30 = vld [vmem:[#allocation2 + $0x198] sm:$0xf] }
 0x3a4   : > { %v5135_v12 = vor.u32 %v5134_v37, %v5131_v9  ;;  %v5145_v33 = vor.u32 %v15313_v2, %v5140_v40  ;;  %v7119_v8 = vsel %vm7081_vm2, %v13628_v14, %v13600_v20  ;;  %v2501_v52 = vshrl.u32 %v1961_v42, 16  ;;  %v10524_v9 = vld [vmem:[%s10738_s8 + $0x50] sm:$0xff] }
 0x3a5   : > { %v4348_v10 = vsel %vm10972_vm11, %v9435_v48, %v4347_v5  ;;  %v4349_v24 = vrot.slane %v4347_v5, 4  ;;  %7746 = vmatmul.bf16.gmra.mxu1 %v7119_v8  ;;  %v2504_v22 = vshll.u32 %v1961_v42, 16  ;;  %v2510_v27 = vshll.u32 %v13785_v28, 16  ;;  %v13806_v14 = vld [vmem:[#allocation2 + $0x110] sm:$0x1]  ;;  %v13809_v42 = vpop.f32.mrf.mxu3 }
 0x3a6   : > { %v5136_v54 = vrot.slane %v5135_v12, 4  ;;  %v5146_v60 = vrot.slane %v5145_v33, 4  ;;  %v6372_v38 = vunpack.c.l.b16 %v4348_v10  ;;  %v2503_v48 = vrot.slane %v2501_v52, 4  ;;  %15315 = vst [vmem:[#allocation30_spill] sm:$0xff] %v13809_v42  ;;  %v13811_v12 = vpop.permute.xlu2 %6808  ;;  %v15316_v33 = vld [vmem:[#allocation12_spill] sm:$0xff] }
 0x3a7   : > { %8493 = vrot.lane.b32.xlu1 %v10524_v9, %s10630_s14  ;;  %v4351_v20 = vsel %vm10972_vm11, %v4349_v24, %v4350_v44  ;;  %v2506_v37 = vrot.slane %v2504_v22, 5  ;;  %v2514_v5 = vshrl.u32 %v13785_v28, 16  ;;  %v2512_v9 = vrot.slane %v2510_v27, 5  ;;  %v7722_v22 = vpop.f32.mrf.mxu1  ;;  %v13827_v27 = vpop.permute.xlu1 %5828 }
 0x3a8   : > { %v5141_v2 = vsel %vm10985_vm14, %v5136_v54, %v5140_v40  ;;  %v5151_v8 = vsel %vm10985_vm14, %v5146_v60, %v15316_v33  ;;  %v6373_v10 = vunpack.c.l.b16 %v4351_v20  ;;  %v3790_v42 = vsel %vm10985_vm14, %v13779_v61, %v13777_v50  ;;  %v15317_v54 = vld [vmem:[#allocation47_spill] sm:$0xff] }
 0x3a9   : > { %v6720_v44 = vunpack.c.l.b16 %v5141_v2  ;;  %v6721_v24 = vunpack.c.l.b16 %v5151_v8  ;;  %v2507_v21 = vor.u32 %v2506_v37, %v2503_v48  ;;  %v2516_v52 = vrot.slane %v2514_v5, 4  ;;  %v1959_v8 = vld [vmem:[#allocation2 + $0xfc] sm:$0xf] }
 0x3aa   : > { %v6406_v3 = vpack.c.b16 %v6373_v10, %v6372_v38  ;;  %v2520_v40 = vshll.u32 %v13806_v14, 16  ;;  %v15318_v7 = vunpack.c.l.b16 %v15317_v54  ;;  %v15319_v60 = vunpack.c.l.b16 %v13572_v62  ;;  %v15321_v54 = vld [vmem:[#allocation49_spill] sm:$0xff] }
 0x3ab   : > { %v13829_v2 = vunpack.c.l.b16 %v3780_v63  ;;  %v6756_v48 = vpack.c.b16 %v6721_v24, %v6720_v44  ;;  %v2508_v37 = vrot.slane %v2507_v21, 4  ;;  %v2517_v5 = vor.u32 %v2516_v52, %v2512_v9  ;;  %v13840_v21 = vld [vmem:[%s15123_s4] ss:$0 sm:$0xff]  ;;  %v10526_v63 = vld [vmem:[#allocation2 + $0x19c] sm:$0xf] }
 0x3ac   : > { %v8444_v20 = vpack.c.b16 %v15319_v60, %v15318_v7  ;;  %6468 = vrot.lane.b32.xlu2 %v6406_v3, %s10630_s14  ;;  %v2522_v33 = vrot.slane %v2520_v40, 5  ;;  %v5177_v50 = vshrl.u32 %v4420_v30, 16  ;;  %v5180_v38 = vshll.u32 %v4420_v30, 16 }
 0x3ad   : > { %6816 = vrot.lane.b32.xlu0 %v6756_v48, %s10632_s18  ;;  %v2513_v62 = vsel %vm10985_vm14, %v2508_v37, %v2512_v9  ;;  %v2518_v7 = vrot.slane %v2517_v5, 4  ;;  %v7723_v3 = vadd.f32 %v13840_v21, %v7722_v22  ;;  %v5186_v10 = vshll.u32 %v10526_v63, 16 }
 0x3ae   : > { %v8548_v61 = vsel %vm6920_vm15, %v8444_v20, %v13743_v55  ;;  %v13844_v55 = vpop.f32.mrf.mxu2  ;;  %v13846_v30 = vunpack.c.l.b16 %v3790_v42  ;;  %v5744_v44 = vunpack.c.l.b16 %v2513_v62  ;;  %v5179_v24 = vrot.slane %v5177_v50, 4  ;;  %v13854_v42 = vpop.permute.xlu0 %6178 }
 0x3af   : > { %9984 = vmatmul.msk.bf16.gmra.mxu3 %vm7081_vm2, %v8548_v61  ;;  %15320 = vst [vmem:[#allocation18_spill] sm:$0xff] %v13844_v55  ;;  %v5182_v52 = vrot.slane %v5180_v38, 5  ;;  %v2523_v9 = vsel %vm10985_vm14, %v2518_v7, %v2522_v33  ;;  %v5188_v40 = vrot.slane %v5186_v10, 5  ;;  %v7402_v60 = vsel %vm7081_vm2, %v13617_v47, %v15321_v54  ;;  %v15322_v61 = vld [vmem:[#allocation6_spill] sm:$0xff]  ;;  %v13859_v7 = vpop.f32.mrf.mxu3  ;;  %v13861_v10 = vpop.permute.xlu2 %8483 }
 0x3b0   : > { %v2477_v22 = vshrl.u32 %v1959_v8, 16  ;;  %v5745_v20 = vunpack.c.l.b16 %v2523_v9  ;;  %7960 = vmatmul.bf16.gmra.mxu2 %v7402_v60  ;;  %v2480_v37 = vshll.u32 %v1959_v8, 16  ;;  %v2486_v5 = vshll.u32 %v13716_v1, 16  ;;  %v15323_v38 = vld [vmem:[#allocation26_spill] sm:$0xff]  ;;  %15324 = vst [vmem:[#allocation28_spill] sm:$0xff] %v13859_v7 }
 0x3b1   : > { %v5183_v48 = vor.u32 %v5182_v52, %v5179_v24  ;;  %v7892_v50 = vadd.f32 %v15322_v61, %v7723_v3  ;;  %v5193_v62 = vor.u32 %v15323_v38, %v5188_v40  ;;  %v2490_v33 = vshrl.u32 %v13716_v1, 16  ;;  %v7724_v61 = vpop.f32.mrf.mxu1 }
 0x3b2   : > { %v2479_v63 = vrot.slane %v2477_v22, 4  ;;  %v5788_v47 = vpack.c.b16 %v5745_v20, %v5744_v44  ;;  %v2482_v24 = vrot.slane %v2480_v37, 5  ;;  %v2488_v8 = vrot.slane %v2486_v5, 5  ;;  %v1963_v37 = vld [vmem:[#allocation2 + $0x114] sm:$0xf] }
 0x3b3   : > { %v5184_v9 = vrot.slane %v5183_v48, 4  ;;  %v5194_v54 = vrot.slane %v5193_v62, 4  ;;  %v2492_v60 = vrot.slane %v2490_v33, 4  ;;  %v2496_v3 = vshll.u32 %v13723_v34, 16  ;;  %v13874_v48 = vpop.permute.xlu1 %6180  ;;  %v13876_v5 = vld [vmem:[#allocation2 + $0x118] sm:$0xf] }
 0x3b4   : > { %v6302_v22 = vpack.c.b16 %v13846_v30, %v13829_v2  ;;  %v15325_v1 = vunpack.c.l.b16 %v13577_v18  ;;  %v15326_v38 = vunpack.c.l.b16 %v13586_v58  ;;  %5840 = vrot.lane.b32.xlu1 %v5788_v47, %s10630_s14  ;;  %v2483_v20 = vor.u32 %v2482_v24, %v2479_v63  ;;  %v10527_v34 = vld [vmem:[%s10738_s8 + $0x48] sm:$0xff]  ;;  %v15327_v2 = vld [vmem:[#allocation42_spill] sm:$0xff]  ;;  %v15328_v18 = vld [vmem:[#allocation27_spill] sm:$0xff] }
 0x3b5   : > { %v5189_v44 = vsel %vm10985_vm14, %v5184_v9, %v5188_v40  ;;  %8491 = vrot.lane.b32.xlu0 %v10527_v34, %s10630_s14  ;;  %v13881_v30 = vadd.f32 %v15327_v2, %v7892_v50  ;;  %v5199_v58 = vsel %vm10985_vm14, %v5194_v54, %v15328_v18  ;;  %v2493_v33 = vor.u32 %v2492_v60, %v2488_v8  ;;  %v10069_v9 = vld [vmem:[#allocation2 + $0x9c] sm:$0xff] }
 0x3b6   : > { %v8445_v7 = vpack.c.b16 %v15326_v38, %v15325_v1  ;;  %v6724_v62 = vunpack.c.l.b16 %v5189_v44  ;;  %v6725_v47 = vunpack.c.l.b16 %v5199_v58  ;;  %v2484_v40 = vrot.slane %v2483_v20, 4  ;;  %v13888_v55 = vpop.f32.mrf.mxu2  ;;  %v13894_v60 = vld [vmem:[#allocation2 + $0x11c] sm:$0x1] }
 0x3b7   : > { %v2498_v63 = vrot.slane %v2496_v3, 5  ;;  %v7725_v24 = vadd.f32 %v13840_v21, %v7724_v61  ;;  %v2494_v1 = vrot.slane %v2493_v33, 4  ;;  %v2525_v38 = vshrl.u32 %v1963_v37, 16  ;;  %15329 = vst [vmem:[#allocation19_spill] sm:$0xff] %v13888_v55 }
 0x3b8   : > { %v2528_v52 = vshll.u32 %v1963_v37, 16  ;;  %v2534_v34 = vshll.u32 %v13876_v5, 16  ;;  %v6758_v50 = vpack.c.b16 %v6725_v47, %v6724_v62  ;;  %v2489_v2 = vsel %vm10985_vm14, %v2484_v40, %v2488_v8  ;;  %v10108_v8 = vld [vmem:[#allocation2 + $0x114] sm:$0xff] }
 0x3b9   : > { %v6962_v54 = vsel %vm6920_vm15, %v10069_v9, %v13800_v15  ;;  %v2538_v3 = vshrl.u32 %v13876_v5, 16  ;;  %v2499_v61 = vsel %vm10985_vm14, %v2494_v1, %v2498_v63  ;;  %v5742_v44 = vunpack.c.l.b16 %v2489_v2  ;;  %v13902_v15 = vpop.permute.xlu0 %6648  ;;  %v15330_v47 = vld [vmem:[#allocation23_spill] sm:$0xff]  ;;  %v13908_v1 = vpop.f32.mrf.mxu3 }
 0x3ba   : > { %v2527_v20 = vrot.slane %v2525_v38, 4  ;;  %v2530_v37 = vrot.slane %v2528_v52, 5  ;;  %v7246_v18 = vsel %vm6920_vm15, %v6302_v22, %v13647_v29  ;;  %6820 = vrot.lane.b32.xlu2 %v6758_v50, %s10632_s18  ;;  %v5743_v58 = vunpack.c.l.b16 %v2499_v61  ;;  %v2809_v52 = vld [vmem:[#allocation2 + $0x114] sm:$0xe]  ;;  %15331 = vst [vmem:[#allocation21_spill] sm:$0xff] %v13908_v1  ;;  %v5831_v22 = vpop.permute.xlu2 %5830 }
 0x3bb   : > { %v2536_v62 = vrot.slane %v2534_v34, 5  ;;  %v2540_v33 = vrot.slane %v2538_v3, 4  ;;  %v7894_v40 = vadd.f32 %v15330_v47, %v7725_v24  ;;  %v2544_v55 = vshll.u32 %v13894_v60, 16 }
 0x3bc   : > { %v2531_v9 = vor.u32 %v2530_v37, %v2527_v20  ;;  %v7044_v63 = vsel %vm544_vm0, %v6962_v54, %v13700_v6  ;;  %v8551_v29 = vsel %vm6920_vm15, %v8445_v7, %v13769_v56  ;;  %v5787_v38 = vpack.c.b16 %v5743_v58, %v5742_v44  ;;  %6192 = vrot.lane.b32.xlu1 %v10108_v8, %s10632_s18  ;;  %v7727_v56 = vpop.f32.mrf.mxu1  ;;  %v13923_v7 = vpop.permute.xlu1 %6650 }
 0x3bd   : > { %v2541_v34 = vor.u32 %v2540_v33, %v2536_v62  ;;  %v7122_v24 = vsel %vm7081_vm2, %v7044_v63, %v13854_v42  ;;  %v15332_v50 = vmax.f32 %v13719_v16, 0.0  ;;  %v8199_v6 = vmax.f32 %v13881_v30, 0.0  ;;  %v10528_v63 = vld [vmem:[%s10738_s8 + $0x58] sm:$0xff] }
 0x3be   : > { %v2532_v54 = vrot.slane %v2531_v9, 4  ;;  %v2546_v3 = vrot.slane %v2544_v55, 5  ;;  %7751 = vmatmul.bf16.gmra.mxu1 %v7122_v24  ;;  %5838 = vrot.lane.b32.xlu0 %v5787_v38, %s10630_s14  ;;  %v7319_v42 = vsel %vm544_vm0, %v7246_v18, %v13555_v57  ;;  %v9394_v16 = vrot.slane %v2809_v52, 9  ;;  %v15334_v55 = vld [vmem:[#allocation46_spill] sm:$0xff]  ;;  %v1965_v24 = vld [vmem:[#allocation2 + $0x120] sm:$0xf] }
 0x3bf   : > { %v13918_v2 = vpack.c.bf16 %v15332_v50, %v15332_v50  ;;  %9985 = vmatmul.msk.bf16.gmra.mxu3 %vm7081_vm2, %v8551_v29  ;;  %v2542_v61 = vrot.slane %v2541_v34, 4  ;;  %v3068_v44 = vrot.slane %v13876_v5, 5  ;;  %v15333_v20 = vmax.f32 %v13782_v26, 0.0  ;;  %v10151_v5 = vld [vmem:[#allocation2 + $0x1a4] sm:$0xff] }
 0x3c0   : > { %v8063_v37 = vadd.f32 %v15334_v55, %v7894_v40  ;;  %v7405_v58 = vsel %vm7081_vm2, %v7319_v42, %v13693_v32  ;;  %v3071_v8 = vrot.slane %v13894_v60, 5  ;;  %v6304_v33 = vpack.c.b16 %v13745_v19, %v13740_v49  ;;  %v13952_v19 = vpop.f32.mrf.mxu2  ;;  %v3197_v34 = vld [vmem:[#allocation2 + $0x168] sm:$0xf]  ;;  %v13975_v42 = vld [vmem:[#allocation2 + $0x124] sm:$0xf] }
 0x3c1   : > { %v13931_v30 = vpack.c.bf16 %v15333_v20, %v15333_v20  ;;  %v6303_v57 = vpack.c.b16 %v13773_v13, %v13771_v59  ;;  %7965 = vmatmul.bf16.gmra.mxu2 %v7405_v58  ;;  %v3070_v26 = vrot.slane %v3068_v44, 4  ;;  %v7728_v18 = vadd.f32 %v13840_v21, %v7727_v56  ;;  %v10071_v13 = vld [vmem:[#allocation2 + $0xb4] sm:$0xff]  ;;  %v13985_v55 = vpop.f32.mrf.mxu3 }
 0x3c2   : > { %v15335_v47 = vunpack.c.l.b16 %v13643_v46  ;;  %v15336_v40 = vunpack.c.l.b16 %v13702_v4  ;;  %v13946_v32 = vpack.c.bf16 %v8199_v6, %v8199_v6  ;;  %v2537_v60 = vsel %vm10985_vm14, %v2532_v54, %v2536_v62  ;;  %8495 = vrot.lane.b32.xlu2 %v10528_v63, %s10630_s14  ;;  %v10107_v6 = vld [vmem:[#allocation2 + $0x108] sm:$0xff]  ;;  %v15337_v56 = vld [vmem:[#allocation22_spill] sm:$0xff]  ;;  %15338 = vst [vmem:[#allocation45_spill] sm:$0xff] %v13985_v55 }
 0x3c3   : > { %v2547_v49 = vsel %vm10985_vm14, %v2542_v61, %v2546_v3  ;;  %v13956_v59 = vsel %vm6920_vm15, %v6304_v33, %v13752_v45  ;;  %v13960_v46 = vsel %vm6920_vm15, %v6303_v57, %v13667_v43  ;;  %v3069_v62 = vsel %vm10972_vm11, %v9394_v16, %v3068_v44  ;;  %v10070_v45 = vld [vmem:[#allocation2 + $0xa8] sm:$0xff]  ;;  %v13977_v16 = vpop.permute.xlu0 %5988 }
 0x3c4   : > { %v8446_v9 = vpack.c.b16 %v15336_v40, %v15335_v47  ;;  %v8200_v38 = vmax.f32 %v8063_v37, 0.0  ;;  %v3072_v43 = vsel %vm10972_vm11, %v3070_v26, %v3071_v8  ;;  %v6968_v50 = vsel %vm6920_vm15, %v10071_v13, %v5831_v22  ;;  %6662 = vrot.lane.b32.xlu1 %v10151_v5, %s10631_s17  ;;  %v13987_v37 = vpop.permute.xlu2 %6182  ;;  %v2808_v33 = vld [vmem:[#allocation2 + $0x108] sm:$0xe] }
 0x3c5   : > { %v5746_v54 = vunpack.c.l.b16 %v2537_v60  ;;  %v5747_v3 = vunpack.c.l.b16 %v2547_v49  ;;  %v7897_v61 = vadd.f32 %v15337_v56, %v7728_v18  ;;  %v5906_v20 = vunpack.c.l.b16 %v3069_v62  ;;  %v10529_v18 = vld [vmem:[#allocation2 + $0x16c] sm:$0xf]  ;;  %v15339_v60 = vld [vmem:[#allocation15_spill] sm:$0xff]  ;;  %v14000_v62 = vld [vmem:[#allocation2 + $0x128] sm:$0x1] }
 0x3c6   : > { %v8554_v29 = vsel %vm6920_vm15, %v8446_v9, %v13861_v10  ;;  %v13981_v10 = vsel %vm6920_vm15, %v10070_v45, %v13827_v27  ;;  %v3061_v22 = vrot.slane %v13785_v28, 5  ;;  %6190 = vrot.lane.b32.xlu0 %v10107_v6, %s10632_s18  ;;  %v5907_v58 = vunpack.c.l.b16 %v3072_v43  ;;  %v5991_v28 = vpop.permute.xlu1 %5990 }
 0x3c7   : > { %v3888_v8 = vshrl.u32 %v3197_v34, 16  ;;  %v2549_v57 = vshrl.u32 %v1965_v24, 16  ;;  %v2552_v5 = vshll.u32 %v1965_v24, 16  ;;  %v13990_v26 = vpack.c.bf16 %v8200_v38, %v8200_v38 }
 0x3c8   : > { %v3891_v27 = vshll.u32 %v3197_v34, 16  ;;  %v3897_v47 = vshll.u32 %v10529_v18, 16  ;;  %v2558_v40 = vshll.u32 %v13975_v42, 16  ;;  %v5789_v9 = vpack.c.b16 %v5747_v3, %v5746_v54 }
 0x3c9   : > { %v13994_v49 = vadd.f32 %v15339_v60, %v7897_v61  ;;  %v15340_v13 = vshrl.u32 %v13404_v36, 16  ;;  %v2551_v45 = vrot.slane %v2549_v57, 4  ;;  %v9393_v43 = vrot.slane %v2808_v33, 9  ;;  %v3195_v33 = vld [vmem:[#allocation2 + $0x15c] sm:$0xf]  ;;  %v14012_v60 = vpop.f32.mrf.mxu2 }
 0x3ca   : > { %v3063_v38 = vrot.slane %v3061_v22, 4  ;;  %v3064_v34 = vrot.slane %v13806_v14, 5  ;;  %v2554_v24 = vrot.slane %v2552_v5, 5  ;;  %5842 = vrot.lane.b32.xlu2 %v5789_v9, %s10630_s14  ;;  %v5949_v6 = vpack.c.b16 %v5907_v58, %v5906_v20  ;;  %v10150_v5 = vld [vmem:[#allocation2 + $0x198] sm:$0xff] }
 0x3cb   : > { %v13998_v63 = vrot.slane %v15340_v13, 4  ;;  %v14004_v54 = vrot.slane %v3888_v8, 4  ;;  %v2560_v3 = vrot.slane %v2558_v40, 5  ;;  %v2562_v56 = vshrl.u32 %v13975_v42, 16 }
 0x3cc   : > { %v14007_v61 = vrot.slane %v3891_v27, 5  ;;  %v14009_v36 = vrot.slane %v3897_v47, 5  ;;  %v2555_v18 = vor.u32 %v2554_v24, %v2551_v45  ;;  %v2568_v57 = vshll.u32 %v14000_v62, 16  ;;  %6002 = vrot.lane.b32.xlu1 %v5949_v6, %s10631_s17  ;;  %v2810_v45 = vld [vmem:[#allocation2 + $0x120] sm:$0xe]  ;;  %v14034_v24 = vpop.permute.xlu0 %6458 }
 0x3cd   : > { %v14019_v20 = vsel %vm544_vm0, %v13956_v59, %v13902_v15  ;;  %v14022_v58 = vsel %vm544_vm0, %v6968_v50, %v5991_v28  ;;  %v2564_v8 = vrot.slane %v2562_v56, 4  ;;  %v15341_v27 = vshll.u32 %v13384_v41, 16  ;;  %v10109_v6 = vld [vmem:[#allocation2 + $0x120] sm:$0xff] }
 0x3ce   : > { %v3062_v40 = vsel %vm10972_vm11, %v9393_v43, %v3061_v22  ;;  %v3065_v9 = vsel %vm10972_vm11, %v3063_v38, %v3064_v34  ;;  %v2556_v13 = vrot.slane %v2555_v18, 4  ;;  %6660 = vrot.lane.b32.xlu0 %v10150_v5, %s10631_s17  ;;  %v2570_v59 = vrot.slane %v2568_v57, 5  ;;  %v14043_v38 = vpop.f32.mrf.mxu3  ;;  %v14045_v34 = vpop.permute.xlu2 %6652 }
 0x3cf   : > { %v14026_v47 = vrot.slane %v15341_v27, 5  ;;  %9986 = vmatmul.msk.bf16.gmra.mxu3 %vm7081_vm2, %v8554_v29  ;;  %v2565_v15 = vor.u32 %v2564_v8, %v2560_v3  ;;  %v3864_v50 = vshrl.u32 %v3195_v33, 16  ;;  %v3867_v28 = vshll.u32 %v3195_v33, 16  ;;  %15342 = vst [vmem:[#allocation32_spill] sm:$0xff] %v14043_v38  ;;  %v10530_v33 = vld [vmem:[#allocation2 + $0x160] sm:$0xf] }
 0x3d0   : > { %v8201_v41 = vmax.f32 %v13994_v49, 0.0  ;;  %v3894_v22 = vor.u32 %v14007_v61, %v14004_v54  ;;  %v3904_v43 = vor.u32 %v13998_v63, %v14009_v36  ;;  %v2561_v29 = vsel %vm10985_vm14, %v2556_v13, %v2560_v3  ;;  %v15353_v38 = vld [vmem:[#allocation9_spill] sm:$0xff] }
 0x3d1   : > { %v5904_v56 = vunpack.c.l.b16 %v3062_v40  ;;  %v5905_v18 = vunpack.c.l.b16 %v3065_v9  ;;  %v2566_v57 = vrot.slane %v2565_v15, 4  ;;  %v3873_v5 = vshll.u32 %v10530_v33, 16  ;;  %v14055_v9 = vpop.permute.xlu1 %6460  ;;  %v7729_v15 = vpop.f32.mrf.mxu1  ;;  %v4038_v33 = vld [vmem:[#allocation2 + $0x198] sm:$0xe] }
 0x3d2   : > { %v5748_v49 = vunpack.c.l.b16 %v2561_v29  ;;  %v9395_v8 = vrot.slane %v2810_v45, 9  ;;  %v3075_v54 = vrot.slane %v13975_v42, 5  ;;  %v3078_v61 = vrot.slane %v14000_v62, 5  ;;  %6194 = vrot.lane.b32.xlu2 %v10109_v6, %s10632_s18  ;;  %v14062_v29 = vpop.f32.mrf.mxu2  ;;  %v15343_v6 = vld [vmem:[#allocation14_spill] sm:$0xff] }
 0x3d3   : > { %v2571_v63 = vsel %vm10985_vm14, %v2566_v57, %v2570_v59  ;;  %v7046_v3 = vsel %vm544_vm0, %v13981_v10, %v13977_v16  ;;  %v3866_v27 = vrot.slane %v3864_v50, 4  ;;  %v3869_v40 = vrot.slane %v3867_v28, 5  ;;  %v3238_v28 = vld [vmem:[#allocation2 + $0x1a0] sm:$0x1] }
 0x3d4   : > { %v5749_v13 = vunpack.c.l.b16 %v2571_v63  ;;  %v3076_v42 = vsel %vm10972_vm11, %v9395_v8, %v3075_v54  ;;  %v3077_v45 = vrot.slane %v3075_v54, 4  ;;  %v7321_v62 = vsel %vm544_vm0, %v13960_v46, %v13657_v17  ;;  %v3193_v46 = vld [vmem:[#allocation2 + $0x150] sm:$0xf] }
 0x3d5   : > { %v5948_v59 = vpack.c.b16 %v5905_v18, %v5904_v56  ;;  %v15344_v57 = vshrl.u32 %v15343_v6, 16  ;;  %v5908_v10 = vunpack.c.l.b16 %v3076_v42  ;;  %v7408_v50 = vsel %vm7081_vm2, %v7321_v62, %v13712_v25  ;;  %v3206_v42 = vld [vmem:[#allocation2 + $0x19c] sm:$0xf] }
 0x3d6   : > { %v5790_v63 = vpack.c.b16 %v5749_v13, %v5748_v49  ;;  %v14068_v14 = vrot.slane %v3873_v5, 5  ;;  %v3079_v8 = vsel %vm10972_vm11, %v3077_v45, %v3078_v61  ;;  %7970 = vmatmul.bf16.gmra.mxu2 %v7408_v50  ;;  %v7125_v17 = vsel %vm7081_vm2, %v7046_v3, %v13874_v48  ;;  %v14084_v6 = vpop.f32.mrf.mxu3  ;;  %v15346_v50 = vld [vmem:[#allocation8_spill] sm:$0xff] }
 0x3d7   : > { %v3879_v16 = vrot.slane %v15344_v57, 4  ;;  %v3895_v56 = vrot.slane %v3894_v22, 4  ;;  %6000 = vrot.lane.b32.xlu0 %v5948_v59, %s10631_s17  ;;  %v3870_v18 = vor.u32 %v3869_v40, %v3866_v27  ;;  %v7730_v54 = vadd.f32 %v13840_v21, %v7729_v15  ;;  %7756 = vmatmul.bf16.gmra.mxu1 %v7125_v17  ;;  %v14079_v22 = vpop.permute.xlu0 %6810  ;;  %v10531_v59 = vld [vmem:[#allocation2 + $0x154] sm:$0xf]  ;;  %15345 = vst [vmem:[#allocation10_spill] sm:$0xff] %v14084_v6  ;;  %v14086_v57 = vpop.permute.xlu2 %5992 }
 0x3d8   : > { %v5909_v25 = vunpack.c.l.b16 %v3079_v8  ;;  %v3905_v49 = vrot.slane %v3904_v43, 4  ;;  %5844 = vrot.lane.b32.xlu1 %v5790_v63, %s10630_s14  ;;  %v9436_v5 = vrot.slane %v4038_v33, 9  ;;  %v4354_v13 = vrot.slane %v3206_v42, 5  ;;  %v1967_v33 = vld [vmem:[#allocation2 + $0x12c] sm:$0xf]  ;;  %v15347_v42 = vld [vmem:[#allocation20_spill] sm:$0xff] }
 0x3d9   : > { %v4357_v61 = vrot.slane %v3238_v28, 5  ;;  %v14077_v45 = vpack.c.bf16 %v8201_v41, %v8201_v41  ;;  %v3840_v48 = vshrl.u32 %v3193_v46, 16  ;;  %v3843_v3 = vshll.u32 %v3193_v46, 16  ;;  %v14093_v63 = vld [vmem:[#allocation2 + $0x130] sm:$0xf] }
 0x3da   : > { %v5950_v62 = vpack.c.b16 %v5909_v25, %v5908_v10  ;;  %v3880_v27 = vor.u32 %v3879_v16, %v14068_v14  ;;  %v4355_v40 = vsel %vm10972_vm11, %v9436_v5, %v4354_v13  ;;  %v4356_v15 = vrot.slane %v4354_v13, 4  ;;  %v15349_v5 = vld [vmem:[#allocation13_spill] sm:$0xff] }
 0x3db   : > { %v3849_v43 = vshll.u32 %v10531_v59, 16  ;;  %v3900_v41 = vsel %vm10985_vm14, %v3895_v56, %v14009_v36  ;;  %v3871_v10 = vrot.slane %v3870_v18, 4  ;;  %v7899_v28 = vadd.f32 %v15346_v50, %v7730_v54  ;;  %v14108_v50 = vld [vmem:[#allocation2 + $0x134] sm:$0x1] }
 0x3dc   : > { %6004 = vrot.lane.b32.xlu2 %v5950_v62, %s10631_s17  ;;  %v6374_v16 = vunpack.c.l.b16 %v4355_v40  ;;  %v3910_v8 = vsel %vm10985_vm14, %v3905_v49, %v14026_v47  ;;  %v4358_v17 = vsel %vm10972_vm11, %v4356_v15, %v4357_v61  ;;  %v3842_v46 = vrot.slane %v3840_v48, 4  ;;  %v14106_v40 = vpop.permute.xlu1 %6812  ;;  %v14111_v48 = vpop.f32.mrf.mxu2  ;;  %v15351_v15 = vld [vmem:[#allocation17_spill] sm:$0xff] }
 0x3dd   : > { %v3845_v25 = vrot.slane %v3843_v3, 5  ;;  %v15348_v36 = vshll.u32 %v15347_v42, 16  ;;  %v6375_v18 = vunpack.c.l.b16 %v4358_v17  ;;  %v14102_v54 = vrot.slane %v3849_v43, 5 }
 0x3de   : > { %v15350_v13 = vshrl.u32 %v15349_v5, 16  ;;  %v3881_v59 = vrot.slane %v3880_v27, 4  ;;  %v2573_v47 = vshrl.u32 %v1967_v33, 16  ;;  %v2576_v49 = vshll.u32 %v1967_v33, 16 }
 0x3df   : > { %v3885_v56 = vrot.slane %v15348_v36, 5  ;;  %v2582_v61 = vshll.u32 %v14093_v63, 16  ;;  %v3876_v3 = vsel %vm10985_vm14, %v3871_v10, %v14068_v14  ;;  %v8068_v43 = vadd.f32 %v15351_v15, %v7899_v28  ;;  %v10532_v36 = vld [vmem:[%s10738_s8 + $0x68] sm:$0xff]  ;;  %v4422_v10 = vld [vmem:[#allocation2 + $0x1a4] sm:$0xf]  ;;  %v8486_v15 = vpop.permute.xlu0 %8485  ;;  %v14134_v6 = vpop.permute.xlu2 %6462 }
 0x3e0   : > { %v3855_v62 = vrot.slane %v15350_v13, 4  ;;  %v6407_v17 = vpack.c.b16 %v6375_v18, %v6374_v16  ;;  %v2586_v42 = vshrl.u32 %v14093_v63, 16  ;;  %8499 = vrot.lane.b32.xlu1 %v10532_v36, %s10630_s14  ;;  %v3846_v27 = vor.u32 %v3845_v25, %v3842_v46 }
 0x3e1   : > { %v2575_v5 = vrot.slane %v2573_v47, 4  ;;  %v2578_v13 = vrot.slane %v2576_v49, 5  ;;  %v2584_v33 = vrot.slane %v2582_v61, 5  ;;  %v2592_v14 = vshll.u32 %v14108_v50, 16 }
 0x3e2   : > { %6470 = vrot.lane.b32.xlu0 %v6407_v17, %s10630_s14  ;;  %v3856_v52 = vor.u32 %v3855_v62, %v14102_v54  ;;  %v2588_v4 = vrot.slane %v2586_v42, 4  ;;  %v14124_v28 = vunpack.c.l.b16 %v3900_v41  ;;  %v14126_v16 = vunpack.c.l.b16 %v3910_v8  ;;  %v14132_v17 = vpop.f32.mrf.mxu3  ;;  %v7732_v42 = vpop.f32.mrf.mxu1 }
 0x3e3   : > { %v3886_v46 = vsel %vm10985_vm14, %v3881_v59, %v3885_v56  ;;  %v2579_v25 = vor.u32 %v2578_v13, %v2575_v5  ;;  %v14130_v18 = vunpack.c.l.b16 %v3876_v3  ;;  %v8202_v47 = vmax.f32 %v8068_v43, 0.0  ;;  %15352 = vst [vmem:[#allocation11_spill] sm:$0xff] %v14132_v17  ;;  %v10533_v3 = vld [vmem:[#allocation2 + $0x1a8] sm:$0xf] }
 0x3e4   : > { %v2589_v49 = vor.u32 %v2588_v4, %v2584_v33  ;;  %v2594_v61 = vrot.slane %v2592_v14, 5  ;;  %v3847_v62 = vrot.slane %v3846_v27, 4  ;;  %v5201_v44 = vshrl.u32 %v4422_v10, 16  ;;  %v10111_v14 = vld [vmem:[#allocation2 + $0x138] sm:$0xff] }
 0x3e5   : > { %v2580_v36 = vrot.slane %v2579_v25, 4  ;;  %v5204_v41 = vshll.u32 %v4422_v10, 16  ;;  %v3857_v8 = vrot.slane %v3856_v52, 4  ;;  %v15354_v55 = vshll.u32 %v15353_v38, 16  ;;  %v2812_v25 = vld [vmem:[#allocation2 + $0x138] sm:$0xe] }
 0x3e6   : > { %v2590_v59 = vrot.slane %v2589_v49, 4  ;;  %v5210_v5 = vshll.u32 %v10533_v3, 16  ;;  %v14138_v43 = vunpack.c.l.b16 %v3886_v46  ;;  %v5203_v13 = vrot.slane %v5201_v44, 4  ;;  %v14151_v44 = vld [vmem:[#allocation2 + $0x140] sm:$0x1] }
 0x3e7   : > { %v3861_v56 = vrot.slane %v15354_v55, 5  ;;  %v2585_v4 = vsel %vm10985_vm14, %v2580_v36, %v2584_v33  ;;  %v5206_v27 = vrot.slane %v5204_v41, 5  ;;  %v8266_v17 = vpack.c.bf16 %v8202_v47, %v8202_v47  ;;  %v14145_v55 = vpop.permute.xlu1 %8487  ;;  %v14153_v47 = vpop.f32.mrf.mxu2 }
 0x3e8   : > { %v7733_v10 = vadd.f32 %v13840_v21, %v7732_v42  ;;  %v2595_v52 = vsel %vm10985_vm14, %v2590_v59, %v2594_v61  ;;  %v5750_v38 = vunpack.c.l.b16 %v2585_v4  ;;  %v3852_v46 = vsel %vm10985_vm14, %v3847_v62, %v14102_v54  ;;  %6198 = vrot.lane.b32.xlu1 %v10111_v14, %s10632_s18  ;;  %v14163_v62 = vld [vmem:[#allocation2 + $0x13c] sm:$0xf] }
 0x3e9   : > { %v5751_v49 = vunpack.c.l.b16 %v2595_v52  ;;  %v5207_v3 = vor.u32 %v5206_v27, %v5203_v13  ;;  %v5212_v33 = vrot.slane %v5210_v5, 5  ;;  %v3862_v42 = vsel %vm10985_vm14, %v3857_v8, %v3861_v56  ;;  %v15355_v56 = vld [vmem:[#allocation44_spill] sm:$0xff] }
 0x3ea   : > { %v7411_v61 = vsel %vm7081_vm2, %v14019_v20, %v13811_v12  ;;  %v7128_v54 = vsel %vm7081_vm2, %v14022_v58, %v13987_v37  ;;  %v9397_v36 = vrot.slane %v2812_v25, 9  ;;  %v3089_v4 = vrot.slane %v14163_v62, 5  ;;  %v1971_v27 = vld [vmem:[#allocation2 + $0x144] sm:$0xf] }
 0x3eb   : > { %v5791_v41 = vpack.c.b16 %v5751_v49, %v5750_v38  ;;  %v5208_v59 = vrot.slane %v5207_v3, 4  ;;  %v5217_v5 = vor.u32 %v13515_v35, %v5212_v33  ;;  %7975 = vmatmul.bf16.gmra.mxu2 %v7411_v61  ;;  %7761 = vmatmul.bf16.gmra.mxu1 %v7128_v54  ;;  %v6266_v8 = vunpack.c.l.b16 %v3852_v46  ;;  %v5833_v3 = vpop.permute.xlu0 %5832  ;;  %v14183_v61 = vpop.f32.mrf.mxu3 }
 0x3ec   : > { %v7902_v13 = vadd.f32 %v15355_v56, %v7733_v10  ;;  %v3092_v12 = vrot.slane %v14151_v44, 5  ;;  %v15356_v20 = vunpack.c.l.b16 %v13918_v2  ;;  %v15357_v37 = vunpack.c.l.b16 %v13931_v30  ;;  %v14179_v2 = vld [vmem:[#allocation2 + $0x148] sm:$0xf]  ;;  %v14181_v30 = vld [vmem:[#allocation2 + $0x14c] sm:$0x1]  ;;  %15358 = vst [vmem:[#allocation12_spill] sm:$0xff] %v14183_v61 }
 0x3ed   : > { %5846 = vrot.lane.b32.xlu2 %v5791_v41, %s10630_s14  ;;  %v5213_v35 = vsel %vm10985_vm14, %v5208_v59, %v5212_v33  ;;  %v5218_v14 = vrot.slane %v5217_v5, 4  ;;  %v3090_v25 = vsel %vm10972_vm11, %v9397_v36, %v3089_v4  ;;  %v3091_v52 = vrot.slane %v3089_v4, 4  ;;  %v14191_v41 = vpop.permute.xlu2 %6814 }
 0x3ee   : > { %v8447_v58 = vpack.c.b16 %v15357_v37, %v15356_v20  ;;  %v6267_v38 = vunpack.c.l.b16 %v3862_v42  ;;  %v6726_v10 = vunpack.c.l.b16 %v5213_v35  ;;  %v5912_v46 = vunpack.c.l.b16 %v3090_v25  ;;  %v2813_v25 = vld [vmem:[#allocation2 + $0x144] sm:$0xe] }
 0x3ef   : > { %v8394_v54 = vunpack.c.l.b16 %v8266_v17  ;;  %v5223_v33 = vsel %vm10985_vm14, %v5218_v14, %v13564_v23  ;;  %v3093_v36 = vsel %vm10972_vm11, %v3091_v52, %v3092_v12  ;;  %v2621_v42 = vshrl.u32 %v1971_v27, 16  ;;  %v14199_v35 = vpop.permute.xlu1 %5834 }
 0x3f0   : > { %v8557_v49 = vsel %vm6920_vm15, %v8447_v58, %v8486_v15  ;;  %v14194_v15 = vadd.f32 %v13519_v53, %v7902_v13  ;;  %v6727_v59 = vunpack.c.l.b16 %v5223_v33  ;;  %v5913_v5 = vunpack.c.l.b16 %v3093_v36  ;;  %v7734_v33 = vpop.f32.mrf.mxu1 }
 0x3f1   : > { %9987 = vmatmul.msk.bf16.gmra.mxu3 %vm7081_vm2, %v8557_v49  ;;  %v2624_v4 = vshll.u32 %v1971_v27, 16  ;;  %v2623_v56 = vrot.slane %v2621_v42, 4  ;;  %v2630_v17 = vshll.u32 %v14179_v2, 16  ;;  %v2634_v20 = vshrl.u32 %v14179_v2, 16 }
 0x3f2   : > { %v2640_v23 = vshll.u32 %v14181_v30, 16  ;;  %v6305_v37 = vpack.c.b16 %v6267_v38, %v6266_v8  ;;  %v6759_v12 = vpack.c.b16 %v6727_v59, %v6726_v10  ;;  %v5952_v58 = vpack.c.b16 %v5913_v5, %v5912_v46  ;;  %v10072_v8 = vld [vmem:[#allocation2 + $0xd8] sm:$0xff]  ;;  %v14209_v38 = vpop.f32.mrf.mxu2 }
 0x3f3   : > { %v2626_v14 = vrot.slane %v2624_v4, 5  ;;  %v15359_v53 = vunpack.c.l.b16 %v14077_v45  ;;  %v15360_v27 = vunpack.c.l.b16 %v13946_v32  ;;  %v15361_v52 = vunpack.c.l.b16 %v13990_v26 }
 0x3f4   : > { %v2632_v36 = vrot.slane %v2630_v17, 5  ;;  %v2636_v42 = vrot.slane %v2634_v20, 4  ;;  %v7255_v10 = vsel %vm6920_vm15, %v6305_v37, %v14034_v24  ;;  %v8203_v46 = vmax.f32 %v14194_v15, 0.0  ;;  %6822 = vrot.lane.b32.xlu0 %v6759_v12, %s10632_s18  ;;  %6008 = vrot.lane.b32.xlu1 %v5952_v58, %s10631_s17  ;;  %v2811_v24 = vld [vmem:[#allocation2 + $0x12c] sm:$0xe] }
 0x3f5   : > { %v14203_v13 = vpack.c.b16 %v8394_v54, %v15359_v53  ;;  %v8448_v49 = vpack.c.b16 %v15361_v52, %v15360_v27  ;;  %v2627_v45 = vor.u32 %v2626_v14, %v2623_v56  ;;  %v3096_v32 = vrot.slane %v14179_v2, 5  ;;  %v10534_v54 = vld [vmem:[%s10738_s8 + $0x70] sm:$0xff]  ;;  %v6185_v53 = vpop.permute.xlu0 %6184 }
 0x3f6   : > { %8501 = vrot.lane.b32.xlu2 %v10534_v54, %s10630_s14  ;;  %v2637_v59 = vor.u32 %v2636_v42, %v2632_v36  ;;  %v2642_v5 = vrot.slane %v2640_v23, 5  ;;  %v9398_v4 = vrot.slane %v2813_v25, 9  ;;  %v1973_v17 = vld [vmem:[#allocation2 + $0x150] sm:$0xf]  ;;  %v7735_v20 = vadd.f32 %v13840_v21, %v7734_v33  ;;  %v14231_v27 = vld [vmem:[#allocation2 + $0x154] sm:$0xf] }
 0x3f7   : > { %v14219_v26 = vsel %vm6920_vm15, %v8448_v49, %v14145_v55  ;;  %v2628_v37 = vrot.slane %v2627_v45, 4  ;;  %v3098_v12 = vrot.slane %v3096_v32, 4  ;;  %v3099_v56 = vrot.slane %v14181_v30, 5  ;;  %v8758_v49 = vpop.f32.mrf.mxu3  ;;  %v10112_v42 = vld [vmem:[#allocation2 + $0x144] sm:$0xff] }
 0x3f8   : > { %v2638_v58 = vrot.slane %v2637_v59, 4  ;;  %v6971_v2 = vsel %vm6920_vm15, %v10072_v8, %v5833_v3  ;;  %v7325_v55 = vsel %vm544_vm0, %v7255_v10, %v13923_v7  ;;  %v3082_v14 = vrot.slane %v14093_v63, 5  ;;  %v14239_v63 = vld [vmem:[#allocation2 + $0x158] sm:$0x1] }
 0x3f9   : > { %v2633_v23 = vsel %vm10985_vm14, %v2628_v37, %v2632_v36  ;;  %v9396_v25 = vrot.slane %v2811_v24, 9  ;;  %v2645_v21 = vshrl.u32 %v1973_v17, 16  ;;  %v2648_v52 = vshll.u32 %v1973_v17, 16  ;;  %v14241_v36 = vpop.permute.xlu2 %8489  ;;  %v15362_v24 = vld [vmem:[#allocation48_spill] sm:$0xff] }
 0x3fa   : > { %v2643_v30 = vsel %vm10985_vm14, %v2638_v58, %v2642_v5  ;;  %v5754_v33 = vunpack.c.l.b16 %v2633_v23  ;;  %v3097_v3 = vsel %vm10972_vm11, %v9398_v4, %v3096_v32  ;;  %v7414_v7 = vsel %vm7081_vm2, %v7325_v55, %v14079_v22  ;;  %v1969_v22 = vld [vmem:[#allocation2 + $0x138] sm:$0xf]  ;;  %v10535_v37 = vld [vmem:[%s10738_s8 + $0x60] sm:$0xff]  ;;  %v14251_v55 = vpop.permute.xlu1 %6186 }
 0x3fb   : > { %v5755_v8 = vunpack.c.l.b16 %v2643_v30  ;;  %v3100_v10 = vsel %vm10972_vm11, %v3098_v12, %v3099_v56  ;;  %v3085_v45 = vrot.slane %v14108_v50, 5  ;;  %v2647_v54 = vrot.slane %v2645_v21, 4  ;;  %7980 = vmatmul.bf16.gmra.mxu2 %v7414_v7  ;;  %v14257_v30 = vpop.f32.mrf.mxu2  ;;  %v14266_v7 = vld [vmem:[%s15125_s6] ss:$0 sm:$0xff] }
 0x3fc   : > { %v3084_v59 = vrot.slane %v3082_v14, 4  ;;  %v2650_v5 = vrot.slane %v2648_v52, 5  ;;  %v2654_v32 = vshll.u32 %v14231_v27, 16  ;;  %v2658_v4 = vshrl.u32 %v14231_v27, 16  ;;  %8497 = vrot.lane.b32.xlu0 %v10535_v37, %s10630_s14  ;;  %15363 = vst [vmem:[#allocation47_spill] sm:$0xff] %v14257_v30 }
 0x3fd   : > { %v7904_v17 = vadd.f32 %v15362_v24, %v7735_v20  ;;  %v5793_v58 = vpack.c.b16 %v5755_v8, %v5754_v33  ;;  %v5914_v12 = vunpack.c.l.b16 %v3097_v3  ;;  %v2664_v50 = vshll.u32 %v14239_v63, 16  ;;  %v14275_v37 = vpop.permute.xlu0 %6654 }
 0x3fe   : > { %6200 = vrot.lane.b32.xlu2 %v10112_v42, %s10632_s18  ;;  %v2651_v56 = vor.u32 %v2650_v5, %v2647_v54  ;;  %v2656_v23 = vrot.slane %v2654_v32, 5  ;;  %v2660_v21 = vrot.slane %v2658_v4, 4  ;;  %v7050_v52 = vsel %vm544_vm0, %v6971_v2, %v14086_v57 }
 0x3ff   : > { %5850 = vrot.lane.b32.xlu1 %v5793_v58, %s10630_s14  ;;  %v5915_v20 = vunpack.c.l.b16 %v3100_v10  ;;  %v3083_v33 = vsel %vm10972_vm11, %v9396_v25, %v3082_v14  ;;  %v7131_v3 = vsel %vm7081_vm2, %v7050_v52, %v6185_v53  ;;  %v2597_v42 = vshrl.u32 %v1969_v22, 16 }
 0x400   : > { %v3086_v8 = vsel %vm10972_vm11, %v3084_v59, %v3085_v45  ;;  %v2661_v57 = vor.u32 %v2660_v21, %v2656_v23  ;;  %v2666_v2 = vrot.slane %v2664_v50, 5  ;;  %7766 = vmatmul.bf16.gmra.mxu1 %v7131_v3  ;;  %v2600_v10 = vshll.u32 %v1969_v22, 16  ;;  %v14277_v45 = vpop.f32.mrf.mxu0  ;;  %v10110_v59 = vld [vmem:[#allocation2 + $0x12c] sm:$0xff] }
 0x401   : > { %9988 = vmatmul.msk.bf16.gmra.mxu3 %vm7081_vm2, %v14219_v26  ;;  %v2652_v54 = vrot.slane %v2651_v56, 4  ;;  %v2599_v14 = vrot.slane %v2597_v42, 4  ;;  %v2606_v53 = vshll.u32 %v14163_v62, 16  ;;  %v2610_v25 = vshrl.u32 %v14163_v62, 16  ;;  %v8760_v56 = vpop.f32.mrf.mxu3  ;;  %v14287_v52 = vpop.permute.xlu2 %6188 }
 0x402   : > { %v8073_v5 = vadd.f32 %v13575_v51, %v7904_v17  ;;  %v5910_v32 = vunpack.c.l.b16 %v3083_v33  ;;  %v2662_v4 = vrot.slane %v2661_v57, 4  ;;  %v2602_v24 = vrot.slane %v2600_v10, 5  ;;  %v2815_v57 = vld [vmem:[#allocation2 + $0x15c] sm:$0xe] }
 0x403   : > { %v5911_v58 = vunpack.c.l.b16 %v3086_v8  ;;  %v14280_v26 = vadd.f32 %v14266_v7, %v8758_v49  ;;  %v14282_v22 = vrot.slane %v2606_v53, 5  ;;  %v2612_v50 = vrot.slane %v2610_v25, 4  ;;  %v10536_v8 = vld [vmem:[%s10738_s8 + $0x80] sm:$0xff] }
 0x404   : > { %v6306_v51 = vpack.c.b16 %v14138_v43, %v14130_v18  ;;  %v5953_v62 = vpack.c.b16 %v5915_v20, %v5914_v12  ;;  %v2603_v17 = vor.u32 %v2602_v24, %v2599_v14  ;;  %v2616_v21 = vshll.u32 %v14151_v44, 16  ;;  %6196 = vrot.lane.b32.xlu0 %v10110_v59, %s10632_s18  ;;  %v14318_v14 = vpop.f32.mrf.mxu2  ;;  %v10537_v59 = vld [vmem:[#allocation2 + $0x190] sm:$0xf] }
 0x405   : > { %v2657_v49 = vsel %vm10985_vm14, %v2652_v54, %v2656_v23  ;;  %v2667_v33 = vsel %vm10985_vm14, %v2662_v4, %v2666_v2  ;;  %v2613_v3 = vor.u32 %v2612_v50, %v14282_v22  ;;  %v6307_v18 = vpack.c.b16 %v14126_v16, %v14124_v28  ;;  %v3203_v23 = vld [vmem:[#allocation2 + $0x18c] sm:$0xf]  ;;  %v14316_v54 = vld [vmem:[#allocation2 + $0x164] sm:$0x1]  ;;  %v14329_v50 = vld [vmem:[#allocation2 + $0x160] sm:$0xf] }
 0x406   : > { %v7258_v43 = vsel %vm6920_vm15, %v6306_v51, %v14055_v9  ;;  %v14302_v44 = vpack.c.bf16 %v8203_v46, %v8203_v46  ;;  %v14307_v12 = vsel %vm6920_vm15, %v14203_v13, %v14241_v36  ;;  %6010 = vrot.lane.b32.xlu2 %v5953_v62, %s10631_s17  ;;  %v8204_v20 = vmax.f32 %v8073_v5, 0.0  ;;  %v14313_v9 = vpop.permute.xlu1 %6656  ;;  %v10073_v4 = vld [vmem:[#allocation2 + $0xe4] sm:$0xff]  ;;  %v14378_v16 = vld [vmem:[#allocation2 + $0x16c] sm:$0xf] }
 0x407   : > { %v5951_v42 = vpack.c.b16 %v5911_v58, %v5910_v32  ;;  %8505 = vrot.lane.b32.xlu1 %v10536_v8, %s10630_s14  ;;  %v8918_v15 = vmax.f32 %v14280_v26, 0.0  ;;  %v2604_v46 = vrot.slane %v2603_v17, 4  ;;  %v5756_v2 = vunpack.c.l.b16 %v2657_v49 }
 0x408   : > { %v5757_v10 = vunpack.c.l.b16 %v2667_v33  ;;  %v2614_v13 = vrot.slane %v2613_v3, 4  ;;  %v2618_v36 = vrot.slane %v2616_v21, 5  ;;  %v7327_v53 = vsel %vm544_vm0, %v7258_v43, %v14045_v34  ;;  %v5995_v43 = vpop.permute.xlu0 %5994 }
 0x409   : > { %v3960_v25 = vshrl.u32 %v3203_v23, 16  ;;  %v3963_v5 = vshll.u32 %v3203_v23, 16  ;;  %v8761_v32 = vadd.f32 %v14266_v7, %v8760_v56  ;;  %v7417_v24 = vsel %vm7081_vm2, %v7327_v53, %v14106_v40  ;;  %v7737_v56 = vpop.f32.mrf.mxu1  ;;  %v14342_v23 = vpop.f32.mrf.mxu0 }
 0x40a   : > { %v3969_v58 = vshll.u32 %v10537_v59, 16  ;;  %v3973_v26 = vshrl.u32 %v10537_v59, 16  ;;  %v9400_v51 = vrot.slane %v2815_v57, 9  ;;  %v2609_v34 = vsel %vm10985_vm14, %v2604_v46, %v14282_v22  ;;  %v10114_v22 = vld [vmem:[#allocation2 + $0x15c] sm:$0xff]  ;;  %v14345_v53 = vpop.f32.mrf.mxu3 }
 0x40b   : > { %v8919_v62 = vmax.f32 %v8761_v32, 0.0  ;;  %v3110_v17 = vrot.slane %v14329_v50, 5  ;;  %v3113_v21 = vrot.slane %v14316_v54, 5  ;;  %v14336_v49 = vpack.c.bf16 %v8204_v20, %v8204_v20  ;;  %7985 = vmatmul.bf16.gmra.mxu2 %v7417_v24  ;;  %v10074_v24 = vld [vmem:[#allocation2 + $0xf0] sm:$0xff]  ;;  %v3201_v59 = vld [vmem:[#allocation2 + $0x180] sm:$0xf] }
 0x40c   : > { %v6974_v40 = vsel %vm6920_vm15, %v10073_v4, %v14199_v35  ;;  %v5794_v33 = vpack.c.b16 %v5757_v10, %v5756_v2  ;;  %v2619_v3 = vsel %vm10985_vm14, %v2614_v13, %v2618_v36  ;;  %6006 = vrot.lane.b32.xlu0 %v5951_v42, %s10631_s17  ;;  %v3962_v8 = vrot.slane %v3960_v25, 4  ;;  %v14355_v42 = vld [vmem:[%s15123_s4] ss:$0 sm:$0xff]  ;;  %v5837_v36 = vpop.permute.xlu2 %5836 }
 0x40d   : > { %v3965_v46 = vrot.slane %v3963_v5, 5  ;;  %v10181_v57 = vpack.c.bf16 %v8919_v62, %v8918_v15  ;;  %v3112_v20 = vrot.slane %v3110_v17, 4  ;;  %v5752_v35 = vunpack.c.l.b16 %v2609_v34 }
 0x40e   : > { %5852 = vrot.lane.b32.xlu2 %v5794_v33, %s10630_s14  ;;  %v14348_v2 = vrot.slane %v3969_v58, 5  ;;  %v3111_v10 = vsel %vm10972_vm11, %v9400_v51, %v3110_v17  ;;  %v7738_v13 = vadd.f32 %v14355_v42, %v7737_v56  ;;  %v5753_v15 = vunpack.c.l.b16 %v2619_v3  ;;  %v10539_v51 = vld [vmem:[#allocation2 + $0x194] sm:$0x1]  ;;  %v15364_v33 = vld [vmem:[#allocation31_spill] sm:$0xff] }
 0x40f   : > { %6204 = vrot.lane.b32.xlu1 %v10114_v22, %s10632_s18  ;;  %v3975_v25 = vrot.slane %v3973_v26, 4  ;;  %10182 = vst [vmem:[%s14360_s15] sm:$0xff] %v10181_v57   ;;  %v3114_v5 = vsel %vm10972_vm11, %v3112_v20, %v3113_v21  ;;  %v7052_v32 = vsel %vm544_vm0, %v6974_v40, %v5995_v43  ;;  %v7261_v4 = vsel %vm6920_vm15, %v6307_v18, %v14134_v6  ;;  %v5997_v26 = vpop.permute.xlu1 %5996  ;;  %v1977_v21 = vld [vmem:[#allocation2 + $0x168] sm:$0xf]  ;;  %v14380_v18 = vpop.f32.mrf.mxu2 }
 0x410   : > { %v3979_v34 = vshll.u32 %v10539_v51, 16  ;;  %v5918_v62 = vunpack.c.l.b16 %v3111_v10  ;;  %v5919_v17 = vunpack.c.l.b16 %v3114_v5  ;;  %v6977_v56 = vsel %vm6920_vm15, %v10074_v24, %v5837_v36  ;;  %15365 = vst [vmem:[#allocation49_spill] sm:$0xff] %v14380_v18 }
 0x411   : > { %9989 = vmatmul.msk.bf16.gmra.mxu3 %vm7081_vm2, %v14307_v12  ;;  %v3966_v40 = vor.u32 %v3965_v46, %v3962_v8  ;;  %v7907_v28 = vadd.f32 %v15364_v33, %v7738_v13  ;;  %v7134_v6 = vsel %vm7081_vm2, %v7052_v32, %v14251_v55  ;;  %v5792_v3 = vpack.c.b16 %v5753_v15, %v5752_v35  ;;  %v14394_v13 = vld [vmem:[#allocation2 + $0x170] sm:$0x1]  ;;  %v10540_v15 = vld [vmem:[%s10738_s8 + $0x88] sm:$0xff]  ;;  %v14405_v24 = vpop.f32.mrf.mxu0  ;;  %v7739_v33 = vpop.f32.mrf.mxu1 }
 0x412   : > { %v3976_v43 = vor.u32 %v3975_v25, %v14348_v2  ;;  %v3936_v22 = vshrl.u32 %v3201_v59, 16  ;;  %7771 = vmatmul.bf16.gmra.mxu1 %v7134_v6  ;;  %v14386_v8 = vsel %vm544_vm0, %v7261_v4, %v14275_v37  ;;  %v14389_v46 = vsel %vm544_vm0, %v6977_v56, %v5997_v26  ;;  %v3199_v4 = vld [vmem:[#allocation2 + $0x174] sm:$0xf] }
 0x413   : > { %v3939_v55 = vshll.u32 %v3201_v59, 16  ;;  %v2693_v57 = vshrl.u32 %v1977_v21, 16  ;;  %v14392_v20 = vrot.slane %v3979_v34, 5  ;;  %v5955_v10 = vpack.c.b16 %v5919_v17, %v5918_v62  ;;  %v14412_v62 = vpop.f32.mrf.mxu3 }
 0x414   : > { %5848 = vrot.lane.b32.xlu0 %v5792_v3, %s10630_s14  ;;  %v2696_v35 = vshll.u32 %v1977_v21, 16  ;;  %v2702_v36 = vshll.u32 %v14378_v16, 16  ;;  %v14399_v37 = vrot.slane %v3966_v40, 4  ;;  %v14402_v25 = vadd.f32 %v14277_v45, %v7907_v28  ;;  %v10541_v45 = vld [vmem:[#allocation2 + $0x184] sm:$0xf]  ;;  %v14417_v28 = vpop.permute.xlu0 %6464 }
 0x415   : > { %v2695_v5 = vrot.slane %v2693_v57, 4  ;;  %v2706_v32 = vshrl.u32 %v14378_v16, 16  ;;  %v14407_v59 = vrot.slane %v3976_v43, 4  ;;  %v14410_v26 = vrot.slane %v3936_v22, 4  ;;  %v10544_v22 = vld [vmem:[%s10738_s8 + $0x78] sm:$0xff] }
 0x416   : > { %8507 = vrot.lane.b32.xlu2 %v10540_v15, %s10630_s14  ;;  %v2698_v51 = vrot.slane %v2696_v35, 5  ;;  %v2704_v34 = vrot.slane %v2702_v36, 5  ;;  %v14414_v17 = vrot.slane %v3939_v55, 5  ;;  %v3945_v21 = vshll.u32 %v10541_v45, 16 }
 0x417   : > { %6014 = vrot.lane.b32.xlu1 %v5955_v10, %s10631_s17  ;;  %v2708_v56 = vrot.slane %v2706_v32, 4  ;;  %v2712_v40 = vshll.u32 %v14394_v13, 16  ;;  %v3949_v6 = vshrl.u32 %v10541_v45, 16  ;;  %v3912_v43 = vshrl.u32 %v3199_v4, 16  ;;  %v10542_v10 = vld [vmem:[#allocation2 + $0x188] sm:$0x1]  ;;  %v14424_v45 = vpop.f32.mrf.mxu2 }
 0x418   : > { %v2699_v3 = vor.u32 %v2698_v51, %v2695_v5  ;;  %v3915_v57 = vshll.u32 %v3199_v4, 16  ;;  %v3955_v35 = vshll.u32 %v10542_v10, 16  ;;  %v10543_v32 = vld [vmem:[#allocation2 + $0x178] sm:$0xf]  ;;  %v3942_v1 = vor.u32 %v14414_v17, %v14410_v26  ;;  %v10115_v5 = vld [vmem:[#allocation2 + $0x168] sm:$0xff]  ;;  %15366 = vst [vmem:[#allocation6_spill] sm:$0xff] %v14424_v45 }
 0x419   : > { %v2709_v36 = vor.u32 %v2708_v56, %v2704_v34  ;;  %v2714_v55 = vrot.slane %v2712_v40, 5  ;;  %v3914_v12 = vrot.slane %v3912_v43, 4  ;;  %v3921_v61 = vshll.u32 %v10543_v32, 16  ;;  %v10545_v43 = vld [vmem:[#allocation2 + $0x17c] sm:$0x1] }
 0x41a   : > { %v2700_v15 = vrot.slane %v2699_v3, 4  ;;  %v3917_v58 = vrot.slane %v3915_v57, 5  ;;  %v14422_v18 = vrot.slane %v3945_v21, 5  ;;  %v3925_v4 = vshrl.u32 %v10543_v32, 16  ;;  %v2816_v10 = vld [vmem:[#allocation2 + $0x168] sm:$0xe] }
 0x41b   : > { %v2710_v51 = vrot.slane %v2709_v36, 4  ;;  %v3923_v3 = vrot.slane %v3921_v61, 5  ;;  %v3931_v57 = vshll.u32 %v10545_v43, 16  ;;  %v3951_v30 = vrot.slane %v3949_v6, 4  ;;  %v14438_v61 = vpop.permute.xlu1 %6466 }
 0x41c   : > { %8503 = vrot.lane.b32.xlu0 %v10544_v22, %s10630_s14  ;;  %v2705_v56 = vsel %vm10985_vm14, %v2700_v15, %v2704_v34  ;;  %v3918_v40 = vor.u32 %v3917_v58, %v3914_v12  ;;  %v7740_v21 = vadd.f32 %v14355_v42, %v7739_v33  ;;  %v14434_v36 = vrot.slane %v3955_v35, 5 }
 0x41d   : > { %v2715_v26 = vsel %vm10985_vm14, %v2710_v51, %v2714_v55  ;;  %v5760_v17 = vunpack.c.l.b16 %v2705_v56  ;;  %v8764_v22 = vadd.f32 %v14266_v7, %v14345_v53  ;;  %v3927_v58 = vrot.slane %v3925_v4, 4  ;;  %v14442_v55 = vpop.f32.mrf.mxu0  ;;  %v14447_v56 = vpop.f32.mrf.mxu3 }
 0x41e   : > { %6206 = vrot.lane.b32.xlu2 %v10115_v5, %s10632_s18  ;;  %v5761_v34 = vunpack.c.l.b16 %v2715_v26  ;;  %v3919_v12 = vrot.slane %v3918_v40, 4  ;;  %v9401_v15 = vrot.slane %v2816_v10, 9  ;;  %v3117_v6 = vrot.slane %v14378_v16, 5  ;;  %v2814_v5 = vld [vmem:[#allocation2 + $0x150] sm:$0xe]  ;;  %v14455_v26 = vpop.f32.mrf.mxu1 }
 0x41f   : > { %v3120_v32 = vrot.slane %v14394_v13, 5  ;;  %v3928_v33 = vor.u32 %v3927_v58, %v3923_v3  ;;  %v3933_v35 = vrot.slane %v3931_v57, 5  ;;  %v7420_v53 = vsel %vm7081_vm2, %v14386_v8, %v14191_v41  ;;  %v15367_v40 = vld [vmem:[#allocation50_spill] sm:$0xff]  ;;  %v14453_v10 = vpop.permute.xlu0 %6816 }
 0x420   : > { %v5796_v51 = vpack.c.b16 %v5761_v34, %v5760_v17  ;;  %v3952_v4 = vor.u32 %v3951_v30, %v14422_v18  ;;  %v7909_v43 = vadd.f32 %v15367_v40, %v7740_v21  ;;  %v3118_v16 = vsel %vm10972_vm11, %v9401_v15, %v3117_v6  ;;  %7990 = vmatmul.bf16.gmra.mxu2 %v7420_v53  ;;  %v10113_v57 = vld [vmem:[#allocation2 + $0x150] sm:$0xff]  ;;  %v14460_v34 = vpop.permute.xlu2 %6658 }
 0x421   : > { %v3119_v13 = vrot.slane %v3117_v6, 4  ;;  %v3929_v17 = vrot.slane %v3928_v33, 4  ;;  %v5920_v41 = vunpack.c.l.b16 %v3118_v16  ;;  %v8766_v8 = vadd.f32 %v14266_v7, %v14412_v62  ;;  %v1979_v53 = vld [vmem:[#allocation2 + $0x174] sm:$0xf] }
 0x422   : > { %5856 = vrot.lane.b32.xlu1 %v5796_v51, %s10630_s14  ;;  %v9399_v30 = vrot.slane %v2814_v5, 9  ;;  %v8920_v21 = vmax.f32 %v8764_v22, 0.0  ;;  %v3103_v15 = vrot.slane %v14231_v27, 5  ;;  %v3106_v6 = vrot.slane %v14239_v63, 5 }
 0x423   : > { %v3121_v58 = vsel %vm10972_vm11, %v3119_v13, %v3120_v32  ;;  %v3924_v51 = vsel %vm10985_vm14, %v3919_v12, %v3923_v3  ;;  %v3934_v33 = vsel %vm10985_vm14, %v3929_v17, %v3933_v35  ;;  %v8921_v5 = vmax.f32 %v8766_v8, 0.0  ;;  %v14477_v32 = vld [vmem:[#allocation2 + $0x178] sm:$0xf]  ;;  %v14479_v16 = vpop.f32.mrf.mxu2 }
 0x424   : > { %6202 = vrot.lane.b32.xlu0 %v10113_v57, %s10632_s18  ;;  %v5921_v62 = vunpack.c.l.b16 %v3121_v58  ;;  %v14471_v40 = vrot.slane %v3942_v1, 4  ;;  %v14473_v22 = vrot.slane %v3952_v4, 4  ;;  %v3104_v27 = vsel %vm10972_vm11, %v9399_v30, %v3103_v15  ;;  %15368 = vst [vmem:[#allocation26_spill] sm:$0xff] %v14479_v16  ;;  %v14484_v57 = vld [vmem:[#allocation2 + $0x17c] sm:$0x1] }
 0x425   : > { %v3105_v63 = vrot.slane %v3103_v15, 4  ;;  %v14482_v3 = vadd.f32 %v14342_v23, %v7909_v43  ;;  %v10186_v35 = vpack.c.bf16 %v8921_v5, %v8920_v21  ;;  %v5916_v13 = vunpack.c.l.b16 %v3104_v27 }
 0x426   : > { %v5956_v12 = vpack.c.b16 %v5921_v62, %v5920_v41  ;;  %v6272_v1 = vunpack.c.l.b16 %v3924_v51  ;;  %v6273_v17 = vunpack.c.l.b16 %v3934_v33  ;;  %v2717_v8 = vshrl.u32 %v1979_v53, 16  ;;  %v1975_v62 = vld [vmem:[#allocation2 + $0x15c] sm:$0xf] }
 0x427   : > { %v3107_v4 = vsel %vm10972_vm11, %v3105_v63, %v3106_v6  ;;  %10338 = vst [vmem:[%s14360_s15 + $0x8] sm:$0xff] %v10186_v35   ;;  %v2720_v58 = vshll.u32 %v1979_v53, 16  ;;  %v2726_v23 = vshll.u32 %v14477_v32, 16  ;;  %v2730_v43 = vshrl.u32 %v14477_v32, 16  ;;  %v14501_v6 = vpop.permute.xlu1 %6818  ;;  %v8492_v5 = vpop.permute.xlu0 %8491  ;;  %v10546_v63 = vld [vmem:[%s10738_s8 + $0x98] sm:$0xff] }
 0x428   : > { %6016 = vrot.lane.b32.xlu2 %v5956_v12, %s10631_s17  ;;  %v5917_v30 = vunpack.c.l.b16 %v3107_v4  ;;  %v15369_v41 = vmax.f32 %v14402_v25, 0.0  ;;  %v2719_v51 = vrot.slane %v2717_v8, 4  ;;  %v2736_v33 = vshll.u32 %v14484_v57, 16  ;;  %v14504_v53 = vpop.f32.mrf.mxu0  ;;  %v8770_v4 = vpop.f32.mrf.mxu3 }
 0x429   : > { %v2722_v25 = vrot.slane %v2720_v58, 5  ;;  %v2728_v12 = vrot.slane %v2726_v23, 5  ;;  %v2732_v35 = vrot.slane %v2730_v43, 4  ;;  %v8206_v8 = vmax.f32 %v14482_v3, 0.0 }
 0x42a   : > { %v14495_v21 = vpack.c.bf16 %v15369_v41, %v15369_v41  ;;  %v5954_v27 = vpack.c.b16 %v5917_v30, %v5916_v13  ;;  %8511 = vrot.lane.b32.xlu1 %v10546_v63, %s10630_s14  ;;  %v6308_v15 = vpack.c.b16 %v6273_v17, %v6272_v1  ;;  %v7137_v16 = vsel %vm7081_vm2, %v14389_v46, %v14287_v52  ;;  %v7744_v13 = vpop.f32.mrf.mxu1  ;;  %v14517_v63 = vpop.permute.xlu2 %5998 }
 0x42b   : > { %v2723_v30 = vor.u32 %v2722_v25, %v2719_v51  ;;  %v2733_v58 = vor.u32 %v2732_v35, %v2728_v12  ;;  %v2738_v23 = vrot.slane %v2736_v33, 5  ;;  %7776 = vmatmul.bf16.gmra.mxu1 %v7137_v16  ;;  %v2669_v43 = vshrl.u32 %v1975_v62, 16  ;;  %v14523_v17 = vpop.f32.mrf.mxu2 }
 0x42c   : > { %6012 = vrot.lane.b32.xlu0 %v5954_v27, %s10631_s17  ;;  %v7743_v41 = vadd.f32 %v14355_v42, %v14455_v26  ;;  %v2672_v45 = vshll.u32 %v1975_v62, 16  ;;  %v2678_v3 = vshll.u32 %v14329_v50, 16  ;;  %v2682_v1 = vshrl.u32 %v14329_v50, 16  ;;  %15370 = vst [vmem:[#allocation42_spill] sm:$0xff] %v14523_v17  ;;  %v10117_v17 = vld [vmem:[#allocation2 + $0x180] sm:$0xff] }
 0x42d   : > { %v7264_v52 = vsel %vm6920_vm15, %v6308_v15, %v14417_v28  ;;  %v2724_v46 = vrot.slane %v2723_v30, 4  ;;  %v2734_v51 = vrot.slane %v2733_v58, 4  ;;  %v2671_v33 = vrot.slane %v2669_v43, 4 }
 0x42e   : > { %v2674_v16 = vrot.slane %v2672_v45, 5  ;;  %v2680_v27 = vrot.slane %v2678_v3, 5  ;;  %v2684_v25 = vrot.slane %v2682_v1, 4  ;;  %v2688_v35 = vshll.u32 %v14316_v54, 16  ;;  %v2818_v54 = vld [vmem:[#allocation2 + $0x180] sm:$0xe] }
 0x42f   : > { %v2729_v26 = vsel %vm10985_vm14, %v2724_v46, %v2728_v12  ;;  %v2739_v62 = vsel %vm10985_vm14, %v2734_v51, %v2738_v23  ;;  %v8769_v50 = vadd.f32 %v14266_v7, %v14447_v56  ;;  %v15371_v28 = vunpack.c.l.b16 %v14302_v44  ;;  %v14543_v23 = vld [vmem:[#allocation2 + $0x188] sm:$0x1]  ;;  %v14549_v51 = vpop.permute.xlu1 %8493 }
 0x430   : > { %v15372_v15 = vunpack.c.l.b16 %v14336_v49  ;;  %v5762_v45 = vunpack.c.l.b16 %v2729_v26  ;;  %v5763_v58 = vunpack.c.l.b16 %v2739_v62  ;;  %v2675_v43 = vor.u32 %v2674_v16, %v2671_v33  ;;  %v14545_v44 = vpop.permute.xlu0 %5838 }
 0x431   : > { %v2685_v3 = vor.u32 %v2684_v25, %v2680_v27  ;;  %v14538_v1 = vpack.c.bf16 %v8206_v8, %v8206_v8  ;;  %v7912_v12 = vadd.f32 %v13524_v31, %v7743_v41  ;;  %v2690_v46 = vrot.slane %v2688_v35, 5  ;;  %v14554_v31 = vpop.f32.mrf.mxu0  ;;  %v14559_v35 = vld [vmem:[#allocation2 + $0x184] sm:$0xf] }
 0x432   : > { %v8450_v30 = vpack.c.b16 %v15372_v15, %v15371_v28  ;;  %6210 = vrot.lane.b32.xlu1 %v10117_v17, %s10632_s18  ;;  %v14547_v49 = vpop.f32.mrf.mxu3  ;;  %v5797_v33 = vpack.c.b16 %v5763_v58, %v5762_v45  ;;  %v2676_v16 = vrot.slane %v2675_v43, 4  ;;  %v7331_v8 = vsel %vm544_vm0, %v7264_v52, %v14313_v9  ;;  %v14568_v28 = vpop.f32.mrf.mxu1  ;;  %v1983_v58 = vld [vmem:[#allocation2 + $0x18c] sm:$0xf] }
 0x433   : > { %v2686_v25 = vrot.slane %v2685_v3, 4  ;;  %v8922_v41 = vmax.f32 %v8769_v50, 0.0  ;;  %v8771_v17 = vadd.f32 %v14266_v7, %v8770_v4  ;;  %v9403_v26 = vrot.slane %v2818_v54, 9  ;;  %v14573_v43 = vpop.permute.xlu2 %6468 }
 0x434   : > { %v8566_v56 = vsel %vm6920_vm15, %v8450_v30, %v8492_v5  ;;  %v7423_v5 = vsel %vm7081_vm2, %v7331_v8, %v14453_v10  ;;  %5858 = vrot.lane.b32.xlu2 %v5797_v33, %s10630_s14  ;;  %v2681_v62 = vsel %vm10985_vm14, %v2676_v16, %v2680_v27  ;;  %v3131_v52 = vrot.slane %v14559_v35, 5  ;;  %v14570_v10 = vpop.f32.mrf.mxu2  ;;  %v14587_v33 = vld [vmem:[#allocation2 + $0x190] sm:$0xf] }
 0x435   : > { %9990 = vmatmul.msk.bf16.gmra.mxu3 %vm7081_vm2, %v8566_v56  ;;  %v2691_v9 = vsel %vm10985_vm14, %v2686_v25, %v2690_v46  ;;  %7995 = vmatmul.bf16.gmra.mxu2 %v7423_v5  ;;  %v3134_v50 = vrot.slane %v14543_v23, 5  ;;  %v5758_v4 = vunpack.c.l.b16 %v2681_v62  ;;  %v7745_v30 = vadd.f32 %v14355_v42, %v7744_v13 }
 0x436   : > { %v5759_v15 = vunpack.c.l.b16 %v2691_v9  ;;  %v8923_v45 = vmax.f32 %v8771_v17, 0.0  ;;  %v15373_v27 = vsel %vm10985_vm14, %v14471_v40, %v14422_v18  ;;  %v15374_v54 = vsel %vm10985_vm14, %v14473_v22, %v14434_v36  ;;  %v14590_v18 = vld [vmem:[#allocation2 + $0x194] sm:$0x1] }
 0x437   : > { %v6274_v3 = vunpack.c.l.b16 %v15373_v27  ;;  %v6275_v46 = vunpack.c.l.b16 %v15374_v54  ;;  %v3132_v13 = vsel %vm10972_vm11, %v9403_v26, %v3131_v52  ;;  %v3133_v56 = vrot.slane %v3131_v52, 4  ;;  %v2819_v27 = vld [vmem:[#allocation2 + $0x18c] sm:$0xe] }
 0x438   : > { %v8398_v16 = vunpack.c.l.b16 %v14538_v1  ;;  %v5795_v25 = vpack.c.b16 %v5759_v15, %v5758_v4  ;;  %v10191_v8 = vpack.c.bf16 %v8923_v45, %v8922_v41  ;;  %v5924_v5 = vunpack.c.l.b16 %v3132_v13  ;;  %v6191_v9 = vpop.permute.xlu0 %6190 }
 0x439   : > { %v8081_v40 = vadd.f32 %v14405_v24, %v7912_v12  ;;  %v3135_v36 = vsel %vm10972_vm11, %v3133_v56, %v3134_v50  ;;  %v2765_v22 = vshrl.u32 %v1983_v58, 16  ;;  %v2768_v17 = vshll.u32 %v1983_v58, 16  ;;  %v10075_v12 = vld [vmem:[#allocation2 + $0xfc] sm:$0xff]  ;;  %v14604_v56 = vpop.permute.xlu1 %5840 }
 0x43a   : > { %5854 = vrot.lane.b32.xlu0 %v5795_v25, %s10630_s14  ;;  %v7914_v26 = vadd.f32 %v13581_v39, %v7745_v30  ;;  %10339 = vst [vmem:[%s14360_s15 + $0x10] sm:$0xff] %v10191_v8   ;;  %v5925_v62 = vunpack.c.l.b16 %v3135_v36  ;;  %v2774_v1 = vshll.u32 %v14587_v33, 16  ;;  %v2778_v41 = vshrl.u32 %v14587_v33, 16  ;;  %v14600_v52 = vpop.f32.mrf.mxu3  ;;  %v10547_v25 = vld [vmem:[%s10738_s8 + $0xa0] sm:$0xff] }
 0x43b   : > { %v8397_v24 = vunpack.c.l.b16 %v14495_v21  ;;  %v2767_v50 = vrot.slane %v2765_v22, 4  ;;  %v2770_v4 = vrot.slane %v2768_v17, 5  ;;  %v2784_v15 = vshll.u32 %v14590_v18, 16 }
 0x43c   : > { %v6309_v45 = vpack.c.b16 %v6275_v46, %v6274_v3  ;;  %v5958_v58 = vpack.c.b16 %v5925_v62, %v5924_v5  ;;  %v2776_v39 = vrot.slane %v2774_v1, 5  ;;  %v2780_v30 = vrot.slane %v2778_v41, 4  ;;  %8513 = vrot.lane.b32.xlu2 %v10547_v25, %s10630_s14  ;;  %v14610_v36 = vpop.f32.mrf.mxu2 }
 0x43d   : > { %v8207_v54 = vmax.f32 %v8081_v40, 0.0  ;;  %v8451_v13 = vpack.c.b16 %v8398_v16, %v8397_v24  ;;  %v6980_v21 = vsel %vm6920_vm15, %v10075_v12, %v14545_v44  ;;  %v2771_v8 = vor.u32 %v2770_v4, %v2767_v50  ;;  %v14615_v16 = vpop.f32.mrf.mxu0  ;;  %v14621_v44 = vpop.f32.mrf.mxu1  ;;  %v2817_v12 = vld [vmem:[#allocation2 + $0x174] sm:$0xe] }
 0x43e   : > { %v8083_v22 = vadd.f32 %v14442_v55, %v7914_v26  ;;  %6020 = vrot.lane.b32.xlu1 %v5958_v58, %s10631_s17  ;;  %v2781_v3 = vor.u32 %v2780_v30, %v2776_v39  ;;  %v2786_v46 = vrot.slane %v2784_v15, 5  ;;  %v3138_v5 = vrot.slane %v14587_v33, 5 }
 0x43f   : > { %v3972_v40 = vsel %vm10985_vm14, %v14399_v37, %v14348_v2  ;;  %v2772_v17 = vrot.slane %v2771_v8, 4  ;;  %v9404_v62 = vrot.slane %v2819_v27, 9  ;;  %v3141_v55 = vrot.slane %v14590_v18, 5  ;;  %v14632_v37 = vpop.permute.xlu2 %6820 }
 0x440   : > { %v7267_v26 = vsel %vm6920_vm15, %v6309_v45, %v14438_v61  ;;  %v2782_v1 = vrot.slane %v2781_v3, 4  ;;  %v3140_v41 = vrot.slane %v3138_v5, 4  ;;  %v7056_v33 = vsel %vm544_vm0, %v6980_v21, %v14517_v63  ;;  %v10548_v63 = vld [vmem:[%s10738_s8 + $0x90] sm:$0xff]  ;;  %v14645_v15 = vpop.permute.xlu0 %6660  ;;  %v1981_v21 = vld [vmem:[#allocation2 + $0x180] sm:$0xf] }
 0x441   : > { %v3982_v2 = vsel %vm10985_vm14, %v14407_v59, %v14392_v20  ;;  %v8569_v24 = vsel %vm6920_vm15, %v8451_v13, %v14549_v51  ;;  %v2777_v18 = vsel %vm10985_vm14, %v2772_v17, %v2776_v39  ;;  %v7140_v61 = vsel %vm7081_vm2, %v7056_v33, %v6191_v9  ;;  %v10118_v45 = vld [vmem:[#allocation2 + $0x18c] sm:$0xff] }
 0x442   : > { %v14639_v50 = vpack.c.bf16 %v8207_v54, %v8207_v54  ;;  %v8208_v4 = vmax.f32 %v8083_v22, 0.0  ;;  %8509 = vrot.lane.b32.xlu0 %v10548_v63, %s10630_s14  ;;  %v2787_v20 = vsel %vm10985_vm14, %v2782_v1, %v2786_v46  ;;  %v5766_v59 = vunpack.c.l.b16 %v2777_v18  ;;  %7781 = vmatmul.bf16.gmra.mxu1 %v7140_v61  ;;  %v14647_v51 = vpop.f32.mrf.mxu3  ;;  %v10076_v61 = vld [vmem:[#allocation2 + $0x108] sm:$0xff] }
 0x443   : > { %v5767_v58 = vunpack.c.l.b16 %v2787_v20  ;;  %v3139_v9 = vsel %vm10972_vm11, %v9404_v62, %v3138_v5  ;;  %v3142_v39 = vsel %vm10972_vm11, %v3140_v41, %v3141_v55  ;;  %v7333_v30 = vsel %vm544_vm0, %v7267_v26, %v14460_v34  ;;  %v10116_v41 = vld [vmem:[#allocation2 + $0x174] sm:$0xff] }
 0x444   : > { %v7426_v27 = vsel %vm7081_vm2, %v7333_v30, %v14501_v6  ;;  %v8774_v54 = vadd.f32 %v14266_v7, %v14547_v49  ;;  %v9402_v13 = vrot.slane %v2817_v12, 9  ;;  %v3124_v25 = vrot.slane %v14477_v32, 5  ;;  %6212 = vrot.lane.b32.xlu2 %v10118_v45, %s10632_s18  ;;  %v14664_v62 = vpop.f32.mrf.mxu2  ;;  %v6193_v49 = vpop.permute.xlu1 %6192 }
 0x445   : > { %9991 = vmatmul.msk.bf16.gmra.mxu3 %vm7081_vm2, %v8569_v24  ;;  %v6276_v8 = vunpack.c.l.b16 %v3972_v40  ;;  %v6277_v22 = vunpack.c.l.b16 %v3982_v2  ;;  %v5799_v3 = vpack.c.b16 %v5767_v58, %v5766_v59  ;;  %8000 = vmatmul.bf16.gmra.mxu2 %v7426_v27  ;;  %v3127_v34 = vrot.slane %v14484_v57, 5  ;;  %v14669_v1 = vpop.f32.mrf.mxu1  ;;  %v14675_v18 = vpop.f32.mrf.mxu0 }
 0x446   : > { %v8399_v46 = vunpack.c.l.b16 %v14639_v50  ;;  %v8272_v5 = vpack.c.bf16 %v8208_v4, %v8208_v4  ;;  %v5926_v17 = vunpack.c.l.b16 %v3139_v9  ;;  %v3126_v6 = vrot.slane %v3124_v25, 4 }
 0x447   : > { %5862 = vrot.lane.b32.xlu1 %v5799_v3, %s10630_s14  ;;  %v5927_v32 = vunpack.c.l.b16 %v3142_v39  ;;  %v8776_v40 = vadd.f32 %v14266_v7, %v14600_v52  ;;  %v2741_v55 = vshrl.u32 %v1981_v21, 16  ;;  %v2744_v26 = vshll.u32 %v1981_v21, 16 }
 0x448   : > { %v8924_v57 = vmax.f32 %v8774_v54, 0.0  ;;  %v3125_v33 = vsel %vm10972_vm11, %v9402_v13, %v3124_v25  ;;  %v2750_v2 = vshll.u32 %v14559_v35, 16  ;;  %v2754_v24 = vshrl.u32 %v14559_v35, 16  ;;  %v8496_v54 = vpop.permute.xlu2 %8495 }
 0x449   : > { %v3128_v12 = vsel %vm10972_vm11, %v3126_v6, %v3127_v34  ;;  %v8925_v52 = vmax.f32 %v8776_v40, 0.0  ;;  %v2743_v50 = vrot.slane %v2741_v55, 4  ;;  %v2746_v4 = vrot.slane %v2744_v26, 5  ;;  %v6001_v58 = vpop.permute.xlu0 %6000  ;;  %v3205_v34 = vld [vmem:[#allocation2 + $0x198] sm:$0xf] }
 0x44a   : > { %v8400_v63 = vunpack.c.l.b16 %v8272_v5  ;;  %6208 = vrot.lane.b32.xlu0 %v10116_v41, %s10632_s18  ;;  %v2752_v20 = vrot.slane %v2750_v2, 5  ;;  %v2756_v59 = vrot.slane %v2754_v24, 4  ;;  %v2760_v45 = vshll.u32 %v14543_v23, 16  ;;  %v8780_v9 = vpop.f32.mrf.mxu3  ;;  %v10549_v41 = vld [vmem:[%s10738_s8 + $0xb0] sm:$0xff] }
 0x44b   : > { %v6983_v35 = vsel %vm6920_vm15, %v10076_v61, %v14604_v56  ;;  %v5959_v39 = vpack.c.b16 %v5927_v32, %v5926_v17  ;;  %v10196_v30 = vpack.c.bf16 %v8925_v52, %v8924_v57  ;;  %v2747_v27 = vor.u32 %v2746_v4, %v2743_v50  ;;  %v10551_v50 = vld [vmem:[#allocation2 + $0x1a0] sm:$0x1] }
 0x44c   : > { %v5922_v13 = vunpack.c.l.b16 %v3125_v33  ;;  %v5923_v25 = vunpack.c.l.b16 %v3128_v12  ;;  %v2757_v21 = vor.u32 %v2756_v59, %v2752_v20  ;;  %v7058_v3 = vsel %vm544_vm0, %v6983_v35, %v6001_v58  ;;  %v14695_v33 = vpop.f32.mrf.mxu2 }
 0x44d   : > { %v6310_v5 = vpack.c.b16 %v6277_v22, %v6276_v8  ;;  %6022 = vrot.lane.b32.xlu2 %v5959_v39, %s10631_s17  ;;  %10340 = vst [vmem:[%s14360_s15 + $0x18] sm:$0xff] %v10196_v30   ;;  %v2748_v23 = vrot.slane %v2747_v27, 4  ;;  %v2762_v6 = vrot.slane %v2760_v45, 5  ;;  %v8452_v55 = vpack.c.b16 %v8400_v63, %v8399_v46  ;;  %v14697_v46 = vpop.permute.xlu1 %6662  ;;  %v14703_v2 = vpop.f32.mrf.mxu1 }
 0x44e   : > { %v2758_v40 = vrot.slane %v2757_v21, 4  ;;  %v7143_v17 = vsel %vm7081_vm2, %v7058_v3, %v6193_v49  ;;  %v3984_v32 = vshrl.u32 %v3205_v34, 16  ;;  %v3987_v26 = vshll.u32 %v3205_v34, 16  ;;  %v10552_v21 = vld [vmem:[%s10738_s8 + $0xb8] sm:$0xff] }
 0x44f   : > { %v7270_v56 = vsel %vm6920_vm15, %v6310_v5, %v14573_v43  ;;  %8517 = vrot.lane.b32.xlu1 %v10549_v41, %s10630_s14  ;;  %v5957_v57 = vpack.c.b16 %v5923_v25, %v5922_v13  ;;  %v8779_v22 = vadd.f32 %v14266_v7, %v14647_v51  ;;  %v2753_v43 = vsel %vm10985_vm14, %v2748_v23, %v2752_v20  ;;  %v10550_v51 = vld [vmem:[#allocation2 + $0x19c] sm:$0xf]  ;;  %v14707_v20 = vpop.f32.mrf.mxu0  ;;  %v5246_v5 = vld [vmem:[#allocation2 + $0x138] sm:$0xe] }
 0x450   : > { %v7335_v8 = vsel %vm544_vm0, %v7270_v56, %v14645_v15  ;;  %v2763_v49 = vsel %vm10985_vm14, %v2758_v40, %v2762_v6  ;;  %v3986_v24 = vrot.slane %v3984_v32, 4  ;;  %v3989_v61 = vrot.slane %v3987_v26, 5  ;;  %v10553_v40 = vld [vmem:[%s10738_s8 + $0xc8] sm:$0xff] }
 0x451   : > { %v8572_v15 = vsel %vm6920_vm15, %v8452_v55, %v8496_v54  ;;  %v3993_v12 = vshll.u32 %v10550_v51, 16  ;;  %v3997_v52 = vshrl.u32 %v10550_v51, 16  ;;  %v4003_v4 = vshll.u32 %v10551_v50, 16  ;;  %v15375_v55 = vld [vmem:[#allocation38_spill] sm:$0xff] }
 0x452   : > { %6018 = vrot.lane.b32.xlu0 %v5957_v57, %s10631_s17  ;;  %7786 = vmatmul.bf16.gmra.mxu1 %v7143_v17  ;;  %v8783_v63 = vpop.f32.mrf.mxu3  ;;  %v7750_v59 = vadd.f32 %v14355_v42, %v14621_v44  ;;  %v7429_v45 = vsel %vm7081_vm2, %v7335_v8, %v14632_v37  ;;  %v3990_v58 = vor.u32 %v3989_v61, %v3986_v24  ;;  %v5764_v39 = vunpack.c.l.b16 %v2753_v43  ;;  %v5843_v44 = vpop.permute.xlu2 %5842  ;;  %v15376_v17 = vld [vmem:[#allocation40_spill] sm:$0xff]  ;;  %v15377_v8 = vld [vmem:[#allocation37_spill] sm:$0xff] }
 0x453   : > { %v8781_v35 = vadd.f32 %v14266_v7, %v8780_v9  ;;  %v5765_v30 = vunpack.c.l.b16 %v2763_v49  ;;  %v3995_v27 = vrot.slane %v3993_v12, 5  ;;  %v3999_v54 = vrot.slane %v3997_v52, 4 }
 0x454   : > { %v8926_v13 = vmax.f32 %v8779_v22, 0.0  ;;  %v3991_v3 = vrot.slane %v3990_v58, 4  ;;  %v4005_v34 = vrot.slane %v4003_v4, 5  ;;  %v7748_v9 = vadd.f32 %v14355_v42, %v14568_v28  ;;  %v10077_v28 = vld [vmem:[#allocation2 + $0x114] sm:$0xff] }
 0x455   : > { %9992 = vmatmul.msk.bf16.gmra.mxu3 %vm7081_vm2, %v8572_v15  ;;  %8005 = vmatmul.bf16.gmra.mxu2 %v7429_v45  ;;  %v8927_v25 = vmax.f32 %v8781_v35, 0.0  ;;  %v4000_v37 = vor.u32 %v3999_v54, %v3995_v27  ;;  %v9459_v6 = vrot.slane %v5246_v5, 9  ;;  %v6869_v56 = vunpack.c.l.b16 %v15375_v55  ;;  %v6003_v52 = vpop.permute.xlu1 %6002  ;;  %v14737_v50 = vpop.f32.mrf.mxu1  ;;  %v10555_v54 = vld [vmem:[%s10738_s8 + $0xd0] sm:$0xff]  ;;  %v10557_v5 = vld [vmem:[%s10738_s8 + $0xa8] sm:$0xff] }
 0x456   : > { %8519 = vrot.lane.b32.xlu2 %v10552_v21, %s10630_s14  ;;  %v7919_v32 = vadd.f32 %v15376_v17, %v7750_v59  ;;  %v5798_v26 = vpack.c.b16 %v5765_v30, %v5764_v39  ;;  %v8784_v57 = vadd.f32 %v14266_v7, %v8783_v63  ;;  %v15378_v22 = vrot.slane %v15377_v8, 5  ;;  %v15379_v7 = vld [vmem:[#allocation36_spill] sm:$0xff]  ;;  %v6471_v59 = vpop.permute.xlu0 %6470  ;;  %v10558_v17 = vld [vmem:[%s10738_s8 + $0xe8] sm:$0xff] }
 0x457   : > { %v10201_v23 = vpack.c.bf16 %v8927_v25, %v8926_v13  ;;  %8523 = vrot.lane.b32.xlu1 %v10553_v40, %s10630_s14  ;;  %v4001_v41 = vrot.slane %v4000_v37, 4  ;;  %v3996_v49 = vsel %vm10985_vm14, %v3991_v3, %v3995_v27  ;;  %v7917_v12 = vadd.f32 %v15379_v7, %v7748_v9  ;;  %v14749_v58 = vpop.f32.mrf.mxu0 }
 0x458   : > { %v5509_v43 = vsel %vm10972_vm11, %v9459_v6, %v15378_v22  ;;  %v6986_v11 = vsel %vm6920_vm15, %v10077_v28, %v5843_v44  ;;  %v8088_v63 = vadd.f32 %v14554_v31, %v7919_v32  ;;  %v6278_v35 = vunpack.c.l.b16 %v3996_v49  ;;  %v10556_v31 = vld [vmem:[%s10738_s8 + $0xe0] sm:$0xff]  ;;  %v10119_v28 = vld [vmem:[#allocation2 + $0x198] sm:$0xff]  ;;  %v15381_v49 = vld [vmem:[#allocation25_spill] sm:$0xff] }
 0x459   : > { %10341 = vst [vmem:[%s14360_s15 + $0x20] sm:$0xff] %v10201_v23   ;;  %v4006_v24 = vsel %vm10985_vm14, %v4001_v41, %v4005_v34  ;;  %v14734_v61 = vpop.f32.mrf.mxu2  ;;  %v6868_v51 = vunpack.c.l.b16 %v5509_v43  ;;  %v8928_v30 = vmax.f32 %v8784_v57, 0.0  ;;  %v7060_v13 = vsel %vm544_vm0, %v6986_v11, %v6003_v52  ;;  %v10559_v43 = vld [vmem:[%s10738_s8 + $0xf8] sm:$0xff] }
 0x45a   : > { %5860 = vrot.lane.b32.xlu0 %v5798_v26, %s10630_s14  ;;  %v8785_v15 = vpop.f32.mrf.mxu3  ;;  %v6279_v39 = vunpack.c.l.b16 %v4006_v24  ;;  %v8086_v25 = vadd.f32 %v14504_v53, %v7917_v12  ;;  %v6195_v44 = vpop.permute.xlu2 %6194  ;;  %v8210_v3 = vmax.f32 %v8088_v63, 0.0  ;;  %v7755_v53 = vadd.f32 %v14355_v42, %v14703_v2  ;;  %v15380_v2 = vld [vmem:[#allocation7_spill] sm:$0xff] }
 0x45b   : > { %v8786_v4 = vadd.f32 %v14742_v0, %v8785_v15  ;;  %v14747_v45 = vpack.c.b16 %v6869_v56, %v6868_v51  ;;  %v7146_v34 = vsel %vm7081_vm2, %v7060_v13, %v6195_v44  ;;  %v7753_v55 = vadd.f32 %v14355_v42, %v14669_v1 }
 0x45c   : > { %v6311_v37 = vpack.c.b16 %v6279_v39, %v6278_v35  ;;  %v8209_v9 = vmax.f32 %v8086_v25, 0.0  ;;  %v8274_v40 = vpack.c.bf16 %v8210_v3, %v8210_v3  ;;  %v7924_v8 = vadd.f32 %v15380_v2, %v7755_v53 }
 0x45d   : > { %v8929_v27 = vmax.f32 %v8786_v4, 0.0  ;;  %v7759_v56 = vpop.f32.mrf.mxu1  ;;  %v7922_v24 = vadd.f32 %v15381_v49, %v7753_v55 }
 0x45e   : > { %8525 = vrot.lane.b32.xlu2 %v10555_v54, %s10630_s14  ;;  %v7273_v23 = vsel %vm6920_vm15, %v6311_v37, %v6471_v59  ;;  %v8273_v57 = vpack.c.bf16 %v8209_v9, %v8209_v9  ;;  %v8402_v1 = vunpack.c.l.b16 %v8274_v40  ;;  %v5845_v59 = vpop.permute.xlu1 %5844  ;;  %v10560_v54 = vld [vmem:[%s10738_s8 + $0xc0] sm:$0xff]  ;;  %v7760_v13 = vadd.f32 %v14355_v42, %v7759_v56  ;;  %v15383_v40 = vld [vmem:[#allocation18_spill] sm:$0xff] }
 0x45f   : > { %v10206_v21 = vpack.c.bf16 %v8929_v27, %v8928_v30  ;;  %8529 = vrot.lane.b32.xlu1 %v10556_v31, %s10630_s14  ;;  %v7337_v26 = vsel %vm544_vm0, %v7273_v23, %v14697_v46  ;;  %v14772_v41 = vpop.f32.mrf.mxu0  ;;  %v8093_v46 = vadd.f32 %v14675_v18, %v7924_v8  ;;  %v8091_v51 = vadd.f32 %v14615_v16, %v7922_v24  ;;  %v10078_v30 = vld [vmem:[#allocation2 + $0x120] sm:$0xff] }
 0x460   : > { %v8401_v15 = vunpack.c.l.b16 %v8273_v57  ;;  %v6989_v16 = vsel %vm6920_vm15, %v10078_v30, %v5845_v59  ;;  %v7758_v31 = vadd.f32 %v14355_v42, %v14737_v50 }
 0x461   : > { %10342 = vst [vmem:[%s14360_s15 + $0x28] sm:$0xff] %v10206_v21   ;;  %v14764_v6 = vpop.f32.mrf.mxu2  ;;  %v8212_v4 = vmax.f32 %v8093_v46, 0.0  ;;  %v8211_v39 = vmax.f32 %v8091_v51, 0.0  ;;  %v10079_v46 = vld [vmem:[#allocation2 + $0x12c] sm:$0xff] }
 0x462   : > { %8515 = vrot.lane.b32.xlu0 %v10557_v5, %s10630_s14  ;;  %7791 = vmatmul.bf16.gmra.mxu1 %v7146_v34  ;;  %v8453_v7 = vpack.c.b16 %v8402_v1, %v8401_v15  ;;  %v6005_v25 = vpop.permute.xlu2 %6004  ;;  %v15382_v5 = vld [vmem:[#allocation19_spill] sm:$0xff]  ;;  %v7927_v55 = vadd.f32 %v15383_v40, %v7758_v31 }
 0x463   : > { %v8276_v18 = vpack.c.bf16 %v8212_v4, %v8212_v4  ;;  %v8275_v21 = vpack.c.bf16 %v8211_v39, %v8211_v39  ;;  %v7062_v3 = vsel %vm544_vm0, %v6989_v16, %v6005_v25  ;;  %v7929_v9 = vadd.f32 %v15382_v5, %v7760_v13  ;;  %v10562_v4 = vld [vmem:[%s10738_s8 + $0xf0] sm:$0xff] }
 0x464   : > { %v8096_v8 = vadd.f32 %v14707_v20, %v7927_v55 }
 0x465   : > { %v8404_v34 = vunpack.c.l.b16 %v8276_v18  ;;  %v8403_v23 = vunpack.c.l.b16 %v8275_v21  ;;  %v8098_v57 = vadd.f32 %v14749_v58, %v7929_v9 }
 0x466   : > { %8531 = vrot.lane.b32.xlu2 %v10558_v17, %s10630_s14  ;;  %v6823_v32 = vpop.permute.xlu0 %6822  ;;  %v10561_v17 = vld [vmem:[%s10738_s8 + $0xd8] sm:$0xff]  ;;  %v8213_v51 = vmax.f32 %v8096_v8, 0.0 }
 0x467   : > { %v7432_v22 = vsel %vm7081_vm2, %v7337_v26, %v6823_v32  ;;  %8535 = vrot.lane.b32.xlu1 %v10559_v43, %s10630_s14  ;;  %v14786_v35 = vpop.f32.mrf.mxu0  ;;  %v8454_v26 = vpack.c.b16 %v8404_v34, %v8403_v23  ;;  %v8214_v49 = vmax.f32 %v8098_v57, 0.0 }
 0x468   : > { %8010 = vmatmul.bf16.gmra.mxu2 %v7432_v22  ;;  %v7762_v63 = vpop.f32.mrf.mxu1  ;;  %v8277_v30 = vpack.c.bf16 %v8213_v51, %v8213_v51 }
 0x46a   : > { %6214 = vrot.lane.b32.xlu0 %v10119_v28, %s10632_s18  ;;  %v5847_v15 = vpop.permute.xlu2 %5846  ;;  %v8405_v31 = vunpack.c.l.b16 %v8277_v30  ;;  %s10581_s18 = scalar_lea.hbm %s10580_s19, 256 }
 0x46b   : > { %v6992_v20 = vsel %vm6920_vm15, %v10079_v46, %v5847_v15  ;;  %p10582_p11 = scmp.ne.s32.totalorder %s10580_s19, %s10581_s18 }
 0x46d   : > { %p10583_p12 = pnand %p10582_p11, %p10712_p5 }
 0x46e   : > { %v8498_v12 = vpop.permute.xlu0 %8497  ;;  %v14782_v52 = vpop.f32.mrf.mxu2 }
 0x46f   : > { %v8575_v11 = vsel %vm6920_vm15, %v8453_v7, %v8498_v12  ;;  %v14805_v32 = vpop.f32.mrf.mxu0  ;;  %p10584_p13 = pneg %p10583_p12 }
 0x470   : > { %9993 = vmatmul.msk.bf16.gmra.mxu3 %vm7081_vm2, %v8575_v11  ;;  %v7764_v56 = vpop.f32.mrf.mxu1  ;;  %v8278_v11 = vpack.c.bf16 %v8214_v49, %v8214_v49 }
 0x472   : > { %8521 = vrot.lane.b32.xlu0 %v10560_v54, %s10630_s14  ;;  %v8406_v13 = vunpack.c.l.b16 %v8278_v11  ;;  %v8502_v40 = vpop.permute.xlu2 %8501 }
 0x474   : > { %v8788_v27 = vpop.f32.mrf.mxu3  ;;  %v8455_v9 = vpack.c.b16 %v8406_v13, %v8405_v31 }
 0x475   : > { %v8789_v42 = vadd.f32 %v14742_v0, %v8788_v27  ;;  %v14822_v27 = vld [vmem:[%s15123_s4] ss:$0 sm:$0xff] }
 0x476   : > { %v6197_v44 = vpop.permute.xlu0 %6196  ;;  %v14795_v37 = vpop.f32.mrf.mxu2  ;;  %v7765_v54 = vadd.f32 %v14822_v27, %v7764_v56  ;;  %v7763_v25 = vadd.f32 %v14822_v27, %v7762_v63 }
 0x477   : > { %v7149_v53 = vsel %vm7081_vm2, %v7062_v3, %v6197_v44  ;;  %v8930_v22 = vmax.f32 %v8789_v42, 0.0  ;;  %v8107_v39 = vpop.f32.mrf.mxu0 }
 0x478   : > { %9947 = vmatmul.msk.bf16.vlgmr.msra.gmra.mxu2 %vm6920_vm15, %v14747_v45  ;;  %7796 = vmatmul.bf16.gmra.mxu1 %v7149_v53  ;;  %v8500_v45 = vpop.permute.xlu1 %8499  ;;  %v7934_v44 = vadd.f32 %v14012_v60, %v7765_v54  ;;  %v7932_v5 = vadd.f32 %v13952_v19, %v7763_v25 }
 0x479   : > { %v8578_v1 = vsel %vm6920_vm15, %v8454_v26, %v8500_v45  ;;  %v8581_v26 = vsel %vm6920_vm15, %v8455_v9, %v8502_v40  ;;  %v10081_v9 = vld [vmem:[#allocation2 + $0x144] sm:$0xff] }
 0x47a   : > { %8527 = vrot.lane.b32.xlu0 %v10561_v17, %s10630_s14  ;;  %v8103_v55 = vadd.f32 %v14786_v35, %v7934_v44  ;;  %v8101_v60 = vadd.f32 %v14772_v41, %v7932_v5  ;;  %v10080_v17 = vld [vmem:[#allocation2 + $0x138] sm:$0xff]  ;;  %v6201_v15 = vpop.permute.xlu2 %6200 }
 0x47c   : > { %v8790_v50 = vpop.f32.mrf.mxu3 }
 0x47d   : > { %v8791_v2 = vadd.f32 %v14742_v0, %v8790_v50  ;;  %v7767_v7 = vpop.f32.mrf.mxu1 }
 0x47e   : > { %v14810_v28 = vpop.f32.mrf.mxu2  ;;  %v6007_v58 = vpop.permute.xlu0 %6006  ;;  %v7768_v49 = vadd.f32 %v14822_v27, %v7767_v7 }
 0x47f   : > { %v8931_v43 = vmax.f32 %v8791_v2, 0.0  ;;  %v7064_v59 = vsel %vm544_vm0, %v6992_v20, %v6007_v58  ;;  %v14834_v50 = vpop.f32.mrf.mxu0  ;;  %v8216_v2 = vmax.f32 %v8103_v55, 0.0 }
 0x480   : > { %9994 = vmatmul.msk.bf16.gmra.mxu3 %vm7081_vm2, %v8578_v1  ;;  %v6199_v16 = vpop.permute.xlu1 %6198  ;;  %v7937_v20 = vadd.f32 %v14062_v29, %v7768_v49 }
 0x481   : > { %v10211_v24 = vpack.c.bf16 %v8931_v43, %v8930_v22  ;;  %v7152_v21 = vsel %vm7081_vm2, %v7064_v59, %v6199_v16  ;;  %v8215_v22 = vmax.f32 %v8101_v60, 0.0  ;;  %v8280_v41 = vpack.c.bf16 %v8216_v2, %v8216_v2 }
 0x482   : > { %8533 = vrot.lane.b32.xlu0 %v10562_v4, %s10630_s14  ;;  %s10585_s14 = scalar_lea.hbm %s15126_s7, 1024 }
 0x483   : > { %10343 = vst [vmem:[%s14360_s15 + $0x30] sm:$0xff] %v10211_v24   ;;  %v8279_v46 = vpack.c.bf16 %v8215_v22, %v8215_v22  ;;  %v8408_v4 = vunpack.c.l.b16 %v8280_v41  ;;  %p10587_p1 = scmp.lt.s32.totalorder %s10585_s14, %s10581_s18 }
 0x484   : > { %v8793_v12 = vpop.f32.mrf.mxu3 }
 0x485   : > { %v8794_v3 = vadd.f32 %v14742_v0, %v8793_v12  ;;  %v7769_v53 = vpop.f32.mrf.mxu1  ;;  %v8407_v7 = vunpack.c.l.b16 %v8279_v46  ;;  %p10588_p2 = por %p10587_p1, %p10586_p0 }
 0x486   : > { %v14825_v18 = vpop.f32.mrf.mxu2  ;;  %v5849_v42 = vpop.permute.xlu0 %5848  ;;  %v7770_v43 = vadd.f32 %v14822_v27, %v7769_v53 }
 0x487   : > { %v8932_v63 = vmax.f32 %v8794_v3, 0.0  ;;  %v6995_v45 = vsel %vm6920_vm15, %v10080_v17, %v5849_v42  ;;  %v8112_v12 = vpop.f32.mrf.mxu0  ;;  %v8456_v25 = vpack.c.b16 %v8408_v4, %v8407_v7  ;;  %p10589_p3 = pnand %p10588_p2, %p10584_p13 }
 0x488   : > { %7801 = vmatmul.bf16.gmra.mxu1 %v7152_v21  ;;  %v6009_v8 = vpop.permute.xlu1 %6008  ;;  %v7939_v51 = vadd.f32 %v14111_v48, %v7770_v43  ;;  %v8106_v48 = vadd.f32 %v14805_v32, %v7937_v20 }
 0x489   : > { %v7066_v1 = vsel %vm544_vm0, %v6995_v45, %v6009_v8 }
 0x48a   : > { %v7155_v58 = vsel %vm7081_vm2, %v7066_v1, %v6201_v15  ;;  %v8108_v16 = vadd.f32 %v8107_v39, %v7939_v51  ;;  %v8217_v53 = vmax.f32 %v8106_v48, 0.0 }
 0x48c   : > { %v8795_v34 = vpop.f32.mrf.mxu3  ;;  %v8218_v3 = vmax.f32 %v8108_v16, 0.0  ;;  %v8281_v42 = vpack.c.bf16 %v8217_v53, %v8217_v53 }
 0x48d   : > { %v8796_v23 = vadd.f32 %v14742_v0, %v8795_v34 }
 0x48e   : > { %v14839_v19 = vpop.f32.mrf.mxu2  ;;  %v8504_v11 = vpop.permute.xlu0 %8503  ;;  %v8282_v40 = vpack.c.bf16 %v8218_v3, %v8218_v3  ;;  %v8409_v45 = vunpack.c.l.b16 %v8281_v42  ;;  %v15384_v3 = vld [vmem:[#allocation47_spill] sm:$0xff] }
 0x48f   : > { %v8933_v56 = vmax.f32 %v8796_v23, 0.0  ;;  %v7772_v24 = vpop.f32.mrf.mxu1  ;;  %v8584_v44 = vsel %vm6920_vm15, %v8456_v25, %v8504_v11  ;;  %v8115_v23 = vpop.f32.mrf.mxu0 }
 0x490   : > { %9995 = vmatmul.msk.bf16.gmra.mxu3 %vm7081_vm2, %v8581_v26  ;;  %v5851_v5 = vpop.permute.xlu1 %5850  ;;  %v7773_v60 = vadd.f32 %v14822_v27, %v7772_v24  ;;  %v8410_v26 = vunpack.c.l.b16 %v8282_v40 }
 0x491   : > { %v10216_v57 = vpack.c.bf16 %v8933_v56, %v8932_v63  ;;  %v6998_v39 = vsel %vm6920_vm15, %v10081_v9, %v5851_v5  ;;  %v6011_v56 = vpop.permute.xlu2 %6010 }
 0x492   : > { %v7068_v17 = vsel %vm544_vm0, %v6998_v39, %v6011_v56  ;;  %v8457_v43 = vpack.c.b16 %v8410_v26, %v8409_v45 }
 0x493   : > { %10344 = vst [vmem:[%s14360_s15 + $0x38] sm:$0xff] %v10216_v57  }
 0x494   : > { %v8798_v35 = vpop.f32.mrf.mxu3 }
 0x495   : > { %v8799_v59 = vadd.f32 %v14742_v0, %v8798_v35  ;;  %v7942_v35 = vadd.f32 %v14153_v47, %v7773_v60 }
 0x496   : > { %v14850_v30 = vpop.f32.mrf.mxu2  ;;  %v6203_v55 = vpop.permute.xlu0 %6202 }
 0x497   : > { %v8934_v21 = vmax.f32 %v8799_v59, 0.0  ;;  %v7774_v29 = vpop.f32.mrf.mxu1  ;;  %v7158_v2 = vsel %vm7081_vm2, %v7068_v17, %v6203_v55  ;;  %v8111_v41 = vadd.f32 %v14834_v50, %v7942_v35  ;;  %v8117_v49 = vpop.f32.mrf.mxu0  ;;  %v10083_v55 = vld [vmem:[#allocation2 + $0x15c] sm:$0xff] }
 0x498   : > { %7806 = vmatmul.bf16.gmra.mxu1 %v7155_v58  ;;  %v7775_v32 = vadd.f32 %v14822_v27, %v7774_v29  ;;  %v8506_v1 = vpop.permute.xlu1 %8505 }
 0x499   : > { %v8587_v46 = vsel %vm6920_vm15, %v8457_v43, %v8506_v1  ;;  %v5853_v51 = vpop.permute.xlu2 %5852  ;;  %v8219_v4 = vmax.f32 %v8111_v41, 0.0 }
 0x49a   : > { %v7944_v57 = vadd.f32 %v14209_v38, %v7775_v32  ;;  %v10082_v38 = vld [vmem:[#allocation2 + $0x150] sm:$0xff] }
 0x49b   : > { %v7001_v47 = vsel %vm6920_vm15, %v10082_v38, %v5853_v51  ;;  %v8283_v59 = vpack.c.bf16 %v8219_v4, %v8219_v4 }
 0x49c   : > { %v8800_v54 = vpop.f32.mrf.mxu3  ;;  %v8113_v22 = vadd.f32 %v8112_v12, %v7944_v57 }
 0x49d   : > { %v8801_v13 = vadd.f32 %v14742_v0, %v8800_v54 }
 0x49e   : > { %v8220_v24 = vmax.f32 %v8113_v22, 0.0  ;;  %v6013_v58 = vpop.permute.xlu0 %6012 }
 0x49f   : > { %v8935_v31 = vmax.f32 %v8801_v13, 0.0  ;;  %v7070_v50 = vsel %vm544_vm0, %v7001_v47, %v6013_v58  ;;  %v15385_v47 = vld [vmem:[#allocation49_spill] sm:$0xff] }
 0x4a0   : > { %9996 = vmatmul.msk.bf16.gmra.mxu3 %vm7081_vm2, %v8584_v44  ;;  %v8284_v12 = vpack.c.bf16 %v8220_v24, %v8220_v24  ;;  %v6205_v7 = vpop.permute.xlu1 %6204  ;;  %v8411_v44 = vunpack.c.l.b16 %v8283_v59 }
 0x4a1   : > { %v10221_v34 = vpack.c.bf16 %v8935_v31, %v8934_v21  ;;  %v7161_v25 = vsel %vm7081_vm2, %v7070_v50, %v6205_v7  ;;  %v8120_v21 = vpop.f32.mrf.mxu0  ;;  %v8508_v9 = vpop.permute.xlu2 %8507  ;;  %v15386_v50 = vld [vmem:[#allocation6_spill] sm:$0xff] }
 0x4a2   : > { %v8412_v13 = vunpack.c.l.b16 %v8284_v12 }
 0x4a3   : > { %10345 = vst [vmem:[%s14360_s15 + $0x40] sm:$0xff] %v10221_v34   ;;  %v14859_v63 = vpop.f32.mrf.mxu2 }
 0x4a4   : > { %v8458_v5 = vpack.c.b16 %v8412_v13, %v8411_v44 }
 0x4a8   : > { %7811 = vmatmul.bf16.gmra.mxu1 %v7158_v2  ;;  %v7777_v8 = vpop.f32.mrf.mxu1  ;;  %v6015_v35 = vpop.permute.xlu1 %6014 }
 0x4a9   : > { %v7778_v54 = vadd.f32 %v14822_v27, %v7777_v8  ;;  %v8122_v45 = vpop.f32.mrf.mxu0 }
 0x4ab   : > { %v14867_v15 = vpop.f32.mrf.mxu2  ;;  %v7947_v29 = vadd.f32 %v15384_v3, %v7778_v54 }
 0x4ac   : > { %v5855_v40 = vpop.permute.xlu0 %5854 }
 0x4ad   : > { %v8116_v53 = vadd.f32 %v8115_v23, %v7947_v29  ;;  %v7004_v26 = vsel %vm6920_vm15, %v10083_v55, %v5855_v40 }
 0x4ae   : > { %v7072_v43 = vsel %vm544_vm0, %v7004_v26, %v6015_v35 }
 0x4af   : > { %v8221_v57 = vmax.f32 %v8116_v53, 0.0  ;;  %v10084_v53 = vld [vmem:[#allocation2 + $0x168] sm:$0xff] }
 0x4b0   : > { %9997 = vmatmul.msk.bf16.gmra.mxu3 %vm7081_vm2, %v8587_v46  ;;  %v7779_v20 = vpop.f32.mrf.mxu1 }
 0x4b1   : > { %v7780_v11 = vadd.f32 %v14822_v27, %v7779_v20  ;;  %v8285_v1 = vpack.c.bf16 %v8221_v57, %v8221_v57  ;;  %v8125_v7 = vpop.f32.mrf.mxu0 }
 0x4b3   : > { %v7949_v48 = vadd.f32 %v14318_v14, %v7780_v11  ;;  %v8590_v14 = vsel %vm6920_vm15, %v8458_v5, %v8508_v9  ;;  %v8413_v20 = vunpack.c.l.b16 %v8285_v1  ;;  %v5857_v5 = vpop.permute.xlu1 %5856 }
 0x4b4   : > { %v8510_v11 = vpop.permute.xlu0 %8509 }
 0x4b5   : > { %v8118_v34 = vadd.f32 %v8117_v49, %v7949_v48  ;;  %v6207_v49 = vpop.permute.xlu2 %6206 }
 0x4b6   : > { %v7164_v51 = vsel %vm7081_vm2, %v7072_v43, %v6207_v49 }
 0x4b7   : > { %v8222_v56 = vmax.f32 %v8118_v34, 0.0 }
 0x4b8   : > { %v8803_v16 = vpop.f32.mrf.mxu3  ;;  %7816 = vmatmul.bf16.gmra.mxu1 %v7161_v25  ;;  %v14877_v31 = vpop.f32.mrf.mxu2 }
 0x4b9   : > { %v8804_v39 = vadd.f32 %v14742_v0, %v8803_v16  ;;  %v8286_v8 = vpack.c.bf16 %v8222_v56, %v8222_v56  ;;  %v8127_v57 = vpop.f32.mrf.mxu0 }
 0x4bb   : > { %v8936_v23 = vmax.f32 %v8804_v39, 0.0  ;;  %v8414_v46 = vunpack.c.l.b16 %v8286_v8 }
 0x4bd   : > { %v8459_v54 = vpack.c.b16 %v8414_v46, %v8413_v20 }
 0x4bf   : > { %v7782_v60 = vpop.f32.mrf.mxu1  ;;  %v8593_v3 = vsel %vm6920_vm15, %v8459_v54, %v8510_v11 }
 0x4c0   : > { %v8805_v32 = vpop.f32.mrf.mxu3  ;;  %9998 = vmatmul.msk.bf16.gmra.mxu3 %vm7081_vm2, %v8590_v14  ;;  %v14884_v17 = vpop.f32.mrf.mxu2  ;;  %v7783_v41 = vadd.f32 %v14822_v27, %v7782_v60 }
 0x4c1   : > { %v8806_v42 = vadd.f32 %v14742_v0, %v8805_v32  ;;  %v6209_v14 = vpop.permute.xlu0 %6208 }
 0x4c2   : > { %v7952_v12 = vadd.f32 %v15385_v47, %v7783_v41  ;;  %v15387_v41 = vld [vmem:[#allocation26_spill] sm:$0xff] }
 0x4c3   : > { %v8937_v2 = vmax.f32 %v8806_v42, 0.0  ;;  %v6017_v42 = vpop.permute.xlu2 %6016 }
 0x4c4   : > { %v8121_v13 = vadd.f32 %v8120_v21, %v7952_v12  ;;  %v7007_v21 = vsel %vm6920_vm15, %v10084_v53, %v5857_v5 }
 0x4c5   : > { %v10226_v22 = vpack.c.bf16 %v8937_v2, %v8936_v23  ;;  %v7074_v23 = vsel %vm544_vm0, %v7007_v21, %v6017_v42 }
 0x4c6   : > { %v8223_v39 = vmax.f32 %v8121_v13, 0.0  ;;  %v7167_v35 = vsel %vm7081_vm2, %v7074_v23, %v6209_v14 }
 0x4c7   : > { %10346 = vst [vmem:[%s14360_s15 + $0x48] sm:$0xff] %v10226_v22   ;;  %v7784_v38 = vpop.f32.mrf.mxu1 }
 0x4c8   : > { %v8808_v24 = vpop.f32.mrf.mxu3  ;;  %7821 = vmatmul.bf16.gmra.mxu1 %v7164_v51  ;;  %v14891_v58 = vpop.f32.mrf.mxu2  ;;  %v7785_v4 = vadd.f32 %v14822_v27, %v7784_v38  ;;  %v8287_v60 = vpack.c.bf16 %v8223_v39, %v8223_v39 }
 0x4c9   : > { %v8809_v48 = vadd.f32 %v14742_v0, %v8808_v24  ;;  %v15388_v24 = vld [vmem:[#allocation42_spill] sm:$0xff]  ;;  %v8512_v38 = vpop.permute.xlu1 %8511 }
 0x4ca   : > { %v7954_v59 = vadd.f32 %v15386_v50, %v7785_v4  ;;  %v8415_v1 = vunpack.c.l.b16 %v8287_v60 }
 0x4cb   : > { %v8938_v40 = vmax.f32 %v8809_v48, 0.0  ;;  %v5859_v13 = vpop.permute.xlu2 %5858  ;;  %v10085_v48 = vld [vmem:[#allocation2 + $0x174] sm:$0xff] }
 0x4cc   : > { %v8123_v16 = vadd.f32 %v8122_v45, %v7954_v59 }
 0x4ce   : > { %v8224_v44 = vmax.f32 %v8123_v16, 0.0  ;;  %v8130_v16 = vpop.f32.mrf.mxu0 }
 0x4cf   : > { %v7787_v34 = vpop.f32.mrf.mxu1 }
 0x4d0   : > { %v8810_v25 = vpop.f32.mrf.mxu3  ;;  %9999 = vmatmul.msk.bf16.gmra.mxu3 %vm7081_vm2, %v8593_v3  ;;  %v14900_v9 = vpop.f32.mrf.mxu2  ;;  %v8288_v55 = vpack.c.bf16 %v8224_v44, %v8224_v44  ;;  %v7788_v26 = vadd.f32 %v14822_v27, %v7787_v34  ;;  %v7010_v34 = vsel %vm6920_vm15, %v10085_v48, %v5859_v13 }
 0x4d1   : > { %v8811_v29 = vadd.f32 %v14742_v0, %v8810_v25  ;;  %v6019_v25 = vpop.permute.xlu0 %6018  ;;  %v6211_v21 = vpop.permute.xlu1 %6210 }
 0x4d2   : > { %v8416_v45 = vunpack.c.l.b16 %v8288_v55  ;;  %v7957_v49 = vadd.f32 %v15387_v41, %v7788_v26  ;;  %v7076_v39 = vsel %vm544_vm0, %v7010_v34, %v6019_v25  ;;  %v10086_v41 = vld [vmem:[#allocation2 + $0x180] sm:$0xff] }
 0x4d3   : > { %v8939_v32 = vmax.f32 %v8811_v29, 0.0 }
 0x4d4   : > { %v8460_v51 = vpack.c.b16 %v8416_v45, %v8415_v1  ;;  %v8126_v20 = vadd.f32 %v8125_v7, %v7957_v49 }
 0x4d5   : > { %v10231_v56 = vpack.c.bf16 %v8939_v32, %v8938_v40 }
 0x4d6   : > { %v8596_v50 = vsel %vm6920_vm15, %v8460_v51, %v8512_v38  ;;  %v8225_v44 = vmax.f32 %v8126_v20, 0.0  ;;  %v8132_v23 = vpop.f32.mrf.mxu0 }
 0x4d7   : > { %10347 = vst [vmem:[%s14360_s15 + $0x50] sm:$0xff] %v10231_v56   ;;  %v7789_v8 = vpop.f32.mrf.mxu1  ;;  %v7170_v56 = vsel %vm7081_vm2, %v7076_v39, %v6211_v21 }
 0x4d8   : > { %v8813_v2 = vpop.f32.mrf.mxu3  ;;  %7826 = vmatmul.bf16.gmra.mxu1 %v7167_v35  ;;  %v14907_v22 = vpop.f32.mrf.mxu2  ;;  %v7790_v43 = vadd.f32 %v14822_v27, %v7789_v8  ;;  %v8289_v40 = vpack.c.bf16 %v8225_v44, %v8225_v44 }
 0x4d9   : > { %v8814_v47 = vadd.f32 %v14742_v0, %v8813_v2  ;;  %v8514_v35 = vpop.permute.xlu2 %8513  ;;  %v5861_v1 = vpop.permute.xlu0 %5860 }
 0x4da   : > { %v7959_v46 = vadd.f32 %v15388_v24, %v7790_v43  ;;  %v8417_v60 = vunpack.c.l.b16 %v8289_v40 }
 0x4db   : > { %v8940_v3 = vmax.f32 %v8814_v47, 0.0 }
 0x4dc   : > { %v8128_v4 = vadd.f32 %v8127_v57, %v7959_v46  ;;  %v7013_v46 = vsel %vm6920_vm15, %v10086_v41, %v5861_v1 }
 0x4de   : > { %v8226_v11 = vmax.f32 %v8128_v4, 0.0 }
 0x4df   : > { %v7792_v54 = vpop.f32.mrf.mxu1 }
 0x4e0   : > { %v8815_v12 = vpop.f32.mrf.mxu3  ;;  %10000 = vmatmul.msk.bf16.gmra.mxu3 %vm7081_vm2, %v8596_v50  ;;  %v14916_v29 = vpop.f32.mrf.mxu2  ;;  %v8290_v5 = vpack.c.bf16 %v8226_v11, %v8226_v11  ;;  %v7793_v32 = vadd.f32 %v14822_v27, %v7792_v54 }
 0x4e1   : > { %v8816_v59 = vadd.f32 %v14742_v0, %v8815_v12  ;;  %v6213_v11 = vpop.permute.xlu2 %6212  ;;  %v8516_v13 = vpop.permute.xlu0 %8515 }
 0x4e2   : > { %v8418_v55 = vunpack.c.l.b16 %v8290_v5  ;;  %v7962_v26 = vadd.f32 %v14570_v10, %v7793_v32  ;;  %v6021_v10 = vpop.permute.xlu1 %6020 }
 0x4e3   : > { %v8941_v7 = vmax.f32 %v8816_v59, 0.0  ;;  %v7078_v20 = vsel %vm544_vm0, %v7013_v46, %v6021_v10 }
 0x4e4   : > { %v8461_v45 = vpack.c.b16 %v8418_v55, %v8417_v60  ;;  %v8131_v43 = vadd.f32 %v8130_v16, %v7962_v26  ;;  %v7173_v54 = vsel %vm7081_vm2, %v7078_v20, %v6213_v11  ;;  %v15389_v11 = vld [vmem:[#allocation24_spill] sm:$0xff] }
 0x4e5   : > { %v10236_v53 = vpack.c.bf16 %v8941_v7, %v8940_v3 }
 0x4e6   : > { %v8599_v24 = vsel %vm6920_vm15, %v8461_v45, %v8514_v35  ;;  %v8227_v51 = vmax.f32 %v8131_v43, 0.0 }
 0x4e7   : > { %10348 = vst [vmem:[%s14360_s15 + $0x58] sm:$0xff] %v10236_v53   ;;  %v7794_v14 = vpop.f32.mrf.mxu1 }
 0x4e8   : > { %7831 = vmatmul.bf16.gmra.mxu1 %v7170_v56  ;;  %v7795_v42 = vadd.f32 %v14822_v27, %v7794_v14  ;;  %v8291_v47 = vpack.c.bf16 %v8227_v51, %v8227_v51  ;;  %v10087_v14 = vld [vmem:[#allocation2 + $0x18c] sm:$0xff] }
 0x4e9   : > { %v6023_v35 = vpop.permute.xlu2 %6022 }
 0x4ea   : > { %v7964_v57 = vadd.f32 %v14610_v36, %v7795_v42  ;;  %v8419_v16 = vunpack.c.l.b16 %v8291_v47  ;;  %v5863_v55 = vpop.permute.xlu1 %5862 }
 0x4eb   : > { %v14926_v2 = vpop.f32.mrf.mxu2  ;;  %v7016_v60 = vsel %vm6920_vm15, %v10087_v14, %v5863_v55 }
 0x4ec   : > { %v8133_v8 = vadd.f32 %v8132_v23, %v7964_v57  ;;  %v6215_v23 = vpop.permute.xlu0 %6214 }
 0x4ee   : > { %v8228_v49 = vmax.f32 %v8133_v8, 0.0 }
 0x4f0   : > { %10001 = vmatmul.msk.bf16.gmra.mxu3 %vm7081_vm2, %v8599_v24  ;;  %v8292_v38 = vpack.c.bf16 %v8228_v49, %v8228_v49  ;;  %v7080_v49 = vsel %vm544_vm0, %v7016_v60, %v6023_v35 }
 0x4f1   : > { %v7176_v24 = vsel %vm7081_vm2, %v7080_v49, %v6215_v23  ;;  %v8520_v60 = vpop.permute.xlu2 %8519  ;;  %v15392_v49 = vld [vmem:[#allocation34_spill] sm:$0xff] }
 0x4f2   : > { %v8420_v59 = vunpack.c.l.b16 %v8292_v38  ;;  %v8518_v20 = vpop.permute.xlu1 %8517 }
 0x4f3   : > { %v14931_v36 = vpop.f32.mrf.mxu2  ;;  %v8818_v4 = vpop.f32.mrf.mxu3 }
 0x4f4   : > { %v8819_v48 = vadd.f32 %v14742_v0, %v8818_v4  ;;  %v8462_v7 = vpack.c.b16 %v8420_v59, %v8419_v16 }
 0x4f5   : > { %v7797_v12 = vpop.f32.mrf.mxu1 }
 0x4f6   : > { %v7798_v50 = vadd.f32 %v14822_v27, %v7797_v12  ;;  %v8942_v53 = vmax.f32 %v8819_v48, 0.0  ;;  %v8602_v21 = vsel %vm6920_vm15, %v8462_v7, %v8516_v13 }
 0x4f8   : > { %7836 = vmatmul.bf16.gmra.mxu1 %v7173_v54  ;;  %v7967_v25 = vadd.f32 %v14664_v62, %v7798_v50 }
 0x4fb   : > { %v8135_v44 = vpop.f32.mrf.mxu2  ;;  %v8820_v3 = vpop.f32.mrf.mxu3 }
 0x4fc   : > { %v8821_v34 = vadd.f32 %v14742_v0, %v8820_v3  ;;  %v8136_v39 = vadd.f32 %v8135_v44, %v7967_v25  ;;  %v15390_v3 = vld [vmem:[#allocation43_spill] sm:$0xff] }
 0x4fd   : > { %v7799_v5 = vpop.f32.mrf.mxu1 }
 0x4fe   : > { %v8943_v40 = vmax.f32 %v8821_v34, 0.0  ;;  %v7800_v32 = vadd.f32 %v14822_v27, %v7799_v5  ;;  %v8229_v42 = vmax.f32 %v8136_v39, 0.0 }
 0x500   : > { %v10241_v56 = vpack.c.bf16 %v8943_v40, %v8942_v53  ;;  %10002 = vmatmul.msk.bf16.gmra.mxu3 %vm7081_vm2, %v8602_v21  ;;  %v7969_v62 = vadd.f32 %v14695_v33, %v7800_v32  ;;  %v8293_v43 = vpack.c.bf16 %v8229_v42, %v8229_v42 }
 0x502   : > { %10349 = vst [vmem:[%s14360_s15 + $0x60] sm:$0xff] %v10241_v56   ;;  %v8421_v51 = vunpack.c.l.b16 %v8293_v43 }
 0x503   : > { %v8137_v26 = vpop.f32.mrf.mxu2  ;;  %v8823_v57 = vpop.f32.mrf.mxu3 }
 0x504   : > { %v8138_v45 = vadd.f32 %v8137_v26, %v7969_v62  ;;  %v8824_v38 = vadd.f32 %v14742_v0, %v8823_v57  ;;  %v15391_v26 = vld [vmem:[#allocation16_spill] sm:$0xff] }
 0x505   : > { %v7802_v8 = vpop.f32.mrf.mxu1 }
 0x506   : > { %v8230_v1 = vmax.f32 %v8138_v45, 0.0  ;;  %v7803_v41 = vadd.f32 %v14822_v27, %v7802_v8  ;;  %v8944_v54 = vmax.f32 %v8824_v38, 0.0 }
 0x508   : > { %v8294_v33 = vpack.c.bf16 %v8230_v1, %v8230_v1  ;;  %7841 = vmatmul.bf16.gmra.mxu1 %v7176_v24  ;;  %v7972_v46 = vadd.f32 %v14734_v61, %v7803_v41 }
 0x50a   : > { %v8422_v10 = vunpack.c.l.b16 %v8294_v33  ;;  %v8141_v50 = vadd.f32 %v15389_v11, %v7972_v46 }
 0x50b   : > { %v8825_v4 = vpop.f32.mrf.mxu3 }
 0x50c   : > { %v8463_v47 = vpack.c.b16 %v8422_v10, %v8421_v51  ;;  %v8826_v12 = vadd.f32 %v14742_v0, %v8825_v4  ;;  %v8231_v44 = vmax.f32 %v8141_v50, 0.0 }
 0x50d   : > { %v7804_v59 = vpop.f32.mrf.mxu1 }
 0x50e   : > { %v8945_v16 = vmax.f32 %v8826_v12, 0.0  ;;  %v8605_v13 = vsel %vm6920_vm15, %v8463_v47, %v8518_v20  ;;  %v7805_v48 = vadd.f32 %v14822_v27, %v7804_v59  ;;  %v8295_v53 = vpack.c.bf16 %v8231_v44, %v8231_v44 }
 0x510   : > { %v10246_v61 = vpack.c.bf16 %v8945_v16, %v8944_v54  ;;  %v7974_v25 = vadd.f32 %v14764_v6, %v7805_v48  ;;  %10003 = vmatmul.msk.bf16.gmra.mxu3 %vm7081_vm2, %v8605_v13  ;;  %v8423_v55 = vunpack.c.l.b16 %v8295_v53  ;;  %v8522_v54 = vpop.permute.xlu0 %8521  ;;  %v15393_v16 = vld [vmem:[#allocation51_spill] sm:$0xff] }
 0x512   : > { %10350 = vst [vmem:[%s14360_s15 + $0x68] sm:$0xff] %v10246_v61   ;;  %v8143_v7 = vadd.f32 %v15390_v3, %v7974_v25 }
 0x513   : > { %v8828_v34 = vpop.f32.mrf.mxu3 }
 0x514   : > { %v8232_v5 = vmax.f32 %v8143_v7, 0.0  ;;  %v8829_v6 = vadd.f32 %v14742_v0, %v8828_v34 }
 0x515   : > { %v7807_v39 = vpop.f32.mrf.mxu1 }
 0x516   : > { %v8296_v40 = vpack.c.bf16 %v8232_v5, %v8232_v5  ;;  %v7808_v32 = vadd.f32 %v14822_v27, %v7807_v39  ;;  %v8946_v45 = vmax.f32 %v8829_v6, 0.0  ;;  %v15394_v5 = vld [vmem:[#allocation29_spill] sm:$0xff] }
 0x518   : > { %v8424_v21 = vunpack.c.l.b16 %v8296_v40  ;;  %v7977_v56 = vadd.f32 %v14782_v52, %v7808_v32 }
 0x51a   : > { %v8464_v14 = vpack.c.b16 %v8424_v21, %v8423_v55  ;;  %v8146_v57 = vadd.f32 %v15391_v26, %v7977_v56 }
 0x51b   : > { %v8830_v62 = vpop.f32.mrf.mxu3 }
 0x51c   : > { %v8831_v42 = vadd.f32 %v14742_v0, %v8830_v62  ;;  %v8608_v43 = vsel %vm6920_vm15, %v8464_v14, %v8520_v60  ;;  %v8233_v41 = vmax.f32 %v8146_v57, 0.0  ;;  %v8524_v57 = vpop.permute.xlu1 %8523 }
 0x51d   : > { %v7809_v23 = vpop.f32.mrf.mxu1 }
 0x51e   : > { %v8947_v35 = vmax.f32 %v8831_v42, 0.0  ;;  %v7810_v8 = vadd.f32 %v14822_v27, %v7809_v23  ;;  %v8297_v51 = vpack.c.bf16 %v8233_v41, %v8233_v41  ;;  %v15395_v23 = vld [vmem:[#allocation33_spill] sm:$0xff] }
 0x520   : > { %v10251_v1 = vpack.c.bf16 %v8947_v35, %v8946_v45  ;;  %v7979_v52 = vadd.f32 %v14795_v37, %v7810_v8  ;;  %10004 = vmatmul.msk.bf16.gmra.mxu3 %vm7081_vm2, %v8608_v43  ;;  %v8425_v47 = vunpack.c.l.b16 %v8297_v51 }
 0x522   : > { %10351 = vst [vmem:[%s14360_s15 + $0x70] sm:$0xff] %v10251_v1   ;;  %v8148_v24 = vadd.f32 %v15392_v49, %v7979_v52 }
 0x523   : > { %v8833_v33 = vpop.f32.mrf.mxu3 }
 0x524   : > { %v8234_v46 = vmax.f32 %v8148_v24, 0.0  ;;  %v8834_v37 = vadd.f32 %v14742_v0, %v8833_v33  ;;  %v15396_v24 = vld [vmem:[#allocation35_spill] sm:$0xff] }
 0x525   : > { %v7812_v10 = vpop.f32.mrf.mxu1 }
 0x526   : > { %v8298_v38 = vpack.c.bf16 %v8234_v46, %v8234_v46  ;;  %v7813_v4 = vadd.f32 %v14822_v27, %v7812_v10  ;;  %v8948_v61 = vmax.f32 %v8834_v37, 0.0 }
 0x528   : > { %v8426_v20 = vunpack.c.l.b16 %v8298_v38  ;;  %v7982_v12 = vadd.f32 %v14810_v28, %v7813_v4 }
 0x52a   : > { %v8465_v50 = vpack.c.b16 %v8426_v20, %v8425_v47  ;;  %v8151_v13 = vadd.f32 %v15393_v16, %v7982_v12  ;;  %v15397_v16 = vld [vmem:[#allocation41_spill] sm:$0xff] }
 0x52b   : > { %v8835_v11 = vpop.f32.mrf.mxu3 }
 0x52c   : > { %v8836_v59 = vadd.f32 %v14742_v0, %v8835_v11  ;;  %v8611_v3 = vsel %vm6920_vm15, %v8465_v50, %v8522_v54  ;;  %v8235_v34 = vmax.f32 %v8151_v13, 0.0  ;;  %v8526_v54 = vpop.permute.xlu2 %8525 }
 0x52d   : > { %v7814_v48 = vpop.f32.mrf.mxu1 }
 0x52e   : > { %v8949_v25 = vmax.f32 %v8836_v59, 0.0  ;;  %v7815_v44 = vadd.f32 %v14822_v27, %v7814_v48  ;;  %v8299_v32 = vpack.c.bf16 %v8235_v34, %v8235_v34  ;;  %v15398_v34 = vld [vmem:[#allocation39_spill] sm:$0xff] }
 0x530   : > { %v10256_v7 = vpack.c.bf16 %v8949_v25, %v8948_v61  ;;  %v7984_v28 = vadd.f32 %v14825_v18, %v7815_v44  ;;  %10005 = vmatmul.msk.bf16.gmra.mxu3 %vm7081_vm2, %v8611_v3  ;;  %v8427_v62 = vunpack.c.l.b16 %v8299_v32 }
 0x532   : > { %10352 = vst [vmem:[%s14360_s15 + $0x78] sm:$0xff] %v10256_v7   ;;  %v8153_v53 = vadd.f32 %v15394_v5, %v7984_v28 }
 0x533   : > { %v8838_v39 = vpop.f32.mrf.mxu3 }
 0x534   : > { %v8236_v40 = vmax.f32 %v8153_v53, 0.0  ;;  %v8839_v18 = vadd.f32 %v14742_v0, %v8838_v39 }
 0x535   : > { %v7817_v21 = vpop.f32.mrf.mxu1 }
 0x536   : > { %v8300_v55 = vpack.c.bf16 %v8236_v40, %v8236_v40  ;;  %v7818_v56 = vadd.f32 %v14822_v27, %v7817_v21  ;;  %v8950_v8 = vmax.f32 %v8839_v18, 0.0 }
 0x538   : > { %v8428_v6 = vunpack.c.l.b16 %v8300_v55  ;;  %v7987_v14 = vadd.f32 %v14839_v19, %v7818_v56 }
 0x53a   : > { %v8466_v60 = vpack.c.b16 %v8428_v6, %v8427_v62  ;;  %v8156_v45 = vadd.f32 %v15395_v23, %v7987_v14 }
 0x53b   : > { %v8840_v42 = vpop.f32.mrf.mxu3 }
 0x53c   : > { %v8841_v26 = vadd.f32 %v14742_v0, %v8840_v42  ;;  %v8614_v52 = vsel %vm6920_vm15, %v8466_v60, %v8524_v57  ;;  %v8237_v49 = vmax.f32 %v8156_v45, 0.0  ;;  %v8528_v60 = vpop.permute.xlu0 %8527 }
 0x53d   : > { %v7819_v35 = vpop.f32.mrf.mxu1 }
 0x53e   : > { %v8951_v43 = vmax.f32 %v8841_v26, 0.0  ;;  %v7820_v1 = vadd.f32 %v14822_v27, %v7819_v35  ;;  %v8301_v10 = vpack.c.bf16 %v8237_v49, %v8237_v49  ;;  %v15399_v26 = vld [vmem:[#allocation30_spill] sm:$0xff] }
 0x540   : > { %v10261_v41 = vpack.c.bf16 %v8951_v43, %v8950_v8  ;;  %v7989_v19 = vadd.f32 %v14850_v30, %v7820_v1  ;;  %10006 = vmatmul.msk.bf16.gmra.mxu3 %vm7081_vm2, %v8614_v52  ;;  %v8429_v12 = vunpack.c.l.b16 %v8301_v10 }
 0x542   : > { %10353 = vst [vmem:[%s14360_s15 + $0x80] sm:$0xff] %v10261_v41   ;;  %v8158_v33 = vadd.f32 %v15396_v24, %v7989_v19  ;;  %v15400_v41 = vld [vmem:[#allocation28_spill] sm:$0xff] }
 0x543   : > { %v8843_v46 = vpop.f32.mrf.mxu3 }
 0x544   : > { %v8238_v51 = vmax.f32 %v8158_v33, 0.0  ;;  %v8844_v30 = vadd.f32 %v14742_v0, %v8843_v46 }
 0x545   : > { %v7822_v38 = vpop.f32.mrf.mxu1 }
 0x546   : > { %v8302_v4 = vpack.c.bf16 %v8238_v51, %v8238_v51  ;;  %v7823_v20 = vadd.f32 %v14822_v27, %v7822_v38  ;;  %v8952_v61 = vmax.f32 %v8844_v30, 0.0  ;;  %v8530_v30 = vpop.permute.xlu1 %8529 }
 0x548   : > { %v8430_v47 = vunpack.c.l.b16 %v8302_v4  ;;  %v7992_v37 = vadd.f32 %v14859_v63, %v7823_v20 }
 0x54a   : > { %v8467_v50 = vpack.c.b16 %v8430_v47, %v8429_v12  ;;  %v8161_v13 = vadd.f32 %v15397_v16, %v7992_v37 }
 0x54b   : > { %v8845_v11 = vpop.f32.mrf.mxu3 }
 0x54c   : > { %v8846_v59 = vadd.f32 %v14742_v0, %v8845_v11  ;;  %v8617_v3 = vsel %vm6920_vm15, %v8467_v50, %v8526_v54  ;;  %v8239_v28 = vmax.f32 %v8161_v13, 0.0  ;;  %v15401_v11 = vld [vmem:[#allocation21_spill] sm:$0xff] }
 0x54d   : > { %v7824_v48 = vpop.f32.mrf.mxu1 }
 0x54e   : > { %v8953_v25 = vmax.f32 %v8846_v59, 0.0  ;;  %v7825_v44 = vadd.f32 %v14822_v27, %v7824_v48  ;;  %v8303_v39 = vpack.c.bf16 %v8239_v28, %v8239_v28 }
 0x550   : > { %v10266_v7 = vpack.c.bf16 %v8953_v25, %v8952_v61  ;;  %v7994_v63 = vadd.f32 %v14867_v15, %v7825_v44  ;;  %10007 = vmatmul.msk.bf16.gmra.mxu3 %vm7081_vm2, %v8617_v3  ;;  %v8431_v56 = vunpack.c.l.b16 %v8303_v39  ;;  %v15007_v15 = vld [vmem:[%s15125_s6] ss:$0 sm:$0xff]  ;;  %v15402_v44 = vld [vmem:[#allocation45_spill] sm:$0xff] }
 0x552   : > { %10354 = vst [vmem:[%s14360_s15 + $0x88] sm:$0xff] %v10266_v7   ;;  %v8163_v5 = vadd.f32 %v15398_v34, %v7994_v63 }
 0x553   : > { %v8848_v0 = vpop.f32.mrf.mxu3 }
 0x554   : > { %v8240_v53 = vmax.f32 %v8163_v5, 0.0  ;;  %v8849_v62 = vadd.f32 %v15007_v15, %v8848_v0 }
 0x555   : > { %v7827_v40 = vpop.f32.mrf.mxu1 }
 0x556   : > { %v8304_v32 = vpack.c.bf16 %v8240_v53, %v8240_v53  ;;  %v7828_v21 = vadd.f32 %v14822_v27, %v7827_v40  ;;  %v8954_v45 = vmax.f32 %v8849_v62, 0.0 }
 0x558   : > { %v8432_v55 = vunpack.c.l.b16 %v8304_v32  ;;  %v7997_v6 = vadd.f32 %v14877_v31, %v7828_v21 }
 0x55a   : > { %v8468_v18 = vpack.c.b16 %v8432_v55, %v8431_v56  ;;  %v8166_v57 = vadd.f32 %v15399_v26, %v7997_v6  ;;  %v8532_v56 = vpop.permute.xlu2 %8531  ;;  %v15403_v6 = vld [vmem:[#allocation32_spill] sm:$0xff] }
 0x55b   : > { %v8850_v14 = vpop.f32.mrf.mxu3 }
 0x55c   : > { %v8851_v42 = vadd.f32 %v15007_v15, %v8850_v14  ;;  %v8620_v8 = vsel %vm6920_vm15, %v8468_v18, %v8528_v60  ;;  %v8241_v52 = vmax.f32 %v8166_v57, 0.0 }
 0x55d   : > { %v7829_v23 = vpop.f32.mrf.mxu1 }
 0x55e   : > { %v8955_v35 = vmax.f32 %v8851_v42, 0.0  ;;  %v7830_v31 = vadd.f32 %v14822_v27, %v7829_v23  ;;  %v8305_v33 = vpack.c.bf16 %v8241_v52, %v8241_v52 }
 0x560   : > { %v10271_v43 = vpack.c.bf16 %v8955_v35, %v8954_v45  ;;  %v7999_v1 = vadd.f32 %v14884_v17, %v7830_v31  ;;  %10008 = vmatmul.msk.bf16.gmra.mxu3 %vm7081_vm2, %v8620_v8  ;;  %v8433_v4 = vunpack.c.l.b16 %v8305_v33  ;;  %v15404_v45 = vld [vmem:[#allocation10_spill] sm:$0xff] }
 0x562   : > { %10355 = vst [vmem:[%s14360_s15 + $0x90] sm:$0xff] %v10271_v43   ;;  %v8168_v19 = vadd.f32 %v15400_v41, %v7999_v1 }
 0x563   : > { %v8853_v49 = vpop.f32.mrf.mxu3 }
 0x564   : > { %v8242_v24 = vmax.f32 %v8168_v19, 0.0  ;;  %v8854_v17 = vadd.f32 %v15007_v15, %v8853_v49 }
 0x565   : > { %v7832_v46 = vpop.f32.mrf.mxu1 }
 0x566   : > { %v8306_v51 = vpack.c.bf16 %v8242_v24, %v8242_v24  ;;  %v7833_v10 = vadd.f32 %v14822_v27, %v7832_v46  ;;  %v8956_v54 = vmax.f32 %v8854_v17, 0.0 }
 0x568   : > { %v8434_v38 = vunpack.c.l.b16 %v8306_v51  ;;  %v8002_v20 = vadd.f32 %v14891_v58, %v7833_v10  ;;  %v8534_v10 = vpop.permute.xlu0 %8533 }
 0x56a   : > { %v8469_v12 = vpack.c.b16 %v8434_v38, %v8433_v4  ;;  %v8171_v50 = vadd.f32 %v15401_v11, %v8002_v20  ;;  %v15405_v38 = vld [vmem:[#allocation11_spill] sm:$0xff] }
 0x56b   : > { %v8855_v47 = vpop.f32.mrf.mxu3 }
 0x56c   : > { %v8856_v37 = vadd.f32 %v15007_v15, %v8855_v47  ;;  %v8623_v48 = vsel %vm6920_vm15, %v8469_v12, %v8530_v30  ;;  %v8243_v25 = vmax.f32 %v8171_v50, 0.0  ;;  %v15406_v50 = vld [vmem:[#allocation12_spill] sm:$0xff] }
 0x56d   : > { %v7834_v59 = vpop.f32.mrf.mxu1 }
 0x56e   : > { %v8957_v16 = vmax.f32 %v8856_v37, 0.0  ;;  %v7835_v13 = vadd.f32 %v14822_v27, %v7834_v59  ;;  %v8307_v28 = vpack.c.bf16 %v8243_v25, %v8243_v25 }
 0x570   : > { %v10276_v61 = vpack.c.bf16 %v8957_v16, %v8956_v54  ;;  %v8004_v58 = vadd.f32 %v14900_v9, %v7835_v13  ;;  %10009 = vmatmul.msk.bf16.gmra.mxu3 %vm7081_vm2, %v8623_v48  ;;  %v8435_v39 = vunpack.c.l.b16 %v8307_v28 }
 0x572   : > { %10356 = vst [vmem:[%s14360_s15 + $0x98] sm:$0xff] %v10276_v61   ;;  %v8173_v3 = vadd.f32 %v15402_v44, %v8004_v58 }
 0x573   : > { %v8858_v7 = vpop.f32.mrf.mxu3 }
 0x574   : > { %v8244_v63 = vmax.f32 %v8173_v3, 0.0  ;;  %v8859_v9 = vadd.f32 %v15007_v15, %v8858_v7  ;;  %v8536_v3 = vpop.permute.xlu1 %8535 }
 0x575   : > { %v7837_v34 = vpop.f32.mrf.mxu1 }
 0x576   : > { %v8308_v5 = vpack.c.bf16 %v8244_v63, %v8244_v63  ;;  %v7838_v0 = vadd.f32 %v14822_v27, %v7837_v34  ;;  %v8958_v18 = vmax.f32 %v8859_v9, 0.0 }
 0x578   : > { %v8436_v53 = vunpack.c.l.b16 %v8308_v5  ;;  %v8007_v40 = vadd.f32 %v14907_v22, %v7838_v0 }
 0x57a   : > { %v8470_v21 = vpack.c.b16 %v8436_v53, %v8435_v39  ;;  %v8176_v62 = vadd.f32 %v15403_v6, %v8007_v40 }
 0x57b   : > { %v8860_v32 = vpop.f32.mrf.mxu3 }
 0x57c   : > { %v8861_v55 = vadd.f32 %v15007_v15, %v8860_v32  ;;  %v8626_v26 = vsel %vm6920_vm15, %v8470_v21, %v8532_v56  ;;  %v8245_v23 = vmax.f32 %v8176_v62, 0.0 }
 0x57d   : > { %v7839_v14 = vpop.f32.mrf.mxu1 }
 0x57e   : > { %v8959_v42 = vmax.f32 %v8861_v55, 0.0  ;;  %v7840_v60 = vadd.f32 %v14822_v27, %v7839_v14  ;;  %v8309_v43 = vpack.c.bf16 %v8245_v23, %v8245_v23 }
 0x580   : > { %v10281_v57 = vpack.c.bf16 %v8959_v42, %v8958_v18  ;;  %v8009_v22 = vadd.f32 %v14916_v29, %v7840_v60  ;;  %10010 = vmatmul.msk.bf16.gmra.mxu3 %vm7081_vm2, %v8626_v26  ;;  %v8437_v49 = vunpack.c.l.b16 %v8309_v43 }
 0x582   : > { %10357 = vst [vmem:[%s14360_s15 + $0xa0] sm:$0xff] %v10281_v57   ;;  %v8178_v35 = vadd.f32 %v15404_v45, %v8009_v22 }
 0x583   : > { %v8863_v31 = vpop.f32.mrf.mxu3 }
 0x584   : > { %v8246_v8 = vmax.f32 %v8178_v35, 0.0  ;;  %v8864_v29 = vadd.f32 %v15007_v15, %v8863_v31 }
 0x585   : > { %v7842_v1 = vpop.f32.mrf.mxu1 }
 0x586   : > { %v8310_v52 = vpack.c.bf16 %v8246_v8, %v8246_v8  ;;  %v7843_v41 = vadd.f32 %v14822_v27, %v7842_v1  ;;  %v8960_v17 = vmax.f32 %v8864_v29, 0.0 }
 0x588   : > { %v8438_v19 = vunpack.c.l.b16 %v8310_v52  ;;  %v8012_v24 = vadd.f32 %v14926_v2, %v7843_v41 }
 0x58a   : > { %v8471_v46 = vpack.c.b16 %v8438_v19, %v8437_v49  ;;  %v8181_v4 = vadd.f32 %v15405_v38, %v8012_v24 }
 0x58b   : > { %v8865_v33 = vpop.f32.mrf.mxu3 }
 0x58c   : > { %v8866_v51 = vadd.f32 %v15007_v15, %v8865_v33  ;;  %v8629_v37 = vsel %vm6920_vm15, %v8471_v46, %v8534_v10  ;;  %v8247_v11 = vmax.f32 %v8181_v4, 0.0 }
 0x58d   : > { %v7844_v20 = vpop.f32.mrf.mxu1 }
 0x58e   : > { %v8961_v47 = vmax.f32 %v8866_v51, 0.0  ;;  %v7845_v12 = vadd.f32 %v14822_v27, %v7844_v20  ;;  %v8311_v13 = vpack.c.bf16 %v8247_v11, %v8247_v11 }
 0x590   : > { %v10286_v30 = vpack.c.bf16 %v8961_v47, %v8960_v17  ;;  %v8014_v2 = vadd.f32 %v14931_v36, %v7845_v12  ;;  %10011 = vmatmul.msk.bf16.gmra.mxu3 %vm7081_vm2, %v8629_v37  ;;  %v8439_v58 = vunpack.c.l.b16 %v8311_v13 }
 0x592   : > { %10358 = vst [vmem:[%s14360_s15 + $0xa8] sm:$0xff] %v10286_v30   ;;  %v8183_v59 = vadd.f32 %v15406_v50, %v8014_v2 }
 0x593   : > { %v8868_v54 = vpop.f32.mrf.mxu3 }
 0x594   : > { %v8248_v16 = vmax.f32 %v8183_v59, 0.0  ;;  %v8869_v27 = vadd.f32 %v15007_v15, %v8868_v54 }
 0x596   : > { %v8312_v48 = vpack.c.bf16 %v8248_v16, %v8248_v16  ;;  %v8962_v7 = vmax.f32 %v8869_v27, 0.0 }
 0x598   : > { %v8440_v61 = vunpack.c.l.b16 %v8312_v48 }
 0x59a   : > { %v8472_v44 = vpack.c.b16 %v8440_v61, %v8439_v58 }
 0x59b   : > { %v8870_v25 = vpop.f32.mrf.mxu3 }
 0x59c   : > { %v8871_v36 = vadd.f32 %v15007_v15, %v8870_v25  ;;  %v8632_v28 = vsel %vm6920_vm15, %v8472_v44, %v8536_v3 }
 0x59e   : > { %v8963_v63 = vmax.f32 %v8871_v36, 0.0 }
 0x5a0   : > { %v10291_v34 = vpack.c.bf16 %v8963_v63, %v8962_v7  ;;  %10012 = vmatmul.msk.bf16.gmra.mxu3 %vm7081_vm2, %v8632_v28 }
 0x5a2   : > { %10359 = vst [vmem:[%s14360_s15 + $0xb0] sm:$0xff] %v10291_v34  }
 0x5a3   : > { %v8873_v5 = vpop.f32.mrf.mxu3 }
 0x5a4   : > { %v8874_v0 = vadd.f32 %v15007_v15, %v8873_v5 }
 0x5a6   : > { %v8964_v40 = vmax.f32 %v8874_v0, 0.0 }
 0x5ab   : > { %v8875_v53 = vpop.f32.mrf.mxu3 }
 0x5ac   : > { %v8876_v39 = vadd.f32 %v15007_v15, %v8875_v53 }
 0x5ae   : > { %v8965_v9 = vmax.f32 %v8876_v39, 0.0 }
 0x5b0   : > { %v10296_v32 = vpack.c.bf16 %v8965_v9, %v8964_v40 }
 0x5b2   : > { %10360 = vst [vmem:[%s14360_s15 + $0xb8] sm:$0xff] %v10296_v32  }
 0x5b3   : > { %v8878_v21 = vpop.f32.mrf.mxu3 }
 0x5b4   : > { %v8879_v55 = vadd.f32 %v15007_v15, %v8878_v21 }
 0x5b6   : > { %v8966_v62 = vmax.f32 %v8879_v55, 0.0 }
 0x5bb   : > { %v8880_v56 = vpop.f32.mrf.mxu3 }
 0x5bc   : > { %v8881_v6 = vadd.f32 %v15007_v15, %v8880_v56 }
 0x5be   : > { %v8967_v14 = vmax.f32 %v8881_v6, 0.0 }
 0x5c0   : > { %v10301_v18 = vpack.c.bf16 %v8967_v14, %v8966_v62 }
 0x5c2   : > { %10361 = vst [vmem:[%s14360_s15 + $0xc0] sm:$0xff] %v10301_v18  }
 0x5c3   : > { %v8883_v42 = vpop.f32.mrf.mxu3 }
 0x5c4   : > { %v8884_v60 = vadd.f32 %v15007_v15, %v8883_v42 }
 0x5c6   : > { %v8968_v22 = vmax.f32 %v8884_v60, 0.0 }
 0x5cb   : > { %v8885_v26 = vpop.f32.mrf.mxu3 }
 0x5cc   : > { %v8886_v57 = vadd.f32 %v15007_v15, %v8885_v26 }
 0x5ce   : > { %v8969_v23 = vmax.f32 %v8886_v57, 0.0 }
 0x5d0   : > { %v10306_v45 = vpack.c.bf16 %v8969_v23, %v8968_v22 }
 0x5d2   : > { %10362 = vst [vmem:[%s14360_s15 + $0xc8] sm:$0xff] %v10306_v45  }
 0x5d3   : > { %v8888_v35 = vpop.f32.mrf.mxu3 }
 0x5d4   : > { %v8889_v31 = vadd.f32 %v15007_v15, %v8888_v35 }
 0x5d6   : > { %v8970_v1 = vmax.f32 %v8889_v31, 0.0 }
 0x5db   : > { %v8890_v8 = vpop.f32.mrf.mxu3 }
 0x5dc   : > { %v8891_v43 = vadd.f32 %v15007_v15, %v8890_v8 }
 0x5de   : > { %v8971_v52 = vmax.f32 %v8891_v43, 0.0 }
 0x5e0   : > { %v10311_v41 = vpack.c.bf16 %v8971_v52, %v8970_v1 }
 0x5e2   : > { %10363 = vst [vmem:[%s14360_s15 + $0xd0] sm:$0xff] %v10311_v41  }
 0x5e3   : > { %v8893_v19 = vpop.f32.mrf.mxu3 }
 0x5e4   : > { %v8894_v49 = vadd.f32 %v15007_v15, %v8893_v19 }
 0x5e6   : > { %v8972_v33 = vmax.f32 %v8894_v49, 0.0 }
 0x5eb   : > { %v8895_v24 = vpop.f32.mrf.mxu3 }
 0x5ec   : > { %v8896_v29 = vadd.f32 %v15007_v15, %v8895_v24 }
 0x5ee   : > { %v8973_v46 = vmax.f32 %v8896_v29, 0.0 }
 0x5f0   : > { %v10316_v51 = vpack.c.bf16 %v8973_v46, %v8972_v33 }
 0x5f2   : > { %10364 = vst [vmem:[%s14360_s15 + $0xd8] sm:$0xff] %v10316_v51  }
 0x5f3   : > { %v8898_v10 = vpop.f32.mrf.mxu3 }
 0x5f4   : > { %v8899_v38 = vadd.f32 %v15007_v15, %v8898_v10 }
 0x5f6   : > { %v8974_v17 = vmax.f32 %v8899_v38, 0.0 }
 0x5fb   : > { %v8900_v4 = vpop.f32.mrf.mxu3 }
 0x5fc   : > { %v8901_v20 = vadd.f32 %v15007_v15, %v8900_v4 }
 0x5fe   : > { %v8975_v47 = vmax.f32 %v8901_v20, 0.0 }
 0x600   : > { %v10321_v12 = vpack.c.bf16 %v8975_v47, %v8974_v17 }
 0x602   : > { %10365 = vst [vmem:[%s14360_s15 + $0xe0] sm:$0xff] %v10321_v12  }
 0x603   : > { %v8903_v37 = vpop.f32.mrf.mxu3 }
 0x604   : > { %v8904_v30 = vadd.f32 %v15007_v15, %v8903_v37 }
 0x606   : > { %v8976_v50 = vmax.f32 %v8904_v30, 0.0 }
 0x60b   : > { %v8905_v2 = vpop.f32.mrf.mxu3 }
 0x60c   : > { %v8906_v11 = vadd.f32 %v15007_v15, %v8905_v2 }
 0x60e   : > { %v8977_v59 = vmax.f32 %v8906_v11, 0.0 }
 0x610   : > { %v10326_v54 = vpack.c.bf16 %v8977_v59, %v8976_v50 }
 0x612   : > { %10366 = vst [vmem:[%s14360_s15 + $0xe8] sm:$0xff] %v10326_v54  }
 0x613   : > { %v8908_v16 = vpop.f32.mrf.mxu3 }
 0x614   : > { %v8909_v13 = vadd.f32 %v15007_v15, %v8908_v16 }
 0x616   : > { %v8978_v58 = vmax.f32 %v8909_v13, 0.0 }
 0x61b   : > { %v8910_v48 = vpop.f32.mrf.mxu3 }
 0x61c   : > { %v8911_v61 = vadd.f32 %v15007_v15, %v8910_v48 }
 0x61e   : > { %v8979_v27 = vmax.f32 %v8911_v61, 0.0 }
 0x620   : > { %v10331_v25 = vpack.c.bf16 %v8979_v27, %v8978_v58 }
 0x622   : > { %10367 = vst [vmem:[%s14360_s15 + $0xf0] sm:$0xff] %v10331_v25  }
 0x623   : > { %v8913_v44 = vpop.f32.mrf.mxu3 }
 0x624   : > { %v8914_v36 = vadd.f32 %v15007_v15, %v8913_v44 }
 0x626   : > { %v8980_v63 = vmax.f32 %v8914_v36, 0.0 }
 0x62b   : > { %v8915_v3 = vpop.f32.mrf.mxu3 }
 0x62c   : > { %v8916_v7 = vadd.f32 %v15007_v15, %v8915_v3 }
 0x62e   : > { %v8981_v28 = vmax.f32 %v8916_v7, 0.0 }
 0x630   : > { %v10336_v34 = vpack.c.bf16 %v8981_v28, %v8980_v63 }
 0x632   : > { %10368 = vst [vmem:[%s14360_s15 + $0xf8] sm:$0xff] %v10336_v34  }
 0x633   : > { %10592 = shalt.err (!%p10589_p3)
}
 0x634   : > { %s10633_s23 = smov 4  }
 0x635   : > { %10381 = dma.vmem_to_hbm [thread:$0]  (%p10712_p5), %s9125_s13, 4096, %s9127_s16, %s9111_s28, %s10631_s17, %s10631_s17, %s10633_s23  }
 0x636 PF: > { %p10387_p4 = scmp.ge.s32.totalorder %s10627_s27, 2  ;;  %s9141_s15 = sand.u32 1, %s10615_s24  }
 0x637   : > { %s9142_s29 = scalar_lea.sflag [#allocation4], %s9141_s15 }
 0x638   : > { %p10384_p7 = pnand %p10387_p4, %p10716_p6 }
 0x63a   : > { %p10385_p8 = pneg %p10384_p7 }
 0x63c   : > { %10610 = dma.done.wait (%p10385_p8), %s9142_s29, 4096  }
 0x63d   : > { %10612 = vsyncadd (%p10385_p8), %s9142_s29, 4294963200  ;;  %p17_p9 = scmp.ge.s32.totalorder %s10699_s30, 6   ;;  %s15407_s24 = smov %s10619_s25 }
 0x63e   : > { %s15408_s25 = smov %s10623_s26  ;;  %s15409_s26 = smov %s10710_s10 }
 0x63f   : > { %s15410_s27 = smov %s10699_s30  ;;  %19 = sbr.rel (!%p17_p9) target bundleno = 3 (0x3), region = 85 }
 0x644   :  { %9148 = vsyncpa [#allocation4], 1 }
 0x645   :  { %9150 = vsyncpa [#allocation4 + $0x1], 1 }

</bundles_post_ra>
